<compile_context>
chip_gen: v6e
topology: v6e:2x2x1
jax: 0.10.0
libtpu: 0.0.40
codegen_flags: <defaults>
</compile_context>

<pallas_src>
import jax
import jax.numpy as jnp
from jax import lax
from jax.experimental import pallas as pl
from jax.experimental.pallas import tpu as pltpu

EPS = 1e-5  # InstanceNorm2d default eps


def _resblock_kernel(x_ref, w1_ref, b1_ref, w2_ref, b2_ref, o_ref,
                     pad_ref, acc_ref):
    # Block shapes (per batch element):
    #   x_ref   : (1, H, W, C)    input image (residual source)
    #   w1/w2   : (9, C, C)       conv weights, tap-major (kh*3+kw, Cin, Cout)
    #   b1/b2   : (1, C)          conv biases
    #   o_ref   : (1, H, W, C)
    #   pad_ref : (H+2, W+2, C)   f32 VMEM scratch: reflection-padded frame
    #   acc_ref : (H*W, C)        f32 VMEM scratch: conv accumulator
    _, H, W, C = x_ref.shape

    def fill_reflect_pad(src):
        # src: (H, W, C) value.  Equivalent of nn.ReflectionPad2d(1):
        # interior store + 2 thin row borders from src, then 2 thin column
        # borders (incl. corners) copied from the already-written frame.
        pad_ref[1:H + 1, 1:W + 1, :] = src
        pad_ref[0:1, 1:W + 1, :] = src[1:2, :, :]
        pad_ref[H + 1:H + 2, 1:W + 1, :] = src[H - 2:H - 1, :, :]
        pad_ref[:, 0:1, :] = pad_ref[:, 2:3, :]
        pad_ref[:, W + 1:W + 2, :] = pad_ref[:, W - 1:W, :]

    def conv3x3(w_ref):
        # 3x3 "valid" conv over the padded scratch; result left in acc_ref.
        # kw-shifted slab loaded once and reused for all kh; kh offsets are
        # sublane-aligned row slices of the flattened slab.
        first = True
        for kw in range(3):
            slab = pad_ref[:, kw:kw + W, :]                 # (H+2, W, C)
            slab = slab.reshape((H + 2) * W, C)
            for kh in range(3):
                patch = slab[kh * W:kh * W + H * W, :]      # (H*W, C)
                tap = jnp.dot(patch, w_ref[kh * 3 + kw],
                              preferred_element_type=jnp.float32)
                if first:
                    acc_ref[...] = tap                      # init with 1st tap
                    first = False
                else:
                    acc_ref[...] += tap

    def instance_norm(y):
        # Per-channel mean / biased var over spatial (axis 0), no affine.
        mean = jnp.mean(y, axis=0, keepdims=True)
        var = jnp.mean((y - mean) ** 2, axis=0, keepdims=True)
        return (y - mean) * lax.rsqrt(var + EPS)

    # ---- branch 1: reflect-pad -> conv1 -> InstanceNorm -> ReLU ----
    fill_reflect_pad(x_ref[0])
    conv3x3(w1_ref)
    y = instance_norm(acc_ref[...] + b1_ref[...])
    y = jnp.maximum(y, 0.0)                                 # (H*W, C)

    # ---- branch 2: reflect-pad -> conv2 -> InstanceNorm ----
    fill_reflect_pad(y.reshape(H, W, C))
    conv3x3(w2_ref)
    z = instance_norm(acc_ref[...] + b2_ref[...])           # (H*W, C)

    # ---- residual add ----
    o_ref[0] = (x_ref[0] + z.reshape(H, W, C)).astype(o_ref.dtype)


def residual_block(x_nchw, w1, b1, w2, b2):
    """x_nchw: (N, C, H, W) float32. w*: (3,3,C,C) HWIO. b*: (C,). Returns NCHW."""
    N, C, H, W = x_nchw.shape
    x = jnp.transpose(x_nchw, (0, 2, 3, 1))                 # NHWC; C on lanes
    w1f = w1.reshape(9, C, C)                               # tap-major weights
    w2f = w2.reshape(9, C, C)
    b1r = b1.reshape(1, C)
    b2r = b2.reshape(1, C)

    out = pl.pallas_call(
        _resblock_kernel,
        out_shape=jax.ShapeDtypeStruct((N, H, W, C), x.dtype),
        grid_spec=pltpu.PrefetchScalarGridSpec(
            num_scalar_prefetch=0,
            grid=(N,),
            in_specs=[
                pl.BlockSpec((1, H, W, C), lambda n: (n, 0, 0, 0)),
                pl.BlockSpec((9, C, C), lambda n: (0, 0, 0)),
                pl.BlockSpec((1, C), lambda n: (0, 0)),
                pl.BlockSpec((9, C, C), lambda n: (0, 0, 0)),
                pl.BlockSpec((1, C), lambda n: (0, 0)),
            ],
            out_specs=pl.BlockSpec((1, H, W, C), lambda n: (n, 0, 0, 0)),
            scratch_shapes=[
                pltpu.VMEM((H + 2, W + 2, C), jnp.float32),  # padded frame
                pltpu.VMEM((H * W, C), jnp.float32),         # conv accumulator
            ],
        ),
        compiler_params=pltpu.CompilerParams(
            dimension_semantics=("parallel",)),
    )(x, w1f, b1r, w2f, b2r)

    return jnp.transpose(out, (0, 3, 1, 2))                 # back to NCHW


def _reference(x_nchw, w1, b1, w2, b2):
    """Pure-JAX reference of the PyTorch ResidualBlock forward."""
    x = jnp.transpose(x_nchw, (0, 2, 3, 1))

    def conv(inp, w, b):
        p = jnp.pad(inp, ((0, 0), (1, 1), (1, 1), (0, 0)), mode="reflect")
        y = lax.conv_general_dilated(
            p, w, window_strides=(1, 1), padding="VALID",
            dimension_numbers=("NHWC", "HWIO", "NHWC"))
        return y + b

    def inorm(y):
        m = jnp.mean(y, axis=(1, 2), keepdims=True)
        v = jnp.mean((y - m) ** 2, axis=(1, 2), keepdims=True)
        return (y - m) / jnp.sqrt(v + EPS)

    y = jnp.maximum(inorm(conv(x, w1, b1)), 0.0)
    y = inorm(conv(y, w2, b2))
    return jnp.transpose(x + y, (0, 3, 1, 2))


if __name__ == "__main__":
    N, C, H, W = 2, 4, 16, 16
    key = jax.random.PRNGKey(0)
    kx, kw1, kb1, kw2, kb2 = jax.random.split(key, 5)

    x = jax.random.normal(kx, (N, C, H, W), jnp.float32)

    # PyTorch Conv2d default init: U(-sqrt(k), sqrt(k)), k = 1/(C*3*3)
    bound = 1.0 / jnp.sqrt(jnp.float32(C * 9))
    w1 = jax.random.uniform(kw1, (3, 3, C, C), jnp.float32, -bound, bound)  # HWIO
    b1 = jax.random.uniform(kb1, (C,), jnp.float32, -bound, bound)
    w2 = jax.random.uniform(kw2, (3, 3, C, C), jnp.float32, -bound, bound)
    b2 = jax.random.uniform(kb2, (C,), jnp.float32, -bound, bound)

    out = residual_block(x, w1, b1, w2, b2)
    out = jax.block_until_ready(out)

    ref = jax.block_until_ready(_reference(x, w1, b1, w2, b2))
    assert out.shape == (N, C, H, W)
    assert jnp.max(jnp.abs(out - ref)) < 1e-4, "mismatch vs reference"

    print("KERNEL_OK")
</pallas_src>

<mosaic_0001>
module attributes {stable_mosaic.version = 11 : i64} {
  func.func @_resblock_kernel(%arg0: i32, %arg1: memref<1x16x16x4xf32, #tpu.memory_space<vmem>>, %arg2: memref<9x4x4xf32, #tpu.memory_space<vmem>>, %arg3: memref<1x4xf32, #tpu.memory_space<vmem>>, %arg4: memref<9x4x4xf32, #tpu.memory_space<vmem>>, %arg5: memref<1x4xf32, #tpu.memory_space<vmem>>, %arg6: memref<1x16x16x4xf32, #tpu.memory_space<vmem>>, %arg7: memref<18x18x4xf32, #tpu.memory_space<vmem>>, %arg8: memref<256x4xf32, #tpu.memory_space<vmem>>) attributes {dimension_semantics = [#tpu.dimension_semantics<parallel>], iteration_bounds = array<i64: 2>, scalar_prefetch = 0 : i64, scratch_operands = 2 : i64, tpu.core_type = #tpu.core_type<tc>, window_params = [{transform_indices = @transform_0, window_bounds = array<i64: 1, 16, 16, 4>}, {pipeline_mode = #tpu.pipeline_mode<synchronous>, transform_indices = @transform_1, window_bounds = array<i64: 9, 4, 4>}, {pipeline_mode = #tpu.pipeline_mode<synchronous>, transform_indices = @transform_2, window_bounds = array<i64: 1, 4>}, {pipeline_mode = #tpu.pipeline_mode<synchronous>, transform_indices = @transform_3, window_bounds = array<i64: 9, 4, 4>}, {pipeline_mode = #tpu.pipeline_mode<synchronous>, transform_indices = @transform_4, window_bounds = array<i64: 1, 4>}, {transform_indices = @transform_5, window_bounds = array<i64: 1, 16, 16, 4>}]} {
    %c0 = arith.constant 0 : index
    %c0_0 = arith.constant 0 : index
    %c0_1 = arith.constant 0 : index
    %c0_2 = arith.constant 0 : index
    %0 = vector.load %arg1[%c0, %c0_0, %c0_1, %c0_2] : memref<1x16x16x4xf32, #tpu.memory_space<vmem>>, vector<1x16x16x4xf32>
    %1 = vector.shape_cast %0 : vector<1x16x16x4xf32> to vector<16x16x4xf32>
    %c1 = arith.constant 1 : index
    %c1_3 = arith.constant 1 : index
    %c0_4 = arith.constant 0 : index
    %2 = vector.load %arg7[%c1, %c1_3, %c0_4] : memref<18x18x4xf32, #tpu.memory_space<vmem>>, vector<16x16x4xf32>
    tpu.vector_store %arg7[%c1, %c1_3, %c0_4], %1 {strides = array<i32>} : memref<18x18x4xf32, #tpu.memory_space<vmem>>, vector<16x16x4xf32>,
    %3 = vector.extract_strided_slice %1 {offsets = [1, 0, 0], sizes = [1, 16, 4], strides = [1, 1, 1]} : vector<16x16x4xf32> to vector<1x16x4xf32>
    %c0_5 = arith.constant 0 : index
    %c1_6 = arith.constant 1 : index
    %c0_7 = arith.constant 0 : index
    %4 = vector.load %arg7[%c0_5, %c1_6, %c0_7] : memref<18x18x4xf32, #tpu.memory_space<vmem>>, vector<1x16x4xf32>
    tpu.vector_store %arg7[%c0_5, %c1_6, %c0_7], %3 {strides = array<i32>} : memref<18x18x4xf32, #tpu.memory_space<vmem>>, vector<1x16x4xf32>,
    %5 = vector.extract_strided_slice %1 {offsets = [14, 0, 0], sizes = [1, 16, 4], strides = [1, 1, 1]} : vector<16x16x4xf32> to vector<1x16x4xf32>
    %c17 = arith.constant 17 : index
    %c1_8 = arith.constant 1 : index
    %c0_9 = arith.constant 0 : index
    %6 = vector.load %arg7[%c17, %c1_8, %c0_9] : memref<18x18x4xf32, #tpu.memory_space<vmem>>, vector<1x16x4xf32>
    tpu.vector_store %arg7[%c17, %c1_8, %c0_9], %5 {strides = array<i32>} : memref<18x18x4xf32, #tpu.memory_space<vmem>>, vector<1x16x4xf32>,
    %c0_10 = arith.constant 0 : index
    %c2 = arith.constant 2 : index
    %c0_11 = arith.constant 0 : index
    %7 = vector.load %arg7[%c0_10, %c2, %c0_11] : memref<18x18x4xf32, #tpu.memory_space<vmem>>, vector<18x1x4xf32>
    %c0_12 = arith.constant 0 : index
    %c0_13 = arith.constant 0 : index
    %c0_14 = arith.constant 0 : index
    %8 = vector.load %arg7[%c0_12, %c0_13, %c0_14] : memref<18x18x4xf32, #tpu.memory_space<vmem>>, vector<18x1x4xf32>
    tpu.vector_store %arg7[%c0_12, %c0_13, %c0_14], %7 {strides = array<i32>} : memref<18x18x4xf32, #tpu.memory_space<vmem>>, vector<18x1x4xf32>,
    %c0_15 = arith.constant 0 : index
    %c15 = arith.constant 15 : index
    %c0_16 = arith.constant 0 : index
    %9 = vector.load %arg7[%c0_15, %c15, %c0_16] : memref<18x18x4xf32, #tpu.memory_space<vmem>>, vector<18x1x4xf32>
    %c0_17 = arith.constant 0 : index
    %c17_18 = arith.constant 17 : index
    %c0_19 = arith.constant 0 : index
    %10 = vector.load %arg7[%c0_17, %c17_18, %c0_19] : memref<18x18x4xf32, #tpu.memory_space<vmem>>, vector<18x1x4xf32>
    tpu.vector_store %arg7[%c0_17, %c17_18, %c0_19], %9 {strides = array<i32>} : memref<18x18x4xf32, #tpu.memory_space<vmem>>, vector<18x1x4xf32>,
    %c0_20 = arith.constant 0 : index
    %c0_21 = arith.constant 0 : index
    %c0_22 = arith.constant 0 : index
    %11 = vector.load %arg7[%c0_20, %c0_21, %c0_22] : memref<18x18x4xf32, #tpu.memory_space<vmem>>, vector<18x16x4xf32>
    %12 = vector.shape_cast %11 : vector<18x16x4xf32> to vector<288x4xf32>
    %13 = vector.extract_strided_slice %12 {offsets = [0, 0], sizes = [256, 4], strides = [1, 1]} : vector<288x4xf32> to vector<256x4xf32>
    %c0_23 = arith.constant 0 : index
    %c0_24 = arith.constant 0 : index
    %c0_25 = arith.constant 0 : index
    %14 = vector.load %arg2[%c0_23, %c0_24, %c0_25] : memref<9x4x4xf32, #tpu.memory_space<vmem>>, vector<1x4x4xf32>
    %15 = vector.shape_cast %14 : vector<1x4x4xf32> to vector<4x4xf32>
    %cst = arith.constant dense<0.000000e+00> : vector<256x4xf32>
    %16 = tpu.matmul %13, %15, %cst {dimension_numbers = #tpu.dot_dimension_numbers<[1], [0], [0], [1], [0, 0, 1, 1], [], []>} : vector<256x4xf32>, vector<4x4xf32>, vector<256x4xf32> -> vector<256x4xf32>
    %c0_26 = arith.constant 0 : index
    %c0_27 = arith.constant 0 : index
    %17 = vector.load %arg8[%c0_26, %c0_27] : memref<256x4xf32, #tpu.memory_space<vmem>>, vector<256x4xf32>
    tpu.vector_store %arg8[%c0_26, %c0_27], %16 {strides = array<i32>} : memref<256x4xf32, #tpu.memory_space<vmem>>, vector<256x4xf32>,
    %18 = vector.extract_strided_slice %12 {offsets = [16, 0], sizes = [256, 4], strides = [1, 1]} : vector<288x4xf32> to vector<256x4xf32>
    %c3 = arith.constant 3 : index
    %c0_28 = arith.constant 0 : index
    %c0_29 = arith.constant 0 : index
    %19 = vector.load %arg2[%c3, %c0_28, %c0_29] : memref<9x4x4xf32, #tpu.memory_space<vmem>>, vector<1x4x4xf32>
    %20 = vector.shape_cast %19 : vector<1x4x4xf32> to vector<4x4xf32>
    %cst_30 = arith.constant dense<0.000000e+00> : vector<256x4xf32>
    %21 = tpu.matmul %18, %20, %cst_30 {dimension_numbers = #tpu.dot_dimension_numbers<[1], [0], [0], [1], [0, 0, 1, 1], [], []>} : vector<256x4xf32>, vector<4x4xf32>, vector<256x4xf32> -> vector<256x4xf32>
    %c0_31 = arith.constant 0 : index
    %c0_32 = arith.constant 0 : index
    %22 = vector.load %arg8[%c0_31, %c0_32] : memref<256x4xf32, #tpu.memory_space<vmem>>, vector<256x4xf32>
    %23 = arith.addf %22, %21 : vector<256x4xf32>
    %c0_33 = arith.constant 0 : index
    %c0_34 = arith.constant 0 : index
    %24 = vector.load %arg8[%c0_33, %c0_34] : memref<256x4xf32, #tpu.memory_space<vmem>>, vector<256x4xf32>
    tpu.vector_store %arg8[%c0_33, %c0_34], %23 {strides = array<i32>} : memref<256x4xf32, #tpu.memory_space<vmem>>, vector<256x4xf32>,
    %25 = vector.extract_strided_slice %12 {offsets = [32, 0], sizes = [256, 4], strides = [1, 1]} : vector<288x4xf32> to vector<256x4xf32>
    %c6 = arith.constant 6 : index
    %c0_35 = arith.constant 0 : index
    %c0_36 = arith.constant 0 : index
    %26 = vector.load %arg2[%c6, %c0_35, %c0_36] : memref<9x4x4xf32, #tpu.memory_space<vmem>>, vector<1x4x4xf32>
    %27 = vector.shape_cast %26 : vector<1x4x4xf32> to vector<4x4xf32>
    %cst_37 = arith.constant dense<0.000000e+00> : vector<256x4xf32>
    %28 = tpu.matmul %25, %27, %cst_37 {dimension_numbers = #tpu.dot_dimension_numbers<[1], [0], [0], [1], [0, 0, 1, 1], [], []>} : vector<256x4xf32>, vector<4x4xf32>, vector<256x4xf32> -> vector<256x4xf32>
    %c0_38 = arith.constant 0 : index
    %c0_39 = arith.constant 0 : index
    %29 = vector.load %arg8[%c0_38, %c0_39] : memref<256x4xf32, #tpu.memory_space<vmem>>, vector<256x4xf32>
    %30 = arith.addf %29, %28 : vector<256x4xf32>
    %c0_40 = arith.constant 0 : index
    %c0_41 = arith.constant 0 : index
    %31 = vector.load %arg8[%c0_40, %c0_41] : memref<256x4xf32, #tpu.memory_space<vmem>>, vector<256x4xf32>
    tpu.vector_store %arg8[%c0_40, %c0_41], %30 {strides = array<i32>} : memref<256x4xf32, #tpu.memory_space<vmem>>, vector<256x4xf32>,
    %c0_42 = arith.constant 0 : index
    %c1_43 = arith.constant 1 : index
    %c0_44 = arith.constant 0 : index
    %32 = vector.load %arg7[%c0_42, %c1_43, %c0_44] : memref<18x18x4xf32, #tpu.memory_space<vmem>>, vector<18x16x4xf32>
    %33 = vector.shape_cast %32 : vector<18x16x4xf32> to vector<288x4xf32>
    %34 = vector.extract_strided_slice %33 {offsets = [0, 0], sizes = [256, 4], strides = [1, 1]} : vector<288x4xf32> to vector<256x4xf32>
    %c1_45 = arith.constant 1 : index
    %c0_46 = arith.constant 0 : index
    %c0_47 = arith.constant 0 : index
    %35 = vector.load %arg2[%c1_45, %c0_46, %c0_47] : memref<9x4x4xf32, #tpu.memory_space<vmem>>, vector<1x4x4xf32>
    %36 = vector.shape_cast %35 : vector<1x4x4xf32> to vector<4x4xf32>
    %cst_48 = arith.constant dense<0.000000e+00> : vector<256x4xf32>
    %37 = tpu.matmul %34, %36, %cst_48 {dimension_numbers = #tpu.dot_dimension_numbers<[1], [0], [0], [1], [0, 0, 1, 1], [], []>} : vector<256x4xf32>, vector<4x4xf32>, vector<256x4xf32> -> vector<256x4xf32>
    %c0_49 = arith.constant 0 : index
    %c0_50 = arith.constant 0 : index
    %38 = vector.load %arg8[%c0_49, %c0_50] : memref<256x4xf32, #tpu.memory_space<vmem>>, vector<256x4xf32>
    %39 = arith.addf %38, %37 : vector<256x4xf32>
    %c0_51 = arith.constant 0 : index
    %c0_52 = arith.constant 0 : index
    %40 = vector.load %arg8[%c0_51, %c0_52] : memref<256x4xf32, #tpu.memory_space<vmem>>, vector<256x4xf32>
    tpu.vector_store %arg8[%c0_51, %c0_52], %39 {strides = array<i32>} : memref<256x4xf32, #tpu.memory_space<vmem>>, vector<256x4xf32>,
    %41 = vector.extract_strided_slice %33 {offsets = [16, 0], sizes = [256, 4], strides = [1, 1]} : vector<288x4xf32> to vector<256x4xf32>
    %c4 = arith.constant 4 : index
    %c0_53 = arith.constant 0 : index
    %c0_54 = arith.constant 0 : index
    %42 = vector.load %arg2[%c4, %c0_53, %c0_54] : memref<9x4x4xf32, #tpu.memory_space<vmem>>, vector<1x4x4xf32>
    %43 = vector.shape_cast %42 : vector<1x4x4xf32> to vector<4x4xf32>
    %cst_55 = arith.constant dense<0.000000e+00> : vector<256x4xf32>
    %44 = tpu.matmul %41, %43, %cst_55 {dimension_numbers = #tpu.dot_dimension_numbers<[1], [0], [0], [1], [0, 0, 1, 1], [], []>} : vector<256x4xf32>, vector<4x4xf32>, vector<256x4xf32> -> vector<256x4xf32>
    %c0_56 = arith.constant 0 : index
    %c0_57 = arith.constant 0 : index
    %45 = vector.load %arg8[%c0_56, %c0_57] : memref<256x4xf32, #tpu.memory_space<vmem>>, vector<256x4xf32>
    %46 = arith.addf %45, %44 : vector<256x4xf32>
    %c0_58 = arith.constant 0 : index
    %c0_59 = arith.constant 0 : index
    %47 = vector.load %arg8[%c0_58, %c0_59] : memref<256x4xf32, #tpu.memory_space<vmem>>, vector<256x4xf32>
    tpu.vector_store %arg8[%c0_58, %c0_59], %46 {strides = array<i32>} : memref<256x4xf32, #tpu.memory_space<vmem>>, vector<256x4xf32>,
    %48 = vector.extract_strided_slice %33 {offsets = [32, 0], sizes = [256, 4], strides = [1, 1]} : vector<288x4xf32> to vector<256x4xf32>
    %c7 = arith.constant 7 : index
    %c0_60 = arith.constant 0 : index
    %c0_61 = arith.constant 0 : index
    %49 = vector.load %arg2[%c7, %c0_60, %c0_61] : memref<9x4x4xf32, #tpu.memory_space<vmem>>, vector<1x4x4xf32>
    %50 = vector.shape_cast %49 : vector<1x4x4xf32> to vector<4x4xf32>
    %cst_62 = arith.constant dense<0.000000e+00> : vector<256x4xf32>
    %51 = tpu.matmul %48, %50, %cst_62 {dimension_numbers = #tpu.dot_dimension_numbers<[1], [0], [0], [1], [0, 0, 1, 1], [], []>} : vector<256x4xf32>, vector<4x4xf32>, vector<256x4xf32> -> vector<256x4xf32>
    %c0_63 = arith.constant 0 : index
    %c0_64 = arith.constant 0 : index
    %52 = vector.load %arg8[%c0_63, %c0_64] : memref<256x4xf32, #tpu.memory_space<vmem>>, vector<256x4xf32>
    %53 = arith.addf %52, %51 : vector<256x4xf32>
    %c0_65 = arith.constant 0 : index
    %c0_66 = arith.constant 0 : index
    %54 = vector.load %arg8[%c0_65, %c0_66] : memref<256x4xf32, #tpu.memory_space<vmem>>, vector<256x4xf32>
    tpu.vector_store %arg8[%c0_65, %c0_66], %53 {strides = array<i32>} : memref<256x4xf32, #tpu.memory_space<vmem>>, vector<256x4xf32>,
    %c0_67 = arith.constant 0 : index
    %c2_68 = arith.constant 2 : index
    %c0_69 = arith.constant 0 : index
    %55 = vector.load %arg7[%c0_67, %c2_68, %c0_69] : memref<18x18x4xf32, #tpu.memory_space<vmem>>, vector<18x16x4xf32>
    %56 = vector.shape_cast %55 : vector<18x16x4xf32> to vector<288x4xf32>
    %57 = vector.extract_strided_slice %56 {offsets = [0, 0], sizes = [256, 4], strides = [1, 1]} : vector<288x4xf32> to vector<256x4xf32>
    %c2_70 = arith.constant 2 : index
    %c0_71 = arith.constant 0 : index
    %c0_72 = arith.constant 0 : index
    %58 = vector.load %arg2[%c2_70, %c0_71, %c0_72] : memref<9x4x4xf32, #tpu.memory_space<vmem>>, vector<1x4x4xf32>
    %59 = vector.shape_cast %58 : vector<1x4x4xf32> to vector<4x4xf32>
    %cst_73 = arith.constant dense<0.000000e+00> : vector<256x4xf32>
    %60 = tpu.matmul %57, %59, %cst_73 {dimension_numbers = #tpu.dot_dimension_numbers<[1], [0], [0], [1], [0, 0, 1, 1], [], []>} : vector<256x4xf32>, vector<4x4xf32>, vector<256x4xf32> -> vector<256x4xf32>
    %c0_74 = arith.constant 0 : index
    %c0_75 = arith.constant 0 : index
    %61 = vector.load %arg8[%c0_74, %c0_75] : memref<256x4xf32, #tpu.memory_space<vmem>>, vector<256x4xf32>
    %62 = arith.addf %61, %60 : vector<256x4xf32>
    %c0_76 = arith.constant 0 : index
    %c0_77 = arith.constant 0 : index
    %63 = vector.load %arg8[%c0_76, %c0_77] : memref<256x4xf32, #tpu.memory_space<vmem>>, vector<256x4xf32>
    tpu.vector_store %arg8[%c0_76, %c0_77], %62 {strides = array<i32>} : memref<256x4xf32, #tpu.memory_space<vmem>>, vector<256x4xf32>,
    %64 = vector.extract_strided_slice %56 {offsets = [16, 0], sizes = [256, 4], strides = [1, 1]} : vector<288x4xf32> to vector<256x4xf32>
    %c5 = arith.constant 5 : index
    %c0_78 = arith.constant 0 : index
    %c0_79 = arith.constant 0 : index
    %65 = vector.load %arg2[%c5, %c0_78, %c0_79] : memref<9x4x4xf32, #tpu.memory_space<vmem>>, vector<1x4x4xf32>
    %66 = vector.shape_cast %65 : vector<1x4x4xf32> to vector<4x4xf32>
    %cst_80 = arith.constant dense<0.000000e+00> : vector<256x4xf32>
    %67 = tpu.matmul %64, %66, %cst_80 {dimension_numbers = #tpu.dot_dimension_numbers<[1], [0], [0], [1], [0, 0, 1, 1], [], []>} : vector<256x4xf32>, vector<4x4xf32>, vector<256x4xf32> -> vector<256x4xf32>
    %c0_81 = arith.constant 0 : index
    %c0_82 = arith.constant 0 : index
    %68 = vector.load %arg8[%c0_81, %c0_82] : memref<256x4xf32, #tpu.memory_space<vmem>>, vector<256x4xf32>
    %69 = arith.addf %68, %67 : vector<256x4xf32>
    %c0_83 = arith.constant 0 : index
    %c0_84 = arith.constant 0 : index
    %70 = vector.load %arg8[%c0_83, %c0_84] : memref<256x4xf32, #tpu.memory_space<vmem>>, vector<256x4xf32>
    tpu.vector_store %arg8[%c0_83, %c0_84], %69 {strides = array<i32>} : memref<256x4xf32, #tpu.memory_space<vmem>>, vector<256x4xf32>,
    %71 = vector.extract_strided_slice %56 {offsets = [32, 0], sizes = [256, 4], strides = [1, 1]} : vector<288x4xf32> to vector<256x4xf32>
    %c8 = arith.constant 8 : index
    %c0_85 = arith.constant 0 : index
    %c0_86 = arith.constant 0 : index
    %72 = vector.load %arg2[%c8, %c0_85, %c0_86] : memref<9x4x4xf32, #tpu.memory_space<vmem>>, vector<1x4x4xf32>
    %73 = vector.shape_cast %72 : vector<1x4x4xf32> to vector<4x4xf32>
    %cst_87 = arith.constant dense<0.000000e+00> : vector<256x4xf32>
    %74 = tpu.matmul %71, %73, %cst_87 {dimension_numbers = #tpu.dot_dimension_numbers<[1], [0], [0], [1], [0, 0, 1, 1], [], []>} : vector<256x4xf32>, vector<4x4xf32>, vector<256x4xf32> -> vector<256x4xf32>
    %c0_88 = arith.constant 0 : index
    %c0_89 = arith.constant 0 : index
    %75 = vector.load %arg8[%c0_88, %c0_89] : memref<256x4xf32, #tpu.memory_space<vmem>>, vector<256x4xf32>
    %76 = arith.addf %75, %74 : vector<256x4xf32>
    %c0_90 = arith.constant 0 : index
    %c0_91 = arith.constant 0 : index
    %77 = vector.load %arg8[%c0_90, %c0_91] : memref<256x4xf32, #tpu.memory_space<vmem>>, vector<256x4xf32>
    tpu.vector_store %arg8[%c0_90, %c0_91], %76 {strides = array<i32>} : memref<256x4xf32, #tpu.memory_space<vmem>>, vector<256x4xf32>,
    %c0_92 = arith.constant 0 : index
    %c0_93 = arith.constant 0 : index
    %78 = vector.load %arg8[%c0_92, %c0_93] : memref<256x4xf32, #tpu.memory_space<vmem>>, vector<256x4xf32>
    %c0_94 = arith.constant 0 : index
    %c0_95 = arith.constant 0 : index
    %79 = vector.load %arg3[%c0_94, %c0_95] : memref<1x4xf32, #tpu.memory_space<vmem>>, vector<1x4xf32>
    %80 = vector.broadcast %79 : vector<1x4xf32> to vector<256x4xf32>
    %81 = arith.addf %78, %80 : vector<256x4xf32>
    %cst_96 = arith.constant dense<0.000000e+00> : vector<4xf32>
    %82 = vector.multi_reduction <add>, %81, %cst_96 [0] : vector<256x4xf32> to vector<4xf32>
    %83 = vector.shape_cast %82 : vector<4xf32> to vector<1x4xf32>
    %cst_97 = arith.constant 2.560000e+02 : f32
    %84 = vector.broadcast %cst_97 : f32 to vector<1x4xf32>
    %85 = arith.divf %83, %84 : vector<1x4xf32>
    %86 = vector.broadcast %85 : vector<1x4xf32> to vector<256x4xf32>
    %87 = arith.subf %81, %86 : vector<256x4xf32>
    %88 = arith.mulf %87, %87 : vector<256x4xf32>
    %cst_98 = arith.constant dense<0.000000e+00> : vector<4xf32>
    %89 = vector.multi_reduction <add>, %88, %cst_98 [0] : vector<256x4xf32> to vector<4xf32>
    %90 = vector.shape_cast %89 : vector<4xf32> to vector<1x4xf32>
    %cst_99 = arith.constant 2.560000e+02 : f32
    %91 = vector.broadcast %cst_99 : f32 to vector<1x4xf32>
    %92 = arith.divf %90, %91 : vector<1x4xf32>
    %93 = vector.broadcast %85 : vector<1x4xf32> to vector<256x4xf32>
    %94 = arith.subf %81, %93 : vector<256x4xf32>
    %cst_100 = arith.constant 9.99999974E-6 : f32
    %95 = vector.broadcast %cst_100 : f32 to vector<1x4xf32>
    %96 = arith.addf %92, %95 : vector<1x4xf32>
    %97 = math.rsqrt %96 : vector<1x4xf32>
    %98 = vector.broadcast %97 : vector<1x4xf32> to vector<256x4xf32>
    %99 = arith.mulf %94, %98 : vector<256x4xf32>
    %cst_101 = arith.constant 0.000000e+00 : f32
    %100 = vector.broadcast %cst_101 : f32 to vector<256x4xf32>
    %101 = arith.maximumf %99, %100 : vector<256x4xf32>
    %102 = vector.shape_cast %101 : vector<256x4xf32> to vector<16x16x4xf32>
    %c1_102 = arith.constant 1 : index
    %c1_103 = arith.constant 1 : index
    %c0_104 = arith.constant 0 : index
    %103 = vector.load %arg7[%c1_102, %c1_103, %c0_104] : memref<18x18x4xf32, #tpu.memory_space<vmem>>, vector<16x16x4xf32>
    tpu.vector_store %arg7[%c1_102, %c1_103, %c0_104], %102 {strides = array<i32>} : memref<18x18x4xf32, #tpu.memory_space<vmem>>, vector<16x16x4xf32>,
    %104 = vector.extract_strided_slice %102 {offsets = [1, 0, 0], sizes = [1, 16, 4], strides = [1, 1, 1]} : vector<16x16x4xf32> to vector<1x16x4xf32>
    %c0_105 = arith.constant 0 : index
    %c1_106 = arith.constant 1 : index
    %c0_107 = arith.constant 0 : index
    %105 = vector.load %arg7[%c0_105, %c1_106, %c0_107] : memref<18x18x4xf32, #tpu.memory_space<vmem>>, vector<1x16x4xf32>
    tpu.vector_store %arg7[%c0_105, %c1_106, %c0_107], %104 {strides = array<i32>} : memref<18x18x4xf32, #tpu.memory_space<vmem>>, vector<1x16x4xf32>,
    %106 = vector.extract_strided_slice %102 {offsets = [14, 0, 0], sizes = [1, 16, 4], strides = [1, 1, 1]} : vector<16x16x4xf32> to vector<1x16x4xf32>
    %c17_108 = arith.constant 17 : index
    %c1_109 = arith.constant 1 : index
    %c0_110 = arith.constant 0 : index
    %107 = vector.load %arg7[%c17_108, %c1_109, %c0_110] : memref<18x18x4xf32, #tpu.memory_space<vmem>>, vector<1x16x4xf32>
    tpu.vector_store %arg7[%c17_108, %c1_109, %c0_110], %106 {strides = array<i32>} : memref<18x18x4xf32, #tpu.memory_space<vmem>>, vector<1x16x4xf32>,
    %c0_111 = arith.constant 0 : index
    %c2_112 = arith.constant 2 : index
    %c0_113 = arith.constant 0 : index
    %108 = vector.load %arg7[%c0_111, %c2_112, %c0_113] : memref<18x18x4xf32, #tpu.memory_space<vmem>>, vector<18x1x4xf32>
    %c0_114 = arith.constant 0 : index
    %c0_115 = arith.constant 0 : index
    %c0_116 = arith.constant 0 : index
    %109 = vector.load %arg7[%c0_114, %c0_115, %c0_116] : memref<18x18x4xf32, #tpu.memory_space<vmem>>, vector<18x1x4xf32>
    tpu.vector_store %arg7[%c0_114, %c0_115, %c0_116], %108 {strides = array<i32>} : memref<18x18x4xf32, #tpu.memory_space<vmem>>, vector<18x1x4xf32>,
    %c0_117 = arith.constant 0 : index
    %c15_118 = arith.constant 15 : index
    %c0_119 = arith.constant 0 : index
    %110 = vector.load %arg7[%c0_117, %c15_118, %c0_119] : memref<18x18x4xf32, #tpu.memory_space<vmem>>, vector<18x1x4xf32>
    %c0_120 = arith.constant 0 : index
    %c17_121 = arith.constant 17 : index
    %c0_122 = arith.constant 0 : index
    %111 = vector.load %arg7[%c0_120, %c17_121, %c0_122] : memref<18x18x4xf32, #tpu.memory_space<vmem>>, vector<18x1x4xf32>
    tpu.vector_store %arg7[%c0_120, %c17_121, %c0_122], %110 {strides = array<i32>} : memref<18x18x4xf32, #tpu.memory_space<vmem>>, vector<18x1x4xf32>,
    %c0_123 = arith.constant 0 : index
    %c0_124 = arith.constant 0 : index
    %c0_125 = arith.constant 0 : index
    %112 = vector.load %arg7[%c0_123, %c0_124, %c0_125] : memref<18x18x4xf32, #tpu.memory_space<vmem>>, vector<18x16x4xf32>
    %113 = vector.shape_cast %112 : vector<18x16x4xf32> to vector<288x4xf32>
    %114 = vector.extract_strided_slice %113 {offsets = [0, 0], sizes = [256, 4], strides = [1, 1]} : vector<288x4xf32> to vector<256x4xf32>
    %c0_126 = arith.constant 0 : index
    %c0_127 = arith.constant 0 : index
    %c0_128 = arith.constant 0 : index
    %115 = vector.load %arg4[%c0_126, %c0_127, %c0_128] : memref<9x4x4xf32, #tpu.memory_space<vmem>>, vector<1x4x4xf32>
    %116 = vector.shape_cast %115 : vector<1x4x4xf32> to vector<4x4xf32>
    %cst_129 = arith.constant dense<0.000000e+00> : vector<256x4xf32>
    %117 = tpu.matmul %114, %116, %cst_129 {dimension_numbers = #tpu.dot_dimension_numbers<[1], [0], [0], [1], [0, 0, 1, 1], [], []>} : vector<256x4xf32>, vector<4x4xf32>, vector<256x4xf32> -> vector<256x4xf32>
    %c0_130 = arith.constant 0 : index
    %c0_131 = arith.constant 0 : index
    %118 = vector.load %arg8[%c0_130, %c0_131] : memref<256x4xf32, #tpu.memory_space<vmem>>, vector<256x4xf32>
    tpu.vector_store %arg8[%c0_130, %c0_131], %117 {strides = array<i32>} : memref<256x4xf32, #tpu.memory_space<vmem>>, vector<256x4xf32>,
    %119 = vector.extract_strided_slice %113 {offsets = [16, 0], sizes = [256, 4], strides = [1, 1]} : vector<288x4xf32> to vector<256x4xf32>
    %c3_132 = arith.constant 3 : index
    %c0_133 = arith.constant 0 : index
    %c0_134 = arith.constant 0 : index
    %120 = vector.load %arg4[%c3_132, %c0_133, %c0_134] : memref<9x4x4xf32, #tpu.memory_space<vmem>>, vector<1x4x4xf32>
    %121 = vector.shape_cast %120 : vector<1x4x4xf32> to vector<4x4xf32>
    %cst_135 = arith.constant dense<0.000000e+00> : vector<256x4xf32>
    %122 = tpu.matmul %119, %121, %cst_135 {dimension_numbers = #tpu.dot_dimension_numbers<[1], [0], [0], [1], [0, 0, 1, 1], [], []>} : vector<256x4xf32>, vector<4x4xf32>, vector<256x4xf32> -> vector<256x4xf32>
    %c0_136 = arith.constant 0 : index
    %c0_137 = arith.constant 0 : index
    %123 = vector.load %arg8[%c0_136, %c0_137] : memref<256x4xf32, #tpu.memory_space<vmem>>, vector<256x4xf32>
    %124 = arith.addf %123, %122 : vector<256x4xf32>
    %c0_138 = arith.constant 0 : index
    %c0_139 = arith.constant 0 : index
    %125 = vector.load %arg8[%c0_138, %c0_139] : memref<256x4xf32, #tpu.memory_space<vmem>>, vector<256x4xf32>
    tpu.vector_store %arg8[%c0_138, %c0_139], %124 {strides = array<i32>} : memref<256x4xf32, #tpu.memory_space<vmem>>, vector<256x4xf32>,
    %126 = vector.extract_strided_slice %113 {offsets = [32, 0], sizes = [256, 4], strides = [1, 1]} : vector<288x4xf32> to vector<256x4xf32>
    %c6_140 = arith.constant 6 : index
    %c0_141 = arith.constant 0 : index
    %c0_142 = arith.constant 0 : index
    %127 = vector.load %arg4[%c6_140, %c0_141, %c0_142] : memref<9x4x4xf32, #tpu.memory_space<vmem>>, vector<1x4x4xf32>
    %128 = vector.shape_cast %127 : vector<1x4x4xf32> to vector<4x4xf32>
    %cst_143 = arith.constant dense<0.000000e+00> : vector<256x4xf32>
    %129 = tpu.matmul %126, %128, %cst_143 {dimension_numbers = #tpu.dot_dimension_numbers<[1], [0], [0], [1], [0, 0, 1, 1], [], []>} : vector<256x4xf32>, vector<4x4xf32>, vector<256x4xf32> -> vector<256x4xf32>
    %c0_144 = arith.constant 0 : index
    %c0_145 = arith.constant 0 : index
    %130 = vector.load %arg8[%c0_144, %c0_145] : memref<256x4xf32, #tpu.memory_space<vmem>>, vector<256x4xf32>
    %131 = arith.addf %130, %129 : vector<256x4xf32>
    %c0_146 = arith.constant 0 : index
    %c0_147 = arith.constant 0 : index
    %132 = vector.load %arg8[%c0_146, %c0_147] : memref<256x4xf32, #tpu.memory_space<vmem>>, vector<256x4xf32>
    tpu.vector_store %arg8[%c0_146, %c0_147], %131 {strides = array<i32>} : memref<256x4xf32, #tpu.memory_space<vmem>>, vector<256x4xf32>,
    %c0_148 = arith.constant 0 : index
    %c1_149 = arith.constant 1 : index
    %c0_150 = arith.constant 0 : index
    %133 = vector.load %arg7[%c0_148, %c1_149, %c0_150] : memref<18x18x4xf32, #tpu.memory_space<vmem>>, vector<18x16x4xf32>
    %134 = vector.shape_cast %133 : vector<18x16x4xf32> to vector<288x4xf32>
    %135 = vector.extract_strided_slice %134 {offsets = [0, 0], sizes = [256, 4], strides = [1, 1]} : vector<288x4xf32> to vector<256x4xf32>
    %c1_151 = arith.constant 1 : index
    %c0_152 = arith.constant 0 : index
    %c0_153 = arith.constant 0 : index
    %136 = vector.load %arg4[%c1_151, %c0_152, %c0_153] : memref<9x4x4xf32, #tpu.memory_space<vmem>>, vector<1x4x4xf32>
    %137 = vector.shape_cast %136 : vector<1x4x4xf32> to vector<4x4xf32>
    %cst_154 = arith.constant dense<0.000000e+00> : vector<256x4xf32>
    %138 = tpu.matmul %135, %137, %cst_154 {dimension_numbers = #tpu.dot_dimension_numbers<[1], [0], [0], [1], [0, 0, 1, 1], [], []>} : vector<256x4xf32>, vector<4x4xf32>, vector<256x4xf32> -> vector<256x4xf32>
    %c0_155 = arith.constant 0 : index
    %c0_156 = arith.constant 0 : index
    %139 = vector.load %arg8[%c0_155, %c0_156] : memref<256x4xf32, #tpu.memory_space<vmem>>, vector<256x4xf32>
    %140 = arith.addf %139, %138 : vector<256x4xf32>
    %c0_157 = arith.constant 0 : index
    %c0_158 = arith.constant 0 : index
    %141 = vector.load %arg8[%c0_157, %c0_158] : memref<256x4xf32, #tpu.memory_space<vmem>>, vector<256x4xf32>
    tpu.vector_store %arg8[%c0_157, %c0_158], %140 {strides = array<i32>} : memref<256x4xf32, #tpu.memory_space<vmem>>, vector<256x4xf32>,
    %142 = vector.extract_strided_slice %134 {offsets = [16, 0], sizes = [256, 4], strides = [1, 1]} : vector<288x4xf32> to vector<256x4xf32>
    %c4_159 = arith.constant 4 : index
    %c0_160 = arith.constant 0 : index
    %c0_161 = arith.constant 0 : index
    %143 = vector.load %arg4[%c4_159, %c0_160, %c0_161] : memref<9x4x4xf32, #tpu.memory_space<vmem>>, vector<1x4x4xf32>
    %144 = vector.shape_cast %143 : vector<1x4x4xf32> to vector<4x4xf32>
    %cst_162 = arith.constant dense<0.000000e+00> : vector<256x4xf32>
    %145 = tpu.matmul %142, %144, %cst_162 {dimension_numbers = #tpu.dot_dimension_numbers<[1], [0], [0], [1], [0, 0, 1, 1], [], []>} : vector<256x4xf32>, vector<4x4xf32>, vector<256x4xf32> -> vector<256x4xf32>
    %c0_163 = arith.constant 0 : index
    %c0_164 = arith.constant 0 : index
    %146 = vector.load %arg8[%c0_163, %c0_164] : memref<256x4xf32, #tpu.memory_space<vmem>>, vector<256x4xf32>
    %147 = arith.addf %146, %145 : vector<256x4xf32>
    %c0_165 = arith.constant 0 : index
    %c0_166 = arith.constant 0 : index
    %148 = vector.load %arg8[%c0_165, %c0_166] : memref<256x4xf32, #tpu.memory_space<vmem>>, vector<256x4xf32>
    tpu.vector_store %arg8[%c0_165, %c0_166], %147 {strides = array<i32>} : memref<256x4xf32, #tpu.memory_space<vmem>>, vector<256x4xf32>,
    %149 = vector.extract_strided_slice %134 {offsets = [32, 0], sizes = [256, 4], strides = [1, 1]} : vector<288x4xf32> to vector<256x4xf32>
    %c7_167 = arith.constant 7 : index
    %c0_168 = arith.constant 0 : index
    %c0_169 = arith.constant 0 : index
    %150 = vector.load %arg4[%c7_167, %c0_168, %c0_169] : memref<9x4x4xf32, #tpu.memory_space<vmem>>, vector<1x4x4xf32>
    %151 = vector.shape_cast %150 : vector<1x4x4xf32> to vector<4x4xf32>
    %cst_170 = arith.constant dense<0.000000e+00> : vector<256x4xf32>
    %152 = tpu.matmul %149, %151, %cst_170 {dimension_numbers = #tpu.dot_dimension_numbers<[1], [0], [0], [1], [0, 0, 1, 1], [], []>} : vector<256x4xf32>, vector<4x4xf32>, vector<256x4xf32> -> vector<256x4xf32>
    %c0_171 = arith.constant 0 : index
    %c0_172 = arith.constant 0 : index
    %153 = vector.load %arg8[%c0_171, %c0_172] : memref<256x4xf32, #tpu.memory_space<vmem>>, vector<256x4xf32>
    %154 = arith.addf %153, %152 : vector<256x4xf32>
    %c0_173 = arith.constant 0 : index
    %c0_174 = arith.constant 0 : index
    %155 = vector.load %arg8[%c0_173, %c0_174] : memref<256x4xf32, #tpu.memory_space<vmem>>, vector<256x4xf32>
    tpu.vector_store %arg8[%c0_173, %c0_174], %154 {strides = array<i32>} : memref<256x4xf32, #tpu.memory_space<vmem>>, vector<256x4xf32>,
    %c0_175 = arith.constant 0 : index
    %c2_176 = arith.constant 2 : index
    %c0_177 = arith.constant 0 : index
    %156 = vector.load %arg7[%c0_175, %c2_176, %c0_177] : memref<18x18x4xf32, #tpu.memory_space<vmem>>, vector<18x16x4xf32>
    %157 = vector.shape_cast %156 : vector<18x16x4xf32> to vector<288x4xf32>
    %158 = vector.extract_strided_slice %157 {offsets = [0, 0], sizes = [256, 4], strides = [1, 1]} : vector<288x4xf32> to vector<256x4xf32>
    %c2_178 = arith.constant 2 : index
    %c0_179 = arith.constant 0 : index
    %c0_180 = arith.constant 0 : index
    %159 = vector.load %arg4[%c2_178, %c0_179, %c0_180] : memref<9x4x4xf32, #tpu.memory_space<vmem>>, vector<1x4x4xf32>
    %160 = vector.shape_cast %159 : vector<1x4x4xf32> to vector<4x4xf32>
    %cst_181 = arith.constant dense<0.000000e+00> : vector<256x4xf32>
    %161 = tpu.matmul %158, %160, %cst_181 {dimension_numbers = #tpu.dot_dimension_numbers<[1], [0], [0], [1], [0, 0, 1, 1], [], []>} : vector<256x4xf32>, vector<4x4xf32>, vector<256x4xf32> -> vector<256x4xf32>
    %c0_182 = arith.constant 0 : index
    %c0_183 = arith.constant 0 : index
    %162 = vector.load %arg8[%c0_182, %c0_183] : memref<256x4xf32, #tpu.memory_space<vmem>>, vector<256x4xf32>
    %163 = arith.addf %162, %161 : vector<256x4xf32>
    %c0_184 = arith.constant 0 : index
    %c0_185 = arith.constant 0 : index
    %164 = vector.load %arg8[%c0_184, %c0_185] : memref<256x4xf32, #tpu.memory_space<vmem>>, vector<256x4xf32>
    tpu.vector_store %arg8[%c0_184, %c0_185], %163 {strides = array<i32>} : memref<256x4xf32, #tpu.memory_space<vmem>>, vector<256x4xf32>,
    %165 = vector.extract_strided_slice %157 {offsets = [16, 0], sizes = [256, 4], strides = [1, 1]} : vector<288x4xf32> to vector<256x4xf32>
    %c5_186 = arith.constant 5 : index
    %c0_187 = arith.constant 0 : index
    %c0_188 = arith.constant 0 : index
    %166 = vector.load %arg4[%c5_186, %c0_187, %c0_188] : memref<9x4x4xf32, #tpu.memory_space<vmem>>, vector<1x4x4xf32>
    %167 = vector.shape_cast %166 : vector<1x4x4xf32> to vector<4x4xf32>
    %cst_189 = arith.constant dense<0.000000e+00> : vector<256x4xf32>
    %168 = tpu.matmul %165, %167, %cst_189 {dimension_numbers = #tpu.dot_dimension_numbers<[1], [0], [0], [1], [0, 0, 1, 1], [], []>} : vector<256x4xf32>, vector<4x4xf32>, vector<256x4xf32> -> vector<256x4xf32>
    %c0_190 = arith.constant 0 : index
    %c0_191 = arith.constant 0 : index
    %169 = vector.load %arg8[%c0_190, %c0_191] : memref<256x4xf32, #tpu.memory_space<vmem>>, vector<256x4xf32>
    %170 = arith.addf %169, %168 : vector<256x4xf32>
    %c0_192 = arith.constant 0 : index
    %c0_193 = arith.constant 0 : index
    %171 = vector.load %arg8[%c0_192, %c0_193] : memref<256x4xf32, #tpu.memory_space<vmem>>, vector<256x4xf32>
    tpu.vector_store %arg8[%c0_192, %c0_193], %170 {strides = array<i32>} : memref<256x4xf32, #tpu.memory_space<vmem>>, vector<256x4xf32>,
    %172 = vector.extract_strided_slice %157 {offsets = [32, 0], sizes = [256, 4], strides = [1, 1]} : vector<288x4xf32> to vector<256x4xf32>
    %c8_194 = arith.constant 8 : index
    %c0_195 = arith.constant 0 : index
    %c0_196 = arith.constant 0 : index
    %173 = vector.load %arg4[%c8_194, %c0_195, %c0_196] : memref<9x4x4xf32, #tpu.memory_space<vmem>>, vector<1x4x4xf32>
    %174 = vector.shape_cast %173 : vector<1x4x4xf32> to vector<4x4xf32>
    %cst_197 = arith.constant dense<0.000000e+00> : vector<256x4xf32>
    %175 = tpu.matmul %172, %174, %cst_197 {dimension_numbers = #tpu.dot_dimension_numbers<[1], [0], [0], [1], [0, 0, 1, 1], [], []>} : vector<256x4xf32>, vector<4x4xf32>, vector<256x4xf32> -> vector<256x4xf32>
    %c0_198 = arith.constant 0 : index
    %c0_199 = arith.constant 0 : index
    %176 = vector.load %arg8[%c0_198, %c0_199] : memref<256x4xf32, #tpu.memory_space<vmem>>, vector<256x4xf32>
    %177 = arith.addf %176, %175 : vector<256x4xf32>
    %c0_200 = arith.constant 0 : index
    %c0_201 = arith.constant 0 : index
    %178 = vector.load %arg8[%c0_200, %c0_201] : memref<256x4xf32, #tpu.memory_space<vmem>>, vector<256x4xf32>
    tpu.vector_store %arg8[%c0_200, %c0_201], %177 {strides = array<i32>} : memref<256x4xf32, #tpu.memory_space<vmem>>, vector<256x4xf32>,
    %c0_202 = arith.constant 0 : index
    %c0_203 = arith.constant 0 : index
    %179 = vector.load %arg8[%c0_202, %c0_203] : memref<256x4xf32, #tpu.memory_space<vmem>>, vector<256x4xf32>
    %c0_204 = arith.constant 0 : index
    %c0_205 = arith.constant 0 : index
    %180 = vector.load %arg5[%c0_204, %c0_205] : memref<1x4xf32, #tpu.memory_space<vmem>>, vector<1x4xf32>
    %181 = vector.broadcast %180 : vector<1x4xf32> to vector<256x4xf32>
    %182 = arith.addf %179, %181 : vector<256x4xf32>
    %cst_206 = arith.constant dense<0.000000e+00> : vector<4xf32>
    %183 = vector.multi_reduction <add>, %182, %cst_206 [0] : vector<256x4xf32> to vector<4xf32>
    %184 = vector.shape_cast %183 : vector<4xf32> to vector<1x4xf32>
    %cst_207 = arith.constant 2.560000e+02 : f32
    %185 = vector.broadcast %cst_207 : f32 to vector<1x4xf32>
    %186 = arith.divf %184, %185 : vector<1x4xf32>
    %187 = vector.broadcast %186 : vector<1x4xf32> to vector<256x4xf32>
    %188 = arith.subf %182, %187 : vector<256x4xf32>
    %189 = arith.mulf %188, %188 : vector<256x4xf32>
    %cst_208 = arith.constant dense<0.000000e+00> : vector<4xf32>
    %190 = vector.multi_reduction <add>, %189, %cst_208 [0] : vector<256x4xf32> to vector<4xf32>
    %191 = vector.shape_cast %190 : vector<4xf32> to vector<1x4xf32>
    %cst_209 = arith.constant 2.560000e+02 : f32
    %192 = vector.broadcast %cst_209 : f32 to vector<1x4xf32>
    %193 = arith.divf %191, %192 : vector<1x4xf32>
    %194 = vector.broadcast %186 : vector<1x4xf32> to vector<256x4xf32>
    %195 = arith.subf %182, %194 : vector<256x4xf32>
    %cst_210 = arith.constant 9.99999974E-6 : f32
    %196 = vector.broadcast %cst_210 : f32 to vector<1x4xf32>
    %197 = arith.addf %193, %196 : vector<1x4xf32>
    %198 = math.rsqrt %197 : vector<1x4xf32>
    %199 = vector.broadcast %198 : vector<1x4xf32> to vector<256x4xf32>
    %200 = arith.mulf %195, %199 : vector<256x4xf32>
    %c0_211 = arith.constant 0 : index
    %c0_212 = arith.constant 0 : index
    %c0_213 = arith.constant 0 : index
    %c0_214 = arith.constant 0 : index
    %201 = vector.load %arg1[%c0_211, %c0_212, %c0_213, %c0_214] : memref<1x16x16x4xf32, #tpu.memory_space<vmem>>, vector<1x16x16x4xf32>
    %202 = vector.shape_cast %201 : vector<1x16x16x4xf32> to vector<16x16x4xf32>
    %203 = vector.shape_cast %200 : vector<256x4xf32> to vector<16x16x4xf32>
    %204 = arith.addf %202, %203 : vector<16x16x4xf32>
    %c0_215 = arith.constant 0 : index
    %c0_216 = arith.constant 0 : index
    %c0_217 = arith.constant 0 : index
    %c0_218 = arith.constant 0 : index
    %205 = vector.load %arg6[%c0_215, %c0_216, %c0_217, %c0_218] : memref<1x16x16x4xf32, #tpu.memory_space<vmem>>, vector<1x16x16x4xf32>
    %206 = vector.shape_cast %205 : vector<1x16x16x4xf32> to vector<16x16x4xf32>
    %207 = vector.shape_cast %204 : vector<16x16x4xf32> to vector<1x16x16x4xf32>
    tpu.vector_store %arg6[%c0_215, %c0_216, %c0_217, %c0_218], %207 {strides = array<i32>} : memref<1x16x16x4xf32, #tpu.memory_space<vmem>>, vector<1x16x16x4xf32>,
    return
  }
  func.func @transform_0(%arg0: i32) -> (i32, i32, i32, i32) {
    %c0_i32 = arith.constant 0 : i32
    %c0_i32_0 = arith.constant 0 : i32
    %c0_i32_1 = arith.constant 0 : i32
    %c0_i32_2 = arith.constant 0 : i32
    return %arg0, %c0_i32, %c0_i32_0, %c0_i32_1 : i32, i32, i32, i32
  }
  func.func @transform_1(%arg0: i32) -> (i32, i32, i32) {
    %c0_i32 = arith.constant 0 : i32
    %c0_i32_0 = arith.constant 0 : i32
    %c0_i32_1 = arith.constant 0 : i32
    %c0_i32_2 = arith.constant 0 : i32
    return %c0_i32, %c0_i32_0, %c0_i32_1 : i32, i32, i32
  }
  func.func @transform_2(%arg0: i32) -> (i32, i32) {
    %c0_i32 = arith.constant 0 : i32
    %c0_i32_0 = arith.constant 0 : i32
    %c0_i32_1 = arith.constant 0 : i32
    return %c0_i32, %c0_i32_0 : i32, i32
  }
  func.func @transform_3(%arg0: i32) -> (i32, i32, i32) {
    %c0_i32 = arith.constant 0 : i32
    %c0_i32_0 = arith.constant 0 : i32
    %c0_i32_1 = arith.constant 0 : i32
    %c0_i32_2 = arith.constant 0 : i32
    return %c0_i32, %c0_i32_0, %c0_i32_1 : i32, i32, i32
  }
  func.func @transform_4(%arg0: i32) -> (i32, i32) {
    %c0_i32 = arith.constant 0 : i32
    %c0_i32_0 = arith.constant 0 : i32
    %c0_i32_1 = arith.constant 0 : i32
    return %c0_i32, %c0_i32_0 : i32, i32
  }
  func.func @transform_5(%arg0: i32) -> (i32, i32, i32, i32) {
    %c0_i32 = arith.constant 0 : i32
    %c0_i32_0 = arith.constant 0 : i32
    %c0_i32_1 = arith.constant 0 : i32
    %c0_i32_2 = arith.constant 0 : i32
    return %arg0, %c0_i32, %c0_i32_0, %c0_i32_1 : i32, i32, i32, i32
  }
}

</mosaic_0001>

<bundles_post_ra>
// kernel: tpu_custom_call.1
= control target key start
LH: loop header
LB: loop body
LE: loop exit
PB: predicated region body
PF: predicated region fallthrough
CT: control target
= control target key end

     0   :  { %s10051_s18 = smov 0   ;;  %s13481_s0 = inlined_call_operand.vmem [shape: f32[2,16,16,4], index: 0, kind: input, shape index: {}]   ;;  %s13482_s1 = inlined_call_operand.vmem [shape: f32[9,4,4], index: 1, kind: input, shape index: {}]   ;;  %s13483_s2 = inlined_call_operand.vmem [shape: f32[1,4], index: 2, kind: input, shape index: {}]   ;;  %s13484_s3 = inlined_call_operand.vmem [shape: f32[9,4,4], index: 3, kind: input, shape index: {}]   ;;  %s13485_s4 = inlined_call_operand.vmem [shape: f32[1,4], index: 4, kind: input, shape index: {}]   ;;  %s13486_s5 = inlined_call_operand.vmem [shape: f32[2,16,16,4], index: 5, kind: output, shape index: {}]  }
   0x1 LB: > { %s7882_s19 = sadd.s32 4294967295, %s10019_s18   ;;  %p7886_p0 = scmp.ge.s32.totalorder %s10019_s18, 1  ;;  %s10019_s18 = sphi %s10051_s18, %s15_s18  }
   0x2   : > { %p187_p1 = scmp.lt.s32.totalorder %s10019_s18, 3 }
   0x4   : > { %p188_p2 = pnand %p7886_p0, %p187_p1 }
   0x6   : > { %191 = sbr.rel (%p188_p2) target bundleno = 1382 (0x566), region = 40 }
   0xb   : > { %v405_v0 = vld [vmem:[%s13482_s1] sm:$0xf]  ;;  %vm502_vm0 = vcmask 1043456   ;;  %p215_p3 = scmp.lt.s32.totalorder %s7882_s19, 1  ;;  %v10066_v1 = vld [vmem:[%s13482_s1 + $0x18] sm:$0xf] }
   0xc   : > { %9101 = vmatprep.subr.msk.mxu0 %vm502_vm0, %v405_v0  ;;  %v7924_v2 = vld [vmem:[%s13482_s1 + $0xc] sm:$0xf]  ;;  %v10074_v3 = vld [vmem:[%s13482_s1 + $0x4] sm:$0xf]  ;;  %vm258_vm1 = vcmask 31744   ;;  %vm314_vm2 = vcmask 24576  }
   0xd   : > { %9102 = vmatpush3.msk.msra.mxu0 %vm502_vm0, %v405_v0  ;;  %s13490_s19 = smov (!%p215_p3, %s7882_s19), 1  ;;  %9151 = vmatprep.subr.msk.mxu1 %vm502_vm0, %v7924_v2  ;;  %v10166_v47 = vld [vmem:[%s13482_s1 + $0x10] sm:$0xf] }
   0xe   : > { %9201 = vmatprep.subr.msk.mxu0 %vm502_vm0, %v10066_v1  ;;  %9152 = vmatpush3.msk.msra.mxu1 %vm502_vm0, %v7924_v2  ;;  %s8505_s28 = sshll.u32 %s13490_s19, 8 }
   0xf   : > { %9251 = vmatprep.subr.msk.mxu1 %vm502_vm0, %v10074_v3  ;;  %s10091_s6 = scalar_lea.vmem %s13481_s0, %s8505_s28  ;;  %s13362_s22 = scalar_lea.vmem %s13486_s5, %s8505_s28 }
  0x10   : > { %v227_v4 = vld [vmem:[%s10091_s6 + $0x10] sm:$0xff]  ;;  %v228_v5 = vld [vmem:[%s10091_s6 + $0x18] sm:$0xff]  ;;  %v225_v6 = vld [vmem:[%s10091_s6] sm:$0xff] }
  0x11   : > { %261 = vst.msk [vmem:[#allocation2 + $0x31] sm:$0xff] %vm258_vm1, %v227_v4  ;;  %291 = vst.msk [vmem:[#allocation2 + $0x1] sm:$0xff] %vm258_vm1, %v227_v4  ;;  %v226_v7 = vld [vmem:[%s10091_s6 + $0x8] sm:$0xff]  ;;  %v229_v8 = vld [vmem:[%s10091_s6 + $0x20] sm:$0xff] }
  0x12   : > { %262 = vst.msk [vmem:[#allocation2 + $0x39] sm:$0xff] %vm258_vm1, %v228_v5  ;;  %292 = vst.msk [vmem:[#allocation2 + $0x9] sm:$0xff] %vm258_vm1, %v228_v5  ;;  %v230_v9 = vld [vmem:[%s10091_s6 + $0x28] sm:$0xff]  ;;  %v231_v10 = vld [vmem:[%s10091_s6 + $0x30] sm:$0xff] }
  0x13   : > { %259 = vst.msk [vmem:[#allocation2 + $0x19] sm:$0xff] %vm258_vm1, %v225_v6  ;;  %260 = vst.msk [vmem:[#allocation2 + $0x21] sm:$0xff] %vm258_vm1, %v226_v7  ;;  %v232_v11 = vld [vmem:[%s10091_s6 + $0x38] sm:$0xff]  ;;  %v233_v12 = vld [vmem:[%s10091_s6 + $0x40] sm:$0xff] }
  0x14   : > { %263 = vst.msk [vmem:[#allocation2 + $0x49] sm:$0xff] %vm258_vm1, %v229_v8  ;;  %264 = vst.msk [vmem:[#allocation2 + $0x51] sm:$0xff] %vm258_vm1, %v230_v9  ;;  %v234_v13 = vld [vmem:[%s10091_s6 + $0x48] sm:$0xff]  ;;  %v235_v14 = vld [vmem:[%s10091_s6 + $0x50] sm:$0xff] }
  0x15   : > { %265 = vst.msk [vmem:[#allocation2 + $0x61] sm:$0xff] %vm258_vm1, %v231_v10  ;;  %266 = vst.msk [vmem:[#allocation2 + $0x69] sm:$0xff] %vm258_vm1, %v232_v11  ;;  %v236_v15 = vld [vmem:[%s10091_s6 + $0x58] sm:$0xff]  ;;  %v237_v16 = vld [vmem:[%s10091_s6 + $0x60] sm:$0xff] }
  0x16   : > { %267 = vst.msk [vmem:[#allocation2 + $0x79] sm:$0xff] %vm258_vm1, %v233_v12  ;;  %268 = vst.msk [vmem:[#allocation2 + $0x81] sm:$0xff] %vm258_vm1, %v234_v13  ;;  %v238_v17 = vld [vmem:[%s10091_s6 + $0x68] sm:$0xff]  ;;  %v239_v18 = vld [vmem:[%s10091_s6 + $0x70] sm:$0xff] }
  0x17   : > { %269 = vst.msk [vmem:[#allocation2 + $0x91] sm:$0xff] %vm258_vm1, %v235_v14  ;;  %270 = vst.msk [vmem:[#allocation2 + $0x99] sm:$0xff] %vm258_vm1, %v236_v15  ;;  %v240_v19 = vld [vmem:[%s10091_s6 + $0x78] sm:$0xff]  ;;  %v241_v20 = vld [vmem:[%s10091_s6 + $0x80] sm:$0xff] }
  0x18   : > { %271 = vst.msk [vmem:[#allocation2 + $0xa9] sm:$0xff] %vm258_vm1, %v237_v16  ;;  %272 = vst.msk [vmem:[#allocation2 + $0xb1] sm:$0xff] %vm258_vm1, %v238_v17  ;;  %v242_v21 = vld [vmem:[%s10091_s6 + $0x88] sm:$0xff]  ;;  %v243_v22 = vld [vmem:[%s10091_s6 + $0x90] sm:$0xff] }
  0x19   : > { %273 = vst.msk [vmem:[#allocation2 + $0xc1] sm:$0xff] %vm258_vm1, %v239_v18  ;;  %274 = vst.msk [vmem:[#allocation2 + $0xc9] sm:$0xff] %vm258_vm1, %v240_v19  ;;  %v244_v23 = vld [vmem:[%s10091_s6 + $0x98] sm:$0xff]  ;;  %v245_v24 = vld [vmem:[%s10091_s6 + $0xa0] sm:$0xff] }
  0x1a   : > { %275 = vst.msk [vmem:[#allocation2 + $0xd9] sm:$0xff] %vm258_vm1, %v241_v20  ;;  %276 = vst.msk [vmem:[#allocation2 + $0xe1] sm:$0xff] %vm258_vm1, %v242_v21  ;;  %v246_v25 = vld [vmem:[%s10091_s6 + $0xa8] sm:$0xff]  ;;  %v247_v26 = vld [vmem:[%s10091_s6 + $0xb0] sm:$0xff] }
  0x1b   : > { %277 = vst.msk [vmem:[#allocation2 + $0xf1] sm:$0xff] %vm258_vm1, %v243_v22  ;;  %278 = vst.msk [vmem:[#allocation2 + $0xf9] sm:$0xff] %vm258_vm1, %v244_v23  ;;  %v248_v27 = vld [vmem:[%s10091_s6 + $0xb8] sm:$0xff]  ;;  %v296_v28 = vld [vmem:[#allocation2 + $0x2] sm:$0x1] }
  0x1c   : > { %279 = vst.msk [vmem:[#allocation2 + $0x109] sm:$0xff] %vm258_vm1, %v245_v24  ;;  %v297_v29 = vld [vmem:[#allocation2 + $0x1a] sm:$0x1]  ;;  %280 = vst.msk [vmem:[#allocation2 + $0x111] sm:$0xff] %vm258_vm1, %v246_v25  ;;  %v298_v30 = vld [vmem:[#allocation2 + $0x32] sm:$0x1] }
  0x1d   : > { %281 = vst.msk [vmem:[#allocation2 + $0x121] sm:$0xff] %vm258_vm1, %v247_v26  ;;  %282 = vst.msk [vmem:[#allocation2 + $0x129] sm:$0xff] %vm258_vm1, %v248_v27  ;;  %v299_v31 = vld [vmem:[#allocation2 + $0x4a] sm:$0x1]  ;;  %v300_v32 = vld [vmem:[#allocation2 + $0x62] sm:$0x1] }
  0x1e   : > { %315 = vst.msk [vmem:[#allocation2] sm:$0x1] %vm314_vm2, %v296_v28  ;;  %316 = vst.msk [vmem:[#allocation2 + $0x18] sm:$0x1] %vm314_vm2, %v297_v29  ;;  %v301_v33 = vld [vmem:[#allocation2 + $0x7a] sm:$0x1] }
  0x1f   : > { %317 = vst.msk [vmem:[#allocation2 + $0x30] sm:$0x1] %vm314_vm2, %v298_v30  ;;  %318 = vst.msk [vmem:[#allocation2 + $0x48] sm:$0x1] %vm314_vm2, %v299_v31  ;;  %v302_v34 = vld [vmem:[#allocation2 + $0x92] sm:$0x1] }
  0x20   : > { %319 = vst.msk [vmem:[#allocation2 + $0x60] sm:$0x1] %vm314_vm2, %v300_v32  ;;  %320 = vst.msk [vmem:[#allocation2 + $0x78] sm:$0x1] %vm314_vm2, %v301_v33  ;;  %v303_v35 = vld [vmem:[#allocation2 + $0xaa] sm:$0x1] }
  0x21   : > { %321 = vst.msk [vmem:[#allocation2 + $0x90] sm:$0x1] %vm314_vm2, %v302_v34  ;;  %322 = vst.msk [vmem:[#allocation2 + $0xa8] sm:$0x1] %vm314_vm2, %v303_v35  ;;  %v304_v36 = vld [vmem:[#allocation2 + $0xc2] sm:$0x1] }
  0x22   : > { %323 = vst.msk [vmem:[#allocation2 + $0xc0] sm:$0x1] %vm314_vm2, %v304_v36  ;;  %v305_v37 = vld [vmem:[#allocation2 + $0xda] sm:$0x1]  ;;  %v306_v38 = vld [vmem:[#allocation2 + $0xf2] sm:$0x1] }
  0x23   : > { %v370_v39 = vld [vmem:[#allocation2 + $0x8] sm:$0xff]  ;;  %324 = vst.msk [vmem:[#allocation2 + $0xd8] sm:$0x1] %vm314_vm2, %v305_v37  ;;  %325 = vst.msk [vmem:[#allocation2 + $0xf0] sm:$0x1] %vm314_vm2, %v306_v38  ;;  %v372_v44 = vld [vmem:[#allocation2 + $0x20] sm:$0xff] }
  0x24   : > { %v307_v40 = vld [vmem:[#allocation2 + $0x10a] sm:$0x1]  ;;  %v308_v43 = vld [vmem:[#allocation2 + $0x122] sm:$0x1]  ;;  %v251_v49 = vld [vmem:[%s10091_s6 + $0xd0] sm:$0xff] }
  0x25   : > { %v369_v41 = vld [vmem:[#allocation2] sm:$0xff]  ;;  %v371_v42 = vld [vmem:[#allocation2 + $0x18] sm:$0xff]  ;;  %326 = vst.msk [vmem:[#allocation2 + $0x108] sm:$0x1] %vm314_vm2, %v307_v40  ;;  %327 = vst.msk [vmem:[#allocation2 + $0x120] sm:$0x1] %vm314_vm2, %v308_v43 }
  0x26   : > { %9103 = vmatprep.mubr.msk.f32.mxu0 %vm258_vm1, %v369_v41  ;;  %9153 = vmatprep.mubr.msk.f32.mxu1 %vm258_vm1, %v371_v42  ;;  %v249_v45 = vld [vmem:[%s10091_s6 + $0xc0] sm:$0xff]  ;;  %v250_v46 = vld [vmem:[%s10091_s6 + $0xc8] sm:$0xff]  ;;  %v10171_v48 = vld [vmem:[#allocation2 + $0x30] sm:$0xff]  ;;  %285 = vst.msk [vmem:[#allocation2 + $0x151] sm:$0xff] %vm258_vm1, %v251_v49 }
  0x27   : > { %9104 = vmatmul.mubr.msk.f32.vlgmr.msra.gmra.mxu0 %vm258_vm1, %v370_v39  ;;  %9154 = vmatmul.mubr.msk.f32.vlgmr.msra.gmra.mxu1 %vm258_vm1, %v372_v44  ;;  %283 = vst.msk [vmem:[#allocation2 + $0x139] sm:$0xff] %vm258_vm1, %v249_v45  ;;  %284 = vst.msk [vmem:[#allocation2 + $0x141] sm:$0xff] %vm258_vm1, %v250_v46  ;;  %v252_v50 = vld [vmem:[%s10091_s6 + $0xd8] sm:$0xff]  ;;  %v253_v51 = vld [vmem:[%s10091_s6 + $0xe0] sm:$0xff] }
  0x28   : > { %9202 = vmatpush3.msk.msra.mxu0 %vm502_vm0, %v10066_v1  ;;  %9106 = vmatprep.mubr.msk.f32.mxu0 %vm258_vm1, %v371_v42  ;;  %286 = vst.msk [vmem:[#allocation2 + $0x159] sm:$0xff] %vm258_vm1, %v252_v50  ;;  %v10183_v52 = vld [vmem:[#allocation2 + $0x38] sm:$0xff]  ;;  %287 = vst.msk [vmem:[#allocation2 + $0x169] sm:$0xff] %vm258_vm1, %v253_v51  ;;  %v254_v53 = vld [vmem:[%s10091_s6 + $0xe8] sm:$0xff] }
  0x29   : > { %9156 = vmatprep.mubr.msk.f32.mxu1 %vm258_vm1, %v10171_v48  ;;  %9252 = vmatpush3.msk.msra.mxu1 %vm502_vm0, %v10074_v3  ;;  %294 = vst.msk [vmem:[#allocation2 + $0x199] sm:$0xff] %vm258_vm1, %v253_v51  ;;  %v255_v54 = vld [vmem:[%s10091_s6 + $0xf0] sm:$0xff]  ;;  %v10192_v55 = vld [vmem:[#allocation2 + $0x48] sm:$0xff]  ;;  %288 = vst.msk [vmem:[#allocation2 + $0x171] sm:$0xff] %vm258_vm1, %v254_v53 }
  0x2a   : > { %9301 = vmatprep.subr.msk.mxu0 %vm502_vm0, %v10166_v47  ;;  %295 = vst.msk [vmem:[#allocation2 + $0x1a1] sm:$0xff] %vm258_vm1, %v254_v53  ;;  %289 = vst.msk [vmem:[#allocation2 + $0x181] sm:$0xff] %vm258_vm1, %v255_v54  ;;  %v256_v56 = vld [vmem:[%s10091_s6 + $0xf8] sm:$0xff]  ;;  %v10205_v57 = vld [vmem:[#allocation2 + $0x50] sm:$0xff] }
  0x2b   : > { %9107 = vmatmul.mubr.msk.f32.gmra.mxu0 %vm258_vm1, %v372_v44  ;;  %9157 = vmatmul.mubr.msk.f32.gmra.mxu1 %vm258_vm1, %v10183_v52  ;;  %290 = vst.msk [vmem:[#allocation2 + $0x189] sm:$0xff] %vm258_vm1, %v256_v56  ;;  %v10209_v59 = vld [vmem:[#allocation2 + $0x60] sm:$0xff]  ;;  %v10219_v62 = vld [vmem:[#allocation2 + $0x68] sm:$0xff]  ;;  %v10224_v0 = vld [vmem:[#allocation2 + $0x78] sm:$0xff] }
  0x2c   : > { %9109 = vmatprep.mubr.msk.f32.mxu0 %vm258_vm1, %v10171_v48  ;;  %9159 = vmatprep.mubr.msk.f32.mxu1 %vm258_vm1, %v10192_v55  ;;  %v10233_v1 = vld [vmem:[#allocation2 + $0x80] sm:$0xff]  ;;  %v10237_v2 = vld [vmem:[#allocation2 + $0x90] sm:$0xff]  ;;  %v10244_v3 = vld [vmem:[%s13482_s1 + $0x1c] sm:$0xf] }
  0x2d   : > { %v310_v60 = vld [vmem:[#allocation2 + $0x152] sm:$0x1]  ;;  %9351 = vmatprep.subr.msk.mxu1 %vm502_vm0, %v10244_v3  ;;  %v10252_v5 = vld [vmem:[#allocation2 + $0x98] sm:$0xff]  ;;  %v10257_v6 = vld [vmem:[#allocation2 + $0xa8] sm:$0xff] }
  0x2e   : > { %v309_v58 = vld [vmem:[#allocation2 + $0x13a] sm:$0x1]  ;;  %329 = vst.msk [vmem:[#allocation2 + $0x150] sm:$0x1] %vm314_vm2, %v310_v60  ;;  %v10265_v7 = vld [vmem:[#allocation2 + $0xb0] sm:$0xff]  ;;  %v10269_v8 = vld [vmem:[#allocation2 + $0xc0] sm:$0xff] }
  0x2f   : > { %9110 = vmatmul.mubr.msk.f32.gmra.mxu0 %vm258_vm1, %v10183_v52  ;;  %9160 = vmatmul.mubr.msk.f32.gmra.mxu1 %vm258_vm1, %v10205_v57  ;;  %328 = vst.msk [vmem:[#allocation2 + $0x138] sm:$0x1] %vm314_vm2, %v309_v58  ;;  %v311_v61 = vld [vmem:[#allocation2 + $0x16a] sm:$0x1]  ;;  %v10281_v10 = vld [vmem:[#allocation2 + $0xd8] sm:$0xff]  ;;  %v10289_v11 = vld [vmem:[#allocation2 + $0xe0] sm:$0xff] }
  0x30   : > { %9112 = vmatprep.mubr.msk.f32.mxu0 %vm258_vm1, %v10192_v55  ;;  %9162 = vmatprep.mubr.msk.f32.mxu1 %vm258_vm1, %v10209_v59  ;;  %330 = vst.msk [vmem:[#allocation2 + $0x168] sm:$0x1] %vm314_vm2, %v311_v61  ;;  %v313_v4 = vld [vmem:[#allocation2 + $0x19a] sm:$0x1]  ;;  %v10277_v9 = vld [vmem:[#allocation2 + $0xc8] sm:$0xff]  ;;  %v10293_v12 = vld [vmem:[#allocation2 + $0xf0] sm:$0xff] }
  0x31   : > { %v312_v63 = vld [vmem:[#allocation2 + $0x182] sm:$0x1]  ;;  %332 = vst.msk [vmem:[#allocation2 + $0x198] sm:$0x1] %vm314_vm2, %v313_v4  ;;  %v10301_v13 = vld [vmem:[#allocation2 + $0xf8] sm:$0xff]  ;;  %v10305_v14 = vld [vmem:[#allocation2 + $0x108] sm:$0xff] }
  0x32   : > { %331 = vst.msk [vmem:[#allocation2 + $0x180] sm:$0x1] %vm314_vm2, %v312_v63  ;;  %v10313_v15 = vld [vmem:[#allocation2 + $0x110] sm:$0xff]  ;;  %v10317_v16 = vld [vmem:[#allocation2 + $0x120] sm:$0xff]  ;;  %v10325_v17 = vld [vmem:[#allocation2 + $0x128] sm:$0xff] }
  0x33   : > { %9113 = vmatmul.mubr.msk.f32.gmra.mxu0 %vm258_vm1, %v10205_v57  ;;  %9163 = vmatmul.mubr.msk.f32.gmra.mxu1 %vm258_vm1, %v10219_v62  ;;  %v10337_v19 = vld [vmem:[#allocation2 + $0x140] sm:$0xff]  ;;  %v10349_v21 = vld [vmem:[#allocation2 + $0x158] sm:$0xff]  ;;  %v10363_v24 = vld [vmem:[#allocation2 + $0x170] sm:$0xff] }
  0x34   : > { %9115 = vmatprep.mubr.msk.f32.mxu0 %vm258_vm1, %v10209_v59  ;;  %9165 = vmatprep.mubr.msk.f32.mxu1 %vm258_vm1, %v10224_v0  ;;  %v333_v25 = vld [vmem:[#allocation2 + $0xf] sm:$0x1]  ;;  %v1427_v27 = vld [vmem:[#allocation2 + $0x1] sm:$0xff]  ;;  %v10384_v30 = vld [vmem:[#allocation2 + $0x19] sm:$0xff] }
  0x35   : > { %v10341_v20 = vld [vmem:[#allocation2 + $0x150] sm:$0xff]  ;;  %351 = vst.msk [vmem:[#allocation2 + $0x11] sm:$0x1] %vm314_vm2, %v333_v25  ;;  %v10374_v26 = vld [vmem:[#allocation2 + $0x188] sm:$0xff]  ;;  %v334_v28 = vld [vmem:[#allocation2 + $0x27] sm:$0x1] }
  0x36   : > { %v10329_v18 = vld [vmem:[#allocation2 + $0x138] sm:$0xff]  ;;  %352 = vst.msk [vmem:[#allocation2 + $0x29] sm:$0x1] %vm314_vm2, %v334_v28  ;;  %v1428_v29 = vld [vmem:[#allocation2 + $0x9] sm:$0xff]  ;;  %v10397_v33 = vld [vmem:[%s13482_s1 + $0x14] sm:$0xf] }
  0x37   : > { %9116 = vmatmul.mubr.msk.f32.gmra.mxu0 %vm258_vm1, %v10219_v62  ;;  %9166 = vmatmul.mubr.msk.f32.gmra.mxu1 %vm258_vm1, %v10233_v1  ;;  %v10353_v22 = vld [vmem:[#allocation2 + $0x168] sm:$0xff]  ;;  %v335_v31 = vld [vmem:[#allocation2 + $0x3f] sm:$0x1]  ;;  %v10408_v35 = vld [vmem:[#allocation2 + $0x31] sm:$0xff] }
  0x38   : > { %9118 = vmatprep.mubr.msk.f32.mxu0 %vm258_vm1, %v10224_v0  ;;  %9168 = vmatprep.mubr.msk.f32.mxu1 %vm258_vm1, %v10237_v2  ;;  %v10392_v32 = vld [vmem:[%s13482_s1 + $0x8] sm:$0xf]  ;;  %353 = vst.msk [vmem:[#allocation2 + $0x41] sm:$0x1] %vm314_vm2, %v335_v31  ;;  %v336_v36 = vld [vmem:[#allocation2 + $0x57] sm:$0x1] }
  0x39   : > { %v10361_v23 = vld [vmem:[#allocation2 + $0x180] sm:$0xff]  ;;  %354 = vst.msk [vmem:[#allocation2 + $0x59] sm:$0x1] %vm314_vm2, %v336_v36  ;;  %v10427_v38 = vld [vmem:[#allocation2 + $0x49] sm:$0xff]  ;;  %v10438_v40 = vld [vmem:[#allocation2 + $0x51] sm:$0xff] }
  0x3a   : > { %v10404_v34 = vld [vmem:[#allocation2 + $0x21] sm:$0xff]  ;;  %v10425_v37 = vld [vmem:[#allocation2 + $0x39] sm:$0xff]  ;;  %v337_v39 = vld [vmem:[#allocation2 + $0x6f] sm:$0x1] }
  0x3b   : > { %9119 = vmatmul.mubr.msk.f32.gmra.mxu0 %vm258_vm1, %v10233_v1  ;;  %9169 = vmatmul.mubr.msk.f32.gmra.mxu1 %vm258_vm1, %v10252_v5  ;;  %355 = vst.msk [vmem:[#allocation2 + $0x71] sm:$0x1] %vm314_vm2, %v337_v39  ;;  %v10440_v41 = vld [vmem:[#allocation2 + $0x61] sm:$0xff]  ;;  %v10451_v43 = vld [vmem:[#allocation2 + $0x69] sm:$0xff]  ;;  %v10453_v44 = vld [vmem:[#allocation2 + $0x79] sm:$0xff] }
  0x3c   : > { %9121 = vmatprep.mubr.msk.f32.mxu0 %vm258_vm1, %v10237_v2  ;;  %9171 = vmatprep.mubr.msk.f32.mxu1 %vm258_vm1, %v10257_v6  ;;  %v338_v42 = vld [vmem:[#allocation2 + $0x87] sm:$0x1]  ;;  %v339_v45 = vld [vmem:[#allocation2 + $0x9f] sm:$0x1]  ;;  %v10479_v50 = vld [vmem:[#allocation2 + $0xa9] sm:$0xff] }
  0x3d   : > { %356 = vst.msk [vmem:[#allocation2 + $0x89] sm:$0x1] %vm314_vm2, %v338_v42  ;;  %357 = vst.msk [vmem:[#allocation2 + $0xa1] sm:$0x1] %vm314_vm2, %v339_v45  ;;  %v10464_v46 = vld [vmem:[#allocation2 + $0x81] sm:$0xff]  ;;  %v10477_v49 = vld [vmem:[#allocation2 + $0x99] sm:$0xff] }
  0x3e   : > { %v341_v51 = vld [vmem:[#allocation2 + $0xcf] sm:$0x1]  ;;  %v10492_v53 = vld [vmem:[#allocation2 + $0xc1] sm:$0xff]  ;;  %v10505_v56 = vld [vmem:[#allocation2 + $0xd9] sm:$0xff] }
  0x3f   : > { %9122 = vmatmul.mubr.msk.f32.gmra.mxu0 %vm258_vm1, %v10252_v5  ;;  %9172 = vmatmul.mubr.msk.f32.gmra.mxu1 %vm258_vm1, %v10265_v7  ;;  %359 = vst.msk [vmem:[#allocation2 + $0xd1] sm:$0x1] %vm314_vm2, %v341_v51  ;;  %v342_v54 = vld [vmem:[#allocation2 + $0xe7] sm:$0x1]  ;;  %v344_v60 = vld [vmem:[#allocation2 + $0x117] sm:$0x1] }
  0x40   : > { %9124 = vmatprep.mubr.msk.f32.mxu0 %vm258_vm1, %v10257_v6  ;;  %9174 = vmatprep.mubr.msk.f32.mxu1 %vm258_vm1, %v10269_v8  ;;  %360 = vst.msk [vmem:[#allocation2 + $0xe9] sm:$0x1] %vm314_vm2, %v342_v54  ;;  %v10516_v58 = vld [vmem:[#allocation2 + $0xe1] sm:$0xff]  ;;  %362 = vst.msk [vmem:[#allocation2 + $0x119] sm:$0x1] %vm314_vm2, %v344_v60  ;;  %v10529_v61 = vld [vmem:[#allocation2 + $0xf9] sm:$0xff] }
  0x41   : > { %v345_v63 = vld [vmem:[#allocation2 + $0x12f] sm:$0x1]  ;;  %v10557_v4 = vld [vmem:[#allocation2 + $0x139] sm:$0xff]  ;;  %v10762_v39 = vld [vmem:[#allocation2 + $0x62] sm:$0xff] }
  0x42   : > { %363 = vst.msk [vmem:[#allocation2 + $0x131] sm:$0x1] %vm314_vm2, %v345_v63  ;;  %v10758_v36 = vld [vmem:[#allocation2 + $0x52] sm:$0xff] }
  0x43   : > { %9125 = vmatmul.mubr.msk.f32.gmra.mxu0 %vm258_vm1, %v10265_v7  ;;  %9175 = vmatmul.mubr.msk.f32.gmra.mxu1 %vm258_vm1, %v10277_v9 }
  0x44   : > { %9127 = vmatprep.mubr.msk.f32.mxu0 %vm258_vm1, %v10269_v8  ;;  %9177 = vmatprep.mubr.msk.f32.mxu1 %vm258_vm1, %v10281_v10 }
  0x47   : > { %9128 = vmatmul.mubr.msk.f32.gmra.mxu0 %vm258_vm1, %v10277_v9  ;;  %9178 = vmatmul.mubr.msk.f32.gmra.mxu1 %vm258_vm1, %v10289_v11 }
  0x48   : > { %9130 = vmatprep.mubr.msk.f32.mxu0 %vm258_vm1, %v10281_v10  ;;  %9180 = vmatprep.mubr.msk.f32.mxu1 %vm258_vm1, %v10293_v12 }
  0x4b   : > { %9131 = vmatmul.mubr.msk.f32.gmra.mxu0 %vm258_vm1, %v10289_v11  ;;  %9181 = vmatmul.mubr.msk.f32.gmra.mxu1 %vm258_vm1, %v10301_v13 }
  0x4c   : > { %9133 = vmatprep.mubr.msk.f32.mxu0 %vm258_vm1, %v10293_v12  ;;  %9183 = vmatprep.mubr.msk.f32.mxu1 %vm258_vm1, %v10305_v14 }
  0x4f   : > { %9134 = vmatmul.mubr.msk.f32.gmra.mxu0 %vm258_vm1, %v10301_v13  ;;  %9184 = vmatmul.mubr.msk.f32.gmra.mxu1 %vm258_vm1, %v10313_v15 }
  0x50   : > { %9136 = vmatprep.mubr.msk.f32.mxu0 %vm258_vm1, %v10305_v14  ;;  %9186 = vmatprep.mubr.msk.f32.mxu1 %vm258_vm1, %v10317_v16 }
  0x53   : > { %9137 = vmatmul.mubr.msk.f32.gmra.mxu0 %vm258_vm1, %v10313_v15  ;;  %9187 = vmatmul.mubr.msk.f32.gmra.mxu1 %vm258_vm1, %v10325_v17 }
  0x54   : > { %9139 = vmatprep.mubr.msk.f32.mxu0 %vm258_vm1, %v10317_v16  ;;  %9189 = vmatprep.mubr.msk.f32.mxu1 %vm258_vm1, %v10329_v18 }
  0x57   : > { %9140 = vmatmul.mubr.msk.f32.gmra.mxu0 %vm258_vm1, %v10325_v17  ;;  %9190 = vmatmul.mubr.msk.f32.gmra.mxu1 %vm258_vm1, %v10337_v19 }
  0x58   : > { %9142 = vmatprep.mubr.msk.f32.mxu0 %vm258_vm1, %v10329_v18  ;;  %9192 = vmatprep.mubr.msk.f32.mxu1 %vm258_vm1, %v10341_v20 }
  0x5b   : > { %9143 = vmatmul.mubr.msk.f32.gmra.mxu0 %vm258_vm1, %v10337_v19  ;;  %9193 = vmatmul.mubr.msk.f32.gmra.mxu1 %vm258_vm1, %v10349_v21 }
  0x5c   : > { %9145 = vmatprep.mubr.msk.f32.mxu0 %vm258_vm1, %v10341_v20  ;;  %9195 = vmatprep.mubr.msk.f32.mxu1 %vm258_vm1, %v10353_v22 }
  0x5f   : > { %9146 = vmatmul.mubr.msk.f32.gmra.mxu0 %vm258_vm1, %v10349_v21  ;;  %9196 = vmatmul.mubr.msk.f32.gmra.mxu1 %vm258_vm1, %v10363_v24 }
  0x60   : > { %9148 = vmatprep.mubr.msk.f32.mxu0 %vm258_vm1, %v10353_v22  ;;  %9198 = vmatprep.mubr.msk.f32.mxu1 %vm258_vm1, %v10361_v23 }
  0x63   : > { %9149 = vmatmul.mubr.msk.f32.gmra.mxu0 %vm258_vm1, %v10363_v24  ;;  %9199 = vmatmul.mubr.msk.f32.gmra.mxu1 %vm258_vm1, %v10374_v26 }
  0x64   : > { %9203 = vmatprep.mubr.msk.f32.mxu0 %vm258_vm1, %v10171_v48  ;;  %9253 = vmatprep.mubr.msk.f32.mxu1 %vm258_vm1, %v1427_v27  ;;  %v340_v48 = vld [vmem:[#allocation2 + $0xb7] sm:$0x1] }
  0x65   : > { %358 = vst.msk [vmem:[#allocation2 + $0xb9] sm:$0x1] %vm314_vm2, %v340_v48  ;;  %v10740_v27 = vld [vmem:[#allocation2 + $0x32] sm:$0xff] }
  0x67   : > { %9204 = vmatmul.mubr.msk.f32.vlgmr.msra.gmra.mxu0 %vm258_vm1, %v10183_v52  ;;  %9254 = vmatmul.mubr.msk.f32.vlgmr.msra.gmra.mxu1 %vm258_vm1, %v1428_v29  ;;  %v10490_v52 = vld [vmem:[#allocation2 + $0xb1] sm:$0xff] }
  0x68   : > { %9302 = vmatpush3.msk.msra.mxu0 %vm502_vm0, %v10166_v47  ;;  %9206 = vmatprep.mubr.msk.f32.mxu0 %vm258_vm1, %v10192_v55  ;;  %v10466_v47 = vld [vmem:[#allocation2 + $0x91] sm:$0xff]  ;;  %v10503_v55 = vld [vmem:[#allocation2 + $0xc9] sm:$0xff] }
  0x69   : > { %9256 = vmatprep.mubr.msk.f32.mxu1 %vm258_vm1, %v10384_v30  ;;  %9352 = vmatpush3.msk.msra.mxu1 %vm502_vm0, %v10244_v3  ;;  %v10555_v3 = vld [vmem:[#allocation2 + $0x129] sm:$0xff] }
  0x6a   : > { %9401 = vmatprep.subr.msk.mxu0 %vm502_vm0, %v10392_v32  ;;  %9451 = vmatprep.subr.msk.mxu1 %vm502_vm0, %v10397_v33 }
  0x6b   : > { %9207 = vmatmul.mubr.msk.f32.gmra.mxu0 %vm258_vm1, %v10205_v57  ;;  %9257 = vmatmul.mubr.msk.f32.gmra.mxu1 %vm258_vm1, %v10404_v34  ;;  %v343_v57 = vld [vmem:[#allocation2 + $0xff] sm:$0x1] }
  0x6c   : > { %9209 = vmatprep.mubr.msk.f32.mxu0 %vm258_vm1, %v10209_v59  ;;  %9259 = vmatprep.mubr.msk.f32.mxu1 %vm258_vm1, %v10408_v35  ;;  %361 = vst.msk [vmem:[#allocation2 + $0x101] sm:$0x1] %vm314_vm2, %v343_v57  ;;  %v10518_v59 = vld [vmem:[#allocation2 + $0xf1] sm:$0xff] }
  0x6f   : > { %9210 = vmatmul.mubr.msk.f32.gmra.mxu0 %vm258_vm1, %v10219_v62  ;;  %9260 = vmatmul.mubr.msk.f32.gmra.mxu1 %vm258_vm1, %v10425_v37  ;;  %v10531_v62 = vld [vmem:[#allocation2 + $0x109] sm:$0xff] }
  0x70   : > { %9212 = vmatprep.mubr.msk.f32.mxu0 %vm258_vm1, %v10224_v0  ;;  %9262 = vmatprep.mubr.msk.f32.mxu1 %vm258_vm1, %v10427_v38  ;;  %v10542_v0 = vld [vmem:[#allocation2 + $0x111] sm:$0xff] }
  0x73   : > { %9213 = vmatmul.mubr.msk.f32.gmra.mxu0 %vm258_vm1, %v10233_v1  ;;  %9263 = vmatmul.mubr.msk.f32.gmra.mxu1 %vm258_vm1, %v10438_v40  ;;  %v10544_v1 = vld [vmem:[#allocation2 + $0x121] sm:$0xff] }
  0x74   : > { %9215 = vmatprep.mubr.msk.f32.mxu0 %vm258_vm1, %v10237_v2  ;;  %9265 = vmatprep.mubr.msk.f32.mxu1 %vm258_vm1, %v10440_v41  ;;  %v346_v2 = vld [vmem:[#allocation2 + $0x147] sm:$0x1] }
  0x75   : > { %364 = vst.msk [vmem:[#allocation2 + $0x149] sm:$0x1] %vm314_vm2, %v346_v2  ;;  %v10805_v2 = vld [vmem:[#allocation2 + $0x9a] sm:$0xff] }
  0x77   : > { %9216 = vmatmul.mubr.msk.f32.gmra.mxu0 %vm258_vm1, %v10252_v5  ;;  %9266 = vmatmul.mubr.msk.f32.gmra.mxu1 %vm258_vm1, %v10451_v43  ;;  %v347_v5 = vld [vmem:[#allocation2 + $0x15f] sm:$0x1] }
  0x78   : > { %9218 = vmatprep.mubr.msk.f32.mxu0 %vm258_vm1, %v10257_v6  ;;  %9268 = vmatprep.mubr.msk.f32.mxu1 %vm258_vm1, %v10453_v44  ;;  %365 = vst.msk [vmem:[#allocation2 + $0x161] sm:$0x1] %vm314_vm2, %v347_v5  ;;  %v10568_v6 = vld [vmem:[#allocation2 + $0x141] sm:$0xff]  ;;  %v10809_v5 = vld [vmem:[#allocation2 + $0xaa] sm:$0xff] }
  0x7b   : > { %9219 = vmatmul.mubr.msk.f32.gmra.mxu0 %vm258_vm1, %v10265_v7  ;;  %9269 = vmatmul.mubr.msk.f32.gmra.mxu1 %vm258_vm1, %v10464_v46  ;;  %v10570_v7 = vld [vmem:[#allocation2 + $0x151] sm:$0xff] }
  0x7c   : > { %9221 = vmatprep.mubr.msk.f32.mxu0 %vm258_vm1, %v10269_v8  ;;  %9271 = vmatprep.mubr.msk.f32.mxu1 %vm258_vm1, %v10466_v47  ;;  %v348_v8 = vld [vmem:[#allocation2 + $0x177] sm:$0x1] }
  0x7d   : > { %366 = vst.msk [vmem:[#allocation2 + $0x179] sm:$0x1] %vm314_vm2, %v348_v8 }
  0x7f   : > { %9222 = vmatmul.mubr.msk.f32.gmra.mxu0 %vm258_vm1, %v10277_v9  ;;  %9272 = vmatmul.mubr.msk.f32.gmra.mxu1 %vm258_vm1, %v10477_v49  ;;  %v10581_v9 = vld [vmem:[#allocation2 + $0x159] sm:$0xff] }
  0x80   : > { %9224 = vmatprep.mubr.msk.f32.mxu0 %vm258_vm1, %v10281_v10  ;;  %9274 = vmatprep.mubr.msk.f32.mxu1 %vm258_vm1, %v10479_v50  ;;  %v403_v10 = vld [vmem:[#allocation2 + $0x198] sm:$0xff] }
  0x83   : > { %9225 = vmatmul.mubr.msk.f32.gmra.mxu0 %vm258_vm1, %v10289_v11  ;;  %9275 = vmatmul.mubr.msk.f32.gmra.mxu1 %vm258_vm1, %v10490_v52  ;;  %v10583_v11 = vld [vmem:[#allocation2 + $0x169] sm:$0xff] }
  0x84   : > { %9227 = vmatprep.mubr.msk.f32.mxu0 %vm258_vm1, %v10293_v12  ;;  %9277 = vmatprep.mubr.msk.f32.mxu1 %vm258_vm1, %v10492_v53  ;;  %v404_v12 = vld [vmem:[#allocation2 + $0x1a0] sm:$0xff] }
  0x87   : > { %9228 = vmatmul.mubr.msk.f32.gmra.mxu0 %vm258_vm1, %v10301_v13  ;;  %9278 = vmatmul.mubr.msk.f32.gmra.mxu1 %vm258_vm1, %v10503_v55  ;;  %v10592_v13 = vld [vmem:[#allocation2 + $0x171] sm:$0xff] }
  0x88   : > { %9230 = vmatprep.mubr.msk.f32.mxu0 %vm258_vm1, %v10305_v14  ;;  %9280 = vmatprep.mubr.msk.f32.mxu1 %vm258_vm1, %v10505_v56  ;;  %v349_v14 = vld [vmem:[#allocation2 + $0x18f] sm:$0x1] }
  0x89   : > { %367 = vst.msk [vmem:[#allocation2 + $0x191] sm:$0x1] %vm314_vm2, %v349_v14 }
  0x8b   : > { %9231 = vmatmul.mubr.msk.f32.gmra.mxu0 %vm258_vm1, %v10313_v15  ;;  %9281 = vmatmul.mubr.msk.f32.gmra.mxu1 %vm258_vm1, %v10516_v58  ;;  %v10609_v15 = vld [vmem:[%s13482_s1 + $0x20] sm:$0xf] }
  0x8c   : > { %9233 = vmatprep.mubr.msk.f32.mxu0 %vm258_vm1, %v10317_v16  ;;  %9283 = vmatprep.mubr.msk.f32.mxu1 %vm258_vm1, %v10518_v59  ;;  %v350_v16 = vld [vmem:[#allocation2 + $0x1a7] sm:$0x1] }
  0x8d   : > { %368 = vst.msk [vmem:[#allocation2 + $0x1a9] sm:$0x1] %vm314_vm2, %v350_v16 }
  0x8f   : > { %9234 = vmatmul.mubr.msk.f32.gmra.mxu0 %vm258_vm1, %v10325_v17  ;;  %9284 = vmatmul.mubr.msk.f32.gmra.mxu1 %vm258_vm1, %v10529_v61  ;;  %v1459_v17 = vld [vmem:[#allocation2 + $0x181] sm:$0xff] }
  0x90   : > { %9236 = vmatprep.mubr.msk.f32.mxu0 %vm258_vm1, %v10329_v18  ;;  %9286 = vmatprep.mubr.msk.f32.mxu1 %vm258_vm1, %v10531_v62  ;;  %v1461_v18 = vld [vmem:[#allocation2 + $0x199] sm:$0xff] }
  0x93   : > { %9237 = vmatmul.mubr.msk.f32.gmra.mxu0 %vm258_vm1, %v10337_v19  ;;  %9287 = vmatmul.mubr.msk.f32.gmra.mxu1 %vm258_vm1, %v10542_v0  ;;  %v1460_v19 = vld [vmem:[#allocation2 + $0x189] sm:$0xff] }
  0x94   : > { %9239 = vmatprep.mubr.msk.f32.mxu0 %vm258_vm1, %v10341_v20  ;;  %9289 = vmatprep.mubr.msk.f32.mxu1 %vm258_vm1, %v10544_v1  ;;  %v1462_v20 = vld [vmem:[#allocation2 + $0x1a1] sm:$0xff] }
  0x97   : > { %9240 = vmatmul.mubr.msk.f32.gmra.mxu0 %vm258_vm1, %v10349_v21  ;;  %9290 = vmatmul.mubr.msk.f32.gmra.mxu1 %vm258_vm1, %v10555_v3  ;;  %v2549_v21 = vld [vmem:[#allocation2 + $0x2] sm:$0xff] }
  0x98   : > { %9242 = vmatprep.mubr.msk.f32.mxu0 %vm258_vm1, %v10353_v22  ;;  %9292 = vmatprep.mubr.msk.f32.mxu1 %vm258_vm1, %v10557_v4  ;;  %v2551_v22 = vld [vmem:[#allocation2 + $0x1a] sm:$0xff] }
  0x9b   : > { %9243 = vmatmul.mubr.msk.f32.gmra.mxu0 %vm258_vm1, %v10363_v24  ;;  %9293 = vmatmul.mubr.msk.f32.gmra.mxu1 %vm258_vm1, %v10568_v6  ;;  %v2552_v24 = vld [vmem:[#allocation2 + $0x22] sm:$0xff] }
  0x9c   : > { %9245 = vmatprep.mubr.msk.f32.mxu0 %vm258_vm1, %v10361_v23  ;;  %9295 = vmatprep.mubr.msk.f32.mxu1 %vm258_vm1, %v10570_v7  ;;  %v2550_v23 = vld [vmem:[#allocation2 + $0xa] sm:$0xff] }
  0x9f   : > { %9246 = vmatmul.mubr.msk.f32.gmra.mxu0 %vm258_vm1, %v10374_v26  ;;  %9296 = vmatmul.mubr.msk.f32.gmra.mxu1 %vm258_vm1, %v10581_v9 }
  0xa0   : > { %9248 = vmatprep.mubr.msk.f32.mxu0 %vm258_vm1, %v403_v10  ;;  %9298 = vmatprep.mubr.msk.f32.mxu1 %vm258_vm1, %v10583_v11 }
  0xa3   : > { %9249 = vmatmul.mubr.msk.f32.gmra.mxu0 %vm258_vm1, %v404_v12  ;;  %9299 = vmatmul.mubr.msk.f32.gmra.mxu1 %vm258_vm1, %v10592_v13  ;;  %v10821_v12 = vld [vmem:[#allocation2 + $0xb2] sm:$0xff] }
  0xa4   : > { %9303 = vmatprep.mubr.msk.f32.mxu0 %vm258_vm1, %v10384_v30  ;;  %9353 = vmatprep.mubr.msk.f32.mxu1 %vm258_vm1, %v10408_v35  ;;  %v10745_v30 = vld [vmem:[#allocation2 + $0x3a] sm:$0xff] }
  0xa7   : > { %9304 = vmatmul.mubr.msk.f32.vlgmr.msra.gmra.mxu0 %vm258_vm1, %v10404_v34  ;;  %9354 = vmatmul.mubr.msk.f32.vlgmr.msra.gmra.mxu1 %vm258_vm1, %v10425_v37 }
  0xa8   : > { %9402 = vmatpush3.msk.msra.mxu0 %vm502_vm0, %v10392_v32  ;;  %9306 = vmatprep.mubr.msk.f32.mxu0 %vm258_vm1, %v10408_v35  ;;  %v10748_v32 = vld [vmem:[#allocation2 + $0x4a] sm:$0xff] }
  0xa9   : > { %9356 = vmatprep.mubr.msk.f32.mxu1 %vm258_vm1, %v10427_v38  ;;  %9452 = vmatpush3.msk.msra.mxu1 %vm502_vm0, %v10397_v33 }
  0xaa   : > { %9501 = vmatprep.subr.msk.mxu0 %vm502_vm0, %v10609_v15 }
  0xab   : > { %9307 = vmatmul.mubr.msk.f32.gmra.mxu0 %vm258_vm1, %v10425_v37  ;;  %9357 = vmatmul.mubr.msk.f32.gmra.mxu1 %vm258_vm1, %v10438_v40 }
  0xac   : > { %9309 = vmatprep.mubr.msk.f32.mxu0 %vm258_vm1, %v10427_v38  ;;  %9359 = vmatprep.mubr.msk.f32.mxu1 %vm258_vm1, %v10440_v41 }
  0xaf   : > { %9310 = vmatmul.mubr.msk.f32.gmra.mxu0 %vm258_vm1, %v10438_v40  ;;  %9360 = vmatmul.mubr.msk.f32.gmra.mxu1 %vm258_vm1, %v10451_v43 }
  0xb0   : > { %9312 = vmatprep.mubr.msk.f32.mxu0 %vm258_vm1, %v10440_v41  ;;  %9362 = vmatprep.mubr.msk.f32.mxu1 %vm258_vm1, %v10453_v44 }
  0xb3   : > { %9313 = vmatmul.mubr.msk.f32.gmra.mxu0 %vm258_vm1, %v10451_v43  ;;  %9363 = vmatmul.mubr.msk.f32.gmra.mxu1 %vm258_vm1, %v10464_v46 }
  0xb4   : > { %9315 = vmatprep.mubr.msk.f32.mxu0 %vm258_vm1, %v10453_v44  ;;  %9365 = vmatprep.mubr.msk.f32.mxu1 %vm258_vm1, %v10466_v47 }
  0xb7   : > { %9316 = vmatmul.mubr.msk.f32.gmra.mxu0 %vm258_vm1, %v10464_v46  ;;  %9366 = vmatmul.mubr.msk.f32.gmra.mxu1 %vm258_vm1, %v10477_v49  ;;  %v10773_v46 = vld [vmem:[#allocation2 + $0x6a] sm:$0xff] }
  0xb8   : > { %9318 = vmatprep.mubr.msk.f32.mxu0 %vm258_vm1, %v10466_v47  ;;  %9368 = vmatprep.mubr.msk.f32.mxu1 %vm258_vm1, %v10479_v50 }
  0xbb   : > { %9319 = vmatmul.mubr.msk.f32.gmra.mxu0 %vm258_vm1, %v10477_v49  ;;  %9369 = vmatmul.mubr.msk.f32.gmra.mxu1 %vm258_vm1, %v10490_v52  ;;  %v10777_v49 = vld [vmem:[#allocation2 + $0x7a] sm:$0xff] }
  0xbc   : > { %9321 = vmatprep.mubr.msk.f32.mxu0 %vm258_vm1, %v10479_v50  ;;  %9371 = vmatprep.mubr.msk.f32.mxu1 %vm258_vm1, %v10492_v53 }
  0xbf   : > { %9322 = vmatmul.mubr.msk.f32.gmra.mxu0 %vm258_vm1, %v10490_v52  ;;  %9372 = vmatmul.mubr.msk.f32.gmra.mxu1 %vm258_vm1, %v10503_v55 }
  0xc0   : > { %9324 = vmatprep.mubr.msk.f32.mxu0 %vm258_vm1, %v10492_v53  ;;  %9374 = vmatprep.mubr.msk.f32.mxu1 %vm258_vm1, %v10505_v56 }
  0xc3   : > { %9325 = vmatmul.mubr.msk.f32.gmra.mxu0 %vm258_vm1, %v10503_v55  ;;  %9375 = vmatmul.mubr.msk.f32.gmra.mxu1 %vm258_vm1, %v10516_v58 }
  0xc4   : > { %9327 = vmatprep.mubr.msk.f32.mxu0 %vm258_vm1, %v10505_v56  ;;  %9377 = vmatprep.mubr.msk.f32.mxu1 %vm258_vm1, %v10518_v59  ;;  %v10789_v56 = vld [vmem:[#allocation2 + $0x82] sm:$0xff] }
  0xc7   : > { %9328 = vmatmul.mubr.msk.f32.gmra.mxu0 %vm258_vm1, %v10516_v58  ;;  %9378 = vmatmul.mubr.msk.f32.gmra.mxu1 %vm258_vm1, %v10529_v61 }
  0xc8   : > { %9330 = vmatprep.mubr.msk.f32.mxu0 %vm258_vm1, %v10518_v59  ;;  %9380 = vmatprep.mubr.msk.f32.mxu1 %vm258_vm1, %v10531_v62  ;;  %v10793_v59 = vld [vmem:[#allocation2 + $0x92] sm:$0xff] }
  0xcb   : > { %9331 = vmatmul.mubr.msk.f32.gmra.mxu0 %vm258_vm1, %v10529_v61  ;;  %9381 = vmatmul.mubr.msk.f32.gmra.mxu1 %vm258_vm1, %v10542_v0 }
  0xcc   : > { %9333 = vmatprep.mubr.msk.f32.mxu0 %vm258_vm1, %v10531_v62  ;;  %9383 = vmatprep.mubr.msk.f32.mxu1 %vm258_vm1, %v10544_v1 }
  0xcf   : > { %9334 = vmatmul.mubr.msk.f32.gmra.mxu0 %vm258_vm1, %v10542_v0  ;;  %9384 = vmatmul.mubr.msk.f32.gmra.mxu1 %vm258_vm1, %v10555_v3 }
  0xd0   : > { %9336 = vmatprep.mubr.msk.f32.mxu0 %vm258_vm1, %v10544_v1  ;;  %9386 = vmatprep.mubr.msk.f32.mxu1 %vm258_vm1, %v10557_v4 }
  0xd3   : > { %9337 = vmatmul.mubr.msk.f32.gmra.mxu0 %vm258_vm1, %v10555_v3  ;;  %9387 = vmatmul.mubr.msk.f32.gmra.mxu1 %vm258_vm1, %v10568_v6 }
  0xd4   : > { %9339 = vmatprep.mubr.msk.f32.mxu0 %vm258_vm1, %v10557_v4  ;;  %9389 = vmatprep.mubr.msk.f32.mxu1 %vm258_vm1, %v10570_v7 }
  0xd7   : > { %9340 = vmatmul.mubr.msk.f32.gmra.mxu0 %vm258_vm1, %v10568_v6  ;;  %9390 = vmatmul.mubr.msk.f32.gmra.mxu1 %vm258_vm1, %v10581_v9 }
  0xd8   : > { %9342 = vmatprep.mubr.msk.f32.mxu0 %vm258_vm1, %v10570_v7  ;;  %9392 = vmatprep.mubr.msk.f32.mxu1 %vm258_vm1, %v10583_v11 }
  0xdb   : > { %9343 = vmatmul.mubr.msk.f32.gmra.mxu0 %vm258_vm1, %v10581_v9  ;;  %9393 = vmatmul.mubr.msk.f32.gmra.mxu1 %vm258_vm1, %v10592_v13 }
  0xdc   : > { %9345 = vmatprep.mubr.msk.f32.mxu0 %vm258_vm1, %v10583_v11  ;;  %9395 = vmatprep.mubr.msk.f32.mxu1 %vm258_vm1, %v1459_v17 }
  0xdf   : > { %9346 = vmatmul.mubr.msk.f32.gmra.mxu0 %vm258_vm1, %v10592_v13  ;;  %9396 = vmatmul.mubr.msk.f32.gmra.mxu1 %vm258_vm1, %v1460_v19 }
  0xe0   : > { %9348 = vmatprep.mubr.msk.f32.mxu0 %vm258_vm1, %v1459_v17  ;;  %9398 = vmatprep.mubr.msk.f32.mxu1 %vm258_vm1, %v1461_v18 }
  0xe3   : > { %9349 = vmatmul.mubr.msk.f32.gmra.mxu0 %vm258_vm1, %v1460_v19  ;;  %9399 = vmatmul.mubr.msk.f32.gmra.mxu1 %vm258_vm1, %v1462_v20 }
  0xe4   : > { %9403 = vmatprep.mubr.msk.f32.mxu0 %vm258_vm1, %v2549_v21  ;;  %9453 = vmatprep.mubr.msk.f32.mxu1 %vm258_vm1, %v2551_v22 }
  0xe7   : > { %v9105_v25 = vpop.f32.mrf.mxu0  ;;  %9404 = vmatmul.mubr.msk.f32.vlgmr.msra.gmra.mxu0 %vm258_vm1, %v2550_v23  ;;  %v9155_v26 = vpop.f32.mrf.mxu1  ;;  %9454 = vmatmul.mubr.msk.f32.vlgmr.msra.gmra.mxu1 %vm258_vm1, %v2552_v24 }
  0xe8   : > { %732 = vst.msk [vmem:[#allocation3 + $0x8] sm:$0xff] %vm258_vm1, %v9105_v25  ;;  %9502 = vmatpush3.msk.msra.mxu0 %vm502_vm0, %v10609_v15  ;;  %9406 = vmatprep.mubr.msk.f32.mxu0 %vm258_vm1, %v2551_v22  ;;  %v10825_v15 = vld [vmem:[#allocation2 + $0xc2] sm:$0xff]  ;;  %v10837_v22 = vld [vmem:[#allocation2 + $0xca] sm:$0xff]  ;;  %v10841_v25 = vld [vmem:[#allocation2 + $0xda] sm:$0xff] }
  0xe9   : > { %v572_v28 = vpop.f32.mrf.mxu0  ;;  %v840_v29 = vpop.f32.mrf.mxu1  ;;  %9456 = vmatprep.mubr.msk.f32.mxu1 %vm258_vm1, %v10740_v27 }
  0xea   : > { %731 = vst.msk [vmem:[#allocation3] sm:$0xff] %vm258_vm1, %v572_v28 }
  0xeb   : > { %v9108_v31 = vpop.f32.mrf.mxu0  ;;  %9407 = vmatmul.mubr.msk.f32.gmra.mxu0 %vm258_vm1, %v2552_v24  ;;  %v9158_v33 = vpop.f32.mrf.mxu1  ;;  %9457 = vmatmul.mubr.msk.f32.gmra.mxu1 %vm258_vm1, %v10745_v30 }
  0xec   : > { %734 = vst.msk [vmem:[#allocation3 + $0x18] sm:$0xff] %vm258_vm1, %v9108_v31  ;;  %9409 = vmatprep.mubr.msk.f32.mxu0 %vm258_vm1, %v10740_v27  ;;  %9459 = vmatprep.mubr.msk.f32.mxu1 %vm258_vm1, %v10748_v32 }
  0xed   : > { %v582_v34 = vpop.f32.mrf.mxu0  ;;  %v850_v35 = vpop.f32.mrf.mxu1 }
  0xee   : > { %733 = vst.msk [vmem:[#allocation3 + $0x10] sm:$0xff] %vm258_vm1, %v582_v34 }
  0xef   : > { %v9111_v37 = vpop.f32.mrf.mxu0  ;;  %v1000_v38 = vld [vmem:[#allocation3 + $0x8] sm:$0xff]  ;;  %9410 = vmatmul.mubr.msk.f32.gmra.mxu0 %vm258_vm1, %v10745_v30  ;;  %v9161_v40 = vpop.f32.mrf.mxu1  ;;  %9460 = vmatmul.mubr.msk.f32.gmra.mxu1 %vm258_vm1, %v10758_v36 }
  0xf0   : > { %736 = vst.msk [vmem:[#allocation3 + $0x28] sm:$0xff] %vm258_vm1, %v9111_v37  ;;  %v1032_v41 = vadd.f32 %v9155_v26, %v1000_v38  ;;  %9412 = vmatprep.mubr.msk.f32.mxu0 %vm258_vm1, %v10748_v32  ;;  %9462 = vmatprep.mubr.msk.f32.mxu1 %vm258_vm1, %v10762_v39 }
  0xf1   : > { %v592_v42 = vpop.f32.mrf.mxu0  ;;  %v999_v43 = vld [vmem:[#allocation3] sm:$0xff]  ;;  %v860_v44 = vpop.f32.mrf.mxu1 }
  0xf2   : > { %1064 = vst.msk [vmem:[#allocation3 + $0x8] sm:$0xff] %vm258_vm1, %v1032_v41  ;;  %735 = vst.msk [vmem:[#allocation3 + $0x20] sm:$0xff] %vm258_vm1, %v592_v42  ;;  %v1031_v45 = vadd.f32 %v999_v43, %v840_v29 }
  0xf3   : > { %v9114_v47 = vpop.f32.mrf.mxu0  ;;  %v1002_v48 = vld [vmem:[#allocation3 + $0x18] sm:$0xff]  ;;  %9413 = vmatmul.mubr.msk.f32.gmra.mxu0 %vm258_vm1, %v10758_v36  ;;  %v9164_v50 = vpop.f32.mrf.mxu1  ;;  %9463 = vmatmul.mubr.msk.f32.gmra.mxu1 %vm258_vm1, %v10773_v46 }
  0xf4   : > { %1063 = vst.msk [vmem:[#allocation3] sm:$0xff] %vm258_vm1, %v1031_v45  ;;  %738 = vst.msk [vmem:[#allocation3 + $0x38] sm:$0xff] %vm258_vm1, %v9114_v47  ;;  %v1034_v51 = vadd.f32 %v9158_v33, %v1002_v48  ;;  %9415 = vmatprep.mubr.msk.f32.mxu0 %vm258_vm1, %v10762_v39  ;;  %9465 = vmatprep.mubr.msk.f32.mxu1 %vm258_vm1, %v10777_v49  ;;  %v10869_v48 = vld [vmem:[#allocation2 + $0xfa] sm:$0xff] }
  0xf5   : > { %v602_v52 = vpop.f32.mrf.mxu0  ;;  %v1001_v53 = vld [vmem:[#allocation3 + $0x10] sm:$0xff]  ;;  %v870_v54 = vpop.f32.mrf.mxu1 }
  0xf6   : > { %1066 = vst.msk [vmem:[#allocation3 + $0x18] sm:$0xff] %vm258_vm1, %v1034_v51  ;;  %737 = vst.msk [vmem:[#allocation3 + $0x30] sm:$0xff] %vm258_vm1, %v602_v52  ;;  %v1033_v55 = vadd.f32 %v1001_v53, %v850_v35  ;;  %v10853_v35 = vld [vmem:[#allocation2 + $0xe2] sm:$0xff]  ;;  %v10873_v52 = vld [vmem:[#allocation2 + $0x10a] sm:$0xff] }
  0xf7   : > { %v9117_v57 = vpop.f32.mrf.mxu0  ;;  %v1004_v58 = vld [vmem:[#allocation3 + $0x28] sm:$0xff]  ;;  %9416 = vmatmul.mubr.msk.f32.gmra.mxu0 %vm258_vm1, %v10773_v46  ;;  %v9167_v60 = vpop.f32.mrf.mxu1  ;;  %9466 = vmatmul.mubr.msk.f32.gmra.mxu1 %vm258_vm1, %v10789_v56 }
  0xf8   : > { %1065 = vst.msk [vmem:[#allocation3 + $0x10] sm:$0xff] %vm258_vm1, %v1033_v55  ;;  %740 = vst.msk [vmem:[#allocation3 + $0x48] sm:$0xff] %vm258_vm1, %v9117_v57  ;;  %v1036_v61 = vadd.f32 %v9161_v40, %v1004_v58  ;;  %9418 = vmatprep.mubr.msk.f32.mxu0 %vm258_vm1, %v10777_v49  ;;  %9468 = vmatprep.mubr.msk.f32.mxu1 %vm258_vm1, %v10793_v59  ;;  %v10857_v40 = vld [vmem:[#allocation2 + $0xf2] sm:$0xff] }
  0xf9   : > { %v612_v62 = vpop.f32.mrf.mxu0  ;;  %v1003_v63 = vld [vmem:[#allocation3 + $0x20] sm:$0xff]  ;;  %v880_v0 = vpop.f32.mrf.mxu1 }
  0xfa   : > { %1068 = vst.msk [vmem:[#allocation3 + $0x28] sm:$0xff] %vm258_vm1, %v1036_v61  ;;  %739 = vst.msk [vmem:[#allocation3 + $0x40] sm:$0xff] %vm258_vm1, %v612_v62  ;;  %v1035_v1 = vadd.f32 %v1003_v63, %v860_v44  ;;  %v10885_v61 = vld [vmem:[#allocation2 + $0x112] sm:$0xff] }
  0xfb   : > { %v9120_v3 = vpop.f32.mrf.mxu0  ;;  %v1006_v4 = vld [vmem:[#allocation3 + $0x38] sm:$0xff]  ;;  %9419 = vmatmul.mubr.msk.f32.gmra.mxu0 %vm258_vm1, %v10789_v56  ;;  %v9170_v6 = vpop.f32.mrf.mxu1  ;;  %9469 = vmatmul.mubr.msk.f32.gmra.mxu1 %vm258_vm1, %v10805_v2 }
  0xfc   : > { %1067 = vst.msk [vmem:[#allocation3 + $0x20] sm:$0xff] %vm258_vm1, %v1035_v1  ;;  %742 = vst.msk [vmem:[#allocation3 + $0x58] sm:$0xff] %vm258_vm1, %v9120_v3  ;;  %v1038_v7 = vadd.f32 %v9164_v50, %v1006_v4  ;;  %9421 = vmatprep.mubr.msk.f32.mxu0 %vm258_vm1, %v10793_v59  ;;  %9471 = vmatprep.mubr.msk.f32.mxu1 %vm258_vm1, %v10809_v5 }
  0xfd   : > { %v622_v8 = vpop.f32.mrf.mxu0  ;;  %v1005_v9 = vld [vmem:[#allocation3 + $0x30] sm:$0xff]  ;;  %v890_v10 = vpop.f32.mrf.mxu1 }
  0xfe   : > { %1070 = vst.msk [vmem:[#allocation3 + $0x38] sm:$0xff] %vm258_vm1, %v1038_v7  ;;  %741 = vst.msk [vmem:[#allocation3 + $0x50] sm:$0xff] %vm258_vm1, %v622_v8  ;;  %v1037_v11 = vadd.f32 %v1005_v9, %v870_v54  ;;  %v10901_v9 = vld [vmem:[#allocation2 + $0x12a] sm:$0xff] }
  0xff   : > { %v9123_v13 = vpop.f32.mrf.mxu0  ;;  %v1008_v14 = vld [vmem:[#allocation3 + $0x48] sm:$0xff]  ;;  %9422 = vmatmul.mubr.msk.f32.gmra.mxu0 %vm258_vm1, %v10805_v2  ;;  %v9173_v16 = vpop.f32.mrf.mxu1  ;;  %9472 = vmatmul.mubr.msk.f32.gmra.mxu1 %vm258_vm1, %v10821_v12 }
 0x100   : > { %1069 = vst.msk [vmem:[#allocation3 + $0x30] sm:$0xff] %vm258_vm1, %v1037_v11  ;;  %744 = vst.msk [vmem:[#allocation3 + $0x68] sm:$0xff] %vm258_vm1, %v9123_v13  ;;  %v1040_v17 = vadd.f32 %v9167_v60, %v1008_v14  ;;  %9424 = vmatprep.mubr.msk.f32.mxu0 %vm258_vm1, %v10809_v5  ;;  %9474 = vmatprep.mubr.msk.f32.mxu1 %vm258_vm1, %v10825_v15  ;;  %v10905_v13 = vld [vmem:[#allocation2 + $0x13a] sm:$0xff] }
 0x101   : > { %v632_v18 = vpop.f32.mrf.mxu0  ;;  %v1007_v19 = vld [vmem:[#allocation3 + $0x40] sm:$0xff]  ;;  %v900_v20 = vpop.f32.mrf.mxu1 }
 0x102   : > { %1072 = vst.msk [vmem:[#allocation3 + $0x48] sm:$0xff] %vm258_vm1, %v1040_v17  ;;  %743 = vst.msk [vmem:[#allocation3 + $0x60] sm:$0xff] %vm258_vm1, %v632_v18  ;;  %v1039_v21 = vadd.f32 %v1007_v19, %v880_v0  ;;  %v10889_v0 = vld [vmem:[#allocation2 + $0x122] sm:$0xff] }
 0x103   : > { %v9126_v23 = vpop.f32.mrf.mxu0  ;;  %v1010_v24 = vld [vmem:[#allocation3 + $0x58] sm:$0xff]  ;;  %9425 = vmatmul.mubr.msk.f32.gmra.mxu0 %vm258_vm1, %v10821_v12  ;;  %v9176_v26 = vpop.f32.mrf.mxu1  ;;  %9475 = vmatmul.mubr.msk.f32.gmra.mxu1 %vm258_vm1, %v10837_v22 }
 0x104   : > { %1071 = vst.msk [vmem:[#allocation3 + $0x40] sm:$0xff] %vm258_vm1, %v1039_v21  ;;  %746 = vst.msk [vmem:[#allocation3 + $0x78] sm:$0xff] %vm258_vm1, %v9126_v23  ;;  %v1042_v28 = vadd.f32 %v9170_v6, %v1010_v24  ;;  %9427 = vmatprep.mubr.msk.f32.mxu0 %vm258_vm1, %v10825_v15  ;;  %9477 = vmatprep.mubr.msk.f32.mxu1 %vm258_vm1, %v10841_v25  ;;  %v10917_v21 = vld [vmem:[#allocation2 + $0x142] sm:$0xff] }
 0x105   : > { %v642_v29 = vpop.f32.mrf.mxu0  ;;  %v1009_v31 = vld [vmem:[#allocation3 + $0x50] sm:$0xff]  ;;  %v910_v33 = vpop.f32.mrf.mxu1 }
 0x106   : > { %1074 = vst.msk [vmem:[#allocation3 + $0x58] sm:$0xff] %vm258_vm1, %v1042_v28  ;;  %745 = vst.msk [vmem:[#allocation3 + $0x70] sm:$0xff] %vm258_vm1, %v642_v29  ;;  %v1041_v34 = vadd.f32 %v1009_v31, %v890_v10 }
 0x107   : > { %v9129_v37 = vpop.f32.mrf.mxu0  ;;  %v1012_v38 = vld [vmem:[#allocation3 + $0x68] sm:$0xff]  ;;  %9428 = vmatmul.mubr.msk.f32.gmra.mxu0 %vm258_vm1, %v10837_v22  ;;  %v9179_v41 = vpop.f32.mrf.mxu1  ;;  %9478 = vmatmul.mubr.msk.f32.gmra.mxu1 %vm258_vm1, %v10853_v35 }
 0x108   : > { %1073 = vst.msk [vmem:[#allocation3 + $0x50] sm:$0xff] %vm258_vm1, %v1041_v34  ;;  %748 = vst.msk [vmem:[#allocation3 + $0x88] sm:$0xff] %vm258_vm1, %v9129_v37  ;;  %v1044_v42 = vadd.f32 %v9173_v16, %v1012_v38  ;;  %9430 = vmatprep.mubr.msk.f32.mxu0 %vm258_vm1, %v10841_v25  ;;  %9480 = vmatprep.mubr.msk.f32.mxu1 %vm258_vm1, %v10857_v40  ;;  %v10933_v38 = vld [vmem:[#allocation2 + $0x15a] sm:$0xff] }
 0x109   : > { %v652_v43 = vpop.f32.mrf.mxu0  ;;  %v1011_v44 = vld [vmem:[#allocation3 + $0x60] sm:$0xff]  ;;  %v920_v45 = vpop.f32.mrf.mxu1 }
 0x10a   : > { %1076 = vst.msk [vmem:[#allocation3 + $0x68] sm:$0xff] %vm258_vm1, %v1044_v42  ;;  %747 = vst.msk [vmem:[#allocation3 + $0x80] sm:$0xff] %vm258_vm1, %v652_v43  ;;  %v1043_v47 = vadd.f32 %v1011_v44, %v900_v20  ;;  %v10937_v43 = vld [vmem:[#allocation2 + $0x16a] sm:$0xff] }
 0x10b   : > { %v9132_v50 = vpop.f32.mrf.mxu0  ;;  %v1014_v51 = vld [vmem:[#allocation3 + $0x78] sm:$0xff]  ;;  %9431 = vmatmul.mubr.msk.f32.gmra.mxu0 %vm258_vm1, %v10853_v35  ;;  %v9182_v53 = vpop.f32.mrf.mxu1  ;;  %9481 = vmatmul.mubr.msk.f32.gmra.mxu1 %vm258_vm1, %v10869_v48 }
 0x10c   : > { %1075 = vst.msk [vmem:[#allocation3 + $0x60] sm:$0xff] %vm258_vm1, %v1043_v47  ;;  %750 = vst.msk [vmem:[#allocation3 + $0x98] sm:$0xff] %vm258_vm1, %v9132_v50  ;;  %v1046_v54 = vadd.f32 %v9176_v26, %v1014_v51  ;;  %9433 = vmatprep.mubr.msk.f32.mxu0 %vm258_vm1, %v10857_v40  ;;  %9483 = vmatprep.mubr.msk.f32.mxu1 %vm258_vm1, %v10873_v52  ;;  %v10921_v26 = vld [vmem:[#allocation2 + $0x152] sm:$0xff] }
 0x10d   : > { %v662_v55 = vpop.f32.mrf.mxu0  ;;  %v1013_v57 = vld [vmem:[#allocation3 + $0x70] sm:$0xff]  ;;  %v930_v58 = vpop.f32.mrf.mxu1 }
 0x10e   : > { %1078 = vst.msk [vmem:[#allocation3 + $0x78] sm:$0xff] %vm258_vm1, %v1046_v54  ;;  %749 = vst.msk [vmem:[#allocation3 + $0x90] sm:$0xff] %vm258_vm1, %v662_v55  ;;  %v1045_v60 = vadd.f32 %v1013_v57, %v910_v33  ;;  %v10951_v55 = vld [vmem:[#allocation2 + $0x172] sm:$0xff] }
 0x10f   : > { %v9135_v62 = vpop.f32.mrf.mxu0  ;;  %v1016_v63 = vld [vmem:[#allocation3 + $0x88] sm:$0xff]  ;;  %9434 = vmatmul.mubr.msk.f32.gmra.mxu0 %vm258_vm1, %v10869_v48  ;;  %v9185_v1 = vpop.f32.mrf.mxu1  ;;  %9484 = vmatmul.mubr.msk.f32.gmra.mxu1 %vm258_vm1, %v10885_v61 }
 0x110   : > { %1077 = vst.msk [vmem:[#allocation3 + $0x70] sm:$0xff] %vm258_vm1, %v1045_v60  ;;  %752 = vst.msk [vmem:[#allocation3 + $0xa8] sm:$0xff] %vm258_vm1, %v9135_v62  ;;  %v1048_v3 = vadd.f32 %v9179_v41, %v1016_v63  ;;  %9436 = vmatprep.mubr.msk.f32.mxu0 %vm258_vm1, %v10873_v52  ;;  %9486 = vmatprep.mubr.msk.f32.mxu1 %vm258_vm1, %v10889_v0  ;;  %v10963_v63 = vld [vmem:[#allocation2 + $0x18a] sm:$0xff] }
 0x111   : > { %v672_v4 = vpop.f32.mrf.mxu0  ;;  %v1015_v6 = vld [vmem:[#allocation3 + $0x80] sm:$0xff]  ;;  %v940_v7 = vpop.f32.mrf.mxu1 }
 0x112   : > { %1080 = vst.msk [vmem:[#allocation3 + $0x88] sm:$0xff] %vm258_vm1, %v1048_v3  ;;  %751 = vst.msk [vmem:[#allocation3 + $0xa0] sm:$0xff] %vm258_vm1, %v672_v4  ;;  %v1047_v8 = vadd.f32 %v1015_v6, %v920_v45 }
 0x113   : > { %v9138_v10 = vpop.f32.mrf.mxu0  ;;  %v1018_v11 = vld [vmem:[#allocation3 + $0x98] sm:$0xff]  ;;  %9437 = vmatmul.mubr.msk.f32.gmra.mxu0 %vm258_vm1, %v10885_v61  ;;  %v9188_v14 = vpop.f32.mrf.mxu1  ;;  %9487 = vmatmul.mubr.msk.f32.gmra.mxu1 %vm258_vm1, %v10901_v9 }
 0x114   : > { %1079 = vst.msk [vmem:[#allocation3 + $0x80] sm:$0xff] %vm258_vm1, %v1047_v8  ;;  %754 = vst.msk [vmem:[#allocation3 + $0xb8] sm:$0xff] %vm258_vm1, %v9138_v10  ;;  %v1050_v16 = vadd.f32 %v9182_v53, %v1018_v11  ;;  %9439 = vmatprep.mubr.msk.f32.mxu0 %vm258_vm1, %v10889_v0  ;;  %9489 = vmatprep.mubr.msk.f32.mxu1 %vm258_vm1, %v10905_v13  ;;  %v10947_v53 = vld [vmem:[#allocation2 + $0x182] sm:$0xff] }
 0x115   : > { %v682_v17 = vpop.f32.mrf.mxu0  ;;  %v1017_v18 = vld [vmem:[#allocation3 + $0x90] sm:$0xff]  ;;  %v950_v19 = vpop.f32.mrf.mxu1 }
 0x116   : > { %1082 = vst.msk [vmem:[#allocation3 + $0x98] sm:$0xff] %vm258_vm1, %v1050_v16  ;;  %753 = vst.msk [vmem:[#allocation3 + $0xb0] sm:$0xff] %vm258_vm1, %v682_v17  ;;  %v1049_v20 = vadd.f32 %v1017_v18, %v930_v58 }
 0x117   : > { %v9141_v23 = vpop.f32.mrf.mxu0  ;;  %v1020_v24 = vld [vmem:[#allocation3 + $0xa8] sm:$0xff]  ;;  %9440 = vmatmul.mubr.msk.f32.gmra.mxu0 %vm258_vm1, %v10901_v9  ;;  %v9191_v28 = vpop.f32.mrf.mxu1  ;;  %9490 = vmatmul.mubr.msk.f32.gmra.mxu1 %vm258_vm1, %v10917_v21 }
 0x118   : > { %1081 = vst.msk [vmem:[#allocation3 + $0x90] sm:$0xff] %vm258_vm1, %v1049_v20  ;;  %756 = vst.msk [vmem:[#allocation3 + $0xc8] sm:$0xff] %vm258_vm1, %v9141_v23  ;;  %v1052_v29 = vadd.f32 %v9185_v1, %v1020_v24  ;;  %9442 = vmatprep.mubr.msk.f32.mxu0 %vm258_vm1, %v10905_v13  ;;  %9492 = vmatprep.mubr.msk.f32.mxu1 %vm258_vm1, %v10921_v26  ;;  %v1332_v23 = vld [vmem:[#allocation3 + $0x8] sm:$0xff] }
 0x119   : > { %v692_v31 = vpop.f32.mrf.mxu0  ;;  %v1019_v33 = vld [vmem:[#allocation3 + $0xa0] sm:$0xff]  ;;  %v960_v34 = vpop.f32.mrf.mxu1 }
 0x11a   : > { %1084 = vst.msk [vmem:[#allocation3 + $0xa8] sm:$0xff] %vm258_vm1, %v1052_v29  ;;  %755 = vst.msk [vmem:[#allocation3 + $0xc0] sm:$0xff] %vm258_vm1, %v692_v31  ;;  %v1051_v37 = vadd.f32 %v1019_v33, %v940_v7  ;;  %v1331_v33 = vld [vmem:[#allocation3] sm:$0xff] }
 0x11b   : > { %v9144_v41 = vpop.f32.mrf.mxu0  ;;  %v1022_v42 = vld [vmem:[#allocation3 + $0xb8] sm:$0xff]  ;;  %9443 = vmatmul.mubr.msk.f32.gmra.mxu0 %vm258_vm1, %v10917_v21  ;;  %v9194_v44 = vpop.f32.mrf.mxu1  ;;  %9493 = vmatmul.mubr.msk.f32.gmra.mxu1 %vm258_vm1, %v10933_v38 }
 0x11c   : > { %1083 = vst.msk [vmem:[#allocation3 + $0xa0] sm:$0xff] %vm258_vm1, %v1051_v37  ;;  %758 = vst.msk [vmem:[#allocation3 + $0xd8] sm:$0xff] %vm258_vm1, %v9144_v41  ;;  %v1054_v45 = vadd.f32 %v9188_v14, %v1022_v42  ;;  %9445 = vmatprep.mubr.msk.f32.mxu0 %vm258_vm1, %v10921_v26  ;;  %9495 = vmatprep.mubr.msk.f32.mxu1 %vm258_vm1, %v10937_v43 }
 0x11d   : > { %v702_v47 = vpop.f32.mrf.mxu0  ;;  %v1021_v50 = vld [vmem:[#allocation3 + $0xb0] sm:$0xff]  ;;  %v970_v51 = vpop.f32.mrf.mxu1 }
 0x11e   : > { %1086 = vst.msk [vmem:[#allocation3 + $0xb8] sm:$0xff] %vm258_vm1, %v1054_v45  ;;  %757 = vst.msk [vmem:[#allocation3 + $0xd0] sm:$0xff] %vm258_vm1, %v702_v47  ;;  %v1053_v54 = vadd.f32 %v1021_v50, %v950_v19 }
 0x11f   : > { %v9147_v57 = vpop.f32.mrf.mxu0  ;;  %v1024_v58 = vld [vmem:[#allocation3 + $0xc8] sm:$0xff]  ;;  %9446 = vmatmul.mubr.msk.f32.gmra.mxu0 %vm258_vm1, %v10933_v38  ;;  %v9197_v60 = vpop.f32.mrf.mxu1  ;;  %9496 = vmatmul.mubr.msk.f32.gmra.mxu1 %vm258_vm1, %v10951_v55 }
 0x120   : > { %1085 = vst.msk [vmem:[#allocation3 + $0xb0] sm:$0xff] %vm258_vm1, %v1053_v54  ;;  %760 = vst.msk [vmem:[#allocation3 + $0xe8] sm:$0xff] %vm258_vm1, %v9147_v57  ;;  %v1056_v62 = vadd.f32 %v9191_v28, %v1024_v58  ;;  %9448 = vmatprep.mubr.msk.f32.mxu0 %vm258_vm1, %v10937_v43  ;;  %9498 = vmatprep.mubr.msk.f32.mxu1 %vm258_vm1, %v10947_v53  ;;  %v1333_v54 = vld [vmem:[#allocation3 + $0x10] sm:$0xff] }
 0x121   : > { %v712_v1 = vpop.f32.mrf.mxu0  ;;  %v1023_v3 = vld [vmem:[#allocation3 + $0xc0] sm:$0xff]  ;;  %v980_v4 = vpop.f32.mrf.mxu1 }
 0x122   : > { %1088 = vst.msk [vmem:[#allocation3 + $0xc8] sm:$0xff] %vm258_vm1, %v1056_v62  ;;  %759 = vst.msk [vmem:[#allocation3 + $0xe0] sm:$0xff] %vm258_vm1, %v712_v1  ;;  %v1055_v6 = vadd.f32 %v1023_v3, %v960_v34  ;;  %v1336_v62 = vld [vmem:[#allocation3 + $0x28] sm:$0xff] }
 0x123   : > { %v9150_v7 = vpop.f32.mrf.mxu0  ;;  %v1026_v8 = vld [vmem:[#allocation3 + $0xd8] sm:$0xff]  ;;  %9449 = vmatmul.mubr.msk.f32.gmra.mxu0 %vm258_vm1, %v10951_v55  ;;  %v9200_v10 = vpop.f32.mrf.mxu1  ;;  %9499 = vmatmul.mubr.msk.f32.gmra.mxu1 %vm258_vm1, %v10963_v63 }
 0x124   : > { %1087 = vst.msk [vmem:[#allocation3 + $0xc0] sm:$0xff] %vm258_vm1, %v1055_v6  ;;  %762 = vst.msk [vmem:[#allocation3 + $0xf8] sm:$0xff] %vm258_vm1, %v9150_v7  ;;  %v1058_v11 = vadd.f32 %v9194_v44, %v1026_v8  ;;  %9503 = vmatprep.mubr.msk.f32.mxu0 %vm258_vm1, %v10740_v27  ;;  %v1334_v44 = vld [vmem:[#allocation3 + $0x18] sm:$0xff] }
 0x125   : > { %v722_v14 = vpop.f32.mrf.mxu0  ;;  %v1025_v16 = vld [vmem:[#allocation3 + $0xd0] sm:$0xff]  ;;  %v990_v17 = vpop.f32.mrf.mxu1 }
 0x126   : > { %1090 = vst.msk [vmem:[#allocation3 + $0xd8] sm:$0xff] %vm258_vm1, %v1058_v11  ;;  %761 = vst.msk [vmem:[#allocation3 + $0xf0] sm:$0xff] %vm258_vm1, %v722_v14  ;;  %v1057_v18 = vadd.f32 %v1025_v16, %v970_v51  ;;  %v1338_v14 = vld [vmem:[#allocation3 + $0x38] sm:$0xff] }
 0x127   : > { %v1028_v19 = vld [vmem:[#allocation3 + $0xe8] sm:$0xff]  ;;  %v9205_v20 = vpop.f32.mrf.mxu0  ;;  %9504 = vmatmul.mubr.msk.f32.vlgmr.msra.gmra.mxu0 %vm258_vm1, %v10745_v30  ;;  %v9255_v24 = vpop.f32.mrf.mxu1 }
 0x128   : > { %1089 = vst.msk [vmem:[#allocation3 + $0xd0] sm:$0xff] %vm258_vm1, %v1057_v18  ;;  %v1060_v28 = vadd.f32 %v9197_v60, %v1028_v19  ;;  %v1364_v29 = vadd.f32 %v9205_v20, %v1332_v23  ;;  %9506 = vmatprep.mubr.msk.f32.mxu0 %vm258_vm1, %v10748_v32  ;;  %v1337_v19 = vld [vmem:[#allocation3 + $0x30] sm:$0xff] }
 0x129   : > { %v1027_v27 = vld [vmem:[#allocation3 + $0xe0] sm:$0xff]  ;;  %v1172_v31 = vpop.f32.mrf.mxu0  ;;  %v1630_v34 = vpop.f32.mrf.mxu1 }
 0x12a   : > { %1092 = vst.msk [vmem:[#allocation3 + $0xe8] sm:$0xff] %vm258_vm1, %v1060_v28  ;;  %1396 = vst.msk [vmem:[#allocation3 + $0x8] sm:$0xff] %vm258_vm1, %v1364_v29  ;;  %v1059_v37 = vadd.f32 %v1027_v27, %v980_v4  ;;  %v1363_v41 = vadd.f32 %v1331_v33, %v1172_v31  ;;  %v1335_v4 = vld [vmem:[#allocation3 + $0x20] sm:$0xff]  ;;  %v1340_v29 = vld [vmem:[#allocation3 + $0x48] sm:$0xff] }
 0x12b   : > { %v1030_v42 = vld [vmem:[#allocation3 + $0xf8] sm:$0xff]  ;;  %v9208_v30 = vpop.f32.mrf.mxu0  ;;  %9507 = vmatmul.mubr.msk.f32.gmra.mxu0 %vm258_vm1, %v10758_v36  ;;  %v9258_v45 = vpop.f32.mrf.mxu1 }
 0x12c   : > { %1091 = vst.msk [vmem:[#allocation3 + $0xe0] sm:$0xff] %vm258_vm1, %v1059_v37  ;;  %1395 = vst.msk [vmem:[#allocation3] sm:$0xff] %vm258_vm1, %v1363_v41  ;;  %v1062_v32 = vadd.f32 %v9200_v10, %v1030_v42  ;;  %v1366_v47 = vadd.f32 %v9208_v30, %v1334_v44  ;;  %9509 = vmatprep.mubr.msk.f32.mxu0 %vm258_vm1, %v10762_v39  ;;  %v1339_v37 = vld [vmem:[#allocation3 + $0x40] sm:$0xff] }
 0x12d   : > { %v1029_v50 = vld [vmem:[#allocation3 + $0xf0] sm:$0xff]  ;;  %v1182_v51 = vpop.f32.mrf.mxu0  ;;  %v1640_v57 = vpop.f32.mrf.mxu1 }
 0x12e   : > { %1094 = vst.msk [vmem:[#allocation3 + $0xf8] sm:$0xff] %vm258_vm1, %v1062_v32  ;;  %1398 = vst.msk [vmem:[#allocation3 + $0x18] sm:$0xff] %vm258_vm1, %v1366_v47  ;;  %v1061_v58 = vadd.f32 %v1029_v50, %v990_v17  ;;  %v1365_v36 = vadd.f32 %v1333_v54, %v1182_v51  ;;  %v1341_v54 = vld [vmem:[#allocation3 + $0x50] sm:$0xff] }
 0x12f   : > { %v9211_v60 = vpop.f32.mrf.mxu0  ;;  %9510 = vmatmul.mubr.msk.f32.gmra.mxu0 %vm258_vm1, %v10773_v46  ;;  %v9261_v1 = vpop.f32.mrf.mxu1 }
 0x130   : > { %1093 = vst.msk [vmem:[#allocation3 + $0xf0] sm:$0xff] %vm258_vm1, %v1061_v58  ;;  %1397 = vst.msk [vmem:[#allocation3 + $0x10] sm:$0xff] %vm258_vm1, %v1365_v36  ;;  %v1368_v39 = vadd.f32 %v9211_v60, %v1336_v62  ;;  %9512 = vmatprep.mubr.msk.f32.mxu0 %vm258_vm1, %v10777_v49  ;;  %v1344_v62 = vld [vmem:[#allocation3 + $0x68] sm:$0xff] }
 0x131   : > { %v1192_v3 = vpop.f32.mrf.mxu0  ;;  %v1790_v6 = vld [vmem:[#allocation3 + $0x8] sm:$0xff]  ;;  %v1650_v7 = vpop.f32.mrf.mxu1 }
 0x132   : > { %1400 = vst.msk [vmem:[#allocation3 + $0x28] sm:$0xff] %vm258_vm1, %v1368_v39  ;;  %v1367_v8 = vadd.f32 %v1335_v4, %v1192_v3  ;;  %v1822_v10 = vadd.f32 %v9255_v24, %v1790_v6  ;;  %v1343_v6 = vld [vmem:[#allocation3 + $0x60] sm:$0xff] }
 0x133   : > { %v9214_v11 = vpop.f32.mrf.mxu0  ;;  %v1789_v46 = vld [vmem:[#allocation3] sm:$0xff]  ;;  %9513 = vmatmul.mubr.msk.f32.gmra.mxu0 %vm258_vm1, %v10789_v56  ;;  %v9264_v16 = vpop.f32.mrf.mxu1 }
 0x134   : > { %1399 = vst.msk [vmem:[#allocation3 + $0x20] sm:$0xff] %vm258_vm1, %v1367_v8  ;;  %1854 = vst.msk [vmem:[#allocation3 + $0x8] sm:$0xff] %vm258_vm1, %v1822_v10  ;;  %v1370_v49 = vadd.f32 %v9214_v11, %v1338_v14  ;;  %v1821_v17 = vadd.f32 %v1789_v46, %v1630_v34  ;;  %9515 = vmatprep.mubr.msk.f32.mxu0 %vm258_vm1, %v10793_v59  ;;  %v1346_v14 = vld [vmem:[#allocation3 + $0x78] sm:$0xff] }
 0x135   : > { %v1202_v18 = vpop.f32.mrf.mxu0  ;;  %v1792_v20 = vld [vmem:[#allocation3 + $0x18] sm:$0xff]  ;;  %v1660_v23 = vpop.f32.mrf.mxu1 }
 0x136   : > { %1402 = vst.msk [vmem:[#allocation3 + $0x38] sm:$0xff] %vm258_vm1, %v1370_v49  ;;  %1853 = vst.msk [vmem:[#allocation3] sm:$0xff] %vm258_vm1, %v1821_v17  ;;  %v1369_v24 = vadd.f32 %v1337_v19, %v1202_v18  ;;  %v1824_v56 = vadd.f32 %v9258_v45, %v1792_v20  ;;  %v1342_v45 = vld [vmem:[#allocation3 + $0x58] sm:$0xff]  ;;  %v1345_v18 = vld [vmem:[#allocation3 + $0x70] sm:$0xff] }
 0x137   : > { %v9217_v28 = vpop.f32.mrf.mxu0  ;;  %v1791_v27 = vld [vmem:[#allocation3 + $0x10] sm:$0xff]  ;;  %9516 = vmatmul.mubr.msk.f32.gmra.mxu0 %vm258_vm1, %v10805_v2  ;;  %v9267_v31 = vpop.f32.mrf.mxu1 }
 0x138   : > { %1401 = vst.msk [vmem:[#allocation3 + $0x30] sm:$0xff] %vm258_vm1, %v1369_v24  ;;  %1856 = vst.msk [vmem:[#allocation3 + $0x18] sm:$0xff] %vm258_vm1, %v1824_v56  ;;  %v1372_v59 = vadd.f32 %v9217_v28, %v1340_v29  ;;  %v1823_v33 = vadd.f32 %v1791_v27, %v1640_v57  ;;  %9518 = vmatprep.mubr.msk.f32.mxu0 %vm258_vm1, %v10809_v5  ;;  %v1348_v56 = vld [vmem:[#allocation3 + $0x88] sm:$0xff] }
 0x139   : > { %v1212_v34 = vpop.f32.mrf.mxu0  ;;  %v1794_v41 = vld [vmem:[#allocation3 + $0x28] sm:$0xff]  ;;  %v1670_v42 = vpop.f32.mrf.mxu1 }
 0x13a   : > { %1404 = vst.msk [vmem:[#allocation3 + $0x48] sm:$0xff] %vm258_vm1, %v1372_v59  ;;  %1855 = vst.msk [vmem:[#allocation3 + $0x10] sm:$0xff] %vm258_vm1, %v1823_v33  ;;  %v1371_v30 = vadd.f32 %v1339_v37, %v1212_v34  ;;  %v1826_v2 = vadd.f32 %v9261_v1, %v1794_v41  ;;  %v1347_v59 = vld [vmem:[#allocation3 + $0x80] sm:$0xff] }
 0x13b   : > { %v9220_v44 = vpop.f32.mrf.mxu0  ;;  %v1793_v32 = vld [vmem:[#allocation3 + $0x20] sm:$0xff]  ;;  %9519 = vmatmul.mubr.msk.f32.gmra.mxu0 %vm258_vm1, %v10821_v12  ;;  %v9270_v47 = vpop.f32.mrf.mxu1 }
 0x13c   : > { %1403 = vst.msk [vmem:[#allocation3 + $0x40] sm:$0xff] %vm258_vm1, %v1371_v30  ;;  %1858 = vst.msk [vmem:[#allocation3 + $0x28] sm:$0xff] %vm258_vm1, %v1826_v2  ;;  %v1374_v5 = vadd.f32 %v9220_v44, %v1342_v45  ;;  %v1825_v50 = vadd.f32 %v1793_v32, %v1650_v7  ;;  %9521 = vmatprep.mubr.msk.f32.mxu0 %vm258_vm1, %v10825_v15  ;;  %v1349_v32 = vld [vmem:[#allocation3 + $0x90] sm:$0xff] }
 0x13d   : > { %v1222_v51 = vpop.f32.mrf.mxu0  ;;  %v1796_v57 = vld [vmem:[#allocation3 + $0x38] sm:$0xff]  ;;  %v1680_v58 = vpop.f32.mrf.mxu1 }
 0x13e   : > { %1406 = vst.msk [vmem:[#allocation3 + $0x58] sm:$0xff] %vm258_vm1, %v1374_v5  ;;  %1857 = vst.msk [vmem:[#allocation3 + $0x20] sm:$0xff] %vm258_vm1, %v1825_v50  ;;  %v1373_v36 = vadd.f32 %v1341_v54, %v1222_v51  ;;  %v1828_v12 = vadd.f32 %v9264_v16, %v1796_v57  ;;  %v1352_v54 = vld [vmem:[#allocation3 + $0xa8] sm:$0xff] }
 0x13f   : > { %v9223_v60 = vpop.f32.mrf.mxu0  ;;  %v1795_v1 = vld [vmem:[#allocation3 + $0x30] sm:$0xff]  ;;  %9522 = vmatmul.mubr.msk.f32.gmra.mxu0 %vm258_vm1, %v10837_v22  ;;  %v9273_v39 = vpop.f32.mrf.mxu1 }
 0x140   : > { %1405 = vst.msk [vmem:[#allocation3 + $0x50] sm:$0xff] %vm258_vm1, %v1373_v36  ;;  %1860 = vst.msk [vmem:[#allocation3 + $0x38] sm:$0xff] %vm258_vm1, %v1828_v12  ;;  %v1376_v15 = vadd.f32 %v9223_v60, %v1344_v62  ;;  %v1827_v3 = vadd.f32 %v1795_v1, %v1660_v23  ;;  %9524 = vmatprep.mubr.msk.f32.mxu0 %vm258_vm1, %v10841_v25  ;;  %v1351_v60 = vld [vmem:[#allocation3 + $0xa0] sm:$0xff] }
 0x141   : > { %v1232_v4 = vpop.f32.mrf.mxu0  ;;  %v1798_v7 = vld [vmem:[#allocation3 + $0x48] sm:$0xff]  ;;  %v1690_v8 = vpop.f32.mrf.mxu1 }
 0x142   : > { %1408 = vst.msk [vmem:[#allocation3 + $0x68] sm:$0xff] %vm258_vm1, %v1376_v15  ;;  %1859 = vst.msk [vmem:[#allocation3 + $0x30] sm:$0xff] %vm258_vm1, %v1827_v3  ;;  %v1375_v10 = vadd.f32 %v1343_v6, %v1232_v4  ;;  %v1830_v22 = vadd.f32 %v9267_v31, %v1798_v7  ;;  %v1354_v3 = vld [vmem:[#allocation3 + $0xb8] sm:$0xff] }
 0x143   : > { %v9226_v11 = vpop.f32.mrf.mxu0  ;;  %v1797_v46 = vld [vmem:[#allocation3 + $0x40] sm:$0xff]  ;;  %9525 = vmatmul.mubr.msk.f32.gmra.mxu0 %vm258_vm1, %v10853_v35  ;;  %v9276_v16 = vpop.f32.mrf.mxu1 }
 0x144   : > { %1407 = vst.msk [vmem:[#allocation3 + $0x60] sm:$0xff] %vm258_vm1, %v1375_v10  ;;  %1862 = vst.msk [vmem:[#allocation3 + $0x48] sm:$0xff] %vm258_vm1, %v1830_v22  ;;  %v1378_v25 = vadd.f32 %v9226_v11, %v1346_v14  ;;  %v1829_v49 = vadd.f32 %v1797_v46, %v1670_v42  ;;  %9527 = vmatprep.mubr.msk.f32.mxu0 %vm258_vm1, %v10857_v40  ;;  %v1350_v42 = vld [vmem:[#allocation3 + $0x98] sm:$0xff]  ;;  %v1353_v10 = vld [vmem:[#allocation3 + $0xb0] sm:$0xff] }
 0x145   : > { %v1242_v17 = vpop.f32.mrf.mxu0  ;;  %v1800_v19 = vld [vmem:[#allocation3 + $0x58] sm:$0xff]  ;;  %v1700_v20 = vpop.f32.mrf.mxu1 }
 0x146   : > { %1410 = vst.msk [vmem:[#allocation3 + $0x78] sm:$0xff] %vm258_vm1, %v1378_v25  ;;  %1861 = vst.msk [vmem:[#allocation3 + $0x40] sm:$0xff] %vm258_vm1, %v1829_v49  ;;  %v1377_v23 = vadd.f32 %v1345_v18, %v1242_v17  ;;  %v1832_v35 = vadd.f32 %v9270_v47, %v1800_v19  ;;  %v1355_v19 = vld [vmem:[#allocation3 + $0xc0] sm:$0xff] }
 0x147   : > { %v9229_v24 = vpop.f32.mrf.mxu0  ;;  %v1799_v28 = vld [vmem:[#allocation3 + $0x50] sm:$0xff]  ;;  %9528 = vmatmul.mubr.msk.f32.gmra.mxu0 %vm258_vm1, %v10869_v48  ;;  %v9279_v29 = vpop.f32.mrf.mxu1 }
 0x148   : > { %1409 = vst.msk [vmem:[#allocation3 + $0x70] sm:$0xff] %vm258_vm1, %v1377_v23  ;;  %1864 = vst.msk [vmem:[#allocation3 + $0x58] sm:$0xff] %vm258_vm1, %v1832_v35  ;;  %v1380_v40 = vadd.f32 %v9229_v24, %v1348_v56  ;;  %v1831_v27 = vadd.f32 %v1799_v28, %v1680_v58  ;;  %9530 = vmatprep.mubr.msk.f32.mxu0 %vm258_vm1, %v10873_v52  ;;  %v1358_v56 = vld [vmem:[#allocation3 + $0xd8] sm:$0xff] }
 0x149   : > { %v1252_v31 = vpop.f32.mrf.mxu0  ;;  %v1802_v33 = vld [vmem:[#allocation3 + $0x68] sm:$0xff]  ;;  %v1710_v34 = vpop.f32.mrf.mxu1 }
 0x14a   : > { %1412 = vst.msk [vmem:[#allocation3 + $0x88] sm:$0xff] %vm258_vm1, %v1380_v40  ;;  %1863 = vst.msk [vmem:[#allocation3 + $0x50] sm:$0xff] %vm258_vm1, %v1831_v27  ;;  %v1379_v37 = vadd.f32 %v1347_v59, %v1252_v31  ;;  %v1834_v48 = vadd.f32 %v9273_v39, %v1802_v33  ;;  %v1357_v31 = vld [vmem:[#allocation3 + $0xd0] sm:$0xff] }
 0x14b   : > { %v9232_v41 = vpop.f32.mrf.mxu0  ;;  %v1801_v30 = vld [vmem:[#allocation3 + $0x60] sm:$0xff]  ;;  %9531 = vmatmul.mubr.msk.f32.gmra.mxu0 %vm258_vm1, %v10885_v61  ;;  %v9282_v2 = vpop.f32.mrf.mxu1  ;;  %v2583_v33 = vld [vmem:[#allocation2 + $0x19a] sm:$0xff] }
 0x14c   : > { %1411 = vst.msk [vmem:[#allocation3 + $0x80] sm:$0xff] %vm258_vm1, %v1379_v37  ;;  %1866 = vst.msk [vmem:[#allocation3 + $0x68] sm:$0xff] %vm258_vm1, %v1834_v48  ;;  %v1382_v52 = vadd.f32 %v9232_v41, %v1350_v42  ;;  %v1833_v44 = vadd.f32 %v1801_v30, %v1690_v8  ;;  %9533 = vmatprep.mubr.msk.f32.mxu0 %vm258_vm1, %v10889_v0  ;;  %v1360_v41 = vld [vmem:[#allocation3 + $0xe8] sm:$0xff] }
 0x14d   : > { %v1262_v45 = vpop.f32.mrf.mxu0  ;;  %v1804_v47 = vld [vmem:[#allocation3 + $0x78] sm:$0xff]  ;;  %v1720_v5 = vpop.f32.mrf.mxu1 }
 0x14e   : > { %1414 = vst.msk [vmem:[#allocation3 + $0x98] sm:$0xff] %vm258_vm1, %v1382_v52  ;;  %1865 = vst.msk [vmem:[#allocation3 + $0x60] sm:$0xff] %vm258_vm1, %v1833_v44  ;;  %v1381_v50 = vadd.f32 %v1349_v32, %v1262_v45  ;;  %v1836_v61 = vadd.f32 %v9276_v16, %v1804_v47  ;;  %v1356_v16 = vld [vmem:[#allocation3 + $0xc8] sm:$0xff]  ;;  %v2584_v52 = vld [vmem:[#allocation2 + $0x1a2] sm:$0xff] }
 0x14f   : > { %v9235_v51 = vpop.f32.mrf.mxu0  ;;  %v1803_v57 = vld [vmem:[#allocation3 + $0x70] sm:$0xff]  ;;  %9534 = vmatmul.mubr.msk.f32.gmra.mxu0 %vm258_vm1, %v10901_v9  ;;  %v9285_v58 = vpop.f32.mrf.mxu1  ;;  %v1359_v45 = vld [vmem:[#allocation3 + $0xe0] sm:$0xff] }
 0x150   : > { %1413 = vst.msk [vmem:[#allocation3 + $0x90] sm:$0xff] %vm258_vm1, %v1381_v50  ;;  %1868 = vst.msk [vmem:[#allocation3 + $0x78] sm:$0xff] %vm258_vm1, %v1836_v61  ;;  %v1384_v0 = vadd.f32 %v9235_v51, %v1352_v54  ;;  %v1835_v36 = vadd.f32 %v1803_v57, %v1700_v20  ;;  %9536 = vmatprep.mubr.msk.f32.mxu0 %vm258_vm1, %v10905_v13  ;;  %v1362_v61 = vld [vmem:[#allocation3 + $0xf8] sm:$0xff] }
 0x151   : > { %v1272_v12 = vpop.f32.mrf.mxu0  ;;  %v1806_v62 = vld [vmem:[#allocation3 + $0x88] sm:$0xff]  ;;  %v1730_v1 = vpop.f32.mrf.mxu1 }
 0x152   : > { %1416 = vst.msk [vmem:[#allocation3 + $0xa8] sm:$0xff] %vm258_vm1, %v1384_v0  ;;  %1867 = vst.msk [vmem:[#allocation3 + $0x70] sm:$0xff] %vm258_vm1, %v1835_v36  ;;  %v1383_v39 = vadd.f32 %v1351_v60, %v1272_v12  ;;  %v1838_v9 = vadd.f32 %v9279_v29, %v1806_v62  ;;  %v1361_v36 = vld [vmem:[#allocation3 + $0xf0] sm:$0xff] }
 0x153   : > { %v9238_v15 = vpop.f32.mrf.mxu0  ;;  %v1805_v4 = vld [vmem:[#allocation3 + $0x80] sm:$0xff]  ;;  %9537 = vmatmul.mubr.msk.f32.gmra.mxu0 %vm258_vm1, %v10917_v21  ;;  %v9288_v6 = vpop.f32.mrf.mxu1 }
 0x154   : > { %1415 = vst.msk [vmem:[#allocation3 + $0xa0] sm:$0xff] %vm258_vm1, %v1383_v39  ;;  %1870 = vst.msk [vmem:[#allocation3 + $0x88] sm:$0xff] %vm258_vm1, %v1838_v9  ;;  %v1386_v13 = vadd.f32 %v9238_v15, %v1354_v3  ;;  %v1837_v7 = vadd.f32 %v1805_v4, %v1710_v34  ;;  %9539 = vmatprep.mubr.msk.f32.mxu0 %vm258_vm1, %v10921_v26  ;;  %v2122_v15 = vld [vmem:[#allocation3 + $0x8] sm:$0xff] }
 0x155   : > { %v1282_v8 = vpop.f32.mrf.mxu0  ;;  %v1808_v22 = vld [vmem:[#allocation3 + $0x98] sm:$0xff]  ;;  %v1740_v11 = vpop.f32.mrf.mxu1 }
 0x156   : > { %1418 = vst.msk [vmem:[#allocation3 + $0xb8] sm:$0xff] %vm258_vm1, %v1386_v13  ;;  %1869 = vst.msk [vmem:[#allocation3 + $0x80] sm:$0xff] %vm258_vm1, %v1837_v7  ;;  %v1385_v14 = vadd.f32 %v1353_v10, %v1282_v8  ;;  %v1840_v21 = vadd.f32 %v9282_v2, %v1808_v22  ;;  %v2121_v8 = vld [vmem:[#allocation3] sm:$0xff] }
 0x157   : > { %v9241_v46 = vpop.f32.mrf.mxu0  ;;  %v1807_v25 = vld [vmem:[#allocation3 + $0x90] sm:$0xff]  ;;  %9540 = vmatmul.mubr.msk.f32.gmra.mxu0 %vm258_vm1, %v10933_v38  ;;  %v9291_v49 = vpop.f32.mrf.mxu1 }
 0x158   : > { %1417 = vst.msk [vmem:[#allocation3 + $0xb0] sm:$0xff] %vm258_vm1, %v1385_v14  ;;  %1872 = vst.msk [vmem:[#allocation3 + $0x98] sm:$0xff] %vm258_vm1, %v1840_v21  ;;  %v1388_v26 = vadd.f32 %v9241_v46, %v1356_v16  ;;  %v1839_v17 = vadd.f32 %v1807_v25, %v1720_v5  ;;  %9542 = vmatprep.mubr.msk.f32.mxu0 %vm258_vm1, %v10937_v43  ;;  %v2124_v46 = vld [vmem:[#allocation3 + $0x18] sm:$0xff] }
 0x159   : > { %v1292_v18 = vpop.f32.mrf.mxu0  ;;  %v1810_v20 = vld [vmem:[#allocation3 + $0xa8] sm:$0xff]  ;;  %v1750_v23 = vpop.f32.mrf.mxu1 }
 0x15a   : > { %1420 = vst.msk [vmem:[#allocation3 + $0xc8] sm:$0xff] %vm258_vm1, %v1388_v26  ;;  %1871 = vst.msk [vmem:[#allocation3 + $0x90] sm:$0xff] %vm258_vm1, %v1839_v17  ;;  %v1387_v35 = vadd.f32 %v1355_v19, %v1292_v18  ;;  %v1842_v38 = vadd.f32 %v9285_v58, %v1810_v20  ;;  %v2123_v18 = vld [vmem:[#allocation3 + $0x10] sm:$0xff] }
 0x15b   : > { %v9244_v24 = vpop.f32.mrf.mxu0  ;;  %v1809_v28 = vld [vmem:[#allocation3 + $0xa0] sm:$0xff]  ;;  %9543 = vmatmul.mubr.msk.f32.gmra.mxu0 %vm258_vm1, %v10951_v55  ;;  %v9294_v29 = vpop.f32.mrf.mxu1 }
 0x15c   : > { %1419 = vst.msk [vmem:[#allocation3 + $0xc0] sm:$0xff] %vm258_vm1, %v1387_v35  ;;  %1874 = vst.msk [vmem:[#allocation3 + $0xa8] sm:$0xff] %vm258_vm1, %v1842_v38  ;;  %v1390_v43 = vadd.f32 %v9244_v24, %v1358_v56  ;;  %v1841_v40 = vadd.f32 %v1809_v28, %v1730_v1  ;;  %9545 = vmatprep.mubr.msk.f32.mxu0 %vm258_vm1, %v10947_v53  ;;  %v2126_v24 = vld [vmem:[#allocation3 + $0x28] sm:$0xff] }
 0x15d   : > { %v1302_v27 = vpop.f32.mrf.mxu0  ;;  %v1812_v59 = vld [vmem:[#allocation3 + $0xb8] sm:$0xff]  ;;  %v1760_v34 = vpop.f32.mrf.mxu1 }
 0x15e   : > { %1422 = vst.msk [vmem:[#allocation3 + $0xd8] sm:$0xff] %vm258_vm1, %v1390_v43  ;;  %1873 = vst.msk [vmem:[#allocation3 + $0xa0] sm:$0xff] %vm258_vm1, %v1841_v40  ;;  %v1389_v55 = vadd.f32 %v1357_v31, %v1302_v27  ;;  %v1844_v37 = vadd.f32 %v9288_v6, %v1812_v59  ;;  %v2125_v40 = vld [vmem:[#allocation3 + $0x20] sm:$0xff] }
 0x15f   : > { %v9247_v48 = vpop.f32.mrf.mxu0  ;;  %v1811_v42 = vld [vmem:[#allocation3 + $0xb0] sm:$0xff]  ;;  %9546 = vmatmul.mubr.msk.f32.gmra.mxu0 %vm258_vm1, %v10963_v63  ;;  %v9297_v30 = vpop.f32.mrf.mxu1 }
 0x160   : > { %1421 = vst.msk [vmem:[#allocation3 + $0xd0] sm:$0xff] %vm258_vm1, %v1389_v55  ;;  %1876 = vst.msk [vmem:[#allocation3 + $0xb8] sm:$0xff] %vm258_vm1, %v1844_v37  ;;  %v1392_v53 = vadd.f32 %v9247_v48, %v1360_v41  ;;  %v1843_v2 = vadd.f32 %v1811_v42, %v1740_v11  ;;  %9548 = vmatprep.mubr.msk.f32.mxu0 %vm258_vm1, %v2583_v33  ;;  %v2128_v55 = vld [vmem:[#allocation3 + $0x38] sm:$0xff] }
 0x161   : > { %v1312_v44 = vpop.f32.mrf.mxu0  ;;  %v1814_v32 = vld [vmem:[#allocation3 + $0xc8] sm:$0xff]  ;;  %v1770_v47 = vpop.f32.mrf.mxu1 }
 0x162   : > { %1424 = vst.msk [vmem:[#allocation3 + $0xe8] sm:$0xff] %vm258_vm1, %v1392_v53  ;;  %1875 = vst.msk [vmem:[#allocation3 + $0xb0] sm:$0xff] %vm258_vm1, %v1843_v2  ;;  %v1391_v5 = vadd.f32 %v1359_v45, %v1312_v44  ;;  %v1846_v63 = vadd.f32 %v9291_v49, %v1814_v32  ;;  %v2127_v53 = vld [vmem:[#allocation3 + $0x30] sm:$0xff] }
 0x163   : > { %v9250_v50 = vpop.f32.mrf.mxu0  ;;  %v1813_v51 = vld [vmem:[#allocation3 + $0xc0] sm:$0xff]  ;;  %9549 = vmatmul.mubr.msk.f32.gmra.mxu0 %vm258_vm1, %v2584_v52  ;;  %v9300_v54 = vpop.f32.mrf.mxu1 }
 0x164   : > { %1423 = vst.msk [vmem:[#allocation3 + $0xe0] sm:$0xff] %vm258_vm1, %v1391_v5  ;;  %1878 = vst.msk [vmem:[#allocation3 + $0xc8] sm:$0xff] %vm258_vm1, %v1846_v63  ;;  %v1394_v57 = vadd.f32 %v9250_v50, %v1362_v61  ;;  %v1845_v58 = vadd.f32 %v1813_v51, %v1750_v23 }
 0x165   : > { %v1322_v0 = vpop.f32.mrf.mxu0  ;;  %v1816_v12 = vld [vmem:[#allocation3 + $0xd8] sm:$0xff]  ;;  %v1780_v60 = vpop.f32.mrf.mxu1 }
 0x166   : > { %1426 = vst.msk [vmem:[#allocation3 + $0xf8] sm:$0xff] %vm258_vm1, %v1394_v57  ;;  %1877 = vst.msk [vmem:[#allocation3 + $0xc0] sm:$0xff] %vm258_vm1, %v1845_v58  ;;  %v1393_v62 = vadd.f32 %v1361_v36, %v1322_v0  ;;  %v1848_v1 = vadd.f32 %v9294_v29, %v1816_v12 }
 0x167   : > { %v1815_v39 = vld [vmem:[#allocation3 + $0xd0] sm:$0xff]  ;;  %v9305_v9 = vpop.f32.mrf.mxu0  ;;  %v9355_v3 = vpop.f32.mrf.mxu1 }
 0x168   : > { %1425 = vst.msk [vmem:[#allocation3 + $0xf0] sm:$0xff] %vm258_vm1, %v1393_v62  ;;  %1880 = vst.msk [vmem:[#allocation3 + $0xd8] sm:$0xff] %vm258_vm1, %v1848_v1  ;;  %v1847_v4 = vadd.f32 %v1815_v39, %v1760_v34  ;;  %v2154_v6 = vadd.f32 %v9305_v9, %v2122_v15 }
 0x169   : > { %v1818_v13 = vld [vmem:[#allocation3 + $0xe8] sm:$0xff]  ;;  %v1962_v7 = vpop.f32.mrf.mxu0  ;;  %v2294_v10 = vpop.f32.mrf.mxu1 }
 0x16a   : > { %1879 = vst.msk [vmem:[#allocation3 + $0xd0] sm:$0xff] %vm258_vm1, %v1847_v4  ;;  %2186 = vst.msk [vmem:[#allocation3 + $0x8] sm:$0xff] %vm258_vm1, %v2154_v6  ;;  %v1850_v22 = vadd.f32 %v9297_v30, %v1818_v13  ;;  %v2153_v11 = vadd.f32 %v2121_v8, %v1962_v7 }
 0x16b   : > { %v1817_v14 = vld [vmem:[#allocation3 + $0xe0] sm:$0xff]  ;;  %v9308_v21 = vpop.f32.mrf.mxu0  ;;  %v9358_v16 = vpop.f32.mrf.mxu1 }
 0x16c   : > { %1882 = vst.msk [vmem:[#allocation3 + $0xe8] sm:$0xff] %vm258_vm1, %v1850_v22  ;;  %2185 = vst.msk [vmem:[#allocation3] sm:$0xff] %vm258_vm1, %v2153_v11  ;;  %v1849_v25 = vadd.f32 %v1817_v14, %v1770_v47  ;;  %v2156_v49 = vadd.f32 %v9308_v21, %v2124_v46  ;;  %v2130_v47 = vld [vmem:[#allocation3 + $0x48] sm:$0xff] }
 0x16d   : > { %v1820_v26 = vld [vmem:[#allocation3 + $0xf8] sm:$0xff]  ;;  %v1972_v17 = vpop.f32.mrf.mxu0  ;;  %v2304_v19 = vpop.f32.mrf.mxu1 }
 0x16e   : > { %1881 = vst.msk [vmem:[#allocation3 + $0xe0] sm:$0xff] %vm258_vm1, %v1849_v25  ;;  %2188 = vst.msk [vmem:[#allocation3 + $0x18] sm:$0xff] %vm258_vm1, %v2156_v49  ;;  %v1852_v20 = vadd.f32 %v9300_v54, %v1820_v26  ;;  %v2155_v23 = vadd.f32 %v2123_v18, %v1972_v17  ;;  %v2129_v54 = vld [vmem:[#allocation3 + $0x40] sm:$0xff] }
 0x16f   : > { %v1819_v35 = vld [vmem:[#allocation3 + $0xf0] sm:$0xff]  ;;  %v9311_v38 = vpop.f32.mrf.mxu0  ;;  %v9361_v56 = vpop.f32.mrf.mxu1 }
 0x170   : > { %1884 = vst.msk [vmem:[#allocation3 + $0xf8] sm:$0xff] %vm258_vm1, %v1852_v20  ;;  %2187 = vst.msk [vmem:[#allocation3 + $0x10] sm:$0xff] %vm258_vm1, %v2155_v23  ;;  %v1851_v28 = vadd.f32 %v1819_v35, %v1780_v60  ;;  %v2158_v29 = vadd.f32 %v9311_v38, %v2126_v24  ;;  %v2132_v60 = vld [vmem:[#allocation3 + $0x58] sm:$0xff] }
 0x171   : > { %v1982_v43 = vpop.f32.mrf.mxu0  ;;  %v2454_v27 = vld [vmem:[#allocation3 + $0x8] sm:$0xff]  ;;  %v2314_v31 = vpop.f32.mrf.mxu1 }
 0x172   : > { %1883 = vst.msk [vmem:[#allocation3 + $0xf0] sm:$0xff] %vm258_vm1, %v1851_v28  ;;  %2190 = vst.msk [vmem:[#allocation3 + $0x28] sm:$0xff] %vm258_vm1, %v2158_v29  ;;  %v2157_v59 = vadd.f32 %v2125_v40, %v1982_v43  ;;  %v2486_v33 = vadd.f32 %v9355_v3, %v2454_v27  ;;  %v2131_v3 = vld [vmem:[#allocation3 + $0x50] sm:$0xff] }
 0x173   : > { %v9314_v34 = vpop.f32.mrf.mxu0  ;;  %v2453_v37 = vld [vmem:[#allocation3] sm:$0xff]  ;;  %v9364_v48 = vpop.f32.mrf.mxu1 }
 0x174   : > { %2189 = vst.msk [vmem:[#allocation3 + $0x20] sm:$0xff] %vm258_vm1, %v2157_v59  ;;  %2518 = vst.msk [vmem:[#allocation3 + $0x8] sm:$0xff] %vm258_vm1, %v2486_v33  ;;  %v2160_v41 = vadd.f32 %v9314_v34, %v2128_v55  ;;  %v2485_v42 = vadd.f32 %v2453_v37, %v2294_v10  ;;  %v2134_v10 = vld [vmem:[#allocation3 + $0x68] sm:$0xff] }
 0x175   : > { %v1992_v30 = vpop.f32.mrf.mxu0  ;;  %v2456_v2 = vld [vmem:[#allocation3 + $0x18] sm:$0xff]  ;;  %v2324_v52 = vpop.f32.mrf.mxu1 }
 0x176   : > { %2192 = vst.msk [vmem:[#allocation3 + $0x38] sm:$0xff] %vm258_vm1, %v2160_v41  ;;  %2517 = vst.msk [vmem:[#allocation3] sm:$0xff] %vm258_vm1, %v2485_v42  ;;  %v2159_v44 = vadd.f32 %v2127_v53, %v1992_v30  ;;  %v2488_v45 = vadd.f32 %v9358_v16, %v2456_v2  ;;  %v2133_v16 = vld [vmem:[#allocation3 + $0x60] sm:$0xff] }
 0x177   : > { %v9317_v32 = vpop.f32.mrf.mxu0  ;;  %v2455_v5 = vld [vmem:[#allocation3 + $0x10] sm:$0xff]  ;;  %v9367_v63 = vpop.f32.mrf.mxu1 }
 0x178   : > { %2191 = vst.msk [vmem:[#allocation3 + $0x30] sm:$0xff] %vm258_vm1, %v2159_v44  ;;  %2520 = vst.msk [vmem:[#allocation3 + $0x18] sm:$0xff] %vm258_vm1, %v2488_v45  ;;  %v2162_v50 = vadd.f32 %v9317_v32, %v2130_v47  ;;  %v2487_v61 = vadd.f32 %v2455_v5, %v2304_v19  ;;  %v2136_v19 = vld [vmem:[#allocation3 + $0x78] sm:$0xff] }
 0x179   : > { %v2002_v51 = vpop.f32.mrf.mxu0  ;;  %v2458_v57 = vld [vmem:[#allocation3 + $0x28] sm:$0xff]  ;;  %v2334_v58 = vpop.f32.mrf.mxu1 }
 0x17a   : > { %2194 = vst.msk [vmem:[#allocation3 + $0x48] sm:$0xff] %vm258_vm1, %v2162_v50  ;;  %2519 = vst.msk [vmem:[#allocation3 + $0x10] sm:$0xff] %vm258_vm1, %v2487_v61  ;;  %v2161_v0 = vadd.f32 %v2129_v54, %v2002_v51  ;;  %v2490_v36 = vadd.f32 %v9361_v56, %v2458_v57  ;;  %v2135_v56 = vld [vmem:[#allocation3 + $0x70] sm:$0xff] }
 0x17b   : > { %v9320_v12 = vpop.f32.mrf.mxu0  ;;  %v2457_v62 = vld [vmem:[#allocation3 + $0x20] sm:$0xff]  ;;  %v9370_v1 = vpop.f32.mrf.mxu1 }
 0x17c   : > { %2193 = vst.msk [vmem:[#allocation3 + $0x40] sm:$0xff] %vm258_vm1, %v2161_v0  ;;  %2522 = vst.msk [vmem:[#allocation3 + $0x28] sm:$0xff] %vm258_vm1, %v2490_v36  ;;  %v2164_v39 = vadd.f32 %v9320_v12, %v2132_v60  ;;  %v2489_v9 = vadd.f32 %v2457_v62, %v2314_v31  ;;  %v2138_v31 = vld [vmem:[#allocation3 + $0x88] sm:$0xff] }
 0x17d   : > { %v2012_v15 = vpop.f32.mrf.mxu0  ;;  %v2460_v4 = vld [vmem:[#allocation3 + $0x38] sm:$0xff]  ;;  %v2344_v6 = vpop.f32.mrf.mxu1 }
 0x17e   : > { %2196 = vst.msk [vmem:[#allocation3 + $0x58] sm:$0xff] %vm258_vm1, %v2164_v39  ;;  %2521 = vst.msk [vmem:[#allocation3 + $0x20] sm:$0xff] %vm258_vm1, %v2489_v9  ;;  %v2163_v13 = vadd.f32 %v2131_v3, %v2012_v15  ;;  %v2492_v7 = vadd.f32 %v9364_v48, %v2460_v4  ;;  %v2137_v48 = vld [vmem:[#allocation3 + $0x80] sm:$0xff] }
 0x17f   : > { %v9323_v8 = vpop.f32.mrf.mxu0  ;;  %v2459_v22 = vld [vmem:[#allocation3 + $0x30] sm:$0xff]  ;;  %v9373_v11 = vpop.f32.mrf.mxu1 }
 0x180   : > { %2195 = vst.msk [vmem:[#allocation3 + $0x50] sm:$0xff] %vm258_vm1, %v2163_v13  ;;  %2524 = vst.msk [vmem:[#allocation3 + $0x38] sm:$0xff] %vm258_vm1, %v2492_v7  ;;  %v2166_v14 = vadd.f32 %v9323_v8, %v2134_v10  ;;  %v2491_v21 = vadd.f32 %v2459_v22, %v2324_v52  ;;  %v2140_v52 = vld [vmem:[#allocation3 + $0x98] sm:$0xff] }
 0x181   : > { %v2022_v46 = vpop.f32.mrf.mxu0  ;;  %v2462_v25 = vld [vmem:[#allocation3 + $0x48] sm:$0xff]  ;;  %v2354_v49 = vpop.f32.mrf.mxu1 }
 0x182   : > { %2198 = vst.msk [vmem:[#allocation3 + $0x68] sm:$0xff] %vm258_vm1, %v2166_v14  ;;  %2523 = vst.msk [vmem:[#allocation3 + $0x30] sm:$0xff] %vm258_vm1, %v2491_v21  ;;  %v2165_v26 = vadd.f32 %v2133_v16, %v2022_v46  ;;  %v2494_v17 = vadd.f32 %v9367_v63, %v2462_v25  ;;  %v2139_v63 = vld [vmem:[#allocation3 + $0x90] sm:$0xff] }
 0x183   : > { %v9326_v18 = vpop.f32.mrf.mxu0  ;;  %v2461_v20 = vld [vmem:[#allocation3 + $0x40] sm:$0xff]  ;;  %v9376_v23 = vpop.f32.mrf.mxu1 }
 0x184   : > { %2197 = vst.msk [vmem:[#allocation3 + $0x60] sm:$0xff] %vm258_vm1, %v2165_v26  ;;  %2526 = vst.msk [vmem:[#allocation3 + $0x48] sm:$0xff] %vm258_vm1, %v2494_v17  ;;  %v2168_v35 = vadd.f32 %v9326_v18, %v2136_v19  ;;  %v2493_v38 = vadd.f32 %v2461_v20, %v2334_v58  ;;  %v2142_v58 = vld [vmem:[#allocation3 + $0xa8] sm:$0xff] }
 0x185   : > { %v2032_v24 = vpop.f32.mrf.mxu0  ;;  %v2464_v28 = vld [vmem:[#allocation3 + $0x58] sm:$0xff]  ;;  %v2364_v29 = vpop.f32.mrf.mxu1 }
 0x186   : > { %2200 = vst.msk [vmem:[#allocation3 + $0x78] sm:$0xff] %vm258_vm1, %v2168_v35  ;;  %2525 = vst.msk [vmem:[#allocation3 + $0x40] sm:$0xff] %vm258_vm1, %v2493_v38  ;;  %v2167_v43 = vadd.f32 %v2135_v56, %v2032_v24  ;;  %v2496_v40 = vadd.f32 %v9370_v1, %v2464_v28  ;;  %v2141_v1 = vld [vmem:[#allocation3 + $0xa0] sm:$0xff] }
 0x187   : > { %v9329_v27 = vpop.f32.mrf.mxu0  ;;  %v2463_v59 = vld [vmem:[#allocation3 + $0x50] sm:$0xff]  ;;  %v9379_v33 = vpop.f32.mrf.mxu1 }
 0x188   : > { %2199 = vst.msk [vmem:[#allocation3 + $0x70] sm:$0xff] %vm258_vm1, %v2167_v43  ;;  %2528 = vst.msk [vmem:[#allocation3 + $0x58] sm:$0xff] %vm258_vm1, %v2496_v40  ;;  %v2170_v34 = vadd.f32 %v9329_v27, %v2138_v31  ;;  %v2495_v55 = vadd.f32 %v2463_v59, %v2344_v6  ;;  %v2144_v6 = vld [vmem:[#allocation3 + $0xb8] sm:$0xff] }
 0x189   : > { %v2042_v37 = vpop.f32.mrf.mxu0  ;;  %v2466_v41 = vld [vmem:[#allocation3 + $0x68] sm:$0xff]  ;;  %v2374_v42 = vpop.f32.mrf.mxu1 }
 0x18a   : > { %2202 = vst.msk [vmem:[#allocation3 + $0x88] sm:$0xff] %vm258_vm1, %v2170_v34  ;;  %2527 = vst.msk [vmem:[#allocation3 + $0x50] sm:$0xff] %vm258_vm1, %v2495_v55  ;;  %v2169_v30 = vadd.f32 %v2137_v48, %v2042_v37  ;;  %v2498_v53 = vadd.f32 %v9373_v11, %v2466_v41  ;;  %v2143_v11 = vld [vmem:[#allocation3 + $0xb0] sm:$0xff] }
 0x18b   : > { %v9332_v2 = vpop.f32.mrf.mxu0  ;;  %v2465_v44 = vld [vmem:[#allocation3 + $0x60] sm:$0xff]  ;;  %v9382_v45 = vpop.f32.mrf.mxu1 }
 0x18c   : > { %2201 = vst.msk [vmem:[#allocation3 + $0x80] sm:$0xff] %vm258_vm1, %v2169_v30  ;;  %2530 = vst.msk [vmem:[#allocation3 + $0x68] sm:$0xff] %vm258_vm1, %v2498_v53  ;;  %v2172_v32 = vadd.f32 %v9332_v2, %v2140_v52  ;;  %v2497_v47 = vadd.f32 %v2465_v44, %v2354_v49  ;;  %v2146_v49 = vld [vmem:[#allocation3 + $0xc8] sm:$0xff] }
 0x18d   : > { %v2052_v5 = vpop.f32.mrf.mxu0  ;;  %v2468_v50 = vld [vmem:[#allocation3 + $0x78] sm:$0xff]  ;;  %v2384_v61 = vpop.f32.mrf.mxu1 }
 0x18e   : > { %2204 = vst.msk [vmem:[#allocation3 + $0x98] sm:$0xff] %vm258_vm1, %v2172_v32  ;;  %2529 = vst.msk [vmem:[#allocation3 + $0x60] sm:$0xff] %vm258_vm1, %v2497_v47  ;;  %v2171_v51 = vadd.f32 %v2139_v63, %v2052_v5  ;;  %v2500_v54 = vadd.f32 %v9376_v23, %v2468_v50  ;;  %v2145_v23 = vld [vmem:[#allocation3 + $0xc0] sm:$0xff] }
 0x18f   : > { %v9335_v57 = vpop.f32.mrf.mxu0  ;;  %v2467_v0 = vld [vmem:[#allocation3 + $0x70] sm:$0xff]  ;;  %v9385_v36 = vpop.f32.mrf.mxu1 }
 0x190   : > { %2203 = vst.msk [vmem:[#allocation3 + $0x90] sm:$0xff] %vm258_vm1, %v2171_v51  ;;  %2532 = vst.msk [vmem:[#allocation3 + $0x78] sm:$0xff] %vm258_vm1, %v2500_v54  ;;  %v2174_v12 = vadd.f32 %v9335_v57, %v2142_v58  ;;  %v2499_v60 = vadd.f32 %v2467_v0, %v2364_v29  ;;  %v2148_v29 = vld [vmem:[#allocation3 + $0xd8] sm:$0xff] }
 0x191   : > { %v2062_v62 = vpop.f32.mrf.mxu0  ;;  %v2470_v39 = vld [vmem:[#allocation3 + $0x88] sm:$0xff]  ;;  %v2394_v9 = vpop.f32.mrf.mxu1 }
 0x192   : > { %2206 = vst.msk [vmem:[#allocation3 + $0xa8] sm:$0xff] %vm258_vm1, %v2174_v12  ;;  %2531 = vst.msk [vmem:[#allocation3 + $0x70] sm:$0xff] %vm258_vm1, %v2499_v60  ;;  %v2173_v15 = vadd.f32 %v2141_v1, %v2062_v62  ;;  %v2502_v3 = vadd.f32 %v9379_v33, %v2470_v39  ;;  %v2147_v33 = vld [vmem:[#allocation3 + $0xd0] sm:$0xff] }
 0x193   : > { %v9338_v4 = vpop.f32.mrf.mxu0  ;;  %v2469_v13 = vld [vmem:[#allocation3 + $0x80] sm:$0xff]  ;;  %v9388_v7 = vpop.f32.mrf.mxu1 }
 0x194   : > { %2205 = vst.msk [vmem:[#allocation3 + $0xa0] sm:$0xff] %vm258_vm1, %v2173_v15  ;;  %2534 = vst.msk [vmem:[#allocation3 + $0x88] sm:$0xff] %vm258_vm1, %v2502_v3  ;;  %v2176_v8 = vadd.f32 %v9338_v4, %v2144_v6  ;;  %v2501_v10 = vadd.f32 %v2469_v13, %v2374_v42  ;;  %v2150_v42 = vld [vmem:[#allocation3 + $0xe8] sm:$0xff] }
 0x195   : > { %v2072_v22 = vpop.f32.mrf.mxu0  ;;  %v2472_v14 = vld [vmem:[#allocation3 + $0x98] sm:$0xff]  ;;  %v2404_v21 = vpop.f32.mrf.mxu1  ;;  %v2912_v15 = vld [vmem:[#allocation3 + $0x8] sm:$0xff] }
 0x196   : > { %2208 = vst.msk [vmem:[#allocation3 + $0xb8] sm:$0xff] %vm258_vm1, %v2176_v8  ;;  %2533 = vst.msk [vmem:[#allocation3 + $0x80] sm:$0xff] %vm258_vm1, %v2501_v10  ;;  %v2175_v46 = vadd.f32 %v2143_v11, %v2072_v22  ;;  %v2504_v16 = vadd.f32 %v9382_v45, %v2472_v14  ;;  %v2149_v45 = vld [vmem:[#allocation3 + $0xe0] sm:$0xff] }
 0x197   : > { %v9341_v25 = vpop.f32.mrf.mxu0  ;;  %v2471_v26 = vld [vmem:[#allocation3 + $0x90] sm:$0xff]  ;;  %v9391_v17 = vpop.f32.mrf.mxu1  ;;  %v2911_v8 = vld [vmem:[#allocation3] sm:$0xff] }
 0x198   : > { %2207 = vst.msk [vmem:[#allocation3 + $0xb0] sm:$0xff] %vm258_vm1, %v2175_v46  ;;  %2536 = vst.msk [vmem:[#allocation3 + $0x98] sm:$0xff] %vm258_vm1, %v2504_v16  ;;  %v2178_v18 = vadd.f32 %v9341_v25, %v2146_v49  ;;  %v2503_v19 = vadd.f32 %v2471_v26, %v2384_v61  ;;  %v2152_v61 = vld [vmem:[#allocation3 + $0xf8] sm:$0xff] }
 0x199   : > { %v2082_v20 = vpop.f32.mrf.mxu0  ;;  %v2474_v35 = vld [vmem:[#allocation3 + $0xa8] sm:$0xff]  ;;  %v2414_v38 = vpop.f32.mrf.mxu1  ;;  %v2914_v46 = vld [vmem:[#allocation3 + $0x18] sm:$0xff] }
 0x19a   : > { %2210 = vst.msk [vmem:[#allocation3 + $0xc8] sm:$0xff] %vm258_vm1, %v2178_v18  ;;  %2535 = vst.msk [vmem:[#allocation3 + $0x90] sm:$0xff] %vm258_vm1, %v2503_v19  ;;  %v2177_v24 = vadd.f32 %v2145_v23, %v2082_v20  ;;  %v2506_v56 = vadd.f32 %v9385_v36, %v2474_v35  ;;  %v2151_v36 = vld [vmem:[#allocation3 + $0xf0] sm:$0xff] }
 0x19b   : > { %v9344_v28 = vpop.f32.mrf.mxu0  ;;  %v2473_v43 = vld [vmem:[#allocation3 + $0xa0] sm:$0xff]  ;;  %v9394_v40 = vpop.f32.mrf.mxu1  ;;  %v2913_v18 = vld [vmem:[#allocation3 + $0x10] sm:$0xff] }
 0x19c   : > { %2209 = vst.msk [vmem:[#allocation3 + $0xc0] sm:$0xff] %vm258_vm1, %v2177_v24  ;;  %2538 = vst.msk [vmem:[#allocation3 + $0xa8] sm:$0xff] %vm258_vm1, %v2506_v56  ;;  %v2180_v27 = vadd.f32 %v9344_v28, %v2148_v29  ;;  %v2505_v31 = vadd.f32 %v2473_v43, %v2394_v9  ;;  %v2916_v24 = vld [vmem:[#allocation3 + $0x28] sm:$0xff] }
 0x19d   : > { %v2092_v59 = vpop.f32.mrf.mxu0  ;;  %v2476_v34 = vld [vmem:[#allocation3 + $0xb8] sm:$0xff]  ;;  %v2424_v55 = vpop.f32.mrf.mxu1 }
 0x19e   : > { %2212 = vst.msk [vmem:[#allocation3 + $0xd8] sm:$0xff] %vm258_vm1, %v2180_v27  ;;  %2537 = vst.msk [vmem:[#allocation3 + $0xa0] sm:$0xff] %vm258_vm1, %v2505_v31  ;;  %v2179_v37 = vadd.f32 %v2147_v33, %v2092_v59  ;;  %v2508_v48 = vadd.f32 %v9388_v7, %v2476_v34 }
 0x19f   : > { %v9347_v41 = vpop.f32.mrf.mxu0  ;;  %v2475_v30 = vld [vmem:[#allocation3 + $0xb0] sm:$0xff]  ;;  %v9397_v53 = vpop.f32.mrf.mxu1 }
 0x1a0   : > { %2211 = vst.msk [vmem:[#allocation3 + $0xd0] sm:$0xff] %vm258_vm1, %v2179_v37  ;;  %2540 = vst.msk [vmem:[#allocation3 + $0xb8] sm:$0xff] %vm258_vm1, %v2508_v48  ;;  %v2182_v2 = vadd.f32 %v9347_v41, %v2150_v42  ;;  %v2507_v52 = vadd.f32 %v2475_v30, %v2404_v21 }
 0x1a1   : > { %v2102_v44 = vpop.f32.mrf.mxu0  ;;  %v2478_v32 = vld [vmem:[#allocation3 + $0xc8] sm:$0xff]  ;;  %v2434_v47 = vpop.f32.mrf.mxu1 }
 0x1a2   : > { %2214 = vst.msk [vmem:[#allocation3 + $0xe8] sm:$0xff] %vm258_vm1, %v2182_v2  ;;  %2539 = vst.msk [vmem:[#allocation3 + $0xb0] sm:$0xff] %vm258_vm1, %v2507_v52  ;;  %v2181_v5 = vadd.f32 %v2149_v45, %v2102_v44  ;;  %v2510_v63 = vadd.f32 %v9391_v17, %v2478_v32 }
 0x1a3   : > { %v9350_v50 = vpop.f32.mrf.mxu0  ;;  %v2477_v51 = vld [vmem:[#allocation3 + $0xc0] sm:$0xff]  ;;  %v9400_v54 = vpop.f32.mrf.mxu1 }
 0x1a4   : > { %2213 = vst.msk [vmem:[#allocation3 + $0xe0] sm:$0xff] %vm258_vm1, %v2181_v5  ;;  %2542 = vst.msk [vmem:[#allocation3 + $0xc8] sm:$0xff] %vm258_vm1, %v2510_v63  ;;  %v2184_v57 = vadd.f32 %v9350_v50, %v2152_v61  ;;  %v2509_v58 = vadd.f32 %v2477_v51, %v2414_v38 }
 0x1a5   : > { %v2112_v0 = vpop.f32.mrf.mxu0  ;;  %v2480_v12 = vld [vmem:[#allocation3 + $0xd8] sm:$0xff]  ;;  %v2444_v60 = vpop.f32.mrf.mxu1 }
 0x1a6   : > { %2216 = vst.msk [vmem:[#allocation3 + $0xf8] sm:$0xff] %vm258_vm1, %v2184_v57  ;;  %2541 = vst.msk [vmem:[#allocation3 + $0xc0] sm:$0xff] %vm258_vm1, %v2509_v58  ;;  %v2183_v62 = vadd.f32 %v2151_v36, %v2112_v0  ;;  %v2512_v1 = vadd.f32 %v9394_v40, %v2480_v12  ;;  %v2915_v40 = vld [vmem:[#allocation3 + $0x20] sm:$0xff] }
 0x1a7   : > { %v2479_v39 = vld [vmem:[#allocation3 + $0xd0] sm:$0xff]  ;;  %v9405_v9 = vpop.f32.mrf.mxu0  ;;  %v9455_v3 = vpop.f32.mrf.mxu1 }
 0x1a8   : > { %2215 = vst.msk [vmem:[#allocation3 + $0xf0] sm:$0xff] %vm258_vm1, %v2183_v62  ;;  %2544 = vst.msk [vmem:[#allocation3 + $0xd8] sm:$0xff] %vm258_vm1, %v2512_v1  ;;  %v2511_v4 = vadd.f32 %v2479_v39, %v2424_v55  ;;  %v2944_v6 = vadd.f32 %v9405_v9, %v2912_v15  ;;  %v2918_v55 = vld [vmem:[#allocation3 + $0x38] sm:$0xff] }
 0x1a9   : > { %v2482_v13 = vld [vmem:[#allocation3 + $0xe8] sm:$0xff]  ;;  %v2752_v7 = vpop.f32.mrf.mxu0  ;;  %v3084_v10 = vpop.f32.mrf.mxu1 }
 0x1aa   : > { %2543 = vst.msk [vmem:[#allocation3 + $0xd0] sm:$0xff] %vm258_vm1, %v2511_v4  ;;  %2976 = vst.msk [vmem:[#allocation3 + $0x8] sm:$0xff] %vm258_vm1, %v2944_v6  ;;  %v2514_v22 = vadd.f32 %v9397_v53, %v2482_v13  ;;  %v2943_v11 = vadd.f32 %v2911_v8, %v2752_v7  ;;  %v2917_v53 = vld [vmem:[#allocation3 + $0x30] sm:$0xff] }
 0x1ab   : > { %v2481_v14 = vld [vmem:[#allocation3 + $0xe0] sm:$0xff]  ;;  %v9408_v21 = vpop.f32.mrf.mxu0  ;;  %v9458_v16 = vpop.f32.mrf.mxu1 }
 0x1ac   : > { %2546 = vst.msk [vmem:[#allocation3 + $0xe8] sm:$0xff] %vm258_vm1, %v2514_v22  ;;  %2975 = vst.msk [vmem:[#allocation3] sm:$0xff] %vm258_vm1, %v2943_v11  ;;  %v2513_v25 = vadd.f32 %v2481_v14, %v2434_v47  ;;  %v2946_v49 = vadd.f32 %v9408_v21, %v2914_v46  ;;  %v2920_v47 = vld [vmem:[#allocation3 + $0x48] sm:$0xff] }
 0x1ad   : > { %v2484_v26 = vld [vmem:[#allocation3 + $0xf8] sm:$0xff]  ;;  %v2762_v17 = vpop.f32.mrf.mxu0  ;;  %v3094_v19 = vpop.f32.mrf.mxu1 }
 0x1ae   : > { %2545 = vst.msk [vmem:[#allocation3 + $0xe0] sm:$0xff] %vm258_vm1, %v2513_v25  ;;  %2978 = vst.msk [vmem:[#allocation3 + $0x18] sm:$0xff] %vm258_vm1, %v2946_v49  ;;  %v2516_v20 = vadd.f32 %v9400_v54, %v2484_v26  ;;  %v2945_v23 = vadd.f32 %v2913_v18, %v2762_v17  ;;  %v2919_v54 = vld [vmem:[#allocation3 + $0x40] sm:$0xff] }
 0x1af   : > { %v2483_v35 = vld [vmem:[#allocation3 + $0xf0] sm:$0xff]  ;;  %v9411_v38 = vpop.f32.mrf.mxu0  ;;  %v9461_v56 = vpop.f32.mrf.mxu1 }
 0x1b0   : > { %2548 = vst.msk [vmem:[#allocation3 + $0xf8] sm:$0xff] %vm258_vm1, %v2516_v20  ;;  %2977 = vst.msk [vmem:[#allocation3 + $0x10] sm:$0xff] %vm258_vm1, %v2945_v23  ;;  %v2515_v28 = vadd.f32 %v2483_v35, %v2444_v60  ;;  %v2948_v29 = vadd.f32 %v9411_v38, %v2916_v24  ;;  %v2922_v60 = vld [vmem:[#allocation3 + $0x58] sm:$0xff] }
 0x1b1   : > { %v2772_v43 = vpop.f32.mrf.mxu0  ;;  %v3244_v27 = vld [vmem:[#allocation3 + $0x8] sm:$0xff]  ;;  %v3104_v31 = vpop.f32.mrf.mxu1 }
 0x1b2   : > { %2547 = vst.msk [vmem:[#allocation3 + $0xf0] sm:$0xff] %vm258_vm1, %v2515_v28  ;;  %2980 = vst.msk [vmem:[#allocation3 + $0x28] sm:$0xff] %vm258_vm1, %v2948_v29  ;;  %v2947_v59 = vadd.f32 %v2915_v40, %v2772_v43  ;;  %v3276_v33 = vadd.f32 %v9455_v3, %v3244_v27  ;;  %v2921_v3 = vld [vmem:[#allocation3 + $0x50] sm:$0xff] }
 0x1b3   : > { %v9414_v34 = vpop.f32.mrf.mxu0  ;;  %v3243_v37 = vld [vmem:[#allocation3] sm:$0xff]  ;;  %v9464_v48 = vpop.f32.mrf.mxu1 }
 0x1b4   : > { %2979 = vst.msk [vmem:[#allocation3 + $0x20] sm:$0xff] %vm258_vm1, %v2947_v59  ;;  %3308 = vst.msk [vmem:[#allocation3 + $0x8] sm:$0xff] %vm258_vm1, %v3276_v33  ;;  %v2950_v41 = vadd.f32 %v9414_v34, %v2918_v55  ;;  %v3275_v42 = vadd.f32 %v3243_v37, %v3084_v10  ;;  %v2924_v10 = vld [vmem:[#allocation3 + $0x68] sm:$0xff] }
 0x1b5   : > { %v2782_v30 = vpop.f32.mrf.mxu0  ;;  %v3246_v2 = vld [vmem:[#allocation3 + $0x18] sm:$0xff]  ;;  %v3114_v52 = vpop.f32.mrf.mxu1 }
 0x1b6   : > { %2982 = vst.msk [vmem:[#allocation3 + $0x38] sm:$0xff] %vm258_vm1, %v2950_v41  ;;  %3307 = vst.msk [vmem:[#allocation3] sm:$0xff] %vm258_vm1, %v3275_v42  ;;  %v2949_v44 = vadd.f32 %v2917_v53, %v2782_v30  ;;  %v3278_v45 = vadd.f32 %v9458_v16, %v3246_v2  ;;  %v2923_v16 = vld [vmem:[#allocation3 + $0x60] sm:$0xff] }
 0x1b7   : > { %v9417_v32 = vpop.f32.mrf.mxu0  ;;  %v3245_v5 = vld [vmem:[#allocation3 + $0x10] sm:$0xff]  ;;  %v9467_v63 = vpop.f32.mrf.mxu1 }
 0x1b8   : > { %2981 = vst.msk [vmem:[#allocation3 + $0x30] sm:$0xff] %vm258_vm1, %v2949_v44  ;;  %3310 = vst.msk [vmem:[#allocation3 + $0x18] sm:$0xff] %vm258_vm1, %v3278_v45  ;;  %v2952_v50 = vadd.f32 %v9417_v32, %v2920_v47  ;;  %v3277_v61 = vadd.f32 %v3245_v5, %v3094_v19  ;;  %v2926_v19 = vld [vmem:[#allocation3 + $0x78] sm:$0xff] }
 0x1b9   : > { %v2792_v51 = vpop.f32.mrf.mxu0  ;;  %v3248_v57 = vld [vmem:[#allocation3 + $0x28] sm:$0xff]  ;;  %v3124_v58 = vpop.f32.mrf.mxu1 }
 0x1ba   : > { %2984 = vst.msk [vmem:[#allocation3 + $0x48] sm:$0xff] %vm258_vm1, %v2952_v50  ;;  %3309 = vst.msk [vmem:[#allocation3 + $0x10] sm:$0xff] %vm258_vm1, %v3277_v61  ;;  %v2951_v0 = vadd.f32 %v2919_v54, %v2792_v51  ;;  %v3280_v36 = vadd.f32 %v9461_v56, %v3248_v57  ;;  %v2925_v56 = vld [vmem:[#allocation3 + $0x70] sm:$0xff] }
 0x1bb   : > { %v9420_v12 = vpop.f32.mrf.mxu0  ;;  %v3247_v62 = vld [vmem:[#allocation3 + $0x20] sm:$0xff]  ;;  %v9470_v1 = vpop.f32.mrf.mxu1 }
 0x1bc   : > { %2983 = vst.msk [vmem:[#allocation3 + $0x40] sm:$0xff] %vm258_vm1, %v2951_v0  ;;  %3312 = vst.msk [vmem:[#allocation3 + $0x28] sm:$0xff] %vm258_vm1, %v3280_v36  ;;  %v2954_v39 = vadd.f32 %v9420_v12, %v2922_v60  ;;  %v3279_v9 = vadd.f32 %v3247_v62, %v3104_v31  ;;  %v2928_v31 = vld [vmem:[#allocation3 + $0x88] sm:$0xff] }
 0x1bd   : > { %v2802_v15 = vpop.f32.mrf.mxu0  ;;  %v3250_v4 = vld [vmem:[#allocation3 + $0x38] sm:$0xff]  ;;  %v3134_v6 = vpop.f32.mrf.mxu1 }
 0x1be   : > { %2986 = vst.msk [vmem:[#allocation3 + $0x58] sm:$0xff] %vm258_vm1, %v2954_v39  ;;  %3311 = vst.msk [vmem:[#allocation3 + $0x20] sm:$0xff] %vm258_vm1, %v3279_v9  ;;  %v2953_v13 = vadd.f32 %v2921_v3, %v2802_v15  ;;  %v3282_v7 = vadd.f32 %v9464_v48, %v3250_v4  ;;  %v2927_v48 = vld [vmem:[#allocation3 + $0x80] sm:$0xff] }
 0x1bf   : > { %v9423_v8 = vpop.f32.mrf.mxu0  ;;  %v3249_v22 = vld [vmem:[#allocation3 + $0x30] sm:$0xff]  ;;  %v9473_v11 = vpop.f32.mrf.mxu1 }
 0x1c0   : > { %2985 = vst.msk [vmem:[#allocation3 + $0x50] sm:$0xff] %vm258_vm1, %v2953_v13  ;;  %3314 = vst.msk [vmem:[#allocation3 + $0x38] sm:$0xff] %vm258_vm1, %v3282_v7  ;;  %v2956_v14 = vadd.f32 %v9423_v8, %v2924_v10  ;;  %v3281_v21 = vadd.f32 %v3249_v22, %v3114_v52  ;;  %v2930_v52 = vld [vmem:[#allocation3 + $0x98] sm:$0xff] }
 0x1c1   : > { %v2812_v46 = vpop.f32.mrf.mxu0  ;;  %v3252_v25 = vld [vmem:[#allocation3 + $0x48] sm:$0xff]  ;;  %v3144_v49 = vpop.f32.mrf.mxu1 }
 0x1c2   : > { %2988 = vst.msk [vmem:[#allocation3 + $0x68] sm:$0xff] %vm258_vm1, %v2956_v14  ;;  %3313 = vst.msk [vmem:[#allocation3 + $0x30] sm:$0xff] %vm258_vm1, %v3281_v21  ;;  %v2955_v26 = vadd.f32 %v2923_v16, %v2812_v46  ;;  %v3284_v17 = vadd.f32 %v9467_v63, %v3252_v25  ;;  %v2929_v63 = vld [vmem:[#allocation3 + $0x90] sm:$0xff] }
 0x1c3   : > { %v9426_v18 = vpop.f32.mrf.mxu0  ;;  %v3251_v20 = vld [vmem:[#allocation3 + $0x40] sm:$0xff]  ;;  %v9476_v23 = vpop.f32.mrf.mxu1 }
 0x1c4   : > { %2987 = vst.msk [vmem:[#allocation3 + $0x60] sm:$0xff] %vm258_vm1, %v2955_v26  ;;  %3316 = vst.msk [vmem:[#allocation3 + $0x48] sm:$0xff] %vm258_vm1, %v3284_v17  ;;  %v2958_v35 = vadd.f32 %v9426_v18, %v2926_v19  ;;  %v3283_v38 = vadd.f32 %v3251_v20, %v3124_v58  ;;  %v2932_v58 = vld [vmem:[#allocation3 + $0xa8] sm:$0xff] }
 0x1c5   : > { %v2822_v24 = vpop.f32.mrf.mxu0  ;;  %v3254_v28 = vld [vmem:[#allocation3 + $0x58] sm:$0xff]  ;;  %v3154_v29 = vpop.f32.mrf.mxu1 }
 0x1c6   : > { %2990 = vst.msk [vmem:[#allocation3 + $0x78] sm:$0xff] %vm258_vm1, %v2958_v35  ;;  %3315 = vst.msk [vmem:[#allocation3 + $0x40] sm:$0xff] %vm258_vm1, %v3283_v38  ;;  %v2957_v43 = vadd.f32 %v2925_v56, %v2822_v24  ;;  %v3286_v40 = vadd.f32 %v9470_v1, %v3254_v28  ;;  %v2931_v1 = vld [vmem:[#allocation3 + $0xa0] sm:$0xff] }
 0x1c7   : > { %v9429_v27 = vpop.f32.mrf.mxu0  ;;  %v3253_v59 = vld [vmem:[#allocation3 + $0x50] sm:$0xff]  ;;  %v9479_v33 = vpop.f32.mrf.mxu1 }
 0x1c8   : > { %2989 = vst.msk [vmem:[#allocation3 + $0x70] sm:$0xff] %vm258_vm1, %v2957_v43  ;;  %3318 = vst.msk [vmem:[#allocation3 + $0x58] sm:$0xff] %vm258_vm1, %v3286_v40  ;;  %v2960_v34 = vadd.f32 %v9429_v27, %v2928_v31  ;;  %v3285_v55 = vadd.f32 %v3253_v59, %v3134_v6  ;;  %v2934_v6 = vld [vmem:[#allocation3 + $0xb8] sm:$0xff] }
 0x1c9   : > { %v2832_v37 = vpop.f32.mrf.mxu0  ;;  %v3256_v41 = vld [vmem:[#allocation3 + $0x68] sm:$0xff]  ;;  %v3164_v42 = vpop.f32.mrf.mxu1 }
 0x1ca   : > { %2992 = vst.msk [vmem:[#allocation3 + $0x88] sm:$0xff] %vm258_vm1, %v2960_v34  ;;  %3317 = vst.msk [vmem:[#allocation3 + $0x50] sm:$0xff] %vm258_vm1, %v3285_v55  ;;  %v2959_v30 = vadd.f32 %v2927_v48, %v2832_v37  ;;  %v3288_v53 = vadd.f32 %v9473_v11, %v3256_v41  ;;  %v2933_v11 = vld [vmem:[#allocation3 + $0xb0] sm:$0xff] }
 0x1cb   : > { %v9432_v2 = vpop.f32.mrf.mxu0  ;;  %v3255_v44 = vld [vmem:[#allocation3 + $0x60] sm:$0xff]  ;;  %v9482_v45 = vpop.f32.mrf.mxu1 }
 0x1cc   : > { %2991 = vst.msk [vmem:[#allocation3 + $0x80] sm:$0xff] %vm258_vm1, %v2959_v30  ;;  %3320 = vst.msk [vmem:[#allocation3 + $0x68] sm:$0xff] %vm258_vm1, %v3288_v53  ;;  %v2962_v32 = vadd.f32 %v9432_v2, %v2930_v52  ;;  %v3287_v47 = vadd.f32 %v3255_v44, %v3144_v49  ;;  %v2936_v49 = vld [vmem:[#allocation3 + $0xc8] sm:$0xff]  ;;  %v2939_v44 = vld [vmem:[#allocation3 + $0xe0] sm:$0xff] }
 0x1cd   : > { %v2842_v5 = vpop.f32.mrf.mxu0  ;;  %v3258_v50 = vld [vmem:[#allocation3 + $0x78] sm:$0xff]  ;;  %v3174_v61 = vpop.f32.mrf.mxu1 }
 0x1ce   : > { %2994 = vst.msk [vmem:[#allocation3 + $0x98] sm:$0xff] %vm258_vm1, %v2962_v32  ;;  %3319 = vst.msk [vmem:[#allocation3 + $0x60] sm:$0xff] %vm258_vm1, %v3287_v47  ;;  %v2961_v51 = vadd.f32 %v2929_v63, %v2842_v5  ;;  %v3290_v54 = vadd.f32 %v9476_v23, %v3258_v50  ;;  %v2935_v23 = vld [vmem:[#allocation3 + $0xc0] sm:$0xff]  ;;  %v2942_v50 = vld [vmem:[#allocation3 + $0xf8] sm:$0xff] }
 0x1cf   : > { %v9435_v57 = vpop.f32.mrf.mxu0  ;;  %v3257_v0 = vld [vmem:[#allocation3 + $0x70] sm:$0xff]  ;;  %v9485_v36 = vpop.f32.mrf.mxu1 }
 0x1d0   : > { %2993 = vst.msk [vmem:[#allocation3 + $0x90] sm:$0xff] %vm258_vm1, %v2961_v51  ;;  %3322 = vst.msk [vmem:[#allocation3 + $0x78] sm:$0xff] %vm258_vm1, %v3290_v54  ;;  %v2964_v12 = vadd.f32 %v9435_v57, %v2932_v58  ;;  %v3289_v60 = vadd.f32 %v3257_v0, %v3154_v29  ;;  %v2938_v29 = vld [vmem:[#allocation3 + $0xd8] sm:$0xff]  ;;  %v2941_v58 = vld [vmem:[#allocation3 + $0xf0] sm:$0xff] }
 0x1d1   : > { %v2852_v62 = vpop.f32.mrf.mxu0  ;;  %v3260_v39 = vld [vmem:[#allocation3 + $0x88] sm:$0xff]  ;;  %v3184_v9 = vpop.f32.mrf.mxu1 }
 0x1d2   : > { %2996 = vst.msk [vmem:[#allocation3 + $0xa8] sm:$0xff] %vm258_vm1, %v2964_v12  ;;  %3321 = vst.msk [vmem:[#allocation3 + $0x70] sm:$0xff] %vm258_vm1, %v3289_v60  ;;  %v2963_v15 = vadd.f32 %v2931_v1, %v2852_v62  ;;  %v3292_v3 = vadd.f32 %v9479_v33, %v3260_v39  ;;  %v2937_v33 = vld [vmem:[#allocation3 + $0xd0] sm:$0xff]  ;;  %v3576_v39 = vld [vmem:[#allocation3 + $0x8] sm:$0xff] }
 0x1d3   : > { %v9438_v4 = vpop.f32.mrf.mxu0  ;;  %v3259_v13 = vld [vmem:[#allocation3 + $0x80] sm:$0xff]  ;;  %v9488_v7 = vpop.f32.mrf.mxu1 }
 0x1d4   : > { %2995 = vst.msk [vmem:[#allocation3 + $0xa0] sm:$0xff] %vm258_vm1, %v2963_v15  ;;  %3324 = vst.msk [vmem:[#allocation3 + $0x88] sm:$0xff] %vm258_vm1, %v3292_v3  ;;  %v2966_v8 = vadd.f32 %v9438_v4, %v2934_v6  ;;  %v3291_v10 = vadd.f32 %v3259_v13, %v3164_v42  ;;  %v2940_v42 = vld [vmem:[#allocation3 + $0xe8] sm:$0xff]  ;;  %v3575_v6 = vld [vmem:[#allocation3] sm:$0xff] }
 0x1d5   : > { %v2862_v22 = vpop.f32.mrf.mxu0  ;;  %v3262_v14 = vld [vmem:[#allocation3 + $0x98] sm:$0xff]  ;;  %v3194_v21 = vpop.f32.mrf.mxu1 }
 0x1d6   : > { %2998 = vst.msk [vmem:[#allocation3 + $0xb8] sm:$0xff] %vm258_vm1, %v2966_v8  ;;  %3323 = vst.msk [vmem:[#allocation3 + $0x80] sm:$0xff] %vm258_vm1, %v3291_v10  ;;  %v2965_v46 = vadd.f32 %v2933_v11, %v2862_v22  ;;  %v3294_v16 = vadd.f32 %v9482_v45, %v3262_v14  ;;  %v3578_v11 = vld [vmem:[#allocation3 + $0x18] sm:$0xff] }
 0x1d7   : > { %v9441_v25 = vpop.f32.mrf.mxu0  ;;  %v3261_v26 = vld [vmem:[#allocation3 + $0x90] sm:$0xff]  ;;  %v9491_v17 = vpop.f32.mrf.mxu1 }
 0x1d8   : > { %2997 = vst.msk [vmem:[#allocation3 + $0xb0] sm:$0xff] %vm258_vm1, %v2965_v46  ;;  %3326 = vst.msk [vmem:[#allocation3 + $0x98] sm:$0xff] %vm258_vm1, %v3294_v16  ;;  %v2968_v18 = vadd.f32 %v9441_v25, %v2936_v49  ;;  %v3293_v19 = vadd.f32 %v3261_v26, %v3174_v61  ;;  %v3577_v25 = vld [vmem:[#allocation3 + $0x10] sm:$0xff] }
 0x1d9   : > { %v2872_v20 = vpop.f32.mrf.mxu0  ;;  %v3264_v35 = vld [vmem:[#allocation3 + $0xa8] sm:$0xff]  ;;  %v3204_v38 = vpop.f32.mrf.mxu1 }
 0x1da   : > { %3000 = vst.msk [vmem:[#allocation3 + $0xc8] sm:$0xff] %vm258_vm1, %v2968_v18  ;;  %3325 = vst.msk [vmem:[#allocation3 + $0x90] sm:$0xff] %vm258_vm1, %v3293_v19  ;;  %v2967_v24 = vadd.f32 %v2935_v23, %v2872_v20  ;;  %v3296_v56 = vadd.f32 %v9485_v36, %v3264_v35  ;;  %v3580_v20 = vld [vmem:[#allocation3 + $0x28] sm:$0xff] }
 0x1db   : > { %v9444_v28 = vpop.f32.mrf.mxu0  ;;  %v3263_v43 = vld [vmem:[#allocation3 + $0xa0] sm:$0xff]  ;;  %v9494_v40 = vpop.f32.mrf.mxu1 }
 0x1dc   : > { %2999 = vst.msk [vmem:[#allocation3 + $0xc0] sm:$0xff] %vm258_vm1, %v2967_v24  ;;  %3328 = vst.msk [vmem:[#allocation3 + $0xa8] sm:$0xff] %vm258_vm1, %v3296_v56  ;;  %v2970_v27 = vadd.f32 %v9444_v28, %v2938_v29  ;;  %v3295_v31 = vadd.f32 %v3263_v43, %v3184_v9  ;;  %v11240_v24 = vld [vmem:[%s13483_s2] ss:$0 sm:$0xff]  ;;  %v3579_v28 = vld [vmem:[#allocation3 + $0x20] sm:$0xff] }
 0x1dd   : > { %v2882_v59 = vpop.f32.mrf.mxu0  ;;  %v3266_v34 = vld [vmem:[#allocation3 + $0xb8] sm:$0xff]  ;;  %v3214_v55 = vpop.f32.mrf.mxu1 }
 0x1de   : > { %3002 = vst.msk [vmem:[#allocation3 + $0xd8] sm:$0xff] %vm258_vm1, %v2970_v27  ;;  %3327 = vst.msk [vmem:[#allocation3 + $0xa0] sm:$0xff] %vm258_vm1, %v3295_v31  ;;  %v2969_v37 = vadd.f32 %v2937_v33, %v2882_v59  ;;  %v3298_v48 = vadd.f32 %v9488_v7, %v3266_v34  ;;  %v3582_v27 = vld [vmem:[#allocation3 + $0x38] sm:$0xff] }
 0x1df   : > { %v9447_v41 = vpop.f32.mrf.mxu0  ;;  %v3265_v30 = vld [vmem:[#allocation3 + $0xb0] sm:$0xff]  ;;  %v9497_v32 = vpop.f32.mrf.mxu1 }
 0x1e0   : > { %3001 = vst.msk [vmem:[#allocation3 + $0xd0] sm:$0xff] %vm258_vm1, %v2969_v37  ;;  %3330 = vst.msk [vmem:[#allocation3 + $0xb8] sm:$0xff] %vm258_vm1, %v3298_v48  ;;  %v2972_v53 = vadd.f32 %v9447_v41, %v2940_v42  ;;  %v3297_v2 = vadd.f32 %v3265_v30, %v3194_v21  ;;  %v3581_v37 = vld [vmem:[#allocation3 + $0x30] sm:$0xff] }
 0x1e1   : > { %v2892_v52 = vpop.f32.mrf.mxu0  ;;  %v3268_v45 = vld [vmem:[#allocation3 + $0xc8] sm:$0xff]  ;;  %v3224_v36 = vpop.f32.mrf.mxu1 }
 0x1e2   : > { %3004 = vst.msk [vmem:[#allocation3 + $0xe8] sm:$0xff] %vm258_vm1, %v2972_v53  ;;  %3329 = vst.msk [vmem:[#allocation3 + $0xb0] sm:$0xff] %vm258_vm1, %v3297_v2  ;;  %v2971_v47 = vadd.f32 %v2939_v44, %v2892_v52  ;;  %v3300_v5 = vadd.f32 %v9491_v17, %v3268_v45  ;;  %v3584_v53 = vld [vmem:[#allocation3 + $0x48] sm:$0xff] }
 0x1e3   : > { %v9450_v63 = vpop.f32.mrf.mxu0  ;;  %v3267_v61 = vld [vmem:[#allocation3 + $0xc0] sm:$0xff]  ;;  %v9500_v13 = vpop.f32.mrf.mxu1 }
 0x1e4   : > { %3003 = vst.msk [vmem:[#allocation3 + $0xe0] sm:$0xff] %vm258_vm1, %v2971_v47  ;;  %3332 = vst.msk [vmem:[#allocation3 + $0xc8] sm:$0xff] %vm258_vm1, %v3300_v5  ;;  %v2974_v51 = vadd.f32 %v9450_v63, %v2942_v50  ;;  %v3299_v54 = vadd.f32 %v3267_v61, %v3204_v38  ;;  %v3583_v63 = vld [vmem:[#allocation3 + $0x40] sm:$0xff] }
 0x1e5   : > { %v2902_v57 = vpop.f32.mrf.mxu0  ;;  %v3270_v0 = vld [vmem:[#allocation3 + $0xd8] sm:$0xff]  ;;  %v3234_v49 = vpop.f32.mrf.mxu1 }
 0x1e6   : > { %3006 = vst.msk [vmem:[#allocation3 + $0xf8] sm:$0xff] %vm258_vm1, %v2974_v51  ;;  %3331 = vst.msk [vmem:[#allocation3 + $0xc0] sm:$0xff] %vm258_vm1, %v3299_v54  ;;  %v2973_v12 = vadd.f32 %v2941_v58, %v2902_v57  ;;  %v3302_v60 = vadd.f32 %v9494_v40, %v3270_v0  ;;  %v3586_v58 = vld [vmem:[#allocation3 + $0x58] sm:$0xff] }
 0x1e7   : > { %v3269_v62 = vld [vmem:[#allocation3 + $0xd0] sm:$0xff]  ;;  %v9505_v1 = vpop.f32.mrf.mxu0 }
 0x1e8   : > { %3005 = vst.msk [vmem:[#allocation3 + $0xf0] sm:$0xff] %vm258_vm1, %v2973_v12  ;;  %3334 = vst.msk [vmem:[#allocation3 + $0xd8] sm:$0xff] %vm258_vm1, %v3302_v60  ;;  %v3301_v9 = vadd.f32 %v3269_v62, %v3214_v55  ;;  %v3608_v15 = vadd.f32 %v9505_v1, %v3576_v39 }
 0x1e9   : > { %v3272_v3 = vld [vmem:[#allocation3 + $0xe8] sm:$0xff]  ;;  %v3416_v4 = vpop.f32.mrf.mxu0 }
 0x1ea   : > { %3333 = vst.msk [vmem:[#allocation3 + $0xd0] sm:$0xff] %vm258_vm1, %v3301_v9  ;;  %3640 = vst.msk [vmem:[#allocation3 + $0x8] sm:$0xff] %vm258_vm1, %v3608_v15  ;;  %v3304_v7 = vadd.f32 %v9497_v32, %v3272_v3  ;;  %v3607_v8 = vadd.f32 %v3575_v6, %v3416_v4  ;;  %v3585_v9 = vld [vmem:[#allocation3 + $0x50] sm:$0xff] }
 0x1eb   : > { %v3271_v10 = vld [vmem:[#allocation3 + $0xe0] sm:$0xff]  ;;  %v9508_v22 = vpop.f32.mrf.mxu0 }
 0x1ec   : > { %3336 = vst.msk [vmem:[#allocation3 + $0xe8] sm:$0xff] %vm258_vm1, %v3304_v7  ;;  %3639 = vst.msk [vmem:[#allocation3] sm:$0xff] %vm258_vm1, %v3607_v8  ;;  %v3303_v14 = vadd.f32 %v3271_v10, %v3224_v36  ;;  %v3610_v21 = vadd.f32 %v9508_v22, %v3578_v11  ;;  %v3588_v7 = vld [vmem:[#allocation3 + $0x68] sm:$0xff] }
 0x1ed   : > { %v3274_v46 = vld [vmem:[#allocation3 + $0xf8] sm:$0xff]  ;;  %v3426_v16 = vpop.f32.mrf.mxu0 }
 0x1ee   : > { %3335 = vst.msk [vmem:[#allocation3 + $0xe0] sm:$0xff] %vm258_vm1, %v3303_v14  ;;  %3642 = vst.msk [vmem:[#allocation3 + $0x18] sm:$0xff] %vm258_vm1, %v3610_v21  ;;  %v3306_v26 = vadd.f32 %v9500_v13, %v3274_v46  ;;  %v3609_v17 = vadd.f32 %v3577_v25, %v3426_v16  ;;  %v3587_v16 = vld [vmem:[#allocation3 + $0x60] sm:$0xff] }
 0x1ef   : > { %v3273_v18 = vld [vmem:[#allocation3 + $0xf0] sm:$0xff]  ;;  %v9511_v19 = vpop.f32.mrf.mxu0 }
 0x1f0   : > { %3338 = vst.msk [vmem:[#allocation3 + $0xf8] sm:$0xff] %vm258_vm1, %v3306_v26  ;;  %3641 = vst.msk [vmem:[#allocation3 + $0x10] sm:$0xff] %vm258_vm1, %v3609_v17  ;;  %v3305_v23 = vadd.f32 %v3273_v18, %v3234_v49  ;;  %v3612_v35 = vadd.f32 %v9511_v19, %v3580_v20  ;;  %v3590_v19 = vld [vmem:[#allocation3 + $0x78] sm:$0xff] }
 0x1f1   : > { %v3672_v38 = vld [vmem:[#allocation3 + $0x8] sm:$0xff]  ;;  %v3436_v56 = vpop.f32.mrf.mxu0 }
 0x1f2   : > { %3337 = vst.msk [vmem:[#allocation3 + $0xf0] sm:$0xff] %vm258_vm1, %v3305_v23  ;;  %3644 = vst.msk [vmem:[#allocation3 + $0x28] sm:$0xff] %vm258_vm1, %v3612_v35  ;;  %v3611_v29 = vadd.f32 %v3579_v28, %v3436_v56  ;;  %v11245_v31 = vadd.f32 %v11240_v24, %v3672_v38 }
 0x1f3   : > { %v3671_v43 = vld [vmem:[#allocation3] sm:$0xff]  ;;  %v9514_v40 = vpop.f32.mrf.mxu0 }
 0x1f4   : > { %v11248_v59 = vadd.f32 %v11240_v24, %v3671_v43  ;;  %3643 = vst.msk [vmem:[#allocation3 + $0x20] sm:$0xff] %vm258_vm1, %v3611_v29  ;;  %v3614_v33 = vadd.f32 %v9514_v40, %v3582_v27  ;;  %v3743_v2 = vsel %vm258_vm1, %v11245_v31, 0.0  ;;  %v3589_v43 = vld [vmem:[#allocation3 + $0x70] sm:$0xff] }
 0x1f5   : > { %v3674_v34 = vld [vmem:[#allocation3 + $0x18] sm:$0xff]  ;;  %v3446_v55 = vpop.f32.mrf.mxu0 }
 0x1f6   : > { %v3742_v48 = vsel %vm258_vm1, %v11248_v59, 0.0  ;;  %3646 = vst.msk [vmem:[#allocation3 + $0x38] sm:$0xff] %vm258_vm1, %v3614_v33  ;;  %v3613_v41 = vadd.f32 %v3581_v37, %v3446_v55  ;;  %v11257_v52 = vadd.f32 %v11240_v24, %v3674_v34  ;;  %v3592_v37 = vld [vmem:[#allocation3 + $0x88] sm:$0xff] }
 0x1f7   : > { %v3673_v42 = vld [vmem:[#allocation3 + $0x10] sm:$0xff]  ;;  %v9517_v30 = vpop.f32.mrf.mxu0  ;;  %v3744_v32 = vadd.f32 %v3743_v2, %v3742_v48 }
 0x1f8   : > { %v11260_v44 = vadd.f32 %v11240_v24, %v3673_v42  ;;  %3645 = vst.msk [vmem:[#allocation3 + $0x30] sm:$0xff] %vm258_vm1, %v3613_v41  ;;  %v3616_v45 = vadd.f32 %v9517_v30, %v3584_v53  ;;  %v3747_v0 = vsel %vm258_vm1, %v11257_v52, 0.0 }
 0x1f9   : > { %v3676_v47 = vld [vmem:[#allocation3 + $0x28] sm:$0xff]  ;;  %v3456_v5 = vpop.f32.mrf.mxu0 }
 0x1fa   : > { %v3745_v50 = vsel %vm258_vm1, %v11260_v44, 0.0  ;;  %3648 = vst.msk [vmem:[#allocation3 + $0x48] sm:$0xff] %vm258_vm1, %v3616_v45  ;;  %v3615_v61 = vadd.f32 %v3583_v63, %v3456_v5  ;;  %v11269_v36 = vadd.f32 %v11240_v24, %v3676_v47 }
 0x1fb   : > { %v3746_v51 = vadd.f32 %v3745_v50, %v3744_v32  ;;  %v3675_v54 = vld [vmem:[#allocation3 + $0x20] sm:$0xff]  ;;  %v9520_v57 = vpop.f32.mrf.mxu0 }
 0x1fc   : > { %v11272_v12 = vadd.f32 %v11240_v24, %v3675_v54  ;;  %3647 = vst.msk [vmem:[#allocation3 + $0x40] sm:$0xff] %vm258_vm1, %v3615_v61  ;;  %v3618_v60 = vadd.f32 %v9520_v57, %v3586_v58  ;;  %v3751_v8 = vsel %vm258_vm1, %v11269_v36, 0.0  ;;  %v3591_v32 = vld [vmem:[#allocation3 + $0x80] sm:$0xff] }
 0x1fd   : > { %v3748_v62 = vadd.f32 %v3747_v0, %v3746_v51  ;;  %v3678_v1 = vld [vmem:[#allocation3 + $0x38] sm:$0xff]  ;;  %v3466_v39 = vpop.f32.mrf.mxu0 }
 0x1fe   : > { %v3749_v15 = vsel %vm258_vm1, %v11272_v12, 0.0  ;;  %3650 = vst.msk [vmem:[#allocation3 + $0x58] sm:$0xff] %vm258_vm1, %v3618_v60  ;;  %v3617_v3 = vadd.f32 %v3585_v9, %v3466_v39  ;;  %v11281_v10 = vadd.f32 %v11240_v24, %v3678_v1  ;;  %v3594_v51 = vld [vmem:[#allocation3 + $0x98] sm:$0xff]  ;;  %v3593_v39 = vld [vmem:[#allocation3 + $0x90] sm:$0xff] }
 0x1ff   : > { %v3750_v4 = vadd.f32 %v3749_v15, %v3748_v62  ;;  %v3677_v6 = vld [vmem:[#allocation3 + $0x30] sm:$0xff]  ;;  %v9523_v13 = vpop.f32.mrf.mxu0 }
 0x200   : > { %v11284_v22 = vadd.f32 %v11240_v24, %v3677_v6  ;;  %3649 = vst.msk [vmem:[#allocation3 + $0x50] sm:$0xff] %vm258_vm1, %v3617_v3  ;;  %v3620_v11 = vadd.f32 %v9523_v13, %v3588_v7  ;;  %v3755_v20 = vsel %vm258_vm1, %v11281_v10, 0.0  ;;  %v3596_v13 = vld [vmem:[#allocation3 + $0xa8] sm:$0xff] }
 0x201   : > { %v3752_v14 = vadd.f32 %v3751_v8, %v3750_v4  ;;  %v3680_v21 = vld [vmem:[#allocation3 + $0x48] sm:$0xff]  ;;  %v3476_v46 = vpop.f32.mrf.mxu0 }
 0x202   : > { %v3753_v25 = vsel %vm258_vm1, %v11284_v22, 0.0  ;;  %3652 = vst.msk [vmem:[#allocation3 + $0x68] sm:$0xff] %vm258_vm1, %v3620_v11  ;;  %v3619_v49 = vadd.f32 %v3587_v16, %v3476_v46  ;;  %v11293_v23 = vadd.f32 %v11240_v24, %v3680_v21 }
 0x203   : > { %v3754_v26 = vadd.f32 %v3753_v25, %v3752_v14  ;;  %v3679_v17 = vld [vmem:[#allocation3 + $0x40] sm:$0xff]  ;;  %v9526_v18 = vpop.f32.mrf.mxu0 }
 0x204   : > { %v11296_v35 = vadd.f32 %v11240_v24, %v3679_v17  ;;  %3651 = vst.msk [vmem:[#allocation3 + $0x60] sm:$0xff] %vm258_vm1, %v3619_v49  ;;  %v3622_v38 = vadd.f32 %v9526_v18, %v3590_v19  ;;  %v3759_v48 = vsel %vm258_vm1, %v11293_v23, 0.0  ;;  %v3595_v25 = vld [vmem:[#allocation3 + $0xa0] sm:$0xff] }
 0x205   : > { %v3756_v56 = vadd.f32 %v3755_v20, %v3754_v26  ;;  %v3682_v28 = vld [vmem:[#allocation3 + $0x58] sm:$0xff]  ;;  %v3486_v29 = vpop.f32.mrf.mxu0 }
 0x206   : > { %v3757_v40 = vsel %vm258_vm1, %v11296_v35, 0.0  ;;  %3654 = vst.msk [vmem:[#allocation3 + $0x78] sm:$0xff] %vm258_vm1, %v3622_v38  ;;  %v3621_v27 = vadd.f32 %v3589_v43, %v3486_v29  ;;  %v11305_v41 = vadd.f32 %v11240_v24, %v3682_v28  ;;  %v3598_v20 = vld [vmem:[#allocation3 + $0xb8] sm:$0xff] }
 0x207   : > { %v3758_v33 = vadd.f32 %v3757_v40, %v3756_v56  ;;  %v3681_v34 = vld [vmem:[#allocation3 + $0x50] sm:$0xff]  ;;  %v9529_v55 = vpop.f32.mrf.mxu0 }
 0x208   : > { %v11308_v42 = vadd.f32 %v11240_v24, %v3681_v34  ;;  %3653 = vst.msk [vmem:[#allocation3 + $0x70] sm:$0xff] %vm258_vm1, %v3621_v27  ;;  %v3624_v30 = vadd.f32 %v9529_v55, %v3592_v37  ;;  %v3763_v54 = vsel %vm258_vm1, %v11305_v41, 0.0 }
 0x209   : > { %v3760_v53 = vadd.f32 %v3759_v48, %v3758_v33  ;;  %v3684_v2 = vld [vmem:[#allocation3 + $0x68] sm:$0xff]  ;;  %v3496_v45 = vpop.f32.mrf.mxu0  ;;  %v3597_v33 = vld [vmem:[#allocation3 + $0xb0] sm:$0xff] }
 0x20a   : > { %v3761_v47 = vsel %vm258_vm1, %v11308_v42, 0.0  ;;  %3656 = vst.msk [vmem:[#allocation3 + $0x88] sm:$0xff] %vm258_vm1, %v3624_v30  ;;  %v3623_v5 = vadd.f32 %v3591_v32, %v3496_v45  ;;  %v11317_v57 = vadd.f32 %v11240_v24, %v3684_v2 }
 0x20b   : > { %v3762_v63 = vadd.f32 %v3761_v47, %v3760_v53  ;;  %v3683_v50 = vld [vmem:[#allocation3 + $0x60] sm:$0xff]  ;;  %v9532_v61 = vpop.f32.mrf.mxu0  ;;  %v3600_v53 = vld [vmem:[#allocation3 + $0xc8] sm:$0xff] }
 0x20c   : > { %v11320_v58 = vadd.f32 %v11240_v24, %v3683_v50  ;;  %3655 = vst.msk [vmem:[#allocation3 + $0x80] sm:$0xff] %vm258_vm1, %v3623_v5  ;;  %v3626_v0 = vadd.f32 %v9532_v61, %v3594_v51  ;;  %v3767_v7 = vsel %vm258_vm1, %v11317_v57, 0.0  ;;  %v3599_v61 = vld [vmem:[#allocation3 + $0xc0] sm:$0xff] }
 0x20d   : > { %v3764_v60 = vadd.f32 %v3763_v54, %v3762_v63  ;;  %v3686_v62 = vld [vmem:[#allocation3 + $0x78] sm:$0xff]  ;;  %v3506_v1 = vpop.f32.mrf.mxu0 }
 0x20e   : > { %v3765_v9 = vsel %vm258_vm1, %v11320_v58, 0.0  ;;  %3658 = vst.msk [vmem:[#allocation3 + $0x98] sm:$0xff] %vm258_vm1, %v3626_v0  ;;  %v3625_v15 = vadd.f32 %v3593_v39, %v3506_v1  ;;  %v11329_v8 = vadd.f32 %v11240_v24, %v3686_v62  ;;  %v3602_v1 = vld [vmem:[#allocation3 + $0xd8] sm:$0xff] }
 0x20f   : > { %v3766_v3 = vadd.f32 %v3765_v9, %v3764_v60  ;;  %v3685_v4 = vld [vmem:[#allocation3 + $0x70] sm:$0xff]  ;;  %v9535_v6 = vpop.f32.mrf.mxu0 }
 0x210   : > { %v11332_v11 = vadd.f32 %v11240_v24, %v3685_v4  ;;  %3657 = vst.msk [vmem:[#allocation3 + $0x90] sm:$0xff] %vm258_vm1, %v3625_v15  ;;  %v3628_v14 = vadd.f32 %v9535_v6, %v3596_v13  ;;  %v3771_v38 = vsel %vm258_vm1, %v11329_v8, 0.0 }
 0x211   : > { %v3768_v21 = vadd.f32 %v3767_v7, %v3766_v3  ;;  %v3688_v46 = vld [vmem:[#allocation3 + $0x88] sm:$0xff]  ;;  %v3516_v16 = vpop.f32.mrf.mxu0  ;;  %v3601_v7 = vld [vmem:[#allocation3 + $0xd0] sm:$0xff] }
 0x212   : > { %v3769_v49 = vsel %vm258_vm1, %v11332_v11, 0.0  ;;  %3660 = vst.msk [vmem:[#allocation3 + $0xa8] sm:$0xff] %vm258_vm1, %v3628_v14  ;;  %v3627_v26 = vadd.f32 %v3595_v25, %v3516_v16  ;;  %v11341_v56 = vadd.f32 %v11240_v24, %v3688_v46 }
 0x213   : > { %v3770_v17 = vadd.f32 %v3769_v49, %v3768_v21  ;;  %v3687_v18 = vld [vmem:[#allocation3 + $0x80] sm:$0xff]  ;;  %v9538_v19 = vpop.f32.mrf.mxu0  ;;  %v3604_v49 = vld [vmem:[#allocation3 + $0xe8] sm:$0xff] }
 0x214   : > { %v11344_v28 = vadd.f32 %v11240_v24, %v3687_v18  ;;  %3659 = vst.msk [vmem:[#allocation3 + $0xa0] sm:$0xff] %vm258_vm1, %v3627_v26  ;;  %v3630_v29 = vadd.f32 %v9538_v19, %v3598_v20  ;;  %v3775_v2 = vsel %vm258_vm1, %v11341_v56, 0.0 }
 0x215   : > { %v3772_v43 = vadd.f32 %v3771_v38, %v3770_v17  ;;  %v3690_v40 = vld [vmem:[#allocation3 + $0x98] sm:$0xff]  ;;  %v3526_v27 = vpop.f32.mrf.mxu0 }
 0x216   : > { %v3773_v34 = vsel %vm258_vm1, %v11344_v28, 0.0  ;;  %3662 = vst.msk [vmem:[#allocation3 + $0xb8] sm:$0xff] %vm258_vm1, %v3630_v29  ;;  %v3629_v55 = vadd.f32 %v3597_v33, %v3526_v27  ;;  %v11353_v45 = vadd.f32 %v11240_v24, %v3690_v40 }
 0x217   : > { %v3774_v37 = vadd.f32 %v3773_v34, %v3772_v43  ;;  %v3689_v48 = vld [vmem:[#allocation3 + $0x90] sm:$0xff]  ;;  %v9541_v30 = vpop.f32.mrf.mxu0  ;;  %v3603_v43 = vld [vmem:[#allocation3 + $0xe0] sm:$0xff] }
 0x218   : > { %v11356_v32 = vadd.f32 %v11240_v24, %v3689_v48  ;;  %3661 = vst.msk [vmem:[#allocation3 + $0xb0] sm:$0xff] %vm258_vm1, %v3629_v55  ;;  %v3632_v47 = vadd.f32 %v9541_v30, %v3600_v53  ;;  %v3779_v39 = vsel %vm258_vm1, %v11353_v45, 0.0 }
 0x219   : > { %v3776_v5 = vadd.f32 %v3775_v2, %v3774_v37  ;;  %v3692_v63 = vld [vmem:[#allocation3 + $0xa8] sm:$0xff]  ;;  %v3536_v50 = vpop.f32.mrf.mxu0  ;;  %v3606_v37 = vld [vmem:[#allocation3 + $0xf8] sm:$0xff] }
 0x21a   : > { %v3777_v51 = vsel %vm258_vm1, %v11356_v32, 0.0  ;;  %3664 = vst.msk [vmem:[#allocation3 + $0xc8] sm:$0xff] %vm258_vm1, %v3632_v47  ;;  %v3631_v54 = vadd.f32 %v3599_v61, %v3536_v50  ;;  %v11365_v9 = vadd.f32 %v11240_v24, %v3692_v63  ;;  %v3605_v50 = vld [vmem:[#allocation3 + $0xf0] sm:$0xff] }
 0x21b   : > { %v3778_v0 = vadd.f32 %v3777_v51, %v3776_v5  ;;  %v3691_v60 = vld [vmem:[#allocation3 + $0xa0] sm:$0xff]  ;;  %v9544_v62 = vpop.f32.mrf.mxu0 }
 0x21c   : > { %v11368_v15 = vadd.f32 %v11240_v24, %v3691_v60  ;;  %3663 = vst.msk [vmem:[#allocation3 + $0xc0] sm:$0xff] %vm258_vm1, %v3631_v54  ;;  %v3634_v3 = vadd.f32 %v9544_v62, %v3602_v1  ;;  %v3783_v26 = vsel %vm258_vm1, %v11365_v9, 0.0 }
 0x21d   : > { %v3780_v4 = vadd.f32 %v3779_v39, %v3778_v0  ;;  %v3694_v6 = vld [vmem:[#allocation3 + $0xb8] sm:$0xff]  ;;  %v3546_v13 = vpop.f32.mrf.mxu0 }
 0x21e   : > { %v3781_v14 = vsel %vm258_vm1, %v11368_v15, 0.0  ;;  %3666 = vst.msk [vmem:[#allocation3 + $0xd8] sm:$0xff] %vm258_vm1, %v3634_v3  ;;  %v3633_v21 = vadd.f32 %v3601_v7, %v3546_v13  ;;  %v11377_v17 = vadd.f32 %v11240_v24, %v3694_v6 }
 0x21f   : > { %v3782_v46 = vadd.f32 %v3781_v14, %v3780_v4  ;;  %v3693_v16 = vld [vmem:[#allocation3 + $0xb0] sm:$0xff]  ;;  %v9547_v25 = vpop.f32.mrf.mxu0 }
 0x220   : > { %v11380_v18 = vadd.f32 %v11240_v24, %v3693_v16  ;;  %3665 = vst.msk [vmem:[#allocation3 + $0xd0] sm:$0xff] %vm258_vm1, %v3633_v21  ;;  %v3636_v19 = vadd.f32 %v9547_v25, %v3604_v49  ;;  %v3787_v48 = vsel %vm258_vm1, %v11377_v17, 0.0 }
 0x221   : > { %v3784_v20 = vadd.f32 %v3783_v26, %v3782_v46  ;;  %v3696_v38 = vld [vmem:[#allocation3 + $0xc8] sm:$0xff]  ;;  %v3556_v29 = vpop.f32.mrf.mxu0 }
 0x222   : > { %v3785_v40 = vsel %vm258_vm1, %v11380_v18, 0.0  ;;  %3668 = vst.msk [vmem:[#allocation3 + $0xe8] sm:$0xff] %vm258_vm1, %v3636_v19  ;;  %v3635_v27 = vadd.f32 %v3603_v43, %v3556_v29  ;;  %v11389_v30 = vadd.f32 %v11240_v24, %v3696_v38 }
 0x223   : > { %v3786_v33 = vadd.f32 %v3785_v40, %v3784_v20  ;;  %v3695_v34 = vld [vmem:[#allocation3 + $0xc0] sm:$0xff]  ;;  %v9550_v55 = vpop.f32.mrf.mxu0 }
 0x224   : > { %v11392_v53 = vadd.f32 %v11240_v24, %v3695_v34  ;;  %3667 = vst.msk [vmem:[#allocation3 + $0xe0] sm:$0xff] %vm258_vm1, %v3635_v27  ;;  %v3638_v2 = vadd.f32 %v9550_v55, %v3606_v37  ;;  %v3791_v60 = vsel %vm258_vm1, %v11389_v30, 0.0 }
 0x225   : > { %v3788_v47 = vadd.f32 %v3787_v48, %v3786_v33  ;;  %v3698_v5 = vld [vmem:[#allocation3 + $0xd8] sm:$0xff]  ;;  %v3566_v63 = vpop.f32.mrf.mxu0 }
 0x226   : > { %v3789_v61 = vsel %vm258_vm1, %v11392_v53, 0.0  ;;  %3670 = vst.msk [vmem:[#allocation3 + $0xf8] sm:$0xff] %vm258_vm1, %v3638_v2  ;;  %v3637_v51 = vadd.f32 %v3605_v50, %v3566_v63  ;;  %v11401_v62 = vadd.f32 %v11240_v24, %v3698_v5  ;;  %v11446_v50 = vld [vmem:[%s13484_s3 + $0x18] sm:$0xf] }
 0x227   : > { %v3790_v54 = vadd.f32 %v3789_v61, %v3788_v47  ;;  %v3697_v0 = vld [vmem:[#allocation3 + $0xd0] sm:$0xff] }
 0x228   : > { %v11404_v1 = vadd.f32 %v11240_v24, %v3697_v0  ;;  %3669 = vst.msk [vmem:[#allocation3 + $0xf0] sm:$0xff] %vm258_vm1, %v3637_v51  ;;  %v3795_v7 = vsel %vm258_vm1, %v11401_v62, 0.0  ;;  %v4157_v47 = vld [vmem:[%s13484_s3] sm:$0xf] }
 0x229   : > { %v3792_v39 = vadd.f32 %v3791_v60, %v3790_v54  ;;  %v3700_v3 = vld [vmem:[#allocation3 + $0xe8] sm:$0xff]  ;;  %9551 = vmatprep.subr.msk.mxu1 %vm502_vm0, %v4157_v47 }
 0x22a   : > { %v3793_v4 = vsel %vm258_vm1, %v11404_v1, 0.0  ;;  %v11412_v14 = vadd.f32 %v11240_v24, %v3700_v3  ;;  %9552 = vmatpush3.msk.msra.mxu1 %vm502_vm0, %v4157_v47 }
 0x22b   : > { %v3794_v6 = vadd.f32 %v3793_v4, %v3792_v39  ;;  %v3699_v13 = vld [vmem:[#allocation3 + $0xe0] sm:$0xff]  ;;  %9651 = vmatprep.subr.msk.mxu1 %vm502_vm0, %v11446_v50 }
 0x22c   : > { %v11415_v21 = vadd.f32 %v11240_v24, %v3699_v13  ;;  %v3799_v19 = vsel %vm258_vm1, %v11412_v14, 0.0 }
 0x22d   : > { %v3796_v46 = vadd.f32 %v3795_v7, %v3794_v6  ;;  %v3702_v16 = vld [vmem:[#allocation3 + $0xf8] sm:$0xff] }
 0x22e   : > { %v3797_v25 = vsel %vm258_vm1, %v11415_v21, 0.0  ;;  %v11422_v20 = vadd.f32 %v11240_v24, %v3702_v16 }
 0x22f   : > { %v3798_v49 = vadd.f32 %v3797_v25, %v3796_v46  ;;  %v3701_v26 = vld [vmem:[#allocation3 + $0xf0] sm:$0xff] }
 0x230   : > { %v11425_v38 = vadd.f32 %v11240_v24, %v3701_v26  ;;  %v3803_v27 = vsel %vm258_vm1, %v11422_v20, 0.0  ;;  %v8230_v24 = vld [vmem:[%s13484_s3 + $0xc] sm:$0xf] }
 0x231   : > { %v3800_v29 = vadd.f32 %v3799_v19, %v3798_v49  ;;  %9601 = vmatprep.subr.msk.mxu0 %vm502_vm0, %v8230_v24 }
 0x232   : > { %v3801_v43 = vsel %vm258_vm1, %v11425_v38, 0.0  ;;  %9602 = vmatpush3.msk.msra.mxu0 %vm502_vm0, %v8230_v24 }
 0x233   : > { %v3802_v40 = vadd.f32 %v3801_v43, %v3800_v29 }
 0x235   : > { %v3804_v33 = vadd.f32 %v3803_v27, %v3802_v40 }
 0x237   : > { %v3805_v34 = vrot.slane %v3804_v33, 4 }
 0x239   : > { %v3806_v55 = vadd.f32 %v3805_v34, %v3804_v33 }
 0x23b   : > { %v3807_v37 = vrot.slane %v3806_v55, 2 }
 0x23d   : > { %v3808_v48 = vadd.f32 %v3807_v37, %v3806_v55 }
 0x23f   : > { %v3809_v2 = vrot.slane %v3808_v48, 1 }
 0x241   : > { %v3810_v5 = vadd.f32 %v3809_v2, %v3808_v48 }
 0x243   : > { %v11441_v63 = vmul.f32 0.00390625, %v3810_v5 }
 0x245   : > { %v11450_v61 = vsub.f32 %v11248_v59, %v11441_v63  ;;  %v11454_v51 = vsub.f32 %v11245_v31, %v11441_v63  ;;  %v11460_v54 = vsub.f32 %v11260_v44, %v11441_v63  ;;  %v11464_v0 = vsub.f32 %v11257_v52, %v11441_v63 }
 0x246   : > { %v11472_v31 = vsub.f32 %v11272_v12, %v11441_v63  ;;  %v11478_v44 = vsub.f32 %v11269_v36, %v11441_v63  ;;  %v11486_v13 = vsub.f32 %v11284_v22, %v11441_v63  ;;  %v11493_v36 = vsub.f32 %v11281_v10, %v11441_v63 }
 0x247   : > { %v3845_v60 = vmul.f32 %v11450_v61, %v11450_v61  ;;  %v3846_v59 = vmul.f32 %v11454_v51, %v11454_v51  ;;  %v3847_v39 = vmul.f32 %v11460_v54, %v11460_v54  ;;  %v3848_v52 = vmul.f32 %v11464_v0, %v11464_v0 }
 0x248   : > { %v3849_v12 = vmul.f32 %v11472_v31, %v11472_v31  ;;  %v3850_v16 = vmul.f32 %v11478_v44, %v11478_v44  ;;  %v11500_v22 = vsub.f32 %v11296_v35, %v11441_v63  ;;  %v3851_v26 = vmul.f32 %v11486_v13, %v11486_v13 }
 0x249   : > { %v3877_v3 = vsel %vm258_vm1, %v3845_v60, 0.0  ;;  %v3878_v4 = vsel %vm258_vm1, %v3846_v59, 0.0  ;;  %v3880_v7 = vsel %vm258_vm1, %v3847_v39, 0.0  ;;  %v3882_v25 = vsel %vm258_vm1, %v3848_v52, 0.0 }
 0x24a   : > { %v3879_v6 = vadd.f32 %v3878_v4, %v3877_v3  ;;  %v3884_v19 = vsel %vm258_vm1, %v3849_v12, 0.0  ;;  %v11507_v10 = vsub.f32 %v11293_v23, %v11441_v63  ;;  %v3852_v43 = vmul.f32 %v11493_v36, %v11493_v36 }
 0x24b   : > { %v3886_v40 = vsel %vm258_vm1, %v3850_v16, 0.0  ;;  %v11514_v35 = vsub.f32 %v11308_v42, %v11441_v63  ;;  %v3853_v33 = vmul.f32 %v11500_v22, %v11500_v22  ;;  %v3888_v34 = vsel %vm258_vm1, %v3851_v26, 0.0 }
 0x24c   : > { %v3881_v46 = vadd.f32 %v3880_v7, %v3879_v6  ;;  %v11521_v23 = vsub.f32 %v11305_v41, %v11441_v63  ;;  %v3854_v37 = vmul.f32 %v11507_v10, %v11507_v10  ;;  %v3890_v48 = vsel %vm258_vm1, %v3852_v43, 0.0 }
 0x24d   : > { %v11528_v42 = vsub.f32 %v11320_v58, %v11441_v63  ;;  %v3855_v47 = vmul.f32 %v11514_v35, %v11514_v35  ;;  %v3892_v24 = vsel %vm258_vm1, %v3853_v33, 0.0  ;;  %v11535_v41 = vsub.f32 %v11317_v57, %v11441_v63 }
 0x24e   : > { %v3883_v49 = vadd.f32 %v3882_v25, %v3881_v46  ;;  %v3856_v60 = vmul.f32 %v11521_v23, %v11521_v23  ;;  %v3894_v59 = vsel %vm258_vm1, %v3854_v37, 0.0  ;;  %v11542_v58 = vsub.f32 %v11332_v11, %v11441_v63 }
 0x24f   : > { %v3857_v52 = vmul.f32 %v11528_v42, %v11528_v42  ;;  %v3896_v3 = vsel %vm258_vm1, %v3855_v47, 0.0  ;;  %v11549_v57 = vsub.f32 %v11329_v8, %v11441_v63  ;;  %v3858_v6 = vmul.f32 %v11535_v41, %v11535_v41 }
 0x250   : > { %v3885_v29 = vadd.f32 %v3884_v19, %v3883_v49  ;;  %v3898_v12 = vsel %vm258_vm1, %v3856_v60, 0.0  ;;  %v11556_v11 = vsub.f32 %v11344_v28, %v11441_v63  ;;  %v3859_v46 = vmul.f32 %v11542_v58, %v11542_v58 }
 0x251   : > { %v3900_v16 = vsel %vm258_vm1, %v3857_v52, 0.0  ;;  %v11563_v8 = vsub.f32 %v11341_v56, %v11441_v63  ;;  %v3860_v49 = vmul.f32 %v11549_v57, %v11549_v57  ;;  %v3902_v26 = vsel %vm258_vm1, %v3858_v6, 0.0 }
 0x252   : > { %v3887_v27 = vadd.f32 %v3886_v40, %v3885_v29  ;;  %v11570_v28 = vsub.f32 %v11356_v32, %v11441_v63  ;;  %v3861_v29 = vmul.f32 %v11556_v11, %v11556_v11  ;;  %v3904_v43 = vsel %vm258_vm1, %v3859_v46, 0.0 }
 0x253   : > { %v11577_v56 = vsub.f32 %v11353_v45, %v11441_v63  ;;  %v3906_v33 = vsel %vm258_vm1, %v3860_v49, 0.0  ;;  %v11584_v32 = vsub.f32 %v11368_v15, %v11441_v63  ;;  %v11591_v45 = vsub.f32 %v11365_v9, %v11441_v63 }
 0x254   : > { %v3889_v55 = vadd.f32 %v3888_v34, %v3887_v27  ;;  %v3862_v27 = vmul.f32 %v11563_v8, %v11563_v8  ;;  %v3908_v37 = vsel %vm258_vm1, %v3861_v29, 0.0  ;;  %v11598_v15 = vsub.f32 %v11380_v18, %v11441_v63 }
 0x255   : > { %v11605_v9 = vsub.f32 %v11377_v17, %v11441_v63  ;;  %v11612_v18 = vsub.f32 %v11392_v53, %v11441_v63  ;;  %v11619_v17 = vsub.f32 %v11389_v30, %v11441_v63  ;;  %v11626_v53 = vsub.f32 %v11404_v1, %v11441_v63  ;;  %v11641_v1 = vld [vmem:[%s13484_s3 + $0x4] sm:$0xf] }
 0x256   : > { %v3891_v2 = vadd.f32 %v3890_v48, %v3889_v55  ;;  %v3863_v55 = vmul.f32 %v11570_v28, %v11570_v28  ;;  %v3910_v47 = vsel %vm258_vm1, %v3862_v27, 0.0  ;;  %v11633_v30 = vsub.f32 %v11401_v62, %v11441_v63  ;;  %9701 = vmatprep.subr.msk.mxu0 %vm502_vm0, %v11641_v1 }
 0x257   : > { %v3871_v27 = vmul.f32 %v11626_v53, %v11626_v53 }
 0x258   : > { %v3893_v5 = vadd.f32 %v3892_v24, %v3891_v2  ;;  %v3864_v2 = vmul.f32 %v11577_v56, %v11577_v56  ;;  %v3912_v60 = vsel %vm258_vm1, %v3863_v55, 0.0  ;;  %v3872_v55 = vmul.f32 %v11633_v30, %v11633_v30 }
 0x25a   : > { %v3895_v39 = vadd.f32 %v3894_v59, %v3893_v5  ;;  %v3865_v5 = vmul.f32 %v11584_v32, %v11584_v32  ;;  %v3914_v52 = vsel %vm258_vm1, %v3864_v2, 0.0 }
 0x25c   : > { %v3897_v4 = vadd.f32 %v3896_v3, %v3895_v39  ;;  %v3866_v39 = vmul.f32 %v11591_v45, %v11591_v45  ;;  %v3916_v6 = vsel %vm258_vm1, %v3865_v5, 0.0  ;;  %v3844_v5 = vsub.f32 %v11422_v20, %v11441_v63 }
 0x25e   : > { %v3899_v7 = vadd.f32 %v3898_v12, %v3897_v4  ;;  %v3867_v4 = vmul.f32 %v11598_v15, %v11598_v15  ;;  %v3918_v46 = vsel %vm258_vm1, %v3866_v39, 0.0 }
 0x260   : > { %v3901_v25 = vadd.f32 %v3900_v16, %v3899_v7  ;;  %v3868_v7 = vmul.f32 %v11605_v9, %v11605_v9  ;;  %v3920_v49 = vsel %vm258_vm1, %v3867_v4, 0.0 }
 0x262   : > { %v3903_v19 = vadd.f32 %v3902_v26, %v3901_v25  ;;  %v3869_v25 = vmul.f32 %v11612_v18, %v11612_v18  ;;  %v3922_v29 = vsel %vm258_vm1, %v3868_v7, 0.0 }
 0x264   : > { %v3905_v40 = vadd.f32 %v3904_v43, %v3903_v19  ;;  %v3870_v19 = vmul.f32 %v11619_v17, %v11619_v17  ;;  %v3924_v62 = vsel %vm258_vm1, %v3869_v25, 0.0 }
 0x266   : > { %v3907_v34 = vadd.f32 %v3906_v33, %v3905_v40  ;;  %v11645_v40 = vsub.f32 %v11415_v21, %v11441_v63 }
 0x268   : > { %v3909_v48 = vadd.f32 %v3908_v37, %v3907_v34  ;;  %v11654_v34 = vsub.f32 %v11412_v14, %v11441_v63  ;;  %v3926_v37 = vsel %vm258_vm1, %v3870_v19, 0.0  ;;  %v3873_v2 = vmul.f32 %v11645_v40, %v11645_v40 }
 0x26a   : > { %v3911_v24 = vadd.f32 %v3910_v47, %v3909_v48  ;;  %v3843_v48 = vsub.f32 %v11425_v38, %v11441_v63  ;;  %v3928_v47 = vsel %vm258_vm1, %v3871_v27, 0.0  ;;  %v3874_v14 = vmul.f32 %v11654_v34, %v11654_v34 }
 0x26b   : > { %v3876_v38 = vmul.f32 %v3844_v5, %v3844_v5 }
 0x26c   : > { %v3913_v59 = vadd.f32 %v3912_v60, %v3911_v24  ;;  %v3930_v60 = vsel %vm258_vm1, %v3872_v55, 0.0  ;;  %v3875_v39 = vmul.f32 %v3843_v48, %v3843_v48  ;;  %v3934_v4 = vsel %vm258_vm1, %v3874_v14, 0.0 }
 0x26e   : > { %v3915_v3 = vadd.f32 %v3914_v52, %v3913_v59  ;;  %v3932_v52 = vsel %vm258_vm1, %v3873_v2, 0.0 }
 0x270   : > { %v3917_v12 = vadd.f32 %v3916_v6, %v3915_v3 }
 0x272   : > { %v3919_v16 = vadd.f32 %v3918_v46, %v3917_v12  ;;  %v3936_v12 = vsel %vm258_vm1, %v3875_v39, 0.0  ;;  %v3938_v46 = vsel %vm258_vm1, %v3876_v38, 0.0 }
 0x274   : > { %v3921_v26 = vadd.f32 %v3920_v49, %v3919_v16 }
 0x276   : > { %v3923_v43 = vadd.f32 %v3922_v29, %v3921_v26 }
 0x278   : > { %v3925_v33 = vadd.f32 %v3924_v62, %v3923_v43 }
 0x27a   : > { %v3927_v21 = vadd.f32 %v3926_v37, %v3925_v33 }
 0x27c   : > { %v3929_v24 = vadd.f32 %v3928_v47, %v3927_v21 }
 0x27e   : > { %v3931_v59 = vadd.f32 %v3930_v60, %v3929_v24 }
 0x280   : > { %v3933_v3 = vadd.f32 %v3932_v52, %v3931_v59 }
 0x282   : > { %v3935_v6 = vadd.f32 %v3934_v4, %v3933_v3 }
 0x284   : > { %v3937_v7 = vadd.f32 %v3936_v12, %v3935_v6 }
 0x286   : > { %v3939_v20 = vadd.f32 %v3938_v46, %v3937_v7 }
 0x288   : > { %v3940_v63 = vrot.slane %v3939_v20, 4 }
 0x28a   : > { %v3941_v16 = vadd.f32 %v3940_v63, %v3939_v20 }
 0x28c   : > { %v3942_v25 = vrot.slane %v3941_v16, 2 }
 0x28e   : > { %v3943_v49 = vadd.f32 %v3942_v25, %v3941_v16 }
 0x290   : > { %v3944_v26 = vrot.slane %v3943_v49, 1 }
 0x292   : > { %v3945_v19 = vadd.f32 %v3944_v26, %v3943_v49 }
 0x294   : > { %v3946_v29 = vmul.f32 0.00390625, %v3945_v19 }
 0x296   : > { %v3947_v43 = vadd.f32 1e-05, %v3946_v29 }
 0x298   : > { %10009 = vrsqrt.f32 %v3947_v43 }
 0x2a5   : > { %v10010_v27 = vpop.eup %10009 }
 0x2a6   : > { %v3979_v62 = vmul.f32 %v10010_v27, %v3843_v48  ;;  %v3949_v33 = vmul.f32 %v10010_v27, %v11450_v61  ;;  %v3950_v55 = vmul.f32 %v10010_v27, %v11454_v51  ;;  %v3951_v37 = vmul.f32 %v10010_v27, %v11460_v54 }
 0x2a7   : > { %v3952_v21 = vmul.f32 %v10010_v27, %v11464_v0  ;;  %v3953_v2 = vmul.f32 %v10010_v27, %v11472_v31  ;;  %v3954_v47 = vmul.f32 %v10010_v27, %v11478_v44  ;;  %v3955_v24 = vmul.f32 %v10010_v27, %v11486_v13 }
 0x2a8   : > { %v4011_v14 = vmax.f32 %v3979_v62, 0.0  ;;  %v3956_v60 = vmul.f32 %v10010_v27, %v11493_v36  ;;  %v3957_v59 = vmul.f32 %v10010_v27, %v11500_v22  ;;  %v3958_v48 = vmul.f32 %v10010_v27, %v11507_v10 }
 0x2a9   : > { %v3959_v61 = vmul.f32 %v10010_v27, %v11514_v35  ;;  %v3960_v51 = vmul.f32 %v10010_v27, %v11521_v23  ;;  %v3961_v54 = vmul.f32 %v10010_v27, %v11528_v42  ;;  %v3962_v0 = vmul.f32 %v10010_v27, %v11535_v41 }
 0x2aa   : > { %v3963_v31 = vmul.f32 %v10010_v27, %v11542_v58  ;;  %v11689_v44 = vmul.f32 %v10010_v27, %v11549_v57  ;;  %v11692_v13 = vmul.f32 %v10010_v27, %v11556_v11  ;;  %v11695_v36 = vmul.f32 %v10010_v27, %v11563_v8  ;;  %4043 = vst.msk [vmem:[#allocation2 + $0x181] sm:$0xff] %vm258_vm1, %v4011_v14 }
 0x2ab   : > { %v11699_v22 = vmul.f32 %v10010_v27, %v11570_v28  ;;  %v11702_v10 = vmul.f32 %v10010_v27, %v11577_v56  ;;  %v11705_v35 = vmul.f32 %v10010_v27, %v11584_v32  ;;  %v11708_v23 = vmul.f32 %v10010_v27, %v11591_v45 }
 0x2ac   : > { %v11711_v42 = vmul.f32 %v10010_v27, %v11598_v15  ;;  %v11714_v41 = vmul.f32 %v10010_v27, %v11605_v9  ;;  %v11717_v58 = vmul.f32 %v10010_v27, %v11612_v18  ;;  %v11720_v57 = vmul.f32 %v10010_v27, %v11619_v17 }
 0x2ad   : > { %v11723_v11 = vmul.f32 %v10010_v27, %v11626_v53  ;;  %v11726_v8 = vmul.f32 %v10010_v27, %v11633_v30  ;;  %v11729_v28 = vmul.f32 %v10010_v27, %v11645_v40  ;;  %v11732_v56 = vmul.f32 %v10010_v27, %v11654_v34 }
 0x2ae   : > { %v11734_v32 = vmul.f32 %v10010_v27, %v3844_v5  ;;  %v3981_v45 = vmax.f32 %v3949_v33, 0.0  ;;  %v3982_v15 = vmax.f32 %v3950_v55, 0.0  ;;  %v3983_v9 = vmax.f32 %v3951_v37, 0.0 }
 0x2af   : > { %v3984_v18 = vmax.f32 %v3952_v21, 0.0  ;;  %v3985_v17 = vmax.f32 %v3953_v2, 0.0  ;;  %v3986_v39 = vmax.f32 %v3954_v47, 0.0  ;;  %v3987_v52 = vmax.f32 %v3955_v24, 0.0 }
 0x2b0   : > { %v3988_v53 = vmax.f32 %v3956_v60, 0.0  ;;  %v3989_v3 = vmax.f32 %v3957_v59, 0.0  ;;  %v3990_v38 = vmax.f32 %v3958_v48, 0.0  ;;  %v3991_v30 = vmax.f32 %v3959_v61, 0.0  ;;  %4013 = vst.msk [vmem:[#allocation2 + $0x19] sm:$0xff] %vm258_vm1, %v3981_v45  ;;  %4014 = vst.msk [vmem:[#allocation2 + $0x21] sm:$0xff] %vm258_vm1, %v3982_v15 }
 0x2b1   : > { %4015 = vst.msk [vmem:[#allocation2 + $0x31] sm:$0xff] %vm258_vm1, %v3983_v9  ;;  %4045 = vst.msk [vmem:[#allocation2 + $0x1] sm:$0xff] %vm258_vm1, %v3983_v9  ;;  %v3992_v40 = vmax.f32 %v3960_v51, 0.0  ;;  %v3993_v34 = vmax.f32 %v3961_v54, 0.0  ;;  %v3994_v5 = vmax.f32 %v3962_v0, 0.0  ;;  %v3995_v4 = vmax.f32 %v3963_v31, 0.0 }
 0x2b2   : > { %4016 = vst.msk [vmem:[#allocation2 + $0x39] sm:$0xff] %vm258_vm1, %v3984_v18  ;;  %4017 = vst.msk [vmem:[#allocation2 + $0x49] sm:$0xff] %vm258_vm1, %v3985_v17  ;;  %v4065_v6 = vld [vmem:[#allocation2 + $0x182] sm:$0x1]  ;;  %v3996_v12 = vmax.f32 %v11689_v44, 0.0  ;;  %v3997_v7 = vmax.f32 %v11692_v13, 0.0 }
 0x2b3   : > { %4018 = vst.msk [vmem:[#allocation2 + $0x51] sm:$0xff] %vm258_vm1, %v3986_v39  ;;  %4019 = vst.msk [vmem:[#allocation2 + $0x61] sm:$0xff] %vm258_vm1, %v3987_v52  ;;  %v3998_v46 = vmax.f32 %v11695_v36, 0.0  ;;  %v3999_v20 = vmax.f32 %v11699_v22, 0.0  ;;  %v4000_v63 = vmax.f32 %v11702_v10, 0.0  ;;  %v4001_v16 = vmax.f32 %v11705_v35, 0.0 }
 0x2b4   : > { %4046 = vst.msk [vmem:[#allocation2 + $0x9] sm:$0xff] %vm258_vm1, %v3984_v18  ;;  %4020 = vst.msk [vmem:[#allocation2 + $0x69] sm:$0xff] %vm258_vm1, %v3988_v53  ;;  %v4002_v25 = vmax.f32 %v11708_v23, 0.0  ;;  %v4003_v49 = vmax.f32 %v11711_v42, 0.0  ;;  %v4004_v26 = vmax.f32 %v11714_v41, 0.0  ;;  %v4005_v19 = vmax.f32 %v11717_v58, 0.0 }
 0x2b5   : > { %4021 = vst.msk [vmem:[#allocation2 + $0x79] sm:$0xff] %vm258_vm1, %v3989_v3  ;;  %4022 = vst.msk [vmem:[#allocation2 + $0x81] sm:$0xff] %vm258_vm1, %v3990_v38  ;;  %v4006_v29 = vmax.f32 %v11720_v57, 0.0  ;;  %v4007_v43 = vmax.f32 %v11723_v11, 0.0  ;;  %v4008_v27 = vmax.f32 %v11726_v8, 0.0  ;;  %v4009_v62 = vmax.f32 %v11729_v28, 0.0 }
 0x2b6   : > { %4023 = vst.msk [vmem:[#allocation2 + $0x91] sm:$0xff] %vm258_vm1, %v3991_v30  ;;  %4024 = vst.msk [vmem:[#allocation2 + $0x99] sm:$0xff] %vm258_vm1, %v3992_v40  ;;  %v4010_v33 = vmax.f32 %v11732_v56, 0.0  ;;  %v4012_v55 = vmax.f32 %v11734_v32, 0.0  ;;  %v11809_v10 = vld [vmem:[%s13484_s3 + $0x10] sm:$0xf] }
 0x2b7   : > { %4083 = vst.msk [vmem:[#allocation2 + $0x180] sm:$0x1] %vm314_vm2, %v4065_v6  ;;  %v4050_v21 = vld [vmem:[#allocation2 + $0x1a] sm:$0x1]  ;;  %v4124_v36 = vld [vmem:[#allocation2 + $0x20] sm:$0xff] }
 0x2b8   : > { %4025 = vst.msk [vmem:[#allocation2 + $0xa9] sm:$0xff] %vm258_vm1, %v3993_v34  ;;  %4026 = vst.msk [vmem:[#allocation2 + $0xb1] sm:$0xff] %vm258_vm1, %v3994_v5  ;;  %v4049_v37 = vld [vmem:[#allocation2 + $0x2] sm:$0x1]  ;;  %v4051_v2 = vld [vmem:[#allocation2 + $0x32] sm:$0x1] }
 0x2b9   : > { %4027 = vst.msk [vmem:[#allocation2 + $0xc1] sm:$0xff] %vm258_vm1, %v3995_v4  ;;  %4028 = vst.msk [vmem:[#allocation2 + $0xc9] sm:$0xff] %vm258_vm1, %v3996_v12  ;;  %v4052_v47 = vld [vmem:[#allocation2 + $0x4a] sm:$0x1]  ;;  %v11814_v35 = vld [vmem:[%s13484_s3 + $0x1c] sm:$0xf] }
 0x2ba   : > { %4029 = vst.msk [vmem:[#allocation2 + $0xd9] sm:$0xff] %vm258_vm1, %v3997_v7  ;;  %4030 = vst.msk [vmem:[#allocation2 + $0xe1] sm:$0xff] %vm258_vm1, %v3998_v46  ;;  %v4053_v24 = vld [vmem:[#allocation2 + $0x62] sm:$0x1]  ;;  %v11826_v58 = vld [vmem:[#allocation2 + $0x38] sm:$0xff] }
 0x2bb   : > { %4031 = vst.msk [vmem:[#allocation2 + $0xf1] sm:$0xff] %vm258_vm1, %v3999_v20  ;;  %4032 = vst.msk [vmem:[#allocation2 + $0xf9] sm:$0xff] %vm258_vm1, %v4000_v63  ;;  %v4122_v13 = vld [vmem:[#allocation2 + $0x8] sm:$0xff]  ;;  %v4086_v18 = vld [vmem:[#allocation2 + $0x27] sm:$0x1] }
 0x2bc   : > { %4033 = vst.msk [vmem:[#allocation2 + $0x109] sm:$0xff] %vm258_vm1, %v4001_v16  ;;  %4034 = vst.msk [vmem:[#allocation2 + $0x111] sm:$0xff] %vm258_vm1, %v4002_v25  ;;  %v4054_v14 = vld [vmem:[#allocation2 + $0x7a] sm:$0x1]  ;;  %v11854_v11 = vld [vmem:[#allocation2 + $0x68] sm:$0xff] }
 0x2bd   : > { %4035 = vst.msk [vmem:[#allocation2 + $0x121] sm:$0xff] %vm258_vm1, %v4003_v49  ;;  %4036 = vst.msk [vmem:[#allocation2 + $0x129] sm:$0xff] %vm258_vm1, %v4004_v26  ;;  %v4055_v60 = vld [vmem:[#allocation2 + $0x92] sm:$0x1]  ;;  %v11866_v28 = vld [vmem:[#allocation2 + $0x80] sm:$0xff] }
 0x2be   : > { %4037 = vst.msk [vmem:[#allocation2 + $0x139] sm:$0xff] %vm258_vm1, %v4005_v19  ;;  %4038 = vst.msk [vmem:[#allocation2 + $0x141] sm:$0xff] %vm258_vm1, %v4006_v29  ;;  %v11879_v45 = vld [vmem:[#allocation2 + $0x98] sm:$0xff]  ;;  %v4085_v9 = vld [vmem:[#allocation2 + $0xf] sm:$0x1] }
 0x2bf   : > { %4039 = vst.msk [vmem:[#allocation2 + $0x151] sm:$0xff] %vm258_vm1, %v4007_v43  ;;  %4040 = vst.msk [vmem:[#allocation2 + $0x159] sm:$0xff] %vm258_vm1, %v4008_v27  ;;  %v4056_v59 = vld [vmem:[#allocation2 + $0xaa] sm:$0x1]  ;;  %v4087_v17 = vld [vmem:[#allocation2 + $0x3f] sm:$0x1] }
 0x2c0   : > { %4041 = vst.msk [vmem:[#allocation2 + $0x169] sm:$0xff] %vm258_vm1, %v4009_v62  ;;  %4042 = vst.msk [vmem:[#allocation2 + $0x171] sm:$0xff] %vm258_vm1, %v4010_v33  ;;  %v4057_v48 = vld [vmem:[#allocation2 + $0xc2] sm:$0x1]  ;;  %v4088_v39 = vld [vmem:[#allocation2 + $0x57] sm:$0x1] }
 0x2c1   : > { %4044 = vst.msk [vmem:[#allocation2 + $0x189] sm:$0xff] %vm258_vm1, %v4012_v55  ;;  %4047 = vst.msk [vmem:[#allocation2 + $0x199] sm:$0xff] %vm258_vm1, %v4009_v62  ;;  %v4058_v61 = vld [vmem:[#allocation2 + $0xda] sm:$0x1]  ;;  %v4089_v52 = vld [vmem:[#allocation2 + $0x6f] sm:$0x1] }
 0x2c2   : > { %4048 = vst.msk [vmem:[#allocation2 + $0x1a1] sm:$0xff] %vm258_vm1, %v4010_v33  ;;  %v4059_v51 = vld [vmem:[#allocation2 + $0xf2] sm:$0x1]  ;;  %v4090_v3 = vld [vmem:[#allocation2 + $0x87] sm:$0x1]  ;;  %v11912_v6 = vld [vmem:[#allocation2 + $0xc8] sm:$0xff] }
 0x2c3   : > { %4067 = vst.msk [vmem:[#allocation2] sm:$0x1] %vm314_vm2, %v4049_v37  ;;  %4068 = vst.msk [vmem:[#allocation2 + $0x18] sm:$0x1] %vm314_vm2, %v4050_v21  ;;  %v4060_v54 = vld [vmem:[#allocation2 + $0x10a] sm:$0x1] }
 0x2c4   : > { %4069 = vst.msk [vmem:[#allocation2 + $0x30] sm:$0x1] %vm314_vm2, %v4051_v2  ;;  %4070 = vst.msk [vmem:[#allocation2 + $0x48] sm:$0x1] %vm314_vm2, %v4052_v47  ;;  %v4061_v44 = vld [vmem:[#allocation2 + $0x122] sm:$0x1] }
 0x2c5   : > { %4071 = vst.msk [vmem:[#allocation2 + $0x60] sm:$0x1] %vm314_vm2, %v4053_v24  ;;  %4072 = vst.msk [vmem:[#allocation2 + $0x78] sm:$0x1] %vm314_vm2, %v4054_v14  ;;  %v4062_v22 = vld [vmem:[#allocation2 + $0x13a] sm:$0x1] }
 0x2c6   : > { %4073 = vst.msk [vmem:[#allocation2 + $0x90] sm:$0x1] %vm314_vm2, %v4055_v60  ;;  %4074 = vst.msk [vmem:[#allocation2 + $0xa8] sm:$0x1] %vm314_vm2, %v4056_v59  ;;  %v4063_v42 = vld [vmem:[#allocation2 + $0x152] sm:$0x1] }
 0x2c7   : > { %4075 = vst.msk [vmem:[#allocation2 + $0xc0] sm:$0x1] %vm314_vm2, %v4057_v48  ;;  %4076 = vst.msk [vmem:[#allocation2 + $0xd8] sm:$0x1] %vm314_vm2, %v4058_v61  ;;  %v4064_v41 = vld [vmem:[#allocation2 + $0x16a] sm:$0x1] }
 0x2c8   : > { %4077 = vst.msk [vmem:[#allocation2 + $0xf0] sm:$0x1] %vm314_vm2, %v4059_v51  ;;  %4078 = vst.msk [vmem:[#allocation2 + $0x108] sm:$0x1] %vm314_vm2, %v4060_v54  ;;  %v4066_v32 = vld [vmem:[#allocation2 + $0x19a] sm:$0x1] }
 0x2c9   : > { %4079 = vst.msk [vmem:[#allocation2 + $0x120] sm:$0x1] %vm314_vm2, %v4061_v44  ;;  %4080 = vst.msk [vmem:[#allocation2 + $0x138] sm:$0x1] %vm314_vm2, %v4062_v22  ;;  %v11895_v53 = vld [vmem:[#allocation2 + $0xb0] sm:$0xff]  ;;  %v11928_v63 = vld [vmem:[#allocation2 + $0xe0] sm:$0xff] }
 0x2ca   : > { %v4121_v0 = vld [vmem:[#allocation2] sm:$0xff]  ;;  %v4123_v31 = vld [vmem:[#allocation2 + $0x18] sm:$0xff]  ;;  %4081 = vst.msk [vmem:[#allocation2 + $0x150] sm:$0x1] %vm314_vm2, %v4063_v42  ;;  %4082 = vst.msk [vmem:[#allocation2 + $0x168] sm:$0x1] %vm314_vm2, %v4064_v41 }
 0x2cb   : > { %9553 = vmatprep.mubr.msk.f32.mxu1 %vm258_vm1, %v4121_v0  ;;  %9603 = vmatprep.mubr.msk.f32.mxu0 %vm258_vm1, %v4123_v31  ;;  %v11819_v23 = vld [vmem:[#allocation2 + $0x30] sm:$0xff]  ;;  %4084 = vst.msk [vmem:[#allocation2 + $0x198] sm:$0x1] %vm314_vm2, %v4066_v32  ;;  %4103 = vst.msk [vmem:[#allocation2 + $0x11] sm:$0x1] %vm314_vm2, %v4085_v9  ;;  %v11944_v19 = vld [vmem:[#allocation2 + $0xf8] sm:$0xff] }
 0x2cc   : > { %9554 = vmatmul.mubr.msk.f32.vlgmr.msra.gmra.mxu1 %vm258_vm1, %v4122_v13  ;;  %9604 = vmatmul.mubr.msk.f32.vlgmr.msra.gmra.mxu0 %vm258_vm1, %v4124_v36  ;;  %v11848_v57 = vld [vmem:[#allocation2 + $0x60] sm:$0xff]  ;;  %v11860_v8 = vld [vmem:[#allocation2 + $0x78] sm:$0xff]  ;;  %4104 = vst.msk [vmem:[#allocation2 + $0x29] sm:$0x1] %vm314_vm2, %v4086_v18  ;;  %4105 = vst.msk [vmem:[#allocation2 + $0x41] sm:$0x1] %vm314_vm2, %v4087_v17 }
 0x2cd   : > { %9652 = vmatpush3.msk.msra.mxu1 %vm502_vm0, %v11446_v50  ;;  %9556 = vmatprep.mubr.msk.f32.mxu1 %vm258_vm1, %v4123_v31  ;;  %v11836_v50 = vld [vmem:[#allocation2 + $0x48] sm:$0xff]  ;;  %v11872_v56 = vld [vmem:[#allocation2 + $0x90] sm:$0xff]  ;;  %4106 = vst.msk [vmem:[#allocation2 + $0x59] sm:$0x1] %vm314_vm2, %v4088_v39  ;;  %4107 = vst.msk [vmem:[#allocation2 + $0x71] sm:$0x1] %vm314_vm2, %v4089_v52 }
 0x2ce   : > { %9606 = vmatprep.mubr.msk.f32.mxu0 %vm258_vm1, %v11819_v23  ;;  %9702 = vmatpush3.msk.msra.mxu0 %vm502_vm0, %v11641_v1  ;;  %v11842_v1 = vld [vmem:[#allocation2 + $0x50] sm:$0xff]  ;;  %v11885_v15 = vld [vmem:[#allocation2 + $0xa8] sm:$0xff]  ;;  %v4091_v38 = vld [vmem:[#allocation2 + $0x9f] sm:$0x1]  ;;  %4108 = vst.msk [vmem:[#allocation2 + $0x89] sm:$0x1] %vm314_vm2, %v4090_v3 }
 0x2cf   : > { %9751 = vmatprep.subr.msk.mxu1 %vm502_vm0, %v11809_v10  ;;  %9801 = vmatprep.subr.msk.mxu0 %vm502_vm0, %v11814_v35  ;;  %v11902_v30 = vld [vmem:[#allocation2 + $0xc0] sm:$0xff]  ;;  %4109 = vst.msk [vmem:[#allocation2 + $0xa1] sm:$0x1] %vm314_vm2, %v4091_v38  ;;  %v4092_v40 = vld [vmem:[#allocation2 + $0xb7] sm:$0x1]  ;;  %v11920_v7 = vld [vmem:[#allocation2 + $0xd8] sm:$0xff] }
 0x2d0   : > { %9557 = vmatmul.mubr.msk.f32.gmra.mxu1 %vm258_vm1, %v4124_v36  ;;  %9607 = vmatmul.mubr.msk.f32.gmra.mxu0 %vm258_vm1, %v11826_v58  ;;  %4110 = vst.msk [vmem:[#allocation2 + $0xb9] sm:$0x1] %vm314_vm2, %v4092_v40  ;;  %v4093_v34 = vld [vmem:[#allocation2 + $0xcf] sm:$0x1]  ;;  %v4094_v5 = vld [vmem:[#allocation2 + $0xe7] sm:$0x1] }
 0x2d1   : > { %9559 = vmatprep.mubr.msk.f32.mxu1 %vm258_vm1, %v11819_v23  ;;  %9609 = vmatprep.mubr.msk.f32.mxu0 %vm258_vm1, %v11836_v50  ;;  %4111 = vst.msk [vmem:[#allocation2 + $0xd1] sm:$0x1] %vm314_vm2, %v4093_v34  ;;  %v4095_v4 = vld [vmem:[#allocation2 + $0xff] sm:$0x1]  ;;  %4112 = vst.msk [vmem:[#allocation2 + $0xe9] sm:$0x1] %vm314_vm2, %v4094_v5 }
 0x2d2   : > { %4113 = vst.msk [vmem:[#allocation2 + $0x101] sm:$0x1] %vm314_vm2, %v4095_v4  ;;  %v4096_v12 = vld [vmem:[#allocation2 + $0x117] sm:$0x1]  ;;  %v4097_v46 = vld [vmem:[#allocation2 + $0x12f] sm:$0x1] }
 0x2d3   : > { %4114 = vst.msk [vmem:[#allocation2 + $0x119] sm:$0x1] %vm314_vm2, %v4096_v12  ;;  %4115 = vst.msk [vmem:[#allocation2 + $0x131] sm:$0x1] %vm314_vm2, %v4097_v46  ;;  %v4098_v20 = vld [vmem:[#allocation2 + $0x147] sm:$0x1] }
 0x2d4   : > { %9560 = vmatmul.mubr.msk.f32.gmra.mxu1 %vm258_vm1, %v11826_v58  ;;  %9610 = vmatmul.mubr.msk.f32.gmra.mxu0 %vm258_vm1, %v11842_v1  ;;  %4116 = vst.msk [vmem:[#allocation2 + $0x149] sm:$0x1] %vm314_vm2, %v4098_v20  ;;  %v4099_v16 = vld [vmem:[#allocation2 + $0x15f] sm:$0x1]  ;;  %v11935_v25 = vld [vmem:[#allocation2 + $0xf0] sm:$0xff]  ;;  %v11950_v43 = vld [vmem:[#allocation2 + $0x108] sm:$0xff] }
 0x2d5   : > { %9562 = vmatprep.mubr.msk.f32.mxu1 %vm258_vm1, %v11836_v50  ;;  %9612 = vmatprep.mubr.msk.f32.mxu0 %vm258_vm1, %v11848_v57  ;;  %4117 = vst.msk [vmem:[#allocation2 + $0x161] sm:$0x1] %vm314_vm2, %v4099_v16  ;;  %v4100_v49 = vld [vmem:[#allocation2 + $0x177] sm:$0x1]  ;;  %v4101_v26 = vld [vmem:[#allocation2 + $0x18f] sm:$0x1] }
 0x2d6   : > { %4118 = vst.msk [vmem:[#allocation2 + $0x179] sm:$0x1] %vm314_vm2, %v4100_v49  ;;  %4119 = vst.msk [vmem:[#allocation2 + $0x191] sm:$0x1] %vm314_vm2, %v4101_v26  ;;  %v4102_v29 = vld [vmem:[#allocation2 + $0x1a7] sm:$0x1] }
 0x2d7   : > { %4120 = vst.msk [vmem:[#allocation2 + $0x1a9] sm:$0x1] %vm314_vm2, %v4102_v29  ;;  %v11957_v27 = vld [vmem:[#allocation2 + $0x110] sm:$0xff]  ;;  %v11963_v62 = vld [vmem:[#allocation2 + $0x120] sm:$0xff]  ;;  %v11969_v33 = vld [vmem:[#allocation2 + $0x128] sm:$0xff] }
 0x2d8   : > { %9563 = vmatmul.mubr.msk.f32.gmra.mxu1 %vm258_vm1, %v11842_v1  ;;  %9613 = vmatmul.mubr.msk.f32.gmra.mxu0 %vm258_vm1, %v11854_v11  ;;  %v11975_v55 = vld [vmem:[#allocation2 + $0x138] sm:$0xff]  ;;  %v11981_v37 = vld [vmem:[#allocation2 + $0x140] sm:$0xff]  ;;  %v11987_v21 = vld [vmem:[#allocation2 + $0x150] sm:$0xff] }
 0x2d9   : > { %9565 = vmatprep.mubr.msk.f32.mxu1 %vm258_vm1, %v11848_v57  ;;  %9615 = vmatprep.mubr.msk.f32.mxu0 %vm258_vm1, %v11860_v8  ;;  %v11993_v2 = vld [vmem:[#allocation2 + $0x158] sm:$0xff]  ;;  %v11999_v47 = vld [vmem:[#allocation2 + $0x168] sm:$0xff]  ;;  %v12005_v24 = vld [vmem:[#allocation2 + $0x170] sm:$0xff] }
 0x2da   : > { %v12011_v14 = vld [vmem:[#allocation2 + $0x180] sm:$0xff]  ;;  %v12017_v60 = vld [vmem:[#allocation2 + $0x188] sm:$0xff]  ;;  %v12037_v51 = vld [vmem:[%s13484_s3 + $0x14] sm:$0xf] }
 0x2db   : > { %v5178_v59 = vld [vmem:[#allocation2 + $0x1] sm:$0xff]  ;;  %v5179_v48 = vld [vmem:[#allocation2 + $0x9] sm:$0xff]  ;;  %v12043_v54 = vld [vmem:[#allocation2 + $0x19] sm:$0xff] }
 0x2dc   : > { %9566 = vmatmul.mubr.msk.f32.gmra.mxu1 %vm258_vm1, %v11854_v11  ;;  %9616 = vmatmul.mubr.msk.f32.gmra.mxu0 %vm258_vm1, %v11866_v28  ;;  %v12032_v61 = vld [vmem:[%s13484_s3 + $0x8] sm:$0xf]  ;;  %v12059_v31 = vld [vmem:[#allocation2 + $0x31] sm:$0xff]  ;;  %v12065_v44 = vld [vmem:[#allocation2 + $0x39] sm:$0xff] }
 0x2dd   : > { %9568 = vmatprep.mubr.msk.f32.mxu1 %vm258_vm1, %v11860_v8  ;;  %9618 = vmatprep.mubr.msk.f32.mxu0 %vm258_vm1, %v11872_v56  ;;  %v12049_v0 = vld [vmem:[#allocation2 + $0x21] sm:$0xff]  ;;  %v12071_v13 = vld [vmem:[#allocation2 + $0x49] sm:$0xff]  ;;  %v12077_v36 = vld [vmem:[#allocation2 + $0x51] sm:$0xff] }
 0x2de   : > { %v12083_v22 = vld [vmem:[#allocation2 + $0x61] sm:$0xff]  ;;  %v12107_v42 = vld [vmem:[#allocation2 + $0x91] sm:$0xff]  ;;  %v12113_v41 = vld [vmem:[#allocation2 + $0x99] sm:$0xff] }
 0x2df   : > { %v12167_v32 = vld [vmem:[#allocation2 + $0x109] sm:$0xff]  ;;  %v12191_v18 = vld [vmem:[#allocation2 + $0x139] sm:$0xff]  ;;  %v12197_v17 = vld [vmem:[#allocation2 + $0x141] sm:$0xff] }
 0x2e0   : > { %9569 = vmatmul.mubr.msk.f32.gmra.mxu1 %vm258_vm1, %v11866_v28  ;;  %9619 = vmatmul.mubr.msk.f32.gmra.mxu0 %vm258_vm1, %v11879_v45  ;;  %v12185_v9 = vld [vmem:[#allocation2 + $0x129] sm:$0xff]  ;;  %v12203_v39 = vld [vmem:[#allocation2 + $0x151] sm:$0xff]  ;;  %v12209_v52 = vld [vmem:[#allocation2 + $0x159] sm:$0xff] }
 0x2e1   : > { %9571 = vmatprep.mubr.msk.f32.mxu1 %vm258_vm1, %v11872_v56  ;;  %9621 = vmatprep.mubr.msk.f32.mxu0 %vm258_vm1, %v11885_v15  ;;  %v12215_v3 = vld [vmem:[#allocation2 + $0x169] sm:$0xff]  ;;  %v4156_v38 = vld [vmem:[#allocation2 + $0x1a0] sm:$0xff] }
 0x2e2   : > { %v12236_v40 = vld [vmem:[%s13484_s3 + $0x20] sm:$0xf]  ;;  %v5211_v5 = vld [vmem:[#allocation2 + $0x189] sm:$0xff] }
 0x2e3   : > { %v5210_v34 = vld [vmem:[#allocation2 + $0x181] sm:$0xff]  ;;  %v5212_v4 = vld [vmem:[#allocation2 + $0x199] sm:$0xff]  ;;  %v6301_v46 = vld [vmem:[#allocation2 + $0xa] sm:$0xff] }
 0x2e4   : > { %9572 = vmatmul.mubr.msk.f32.gmra.mxu1 %vm258_vm1, %v11879_v45  ;;  %9622 = vmatmul.mubr.msk.f32.gmra.mxu0 %vm258_vm1, %v11895_v53  ;;  %v6300_v12 = vld [vmem:[#allocation2 + $0x2] sm:$0xff] }
 0x2e5   : > { %9574 = vmatprep.mubr.msk.f32.mxu1 %vm258_vm1, %v11885_v15  ;;  %9624 = vmatprep.mubr.msk.f32.mxu0 %vm258_vm1, %v11902_v30  ;;  %v6303_v20 = vld [vmem:[#allocation2 + $0x22] sm:$0xff] }
 0x2e8   : > { %9575 = vmatmul.mubr.msk.f32.gmra.mxu1 %vm258_vm1, %v11895_v53  ;;  %9625 = vmatmul.mubr.msk.f32.gmra.mxu0 %vm258_vm1, %v11912_v6 }
 0x2e9   : > { %9577 = vmatprep.mubr.msk.f32.mxu1 %vm258_vm1, %v11902_v30  ;;  %9627 = vmatprep.mubr.msk.f32.mxu0 %vm258_vm1, %v11920_v7 }
 0x2ec   : > { %9578 = vmatmul.mubr.msk.f32.gmra.mxu1 %vm258_vm1, %v11912_v6  ;;  %9628 = vmatmul.mubr.msk.f32.gmra.mxu0 %vm258_vm1, %v11928_v63 }
 0x2ed   : > { %9580 = vmatprep.mubr.msk.f32.mxu1 %vm258_vm1, %v11920_v7  ;;  %9630 = vmatprep.mubr.msk.f32.mxu0 %vm258_vm1, %v11935_v25 }
 0x2f0   : > { %9581 = vmatmul.mubr.msk.f32.gmra.mxu1 %vm258_vm1, %v11928_v63  ;;  %9631 = vmatmul.mubr.msk.f32.gmra.mxu0 %vm258_vm1, %v11944_v19 }
 0x2f1   : > { %9583 = vmatprep.mubr.msk.f32.mxu1 %vm258_vm1, %v11935_v25  ;;  %9633 = vmatprep.mubr.msk.f32.mxu0 %vm258_vm1, %v11950_v43 }
 0x2f4   : > { %9584 = vmatmul.mubr.msk.f32.gmra.mxu1 %vm258_vm1, %v11944_v19  ;;  %9634 = vmatmul.mubr.msk.f32.gmra.mxu0 %vm258_vm1, %v11957_v27 }
 0x2f5   : > { %9586 = vmatprep.mubr.msk.f32.mxu1 %vm258_vm1, %v11950_v43  ;;  %9636 = vmatprep.mubr.msk.f32.mxu0 %vm258_vm1, %v11963_v62 }
 0x2f8   : > { %9587 = vmatmul.mubr.msk.f32.gmra.mxu1 %vm258_vm1, %v11957_v27  ;;  %9637 = vmatmul.mubr.msk.f32.gmra.mxu0 %vm258_vm1, %v11969_v33 }
 0x2f9   : > { %9589 = vmatprep.mubr.msk.f32.mxu1 %vm258_vm1, %v11963_v62  ;;  %9639 = vmatprep.mubr.msk.f32.mxu0 %vm258_vm1, %v11975_v55 }
 0x2fc   : > { %9590 = vmatmul.mubr.msk.f32.gmra.mxu1 %vm258_vm1, %v11969_v33  ;;  %9640 = vmatmul.mubr.msk.f32.gmra.mxu0 %vm258_vm1, %v11981_v37 }
 0x2fd   : > { %9592 = vmatprep.mubr.msk.f32.mxu1 %vm258_vm1, %v11975_v55  ;;  %9642 = vmatprep.mubr.msk.f32.mxu0 %vm258_vm1, %v11987_v21 }
 0x300   : > { %9593 = vmatmul.mubr.msk.f32.gmra.mxu1 %vm258_vm1, %v11981_v37  ;;  %9643 = vmatmul.mubr.msk.f32.gmra.mxu0 %vm258_vm1, %v11993_v2 }
 0x301   : > { %9595 = vmatprep.mubr.msk.f32.mxu1 %vm258_vm1, %v11987_v21  ;;  %9645 = vmatprep.mubr.msk.f32.mxu0 %vm258_vm1, %v11999_v47 }
 0x304   : > { %9596 = vmatmul.mubr.msk.f32.gmra.mxu1 %vm258_vm1, %v11993_v2  ;;  %9646 = vmatmul.mubr.msk.f32.gmra.mxu0 %vm258_vm1, %v12005_v24 }
 0x305   : > { %9598 = vmatprep.mubr.msk.f32.mxu1 %vm258_vm1, %v11999_v47  ;;  %9648 = vmatprep.mubr.msk.f32.mxu0 %vm258_vm1, %v12011_v14 }
 0x308   : > { %9599 = vmatmul.mubr.msk.f32.gmra.mxu1 %vm258_vm1, %v12005_v24  ;;  %9649 = vmatmul.mubr.msk.f32.gmra.mxu0 %vm258_vm1, %v12017_v60 }
 0x309   : > { %9653 = vmatprep.mubr.msk.f32.mxu1 %vm258_vm1, %v11819_v23  ;;  %9703 = vmatprep.mubr.msk.f32.mxu0 %vm258_vm1, %v5178_v59  ;;  %v12101_v23 = vld [vmem:[#allocation2 + $0x81] sm:$0xff] }
 0x30c   : > { %9654 = vmatmul.mubr.msk.f32.vlgmr.msra.gmra.mxu1 %vm258_vm1, %v11826_v58  ;;  %9704 = vmatmul.mubr.msk.f32.vlgmr.msra.gmra.mxu0 %vm258_vm1, %v5179_v48  ;;  %v12119_v58 = vld [vmem:[#allocation2 + $0xa9] sm:$0xff] }
 0x30d   : > { %9752 = vmatpush3.msk.msra.mxu1 %vm502_vm0, %v11809_v10  ;;  %9656 = vmatprep.mubr.msk.f32.mxu1 %vm258_vm1, %v11836_v50  ;;  %v12089_v10 = vld [vmem:[#allocation2 + $0x69] sm:$0xff]  ;;  %v12125_v50 = vld [vmem:[#allocation2 + $0xb1] sm:$0xff] }
 0x30e   : > { %9706 = vmatprep.mubr.msk.f32.mxu0 %vm258_vm1, %v12043_v54  ;;  %9802 = vmatpush3.msk.msra.mxu0 %vm502_vm0, %v11814_v35  ;;  %v12095_v35 = vld [vmem:[#allocation2 + $0x79] sm:$0xff] }
 0x30f   : > { %9851 = vmatprep.subr.msk.mxu1 %vm502_vm0, %v12032_v61  ;;  %9901 = vmatprep.subr.msk.mxu0 %vm502_vm0, %v12037_v51 }
 0x310   : > { %9657 = vmatmul.mubr.msk.f32.gmra.mxu1 %vm258_vm1, %v11842_v1  ;;  %9707 = vmatmul.mubr.msk.f32.gmra.mxu0 %vm258_vm1, %v12049_v0  ;;  %v12131_v1 = vld [vmem:[#allocation2 + $0xc1] sm:$0xff] }
 0x311   : > { %9659 = vmatprep.mubr.msk.f32.mxu1 %vm258_vm1, %v11848_v57  ;;  %9709 = vmatprep.mubr.msk.f32.mxu0 %vm258_vm1, %v12059_v31  ;;  %v12137_v57 = vld [vmem:[#allocation2 + $0xc9] sm:$0xff] }
 0x314   : > { %9660 = vmatmul.mubr.msk.f32.gmra.mxu1 %vm258_vm1, %v11854_v11  ;;  %9710 = vmatmul.mubr.msk.f32.gmra.mxu0 %vm258_vm1, %v12065_v44  ;;  %v12143_v11 = vld [vmem:[#allocation2 + $0xd9] sm:$0xff] }
 0x315   : > { %9662 = vmatprep.mubr.msk.f32.mxu1 %vm258_vm1, %v11860_v8  ;;  %9712 = vmatprep.mubr.msk.f32.mxu0 %vm258_vm1, %v12071_v13  ;;  %v12149_v8 = vld [vmem:[#allocation2 + $0xe1] sm:$0xff] }
 0x318   : > { %9663 = vmatmul.mubr.msk.f32.gmra.mxu1 %vm258_vm1, %v11866_v28  ;;  %9713 = vmatmul.mubr.msk.f32.gmra.mxu0 %vm258_vm1, %v12077_v36  ;;  %v12155_v28 = vld [vmem:[#allocation2 + $0xf1] sm:$0xff] }
 0x319   : > { %9665 = vmatprep.mubr.msk.f32.mxu1 %vm258_vm1, %v11872_v56  ;;  %9715 = vmatprep.mubr.msk.f32.mxu0 %vm258_vm1, %v12083_v22  ;;  %v12161_v56 = vld [vmem:[#allocation2 + $0xf9] sm:$0xff] }
 0x31c   : > { %9666 = vmatmul.mubr.msk.f32.gmra.mxu1 %vm258_vm1, %v11879_v45  ;;  %9716 = vmatmul.mubr.msk.f32.gmra.mxu0 %vm258_vm1, %v12089_v10  ;;  %v12173_v45 = vld [vmem:[#allocation2 + $0x111] sm:$0xff] }
 0x31d   : > { %9668 = vmatprep.mubr.msk.f32.mxu1 %vm258_vm1, %v11885_v15  ;;  %9718 = vmatprep.mubr.msk.f32.mxu0 %vm258_vm1, %v12095_v35  ;;  %v12179_v15 = vld [vmem:[#allocation2 + $0x121] sm:$0xff] }
 0x320   : > { %9669 = vmatmul.mubr.msk.f32.gmra.mxu1 %vm258_vm1, %v11895_v53  ;;  %9719 = vmatmul.mubr.msk.f32.gmra.mxu0 %vm258_vm1, %v12101_v23  ;;  %v4155_v53 = vld [vmem:[#allocation2 + $0x198] sm:$0xff] }
 0x321   : > { %9671 = vmatprep.mubr.msk.f32.mxu1 %vm258_vm1, %v11902_v30  ;;  %9721 = vmatprep.mubr.msk.f32.mxu0 %vm258_vm1, %v12107_v42  ;;  %v12220_v30 = vld [vmem:[#allocation2 + $0x171] sm:$0xff] }
 0x324   : > { %9672 = vmatmul.mubr.msk.f32.gmra.mxu1 %vm258_vm1, %v11912_v6  ;;  %9722 = vmatmul.mubr.msk.f32.gmra.mxu0 %vm258_vm1, %v12113_v41  ;;  %v5213_v6 = vld [vmem:[#allocation2 + $0x1a1] sm:$0xff] }
 0x325   : > { %9674 = vmatprep.mubr.msk.f32.mxu1 %vm258_vm1, %v11920_v7  ;;  %9724 = vmatprep.mubr.msk.f32.mxu0 %vm258_vm1, %v12119_v58  ;;  %v6302_v7 = vld [vmem:[#allocation2 + $0x1a] sm:$0xff] }
 0x328   : > { %9675 = vmatmul.mubr.msk.f32.gmra.mxu1 %vm258_vm1, %v11928_v63  ;;  %9725 = vmatmul.mubr.msk.f32.gmra.mxu0 %vm258_vm1, %v12125_v50 }
 0x329   : > { %9677 = vmatprep.mubr.msk.f32.mxu1 %vm258_vm1, %v11935_v25  ;;  %9727 = vmatprep.mubr.msk.f32.mxu0 %vm258_vm1, %v12131_v1  ;;  %v12366_v25 = vld [vmem:[#allocation2 + $0x32] sm:$0xff] }
 0x32c   : > { %9678 = vmatmul.mubr.msk.f32.gmra.mxu1 %vm258_vm1, %v11944_v19  ;;  %9728 = vmatmul.mubr.msk.f32.gmra.mxu0 %vm258_vm1, %v12137_v57  ;;  %v12371_v19 = vld [vmem:[#allocation2 + $0x3a] sm:$0xff] }
 0x32d   : > { %9680 = vmatprep.mubr.msk.f32.mxu1 %vm258_vm1, %v11950_v43  ;;  %9730 = vmatprep.mubr.msk.f32.mxu0 %vm258_vm1, %v12143_v11 }
 0x330   : > { %9681 = vmatmul.mubr.msk.f32.gmra.mxu1 %vm258_vm1, %v11957_v27  ;;  %9731 = vmatmul.mubr.msk.f32.gmra.mxu0 %vm258_vm1, %v12149_v8  ;;  %v12376_v27 = vld [vmem:[#allocation2 + $0x4a] sm:$0xff] }
 0x331   : > { %9683 = vmatprep.mubr.msk.f32.mxu1 %vm258_vm1, %v11963_v62  ;;  %9733 = vmatprep.mubr.msk.f32.mxu0 %vm258_vm1, %v12155_v28 }
 0x334   : > { %9684 = vmatmul.mubr.msk.f32.gmra.mxu1 %vm258_vm1, %v11969_v33  ;;  %9734 = vmatmul.mubr.msk.f32.gmra.mxu0 %vm258_vm1, %v12161_v56 }
 0x335   : > { %9686 = vmatprep.mubr.msk.f32.mxu1 %vm258_vm1, %v11975_v55  ;;  %9736 = vmatprep.mubr.msk.f32.mxu0 %vm258_vm1, %v12167_v32  ;;  %v12384_v55 = vld [vmem:[#allocation2 + $0x52] sm:$0xff] }
 0x338   : > { %9687 = vmatmul.mubr.msk.f32.gmra.mxu1 %vm258_vm1, %v11981_v37  ;;  %9737 = vmatmul.mubr.msk.f32.gmra.mxu0 %vm258_vm1, %v12173_v45 }
 0x339   : > { %9689 = vmatprep.mubr.msk.f32.mxu1 %vm258_vm1, %v11987_v21  ;;  %9739 = vmatprep.mubr.msk.f32.mxu0 %vm258_vm1, %v12179_v15 }
 0x33c   : > { %9690 = vmatmul.mubr.msk.f32.gmra.mxu1 %vm258_vm1, %v11993_v2  ;;  %9740 = vmatmul.mubr.msk.f32.gmra.mxu0 %vm258_vm1, %v12185_v9 }
 0x33d   : > { %9692 = vmatprep.mubr.msk.f32.mxu1 %vm258_vm1, %v11999_v47  ;;  %9742 = vmatprep.mubr.msk.f32.mxu0 %vm258_vm1, %v12191_v18  ;;  %v12390_v47 = vld [vmem:[#allocation2 + $0x62] sm:$0xff] }
 0x340   : > { %9693 = vmatmul.mubr.msk.f32.gmra.mxu1 %vm258_vm1, %v12005_v24  ;;  %9743 = vmatmul.mubr.msk.f32.gmra.mxu0 %vm258_vm1, %v12197_v17 }
 0x341   : > { %9695 = vmatprep.mubr.msk.f32.mxu1 %vm258_vm1, %v12011_v14  ;;  %9745 = vmatprep.mubr.msk.f32.mxu0 %vm258_vm1, %v12203_v39 }
 0x344   : > { %9696 = vmatmul.mubr.msk.f32.gmra.mxu1 %vm258_vm1, %v12017_v60  ;;  %9746 = vmatmul.mubr.msk.f32.gmra.mxu0 %vm258_vm1, %v12209_v52 }
 0x345   : > { %9698 = vmatprep.mubr.msk.f32.mxu1 %vm258_vm1, %v4155_v53  ;;  %9748 = vmatprep.mubr.msk.f32.mxu0 %vm258_vm1, %v12215_v3  ;;  %v12447_v53 = vld [vmem:[#allocation2 + $0xb2] sm:$0xff] }
 0x348   : > { %9699 = vmatmul.mubr.msk.f32.gmra.mxu1 %vm258_vm1, %v4156_v38  ;;  %9749 = vmatmul.mubr.msk.f32.gmra.mxu0 %vm258_vm1, %v12220_v30 }
 0x349   : > { %9753 = vmatprep.mubr.msk.f32.mxu1 %vm258_vm1, %v12043_v54  ;;  %9803 = vmatprep.mubr.msk.f32.mxu0 %vm258_vm1, %v12059_v31 }
 0x34c   : > { %9754 = vmatmul.mubr.msk.f32.vlgmr.msra.gmra.mxu1 %vm258_vm1, %v12049_v0  ;;  %9804 = vmatmul.mubr.msk.f32.vlgmr.msra.gmra.mxu0 %vm258_vm1, %v12065_v44 }
 0x34d   : > { %9852 = vmatpush3.msk.msra.mxu1 %vm502_vm0, %v12032_v61  ;;  %9756 = vmatprep.mubr.msk.f32.mxu1 %vm258_vm1, %v12059_v31  ;;  %v12399_v61 = vld [vmem:[#allocation2 + $0x6a] sm:$0xff]  ;;  %v12405_v31 = vld [vmem:[#allocation2 + $0x7a] sm:$0xff] }
 0x34e   : > { %9806 = vmatprep.mubr.msk.f32.mxu0 %vm258_vm1, %v12071_v13  ;;  %9902 = vmatpush3.msk.msra.mxu0 %vm502_vm0, %v12037_v51 }
 0x34f   : > { %9951 = vmatprep.subr.msk.mxu1 %vm502_vm0, %v12236_v40 }
 0x350   : > { %9757 = vmatmul.mubr.msk.f32.gmra.mxu1 %vm258_vm1, %v12065_v44  ;;  %9807 = vmatmul.mubr.msk.f32.gmra.mxu0 %vm258_vm1, %v12077_v36 }
 0x351   : > { %9759 = vmatprep.mubr.msk.f32.mxu1 %vm258_vm1, %v12071_v13  ;;  %9809 = vmatprep.mubr.msk.f32.mxu0 %vm258_vm1, %v12083_v22 }
 0x354   : > { %9760 = vmatmul.mubr.msk.f32.gmra.mxu1 %vm258_vm1, %v12077_v36  ;;  %9810 = vmatmul.mubr.msk.f32.gmra.mxu0 %vm258_vm1, %v12089_v10 }
 0x355   : > { %9762 = vmatprep.mubr.msk.f32.mxu1 %vm258_vm1, %v12083_v22  ;;  %9812 = vmatprep.mubr.msk.f32.mxu0 %vm258_vm1, %v12095_v35 }
 0x358   : > { %9763 = vmatmul.mubr.msk.f32.gmra.mxu1 %vm258_vm1, %v12089_v10  ;;  %9813 = vmatmul.mubr.msk.f32.gmra.mxu0 %vm258_vm1, %v12101_v23 }
 0x359   : > { %9765 = vmatprep.mubr.msk.f32.mxu1 %vm258_vm1, %v12095_v35  ;;  %9815 = vmatprep.mubr.msk.f32.mxu0 %vm258_vm1, %v12107_v42  ;;  %v12415_v35 = vld [vmem:[#allocation2 + $0x82] sm:$0xff] }
 0x35c   : > { %9766 = vmatmul.mubr.msk.f32.gmra.mxu1 %vm258_vm1, %v12101_v23  ;;  %9816 = vmatmul.mubr.msk.f32.gmra.mxu0 %vm258_vm1, %v12113_v41 }
 0x35d   : > { %9768 = vmatprep.mubr.msk.f32.mxu1 %vm258_vm1, %v12107_v42  ;;  %9818 = vmatprep.mubr.msk.f32.mxu0 %vm258_vm1, %v12119_v58 }
 0x360   : > { %9769 = vmatmul.mubr.msk.f32.gmra.mxu1 %vm258_vm1, %v12113_v41  ;;  %9819 = vmatmul.mubr.msk.f32.gmra.mxu0 %vm258_vm1, %v12125_v50 }
 0x361   : > { %9771 = vmatprep.mubr.msk.f32.mxu1 %vm258_vm1, %v12119_v58  ;;  %9821 = vmatprep.mubr.msk.f32.mxu0 %vm258_vm1, %v12131_v1  ;;  %v12421_v58 = vld [vmem:[#allocation2 + $0x92] sm:$0xff] }
 0x364   : > { %9772 = vmatmul.mubr.msk.f32.gmra.mxu1 %vm258_vm1, %v12125_v50  ;;  %9822 = vmatmul.mubr.msk.f32.gmra.mxu0 %vm258_vm1, %v12137_v57 }
 0x365   : > { %9774 = vmatprep.mubr.msk.f32.mxu1 %vm258_vm1, %v12131_v1  ;;  %9824 = vmatprep.mubr.msk.f32.mxu0 %vm258_vm1, %v12143_v11 }
 0x368   : > { %9775 = vmatmul.mubr.msk.f32.gmra.mxu1 %vm258_vm1, %v12137_v57  ;;  %9825 = vmatmul.mubr.msk.f32.gmra.mxu0 %vm258_vm1, %v12149_v8 }
 0x369   : > { %9777 = vmatprep.mubr.msk.f32.mxu1 %vm258_vm1, %v12143_v11  ;;  %9827 = vmatprep.mubr.msk.f32.mxu0 %vm258_vm1, %v12155_v28 }
 0x36c   : > { %9778 = vmatmul.mubr.msk.f32.gmra.mxu1 %vm258_vm1, %v12149_v8  ;;  %9828 = vmatmul.mubr.msk.f32.gmra.mxu0 %vm258_vm1, %v12161_v56 }
 0x36d   : > { %9780 = vmatprep.mubr.msk.f32.mxu1 %vm258_vm1, %v12155_v28  ;;  %9830 = vmatprep.mubr.msk.f32.mxu0 %vm258_vm1, %v12167_v32  ;;  %v12431_v28 = vld [vmem:[#allocation2 + $0x9a] sm:$0xff] }
 0x370   : > { %9781 = vmatmul.mubr.msk.f32.gmra.mxu1 %vm258_vm1, %v12161_v56  ;;  %9831 = vmatmul.mubr.msk.f32.gmra.mxu0 %vm258_vm1, %v12173_v45 }
 0x371   : > { %9783 = vmatprep.mubr.msk.f32.mxu1 %vm258_vm1, %v12167_v32  ;;  %9833 = vmatprep.mubr.msk.f32.mxu0 %vm258_vm1, %v12179_v15 }
 0x374   : > { %9784 = vmatmul.mubr.msk.f32.gmra.mxu1 %vm258_vm1, %v12173_v45  ;;  %9834 = vmatmul.mubr.msk.f32.gmra.mxu0 %vm258_vm1, %v12185_v9 }
 0x375   : > { %9786 = vmatprep.mubr.msk.f32.mxu1 %vm258_vm1, %v12179_v15  ;;  %9836 = vmatprep.mubr.msk.f32.mxu0 %vm258_vm1, %v12191_v18  ;;  %v12437_v15 = vld [vmem:[#allocation2 + $0xaa] sm:$0xff] }
 0x378   : > { %9787 = vmatmul.mubr.msk.f32.gmra.mxu1 %vm258_vm1, %v12185_v9  ;;  %9837 = vmatmul.mubr.msk.f32.gmra.mxu0 %vm258_vm1, %v12197_v17 }
 0x379   : > { %9789 = vmatprep.mubr.msk.f32.mxu1 %vm258_vm1, %v12191_v18  ;;  %9839 = vmatprep.mubr.msk.f32.mxu0 %vm258_vm1, %v12203_v39 }
 0x37c   : > { %9790 = vmatmul.mubr.msk.f32.gmra.mxu1 %vm258_vm1, %v12197_v17  ;;  %9840 = vmatmul.mubr.msk.f32.gmra.mxu0 %vm258_vm1, %v12209_v52 }
 0x37d   : > { %9792 = vmatprep.mubr.msk.f32.mxu1 %vm258_vm1, %v12203_v39  ;;  %9842 = vmatprep.mubr.msk.f32.mxu0 %vm258_vm1, %v12215_v3 }
 0x380   : > { %9793 = vmatmul.mubr.msk.f32.gmra.mxu1 %vm258_vm1, %v12209_v52  ;;  %9843 = vmatmul.mubr.msk.f32.gmra.mxu0 %vm258_vm1, %v12220_v30 }
 0x381   : > { %9795 = vmatprep.mubr.msk.f32.mxu1 %vm258_vm1, %v12215_v3  ;;  %9845 = vmatprep.mubr.msk.f32.mxu0 %vm258_vm1, %v5210_v34 }
 0x384   : > { %9796 = vmatmul.mubr.msk.f32.gmra.mxu1 %vm258_vm1, %v12220_v30  ;;  %9846 = vmatmul.mubr.msk.f32.gmra.mxu0 %vm258_vm1, %v5211_v5 }
 0x385   : > { %9798 = vmatprep.mubr.msk.f32.mxu1 %vm258_vm1, %v5210_v34  ;;  %9848 = vmatprep.mubr.msk.f32.mxu0 %vm258_vm1, %v5212_v4 }
 0x388   : > { %9799 = vmatmul.mubr.msk.f32.gmra.mxu1 %vm258_vm1, %v5211_v5  ;;  %9849 = vmatmul.mubr.msk.f32.gmra.mxu0 %vm258_vm1, %v5213_v6 }
 0x389   : > { %9853 = vmatprep.mubr.msk.f32.mxu1 %vm258_vm1, %v6300_v12  ;;  %9903 = vmatprep.mubr.msk.f32.mxu0 %vm258_vm1, %v6302_v7 }
 0x38c   : > { %v9555_v63 = vpop.f32.mrf.mxu1  ;;  %v9605_v16 = vpop.f32.mrf.mxu0  ;;  %9854 = vmatmul.mubr.msk.f32.vlgmr.msra.gmra.mxu1 %vm258_vm1, %v6301_v46  ;;  %9904 = vmatmul.mubr.msk.f32.vlgmr.msra.gmra.mxu0 %vm258_vm1, %v6303_v20 }
 0x38d   : > { %4483 = vst.msk [vmem:[#allocation3 + $0x8] sm:$0xff] %vm258_vm1, %v9555_v63  ;;  %9952 = vmatpush3.msk.msra.mxu1 %vm502_vm0, %v12236_v40  ;;  %9856 = vmatprep.mubr.msk.f32.mxu1 %vm258_vm1, %v6302_v7  ;;  %v12453_v40 = vld [vmem:[#allocation2 + $0xc2] sm:$0xff]  ;;  %v12463_v7 = vld [vmem:[#allocation2 + $0xca] sm:$0xff] }
 0x38e   : > { %9906 = vmatprep.mubr.msk.f32.mxu0 %vm258_vm1, %v12366_v25  ;;  %v4323_v49 = vpop.f32.mrf.mxu1  ;;  %v4591_v26 = vpop.f32.mrf.mxu0 }
 0x38f   : > { %4482 = vst.msk [vmem:[#allocation3] sm:$0xff] %vm258_vm1, %v4323_v49 }
 0x390   : > { %v9558_v29 = vpop.f32.mrf.mxu1  ;;  %v9608_v43 = vpop.f32.mrf.mxu0  ;;  %9857 = vmatmul.mubr.msk.f32.gmra.mxu1 %vm258_vm1, %v6303_v20  ;;  %9907 = vmatmul.mubr.msk.f32.gmra.mxu0 %vm258_vm1, %v12371_v19 }
 0x391   : > { %4485 = vst.msk [vmem:[#allocation3 + $0x18] sm:$0xff] %vm258_vm1, %v9558_v29  ;;  %9859 = vmatprep.mubr.msk.f32.mxu1 %vm258_vm1, %v12366_v25  ;;  %9909 = vmatprep.mubr.msk.f32.mxu0 %vm258_vm1, %v12376_v27 }
 0x392   : > { %v4333_v62 = vpop.f32.mrf.mxu1  ;;  %v4601_v33 = vpop.f32.mrf.mxu0 }
 0x393   : > { %4484 = vst.msk [vmem:[#allocation3 + $0x10] sm:$0xff] %vm258_vm1, %v4333_v62 }
 0x394   : > { %v4751_v37 = vld [vmem:[#allocation3 + $0x8] sm:$0xff]  ;;  %v9561_v21 = vpop.f32.mrf.mxu1  ;;  %v9611_v2 = vpop.f32.mrf.mxu0  ;;  %9860 = vmatmul.mubr.msk.f32.gmra.mxu1 %vm258_vm1, %v12371_v19  ;;  %9910 = vmatmul.mubr.msk.f32.gmra.mxu0 %vm258_vm1, %v12384_v55 }
 0x395   : > { %v4783_v24 = vadd.f32 %v9605_v16, %v4751_v37  ;;  %4487 = vst.msk [vmem:[#allocation3 + $0x28] sm:$0xff] %vm258_vm1, %v9561_v21  ;;  %9862 = vmatprep.mubr.msk.f32.mxu1 %vm258_vm1, %v12376_v27  ;;  %9912 = vmatprep.mubr.msk.f32.mxu0 %vm258_vm1, %v12390_v47  ;;  %v12469_v16 = vld [vmem:[#allocation2 + $0xda] sm:$0xff] }
 0x396   : > { %v4750_v14 = vld [vmem:[#allocation3] sm:$0xff]  ;;  %v4343_v60 = vpop.f32.mrf.mxu1  ;;  %v4611_v59 = vpop.f32.mrf.mxu0 }
 0x397   : > { %4815 = vst.msk [vmem:[#allocation3 + $0x8] sm:$0xff] %vm258_vm1, %v4783_v24  ;;  %v4782_v48 = vadd.f32 %v4750_v14, %v4591_v26  ;;  %4486 = vst.msk [vmem:[#allocation3 + $0x20] sm:$0xff] %vm258_vm1, %v4343_v60  ;;  %v12485_v24 = vld [vmem:[#allocation2 + $0xf2] sm:$0xff] }
 0x398   : > { %v4753_v51 = vld [vmem:[#allocation3 + $0x18] sm:$0xff]  ;;  %v9564_v54 = vpop.f32.mrf.mxu1  ;;  %v9614_v0 = vpop.f32.mrf.mxu0  ;;  %9863 = vmatmul.mubr.msk.f32.gmra.mxu1 %vm258_vm1, %v12384_v55  ;;  %9913 = vmatmul.mubr.msk.f32.gmra.mxu0 %vm258_vm1, %v12399_v61 }
 0x399   : > { %4814 = vst.msk [vmem:[#allocation3] sm:$0xff] %vm258_vm1, %v4782_v48  ;;  %v4785_v44 = vadd.f32 %v9608_v43, %v4753_v51  ;;  %4489 = vst.msk [vmem:[#allocation3 + $0x38] sm:$0xff] %vm258_vm1, %v9564_v54  ;;  %9865 = vmatprep.mubr.msk.f32.mxu1 %vm258_vm1, %v12390_v47  ;;  %9915 = vmatprep.mubr.msk.f32.mxu0 %vm258_vm1, %v12405_v31  ;;  %v12495_v54 = vld [vmem:[#allocation2 + $0xfa] sm:$0xff] }
 0x39a   : > { %v4752_v13 = vld [vmem:[#allocation3 + $0x10] sm:$0xff]  ;;  %v4353_v36 = vpop.f32.mrf.mxu1  ;;  %v4621_v22 = vpop.f32.mrf.mxu0 }
 0x39b   : > { %4817 = vst.msk [vmem:[#allocation3 + $0x18] sm:$0xff] %vm258_vm1, %v4785_v44  ;;  %v4784_v10 = vadd.f32 %v4752_v13, %v4601_v33  ;;  %4488 = vst.msk [vmem:[#allocation3 + $0x30] sm:$0xff] %vm258_vm1, %v4353_v36  ;;  %v12479_v33 = vld [vmem:[#allocation2 + $0xe2] sm:$0xff]  ;;  %v12501_v36 = vld [vmem:[#allocation2 + $0x10a] sm:$0xff] }
 0x39c   : > { %v4755_v23 = vld [vmem:[#allocation3 + $0x28] sm:$0xff]  ;;  %v9567_v42 = vpop.f32.mrf.mxu1  ;;  %v9617_v41 = vpop.f32.mrf.mxu0  ;;  %9866 = vmatmul.mubr.msk.f32.gmra.mxu1 %vm258_vm1, %v12399_v61  ;;  %9916 = vmatmul.mubr.msk.f32.gmra.mxu0 %vm258_vm1, %v12415_v35 }
 0x39d   : > { %4816 = vst.msk [vmem:[#allocation3 + $0x10] sm:$0xff] %vm258_vm1, %v4784_v10  ;;  %v4787_v50 = vadd.f32 %v9611_v2, %v4755_v23  ;;  %4491 = vst.msk [vmem:[#allocation3 + $0x48] sm:$0xff] %vm258_vm1, %v9567_v42  ;;  %9868 = vmatprep.mubr.msk.f32.mxu1 %vm258_vm1, %v12405_v31  ;;  %9918 = vmatprep.mubr.msk.f32.mxu0 %vm258_vm1, %v12421_v58 }
 0x39e   : > { %v4754_v1 = vld [vmem:[#allocation3 + $0x20] sm:$0xff]  ;;  %v4363_v57 = vpop.f32.mrf.mxu1  ;;  %v4631_v11 = vpop.f32.mrf.mxu0 }
 0x39f   : > { %4819 = vst.msk [vmem:[#allocation3 + $0x28] sm:$0xff] %vm258_vm1, %v4787_v50  ;;  %v4786_v8 = vadd.f32 %v4754_v1, %v4611_v59  ;;  %4490 = vst.msk [vmem:[#allocation3 + $0x40] sm:$0xff] %vm258_vm1, %v4363_v57  ;;  %v12511_v50 = vld [vmem:[#allocation2 + $0x112] sm:$0xff] }
 0x3a0   : > { %v4757_v56 = vld [vmem:[#allocation3 + $0x38] sm:$0xff]  ;;  %v9570_v32 = vpop.f32.mrf.mxu1  ;;  %v9620_v45 = vpop.f32.mrf.mxu0  ;;  %9869 = vmatmul.mubr.msk.f32.gmra.mxu1 %vm258_vm1, %v12415_v35  ;;  %9919 = vmatmul.mubr.msk.f32.gmra.mxu0 %vm258_vm1, %v12431_v28 }
 0x3a1   : > { %4818 = vst.msk [vmem:[#allocation3 + $0x20] sm:$0xff] %vm258_vm1, %v4786_v8  ;;  %v4789_v9 = vadd.f32 %v9614_v0, %v4757_v56  ;;  %4493 = vst.msk [vmem:[#allocation3 + $0x58] sm:$0xff] %vm258_vm1, %v9570_v32  ;;  %9871 = vmatprep.mubr.msk.f32.mxu1 %vm258_vm1, %v12421_v58  ;;  %9921 = vmatprep.mubr.msk.f32.mxu0 %vm258_vm1, %v12437_v15  ;;  %v12517_v8 = vld [vmem:[#allocation2 + $0x122] sm:$0xff] }
 0x3a2   : > { %v4756_v18 = vld [vmem:[#allocation3 + $0x30] sm:$0xff]  ;;  %v4373_v17 = vpop.f32.mrf.mxu1  ;;  %v4641_v39 = vpop.f32.mrf.mxu0 }
 0x3a3   : > { %4821 = vst.msk [vmem:[#allocation3 + $0x38] sm:$0xff] %vm258_vm1, %v4789_v9  ;;  %v4788_v52 = vadd.f32 %v4756_v18, %v4621_v22  ;;  %4492 = vst.msk [vmem:[#allocation3 + $0x50] sm:$0xff] %vm258_vm1, %v4373_v17  ;;  %v12527_v17 = vld [vmem:[#allocation2 + $0x12a] sm:$0xff] }
 0x3a4   : > { %v4759_v3 = vld [vmem:[#allocation3 + $0x48] sm:$0xff]  ;;  %v9573_v38 = vpop.f32.mrf.mxu1  ;;  %v9623_v30 = vpop.f32.mrf.mxu0  ;;  %9872 = vmatmul.mubr.msk.f32.gmra.mxu1 %vm258_vm1, %v12431_v28  ;;  %9922 = vmatmul.mubr.msk.f32.gmra.mxu0 %vm258_vm1, %v12447_v53 }
 0x3a5   : > { %4820 = vst.msk [vmem:[#allocation3 + $0x30] sm:$0xff] %vm258_vm1, %v4788_v52  ;;  %v4791_v34 = vadd.f32 %v9617_v41, %v4759_v3  ;;  %4495 = vst.msk [vmem:[#allocation3 + $0x68] sm:$0xff] %vm258_vm1, %v9573_v38  ;;  %9874 = vmatprep.mubr.msk.f32.mxu1 %vm258_vm1, %v12437_v15  ;;  %9924 = vmatprep.mubr.msk.f32.mxu0 %vm258_vm1, %v12453_v40  ;;  %v12533_v38 = vld [vmem:[#allocation2 + $0x13a] sm:$0xff] }
 0x3a6   : > { %v4758_v5 = vld [vmem:[#allocation3 + $0x40] sm:$0xff]  ;;  %v4383_v4 = vpop.f32.mrf.mxu1  ;;  %v4651_v6 = vpop.f32.mrf.mxu0 }
 0x3a7   : > { %4823 = vst.msk [vmem:[#allocation3 + $0x48] sm:$0xff] %vm258_vm1, %v4791_v34  ;;  %v4790_v12 = vadd.f32 %v4758_v5, %v4631_v11  ;;  %4494 = vst.msk [vmem:[#allocation3 + $0x60] sm:$0xff] %vm258_vm1, %v4383_v4 }
 0x3a8   : > { %v4761_v46 = vld [vmem:[#allocation3 + $0x58] sm:$0xff]  ;;  %v9576_v20 = vpop.f32.mrf.mxu1  ;;  %v9626_v63 = vpop.f32.mrf.mxu0  ;;  %9875 = vmatmul.mubr.msk.f32.gmra.mxu1 %vm258_vm1, %v12447_v53  ;;  %9925 = vmatmul.mubr.msk.f32.gmra.mxu0 %vm258_vm1, %v12463_v7 }
 0x3a9   : > { %4822 = vst.msk [vmem:[#allocation3 + $0x40] sm:$0xff] %vm258_vm1, %v4790_v12  ;;  %v4793_v49 = vadd.f32 %v9620_v45, %v4761_v46  ;;  %4497 = vst.msk [vmem:[#allocation3 + $0x78] sm:$0xff] %vm258_vm1, %v9576_v20  ;;  %9877 = vmatprep.mubr.msk.f32.mxu1 %vm258_vm1, %v12453_v40  ;;  %9927 = vmatprep.mubr.msk.f32.mxu0 %vm258_vm1, %v12469_v16  ;;  %v12543_v12 = vld [vmem:[#allocation2 + $0x142] sm:$0xff] }
 0x3aa   : > { %v4760_v26 = vld [vmem:[#allocation3 + $0x50] sm:$0xff]  ;;  %v4393_v29 = vpop.f32.mrf.mxu1  ;;  %v4661_v43 = vpop.f32.mrf.mxu0 }
 0x3ab   : > { %4825 = vst.msk [vmem:[#allocation3 + $0x58] sm:$0xff] %vm258_vm1, %v4793_v49  ;;  %v4792_v62 = vadd.f32 %v4760_v26, %v4641_v39  ;;  %4496 = vst.msk [vmem:[#allocation3 + $0x70] sm:$0xff] %vm258_vm1, %v4393_v29  ;;  %v12549_v49 = vld [vmem:[#allocation2 + $0x152] sm:$0xff] }
 0x3ac   : > { %v4763_v37 = vld [vmem:[#allocation3 + $0x68] sm:$0xff]  ;;  %v9579_v21 = vpop.f32.mrf.mxu1  ;;  %v9629_v2 = vpop.f32.mrf.mxu0  ;;  %9878 = vmatmul.mubr.msk.f32.gmra.mxu1 %vm258_vm1, %v12463_v7  ;;  %9928 = vmatmul.mubr.msk.f32.gmra.mxu0 %vm258_vm1, %v12479_v33 }
 0x3ad   : > { %4824 = vst.msk [vmem:[#allocation3 + $0x50] sm:$0xff] %vm258_vm1, %v4792_v62  ;;  %v4795_v14 = vadd.f32 %v9623_v30, %v4763_v37  ;;  %4499 = vst.msk [vmem:[#allocation3 + $0x88] sm:$0xff] %vm258_vm1, %v9579_v21  ;;  %9880 = vmatprep.mubr.msk.f32.mxu1 %vm258_vm1, %v12469_v16  ;;  %9930 = vmatprep.mubr.msk.f32.mxu0 %vm258_vm1, %v12485_v24  ;;  %v12559_v21 = vld [vmem:[#allocation2 + $0x15a] sm:$0xff] }
 0x3ae   : > { %v4762_v60 = vld [vmem:[#allocation3 + $0x60] sm:$0xff]  ;;  %v4403_v59 = vpop.f32.mrf.mxu1  ;;  %v4671_v48 = vpop.f32.mrf.mxu0 }
 0x3af   : > { %4827 = vst.msk [vmem:[#allocation3 + $0x68] sm:$0xff] %vm258_vm1, %v4795_v14  ;;  %v4794_v51 = vadd.f32 %v4762_v60, %v4651_v6  ;;  %4498 = vst.msk [vmem:[#allocation3 + $0x80] sm:$0xff] %vm258_vm1, %v4403_v59  ;;  %v12565_v59 = vld [vmem:[#allocation2 + $0x16a] sm:$0xff] }
 0x3b0   : > { %v4765_v0 = vld [vmem:[#allocation3 + $0x78] sm:$0xff]  ;;  %v9582_v44 = vpop.f32.mrf.mxu1  ;;  %v9632_v13 = vpop.f32.mrf.mxu0  ;;  %9881 = vmatmul.mubr.msk.f32.gmra.mxu1 %vm258_vm1, %v12479_v33  ;;  %9931 = vmatmul.mubr.msk.f32.gmra.mxu0 %vm258_vm1, %v12495_v54 }
 0x3b1   : > { %4826 = vst.msk [vmem:[#allocation3 + $0x60] sm:$0xff] %vm258_vm1, %v4794_v51  ;;  %v4797_v22 = vadd.f32 %v9626_v63, %v4765_v0  ;;  %4501 = vst.msk [vmem:[#allocation3 + $0x98] sm:$0xff] %vm258_vm1, %v9582_v44  ;;  %9883 = vmatprep.mubr.msk.f32.mxu1 %vm258_vm1, %v12485_v24  ;;  %9933 = vmatprep.mubr.msk.f32.mxu0 %vm258_vm1, %v12501_v36 }
 0x3b2   : > { %v4764_v10 = vld [vmem:[#allocation3 + $0x70] sm:$0xff]  ;;  %v4413_v23 = vpop.f32.mrf.mxu1  ;;  %v4681_v42 = vpop.f32.mrf.mxu0 }
 0x3b3   : > { %4829 = vst.msk [vmem:[#allocation3 + $0x78] sm:$0xff] %vm258_vm1, %v4797_v22  ;;  %v4796_v41 = vadd.f32 %v4764_v10, %v4661_v43  ;;  %4500 = vst.msk [vmem:[#allocation3 + $0x90] sm:$0xff] %vm258_vm1, %v4413_v23  ;;  %v12575_v22 = vld [vmem:[#allocation2 + $0x172] sm:$0xff] }
 0x3b4   : > { %v4767_v1 = vld [vmem:[#allocation3 + $0x88] sm:$0xff]  ;;  %v9585_v57 = vpop.f32.mrf.mxu1  ;;  %v9635_v11 = vpop.f32.mrf.mxu0  ;;  %9884 = vmatmul.mubr.msk.f32.gmra.mxu1 %vm258_vm1, %v12495_v54  ;;  %9934 = vmatmul.mubr.msk.f32.gmra.mxu0 %vm258_vm1, %v12511_v50 }
 0x3b5   : > { %4828 = vst.msk [vmem:[#allocation3 + $0x70] sm:$0xff] %vm258_vm1, %v4796_v41  ;;  %v4799_v56 = vadd.f32 %v9629_v2, %v4767_v1  ;;  %4503 = vst.msk [vmem:[#allocation3 + $0xa8] sm:$0xff] %vm258_vm1, %v9585_v57  ;;  %9886 = vmatprep.mubr.msk.f32.mxu1 %vm258_vm1, %v12501_v36  ;;  %9936 = vmatprep.mubr.msk.f32.mxu0 %vm258_vm1, %v12517_v8  ;;  %v12581_v41 = vld [vmem:[#allocation2 + $0x182] sm:$0xff] }
 0x3b6   : > { %v4766_v32 = vld [vmem:[#allocation3 + $0x80] sm:$0xff]  ;;  %v4423_v45 = vpop.f32.mrf.mxu1  ;;  %v4691_v9 = vpop.f32.mrf.mxu0 }
 0x3b7   : > { %4831 = vst.msk [vmem:[#allocation3 + $0x88] sm:$0xff] %vm258_vm1, %v4799_v56  ;;  %v4798_v18 = vadd.f32 %v4766_v32, %v4671_v48  ;;  %4502 = vst.msk [vmem:[#allocation3 + $0xa0] sm:$0xff] %vm258_vm1, %v4423_v45  ;;  %v12591_v45 = vld [vmem:[#allocation2 + $0x18a] sm:$0xff] }
 0x3b8   : > { %v4769_v39 = vld [vmem:[#allocation3 + $0x98] sm:$0xff]  ;;  %v9588_v52 = vpop.f32.mrf.mxu1  ;;  %v9638_v3 = vpop.f32.mrf.mxu0  ;;  %9887 = vmatmul.mubr.msk.f32.gmra.mxu1 %vm258_vm1, %v12511_v50  ;;  %9937 = vmatmul.mubr.msk.f32.gmra.mxu0 %vm258_vm1, %v12527_v17 }
 0x3b9   : > { %4830 = vst.msk [vmem:[#allocation3 + $0x80] sm:$0xff] %vm258_vm1, %v4798_v18  ;;  %v4801_v30 = vadd.f32 %v9632_v13, %v4769_v39  ;;  %4505 = vst.msk [vmem:[#allocation3 + $0xb8] sm:$0xff] %vm258_vm1, %v9588_v52  ;;  %9889 = vmatprep.mubr.msk.f32.mxu1 %vm258_vm1, %v12517_v8  ;;  %9939 = vmatprep.mubr.msk.f32.mxu0 %vm258_vm1, %v12533_v38 }
 0x3ba   : > { %v4768_v34 = vld [vmem:[#allocation3 + $0x90] sm:$0xff]  ;;  %v4433_v5 = vpop.f32.mrf.mxu1  ;;  %v4701_v4 = vpop.f32.mrf.mxu0 }
 0x3bb   : > { %4833 = vst.msk [vmem:[#allocation3 + $0x98] sm:$0xff] %vm258_vm1, %v4801_v30  ;;  %v4800_v6 = vadd.f32 %v4768_v34, %v4681_v42  ;;  %4504 = vst.msk [vmem:[#allocation3 + $0xb0] sm:$0xff] %vm258_vm1, %v4433_v5 }
 0x3bc   : > { %v4771_v46 = vld [vmem:[#allocation3 + $0xa8] sm:$0xff]  ;;  %v9591_v20 = vpop.f32.mrf.mxu1  ;;  %v9641_v63 = vpop.f32.mrf.mxu0  ;;  %9890 = vmatmul.mubr.msk.f32.gmra.mxu1 %vm258_vm1, %v12527_v17  ;;  %9940 = vmatmul.mubr.msk.f32.gmra.mxu0 %vm258_vm1, %v12543_v12 }
 0x3bd   : > { %4832 = vst.msk [vmem:[#allocation3 + $0x90] sm:$0xff] %vm258_vm1, %v4800_v6  ;;  %v4803_v26 = vadd.f32 %v9635_v11, %v4771_v46  ;;  %4507 = vst.msk [vmem:[#allocation3 + $0xc8] sm:$0xff] %vm258_vm1, %v9591_v20  ;;  %9892 = vmatprep.mubr.msk.f32.mxu1 %vm258_vm1, %v12533_v38  ;;  %9942 = vmatprep.mubr.msk.f32.mxu0 %vm258_vm1, %v12549_v49  ;;  %v5083_v46 = vld [vmem:[#allocation3 + $0x8] sm:$0xff] }
 0x3be   : > { %v4770_v29 = vld [vmem:[#allocation3 + $0xa0] sm:$0xff]  ;;  %v4443_v43 = vpop.f32.mrf.mxu1  ;;  %v4711_v62 = vpop.f32.mrf.mxu0 }
 0x3bf   : > { %4835 = vst.msk [vmem:[#allocation3 + $0xa8] sm:$0xff] %vm258_vm1, %v4803_v26  ;;  %v4802_v37 = vadd.f32 %v4770_v29, %v4691_v9  ;;  %4506 = vst.msk [vmem:[#allocation3 + $0xc0] sm:$0xff] %vm258_vm1, %v4443_v43  ;;  %v5082_v43 = vld [vmem:[#allocation3] sm:$0xff] }
 0x3c0   : > { %v4773_v2 = vld [vmem:[#allocation3 + $0xb8] sm:$0xff]  ;;  %v9594_v14 = vpop.f32.mrf.mxu1  ;;  %v9644_v60 = vpop.f32.mrf.mxu0  ;;  %9893 = vmatmul.mubr.msk.f32.gmra.mxu1 %vm258_vm1, %v12543_v12  ;;  %9943 = vmatmul.mubr.msk.f32.gmra.mxu0 %vm258_vm1, %v12559_v21 }
 0x3c1   : > { %4834 = vst.msk [vmem:[#allocation3 + $0xa0] sm:$0xff] %vm258_vm1, %v4802_v37  ;;  %v4805_v48 = vadd.f32 %v9638_v3, %v4773_v2  ;;  %4509 = vst.msk [vmem:[#allocation3 + $0xd8] sm:$0xff] %vm258_vm1, %v9594_v14  ;;  %9895 = vmatprep.mubr.msk.f32.mxu1 %vm258_vm1, %v12549_v49  ;;  %9945 = vmatprep.mubr.msk.f32.mxu0 %vm258_vm1, %v12565_v59 }
 0x3c2   : > { %v4772_v51 = vld [vmem:[#allocation3 + $0xb0] sm:$0xff]  ;;  %v4453_v0 = vpop.f32.mrf.mxu1  ;;  %v4721_v44 = vpop.f32.mrf.mxu0 }
 0x3c3   : > { %4837 = vst.msk [vmem:[#allocation3 + $0xb8] sm:$0xff] %vm258_vm1, %v4805_v48  ;;  %v4804_v13 = vadd.f32 %v4772_v51, %v4701_v4  ;;  %4508 = vst.msk [vmem:[#allocation3 + $0xd0] sm:$0xff] %vm258_vm1, %v4453_v0 }
 0x3c4   : > { %v4775_v10 = vld [vmem:[#allocation3 + $0xc8] sm:$0xff]  ;;  %v9597_v23 = vpop.f32.mrf.mxu1  ;;  %v9647_v42 = vpop.f32.mrf.mxu0  ;;  %9896 = vmatmul.mubr.msk.f32.gmra.mxu1 %vm258_vm1, %v12559_v21  ;;  %9946 = vmatmul.mubr.msk.f32.gmra.mxu0 %vm258_vm1, %v12575_v22 }
 0x3c5   : > { %4836 = vst.msk [vmem:[#allocation3 + $0xb0] sm:$0xff] %vm258_vm1, %v4804_v13  ;;  %v4807_v1 = vadd.f32 %v9641_v63, %v4775_v10  ;;  %4511 = vst.msk [vmem:[#allocation3 + $0xe8] sm:$0xff] %vm258_vm1, %v9597_v23  ;;  %9898 = vmatprep.mubr.msk.f32.mxu1 %vm258_vm1, %v12565_v59  ;;  %9948 = vmatprep.mubr.msk.f32.mxu0 %vm258_vm1, %v12581_v41  ;;  %v5084_v13 = vld [vmem:[#allocation3 + $0x10] sm:$0xff] }
 0x3c6   : > { %v4774_v57 = vld [vmem:[#allocation3 + $0xc0] sm:$0xff]  ;;  %v4463_v11 = vpop.f32.mrf.mxu1  ;;  %v4731_v56 = vpop.f32.mrf.mxu0 }
 0x3c7   : > { %4839 = vst.msk [vmem:[#allocation3 + $0xc8] sm:$0xff] %vm258_vm1, %v4807_v1  ;;  %v4806_v32 = vadd.f32 %v4774_v57, %v4711_v62  ;;  %4510 = vst.msk [vmem:[#allocation3 + $0xe0] sm:$0xff] %vm258_vm1, %v4463_v11  ;;  %v5087_v1 = vld [vmem:[#allocation3 + $0x28] sm:$0xff] }
 0x3c8   : > { %v4777_v9 = vld [vmem:[#allocation3 + $0xd8] sm:$0xff]  ;;  %v9600_v18 = vpop.f32.mrf.mxu1  ;;  %v9650_v39 = vpop.f32.mrf.mxu0  ;;  %9899 = vmatmul.mubr.msk.f32.gmra.mxu1 %vm258_vm1, %v12575_v22  ;;  %9949 = vmatmul.mubr.msk.f32.gmra.mxu0 %vm258_vm1, %v12591_v45 }
 0x3c9   : > { %4838 = vst.msk [vmem:[#allocation3 + $0xc0] sm:$0xff] %vm258_vm1, %v4806_v32  ;;  %v4809_v52 = vadd.f32 %v9644_v60, %v4777_v9  ;;  %4513 = vst.msk [vmem:[#allocation3 + $0xf8] sm:$0xff] %vm258_vm1, %v9600_v18  ;;  %9953 = vmatprep.mubr.msk.f32.mxu1 %vm258_vm1, %v12366_v25  ;;  %v5086_v32 = vld [vmem:[#allocation3 + $0x20] sm:$0xff] }
 0x3ca   : > { %v4776_v3 = vld [vmem:[#allocation3 + $0xd0] sm:$0xff]  ;;  %v4473_v30 = vpop.f32.mrf.mxu1  ;;  %v4741_v34 = vpop.f32.mrf.mxu0 }
 0x3cb   : > { %4841 = vst.msk [vmem:[#allocation3 + $0xd8] sm:$0xff] %vm258_vm1, %v4809_v52  ;;  %v4808_v5 = vadd.f32 %v4776_v3, %v4721_v44  ;;  %4512 = vst.msk [vmem:[#allocation3 + $0xf0] sm:$0xff] %vm258_vm1, %v4473_v30  ;;  %v5089_v30 = vld [vmem:[#allocation3 + $0x38] sm:$0xff] }
 0x3cc   : > { %v4779_v4 = vld [vmem:[#allocation3 + $0xe8] sm:$0xff]  ;;  %v9655_v6 = vpop.f32.mrf.mxu1  ;;  %v9705_v20 = vpop.f32.mrf.mxu0  ;;  %9954 = vmatmul.mubr.msk.f32.vlgmr.msra.gmra.mxu1 %vm258_vm1, %v12371_v19  ;;  %v5085_v19 = vld [vmem:[#allocation3 + $0x18] sm:$0xff] }
 0x3cd   : > { %4840 = vst.msk [vmem:[#allocation3 + $0xd0] sm:$0xff] %vm258_vm1, %v4808_v5  ;;  %v4811_v63 = vadd.f32 %v9647_v42, %v4779_v4  ;;  %v5115_v26 = vadd.f32 %v9655_v6, %v5083_v46  ;;  %9956 = vmatprep.mubr.msk.f32.mxu1 %vm258_vm1, %v12376_v27  ;;  %v5088_v6 = vld [vmem:[#allocation3 + $0x30] sm:$0xff] }
 0x3ce   : > { %v4778_v25 = vld [vmem:[#allocation3 + $0xe0] sm:$0xff]  ;;  %v4923_v29 = vpop.f32.mrf.mxu1  ;;  %v5381_v62 = vpop.f32.mrf.mxu0 }
 0x3cf   : > { %4843 = vst.msk [vmem:[#allocation3 + $0xe8] sm:$0xff] %vm258_vm1, %v4811_v63  ;;  %v4810_v37 = vadd.f32 %v4778_v25, %v4731_v56  ;;  %5147 = vst.msk [vmem:[#allocation3 + $0x8] sm:$0xff] %vm258_vm1, %v5115_v26  ;;  %v5114_v2 = vadd.f32 %v5082_v43, %v4923_v29  ;;  %v5091_v25 = vld [vmem:[#allocation3 + $0x48] sm:$0xff] }
 0x3d0   : > { %v4781_v14 = vld [vmem:[#allocation3 + $0xf8] sm:$0xff]  ;;  %v9658_v60 = vpop.f32.mrf.mxu1  ;;  %v9708_v48 = vpop.f32.mrf.mxu0  ;;  %9957 = vmatmul.mubr.msk.f32.gmra.mxu1 %vm258_vm1, %v12384_v55 }
 0x3d1   : > { %4842 = vst.msk [vmem:[#allocation3 + $0xe0] sm:$0xff] %vm258_vm1, %v4810_v37  ;;  %v4813_v27 = vadd.f32 %v9650_v39, %v4781_v14  ;;  %5146 = vst.msk [vmem:[#allocation3] sm:$0xff] %vm258_vm1, %v5114_v2  ;;  %v5117_v51 = vadd.f32 %v9658_v60, %v5085_v19  ;;  %9959 = vmatprep.mubr.msk.f32.mxu1 %vm258_vm1, %v12390_v47  ;;  %v5090_v2 = vld [vmem:[#allocation3 + $0x40] sm:$0xff] }
 0x3d2   : > { %v4780_v0 = vld [vmem:[#allocation3 + $0xf0] sm:$0xff]  ;;  %v4933_v44 = vpop.f32.mrf.mxu1  ;;  %v5391_v10 = vpop.f32.mrf.mxu0 }
 0x3d3   : > { %4845 = vst.msk [vmem:[#allocation3 + $0xf8] sm:$0xff] %vm258_vm1, %v4813_v27  ;;  %v4812_v23 = vadd.f32 %v4780_v0, %v4741_v34  ;;  %5149 = vst.msk [vmem:[#allocation3 + $0x18] sm:$0xff] %vm258_vm1, %v5117_v51  ;;  %v5116_v42 = vadd.f32 %v5084_v13, %v4933_v44  ;;  %v5093_v27 = vld [vmem:[#allocation3 + $0x58] sm:$0xff] }
 0x3d4   : > { %v9661_v55 = vpop.f32.mrf.mxu1  ;;  %v9711_v57 = vpop.f32.mrf.mxu0  ;;  %9960 = vmatmul.mubr.msk.f32.gmra.mxu1 %vm258_vm1, %v12399_v61 }
 0x3d5   : > { %4844 = vst.msk [vmem:[#allocation3 + $0xf0] sm:$0xff] %vm258_vm1, %v4812_v23  ;;  %5148 = vst.msk [vmem:[#allocation3 + $0x10] sm:$0xff] %vm258_vm1, %v5116_v42  ;;  %v5119_v47 = vadd.f32 %v9661_v55, %v5087_v1  ;;  %9962 = vmatprep.mubr.msk.f32.mxu1 %vm258_vm1, %v12405_v31 }
 0x3d6   : > { %v5541_v11 = vld [vmem:[#allocation3 + $0x8] sm:$0xff]  ;;  %v4943_v56 = vpop.f32.mrf.mxu1  ;;  %v5401_v9 = vpop.f32.mrf.mxu0 }
 0x3d7   : > { %v5573_v18 = vadd.f32 %v9705_v20, %v5541_v11  ;;  %5151 = vst.msk [vmem:[#allocation3 + $0x28] sm:$0xff] %vm258_vm1, %v5119_v47  ;;  %v5118_v39 = vadd.f32 %v5086_v32, %v4943_v56 }
 0x3d8   : > { %v5540_v52 = vld [vmem:[#allocation3] sm:$0xff]  ;;  %v9664_v3 = vpop.f32.mrf.mxu1  ;;  %v9714_v61 = vpop.f32.mrf.mxu0  ;;  %9963 = vmatmul.mubr.msk.f32.gmra.mxu1 %vm258_vm1, %v12415_v35 }
 0x3d9   : > { %5605 = vst.msk [vmem:[#allocation3 + $0x8] sm:$0xff] %vm258_vm1, %v5573_v18  ;;  %v5572_v34 = vadd.f32 %v5540_v52, %v5381_v62  ;;  %5150 = vst.msk [vmem:[#allocation3 + $0x20] sm:$0xff] %vm258_vm1, %v5118_v39  ;;  %v5121_v31 = vadd.f32 %v9664_v3, %v5089_v30  ;;  %9965 = vmatprep.mubr.msk.f32.mxu1 %vm258_vm1, %v12421_v58  ;;  %v5097_v30 = vld [vmem:[#allocation3 + $0x78] sm:$0xff] }
 0x3da   : > { %v5543_v5 = vld [vmem:[#allocation3 + $0x18] sm:$0xff]  ;;  %v4953_v4 = vpop.f32.mrf.mxu1  ;;  %v5411_v46 = vpop.f32.mrf.mxu0 }
 0x3db   : > { %5604 = vst.msk [vmem:[#allocation3] sm:$0xff] %vm258_vm1, %v5572_v34  ;;  %v5575_v20 = vadd.f32 %v9708_v48, %v5543_v5  ;;  %5153 = vst.msk [vmem:[#allocation3 + $0x38] sm:$0xff] %vm258_vm1, %v5121_v31  ;;  %v5120_v63 = vadd.f32 %v5088_v6, %v4953_v4  ;;  %v5096_v4 = vld [vmem:[#allocation3 + $0x70] sm:$0xff] }
 0x3dc   : > { %v5542_v35 = vld [vmem:[#allocation3 + $0x10] sm:$0xff]  ;;  %v9667_v26 = vpop.f32.mrf.mxu1  ;;  %v9717_v29 = vpop.f32.mrf.mxu0  ;;  %9966 = vmatmul.mubr.msk.f32.gmra.mxu1 %vm258_vm1, %v12431_v28 }
 0x3dd   : > { %5607 = vst.msk [vmem:[#allocation3 + $0x18] sm:$0xff] %vm258_vm1, %v5575_v20  ;;  %v5574_v58 = vadd.f32 %v5542_v35, %v5391_v10  ;;  %5152 = vst.msk [vmem:[#allocation3 + $0x30] sm:$0xff] %vm258_vm1, %v5120_v63  ;;  %v5123_v43 = vadd.f32 %v9667_v26, %v5091_v25  ;;  %9968 = vmatprep.mubr.msk.f32.mxu1 %vm258_vm1, %v12437_v15  ;;  %v5092_v10 = vld [vmem:[#allocation3 + $0x50] sm:$0xff]  ;;  %v5099_v35 = vld [vmem:[#allocation3 + $0x88] sm:$0xff] }
 0x3de   : > { %v5545_v62 = vld [vmem:[#allocation3 + $0x28] sm:$0xff]  ;;  %v4963_v37 = vpop.f32.mrf.mxu1  ;;  %v5421_v14 = vpop.f32.mrf.mxu0 }
 0x3df   : > { %5606 = vst.msk [vmem:[#allocation3 + $0x10] sm:$0xff] %vm258_vm1, %v5574_v58  ;;  %v5577_v60 = vadd.f32 %v9711_v57, %v5545_v62  ;;  %5155 = vst.msk [vmem:[#allocation3 + $0x48] sm:$0xff] %vm258_vm1, %v5123_v43  ;;  %v5122_v19 = vadd.f32 %v5090_v2, %v4963_v37  ;;  %v5095_v57 = vld [vmem:[#allocation3 + $0x68] sm:$0xff]  ;;  %v5098_v43 = vld [vmem:[#allocation3 + $0x80] sm:$0xff] }
 0x3e0   : > { %v5544_v28 = vld [vmem:[#allocation3 + $0x20] sm:$0xff]  ;;  %v9670_v48 = vpop.f32.mrf.mxu1  ;;  %v9720_v51 = vpop.f32.mrf.mxu0  ;;  %9969 = vmatmul.mubr.msk.f32.gmra.mxu1 %vm258_vm1, %v12447_v53 }
 0x3e1   : > { %5609 = vst.msk [vmem:[#allocation3 + $0x28] sm:$0xff] %vm258_vm1, %v5577_v60  ;;  %v5576_v15 = vadd.f32 %v5544_v28, %v5401_v9  ;;  %5154 = vst.msk [vmem:[#allocation3 + $0x40] sm:$0xff] %vm258_vm1, %v5122_v19  ;;  %v5125_v0 = vadd.f32 %v9670_v48, %v5093_v27  ;;  %9971 = vmatprep.mubr.msk.f32.mxu1 %vm258_vm1, %v12453_v40  ;;  %v5094_v9 = vld [vmem:[#allocation3 + $0x60] sm:$0xff]  ;;  %v5101_v60 = vld [vmem:[#allocation3 + $0x98] sm:$0xff] }
 0x3e2   : > { %v5547_v44 = vld [vmem:[#allocation3 + $0x38] sm:$0xff]  ;;  %v4973_v13 = vpop.f32.mrf.mxu1  ;;  %v5431_v23 = vpop.f32.mrf.mxu0 }
 0x3e3   : > { %5608 = vst.msk [vmem:[#allocation3 + $0x20] sm:$0xff] %vm258_vm1, %v5576_v15  ;;  %v5579_v42 = vadd.f32 %v9714_v61, %v5547_v44  ;;  %5157 = vst.msk [vmem:[#allocation3 + $0x58] sm:$0xff] %vm258_vm1, %v5125_v0  ;;  %v5124_v55 = vadd.f32 %v5092_v10, %v4973_v13  ;;  %v5103_v10 = vld [vmem:[#allocation3 + $0xa8] sm:$0xff] }
 0x3e4   : > { %v5546_v53 = vld [vmem:[#allocation3 + $0x30] sm:$0xff]  ;;  %v9673_v1 = vpop.f32.mrf.mxu1  ;;  %v9723_v47 = vpop.f32.mrf.mxu0  ;;  %9972 = vmatmul.mubr.msk.f32.gmra.mxu1 %vm258_vm1, %v12463_v7 }
 0x3e5   : > { %5611 = vst.msk [vmem:[#allocation3 + $0x38] sm:$0xff] %vm258_vm1, %v5579_v42  ;;  %v5578_v40 = vadd.f32 %v5546_v53, %v5411_v46  ;;  %5156 = vst.msk [vmem:[#allocation3 + $0x50] sm:$0xff] %vm258_vm1, %v5124_v55  ;;  %v5127_v11 = vadd.f32 %v9673_v1, %v5095_v57  ;;  %9974 = vmatprep.mubr.msk.f32.mxu1 %vm258_vm1, %v12469_v16  ;;  %v5102_v1 = vld [vmem:[#allocation3 + $0xa0] sm:$0xff] }
 0x3e6   : > { %v5549_v56 = vld [vmem:[#allocation3 + $0x48] sm:$0xff]  ;;  %v4983_v32 = vpop.f32.mrf.mxu1  ;;  %v5441_v18 = vpop.f32.mrf.mxu0 }
 0x3e7   : > { %5610 = vst.msk [vmem:[#allocation3 + $0x30] sm:$0xff] %vm258_vm1, %v5578_v40  ;;  %v5581_v39 = vadd.f32 %v9717_v29, %v5549_v56  ;;  %5159 = vst.msk [vmem:[#allocation3 + $0x68] sm:$0xff] %vm258_vm1, %v5127_v11  ;;  %v5126_v52 = vadd.f32 %v5094_v9, %v4983_v32  ;;  %v5105_v56 = vld [vmem:[#allocation3 + $0xb8] sm:$0xff] }
 0x3e8   : > { %v5548_v7 = vld [vmem:[#allocation3 + $0x40] sm:$0xff]  ;;  %v9676_v3 = vpop.f32.mrf.mxu1  ;;  %v9726_v61 = vpop.f32.mrf.mxu0  ;;  %9975 = vmatmul.mubr.msk.f32.gmra.mxu1 %vm258_vm1, %v12479_v33 }
 0x3e9   : > { %5613 = vst.msk [vmem:[#allocation3 + $0x48] sm:$0xff] %vm258_vm1, %v5581_v39  ;;  %v5580_v16 = vadd.f32 %v5548_v7, %v5421_v14  ;;  %5158 = vst.msk [vmem:[#allocation3 + $0x60] sm:$0xff] %vm258_vm1, %v5126_v52  ;;  %v5129_v34 = vadd.f32 %v9676_v3, %v5097_v30  ;;  %9977 = vmatprep.mubr.msk.f32.mxu1 %vm258_vm1, %v12485_v24  ;;  %v5104_v52 = vld [vmem:[#allocation3 + $0xb0] sm:$0xff] }
 0x3ea   : > { %v5551_v31 = vld [vmem:[#allocation3 + $0x58] sm:$0xff]  ;;  %v4993_v5 = vpop.f32.mrf.mxu1  ;;  %v5451_v6 = vpop.f32.mrf.mxu0 }
 0x3eb   : > { %5612 = vst.msk [vmem:[#allocation3 + $0x40] sm:$0xff] %vm258_vm1, %v5580_v16  ;;  %v5583_v46 = vadd.f32 %v9720_v51, %v5551_v31  ;;  %5161 = vst.msk [vmem:[#allocation3 + $0x78] sm:$0xff] %vm258_vm1, %v5129_v34  ;;  %v5128_v20 = vadd.f32 %v5096_v4, %v4993_v5  ;;  %v5100_v51 = vld [vmem:[#allocation3 + $0x90] sm:$0xff]  ;;  %v5107_v16 = vld [vmem:[#allocation3 + $0xc8] sm:$0xff] }
 0x3ec   : > { %v5550_v33 = vld [vmem:[#allocation3 + $0x50] sm:$0xff]  ;;  %v9679_v63 = vpop.f32.mrf.mxu1  ;;  %v9729_v26 = vpop.f32.mrf.mxu0  ;;  %9978 = vmatmul.mubr.msk.f32.gmra.mxu1 %vm258_vm1, %v12495_v54 }
 0x3ed   : > { %5615 = vst.msk [vmem:[#allocation3 + $0x58] sm:$0xff] %vm258_vm1, %v5583_v46  ;;  %v5582_v24 = vadd.f32 %v5550_v33, %v5431_v23  ;;  %5160 = vst.msk [vmem:[#allocation3 + $0x70] sm:$0xff] %vm258_vm1, %v5128_v20  ;;  %v5131_v25 = vadd.f32 %v9679_v63, %v5099_v35  ;;  %9980 = vmatprep.mubr.msk.f32.mxu1 %vm258_vm1, %v12501_v36  ;;  %v5109_v35 = vld [vmem:[#allocation3 + $0xd8] sm:$0xff] }
 0x3ee   : > { %v5553_v29 = vld [vmem:[#allocation3 + $0x68] sm:$0xff]  ;;  %v5003_v58 = vpop.f32.mrf.mxu1  ;;  %v5461_v62 = vpop.f32.mrf.mxu0 }
 0x3ef   : > { %5614 = vst.msk [vmem:[#allocation3 + $0x50] sm:$0xff] %vm258_vm1, %v5582_v24  ;;  %v5585_v37 = vadd.f32 %v9723_v47, %v5553_v29  ;;  %5163 = vst.msk [vmem:[#allocation3 + $0x88] sm:$0xff] %vm258_vm1, %v5131_v25  ;;  %v5130_v2 = vadd.f32 %v5098_v43, %v5003_v58  ;;  %v5108_v58 = vld [vmem:[#allocation3 + $0xd0] sm:$0xff] }
 0x3f0   : > { %v5552_v54 = vld [vmem:[#allocation3 + $0x60] sm:$0xff]  ;;  %v9682_v14 = vpop.f32.mrf.mxu1  ;;  %v9732_v19 = vpop.f32.mrf.mxu0  ;;  %9981 = vmatmul.mubr.msk.f32.gmra.mxu1 %vm258_vm1, %v12511_v50 }
 0x3f1   : > { %5617 = vst.msk [vmem:[#allocation3 + $0x68] sm:$0xff] %vm258_vm1, %v5585_v37  ;;  %v5584_v36 = vadd.f32 %v5552_v54, %v5441_v18  ;;  %5162 = vst.msk [vmem:[#allocation3 + $0x80] sm:$0xff] %vm258_vm1, %v5130_v2  ;;  %v5133_v28 = vadd.f32 %v9682_v14, %v5101_v60  ;;  %9983 = vmatprep.mubr.msk.f32.mxu1 %vm258_vm1, %v12517_v8  ;;  %v5111_v54 = vld [vmem:[#allocation3 + $0xe8] sm:$0xff] }
 0x3f2   : > { %v5555_v48 = vld [vmem:[#allocation3 + $0x78] sm:$0xff]  ;;  %v5013_v27 = vpop.f32.mrf.mxu1  ;;  %v5471_v15 = vpop.f32.mrf.mxu0  ;;  %v6334_v60 = vld [vmem:[#allocation2 + $0x19a] sm:$0xff] }
 0x3f3   : > { %5616 = vst.msk [vmem:[#allocation3 + $0x60] sm:$0xff] %vm258_vm1, %v5584_v36  ;;  %v5587_v0 = vadd.f32 %v9726_v61, %v5555_v48  ;;  %5165 = vst.msk [vmem:[#allocation3 + $0x98] sm:$0xff] %vm258_vm1, %v5133_v28  ;;  %v5132_v44 = vadd.f32 %v5100_v51, %v5013_v27  ;;  %v5110_v48 = vld [vmem:[#allocation3 + $0xe0] sm:$0xff] }
 0x3f4   : > { %v5554_v50 = vld [vmem:[#allocation3 + $0x70] sm:$0xff]  ;;  %v9685_v13 = vpop.f32.mrf.mxu1  ;;  %v9735_v23 = vpop.f32.mrf.mxu0  ;;  %9984 = vmatmul.mubr.msk.f32.gmra.mxu1 %vm258_vm1, %v12527_v17 }
 0x3f5   : > { %5619 = vst.msk [vmem:[#allocation3 + $0x78] sm:$0xff] %vm258_vm1, %v5587_v0  ;;  %v5586_v8 = vadd.f32 %v5554_v50, %v5451_v6  ;;  %5164 = vst.msk [vmem:[#allocation3 + $0x90] sm:$0xff] %vm258_vm1, %v5132_v44  ;;  %v5135_v42 = vadd.f32 %v9685_v13, %v5103_v10  ;;  %9986 = vmatprep.mubr.msk.f32.mxu1 %vm258_vm1, %v12533_v38  ;;  %v5106_v6 = vld [vmem:[#allocation3 + $0xc0] sm:$0xff]  ;;  %v5113_v50 = vld [vmem:[#allocation3 + $0xf8] sm:$0xff] }
 0x3f6   : > { %v5557_v55 = vld [vmem:[#allocation3 + $0x88] sm:$0xff]  ;;  %v5023_v53 = vpop.f32.mrf.mxu1  ;;  %v5481_v57 = vpop.f32.mrf.mxu0 }
 0x3f7   : > { %5618 = vst.msk [vmem:[#allocation3 + $0x70] sm:$0xff] %vm258_vm1, %v5586_v8  ;;  %v5589_v47 = vadd.f32 %v9729_v26, %v5557_v55  ;;  %5167 = vst.msk [vmem:[#allocation3 + $0xa8] sm:$0xff] %vm258_vm1, %v5135_v42  ;;  %v5134_v40 = vadd.f32 %v5102_v1, %v5023_v53  ;;  %v5112_v55 = vld [vmem:[#allocation3 + $0xf0] sm:$0xff] }
 0x3f8   : > { %v5556_v17 = vld [vmem:[#allocation3 + $0x80] sm:$0xff]  ;;  %v9688_v11 = vpop.f32.mrf.mxu1  ;;  %v9738_v32 = vpop.f32.mrf.mxu0  ;;  %9987 = vmatmul.mubr.msk.f32.gmra.mxu1 %vm258_vm1, %v12543_v12 }
 0x3f9   : > { %5621 = vst.msk [vmem:[#allocation3 + $0x88] sm:$0xff] %vm258_vm1, %v5589_v47  ;;  %v5588_v38 = vadd.f32 %v5556_v17, %v5461_v62  ;;  %5166 = vst.msk [vmem:[#allocation3 + $0xa0] sm:$0xff] %vm258_vm1, %v5134_v40  ;;  %v5137_v9 = vadd.f32 %v9688_v11, %v5105_v56  ;;  %9989 = vmatprep.mubr.msk.f32.mxu1 %vm258_vm1, %v12549_v49  ;;  %v5873_v17 = vld [vmem:[#allocation3 + $0x8] sm:$0xff] }
 0x3fa   : > { %v5559_v18 = vld [vmem:[#allocation3 + $0x98] sm:$0xff]  ;;  %v5033_v39 = vpop.f32.mrf.mxu1  ;;  %v5491_v7 = vpop.f32.mrf.mxu0 }
 0x3fb   : > { %5620 = vst.msk [vmem:[#allocation3 + $0x80] sm:$0xff] %vm258_vm1, %v5588_v38  ;;  %v5591_v3 = vadd.f32 %v9732_v19, %v5559_v18  ;;  %5169 = vst.msk [vmem:[#allocation3 + $0xb8] sm:$0xff] %vm258_vm1, %v5137_v9  ;;  %v5136_v30 = vadd.f32 %v5104_v52, %v5033_v39  ;;  %v5872_v18 = vld [vmem:[#allocation3] sm:$0xff] }
 0x3fc   : > { %v5558_v12 = vld [vmem:[#allocation3 + $0x90] sm:$0xff]  ;;  %v9691_v61 = vpop.f32.mrf.mxu1  ;;  %v9741_v34 = vpop.f32.mrf.mxu0  ;;  %9990 = vmatmul.mubr.msk.f32.gmra.mxu1 %vm258_vm1, %v12559_v21 }
 0x3fd   : > { %5623 = vst.msk [vmem:[#allocation3 + $0x98] sm:$0xff] %vm258_vm1, %v5591_v3  ;;  %v5590_v49 = vadd.f32 %v5558_v12, %v5471_v15  ;;  %5168 = vst.msk [vmem:[#allocation3 + $0xb0] sm:$0xff] %vm258_vm1, %v5136_v30  ;;  %v5139_v31 = vadd.f32 %v9691_v61, %v5107_v16  ;;  %9992 = vmatprep.mubr.msk.f32.mxu1 %vm258_vm1, %v12565_v59  ;;  %v5875_v12 = vld [vmem:[#allocation3 + $0x18] sm:$0xff] }
 0x3fe   : > { %v5561_v5 = vld [vmem:[#allocation3 + $0xa8] sm:$0xff]  ;;  %v5043_v4 = vpop.f32.mrf.mxu1  ;;  %v5501_v46 = vpop.f32.mrf.mxu0 }
 0x3ff   : > { %5622 = vst.msk [vmem:[#allocation3 + $0x90] sm:$0xff] %vm258_vm1, %v5590_v49  ;;  %v5593_v20 = vadd.f32 %v9735_v23, %v5561_v5  ;;  %5171 = vst.msk [vmem:[#allocation3 + $0xc8] sm:$0xff] %vm258_vm1, %v5139_v31  ;;  %v5138_v33 = vadd.f32 %v5106_v6, %v5043_v4  ;;  %v5874_v5 = vld [vmem:[#allocation3 + $0x10] sm:$0xff] }
 0x400   : > { %v5560_v21 = vld [vmem:[#allocation3 + $0xa0] sm:$0xff]  ;;  %v9694_v63 = vpop.f32.mrf.mxu1  ;;  %v9744_v26 = vpop.f32.mrf.mxu0  ;;  %9993 = vmatmul.mubr.msk.f32.gmra.mxu1 %vm258_vm1, %v12575_v22 }
 0x401   : > { %5625 = vst.msk [vmem:[#allocation3 + $0xa8] sm:$0xff] %vm258_vm1, %v5593_v20  ;;  %v5592_v59 = vadd.f32 %v5560_v21, %v5481_v57  ;;  %5170 = vst.msk [vmem:[#allocation3 + $0xc0] sm:$0xff] %vm258_vm1, %v5138_v33  ;;  %v5141_v24 = vadd.f32 %v9694_v63, %v5109_v35  ;;  %9995 = vmatprep.mubr.msk.f32.mxu1 %vm258_vm1, %v12581_v41  ;;  %v5877_v21 = vld [vmem:[#allocation3 + $0x28] sm:$0xff] }
 0x402   : > { %v5563_v25 = vld [vmem:[#allocation3 + $0xb8] sm:$0xff]  ;;  %v5053_v29 = vpop.f32.mrf.mxu1  ;;  %v5511_v43 = vpop.f32.mrf.mxu0 }
 0x403   : > { %5624 = vst.msk [vmem:[#allocation3 + $0xa0] sm:$0xff] %vm258_vm1, %v5592_v59  ;;  %v5595_v62 = vadd.f32 %v9738_v32, %v5563_v25  ;;  %5173 = vst.msk [vmem:[#allocation3 + $0xd8] sm:$0xff] %vm258_vm1, %v5141_v24  ;;  %v5140_v37 = vadd.f32 %v5108_v58, %v5053_v29  ;;  %v5876_v25 = vld [vmem:[#allocation3 + $0x20] sm:$0xff] }
 0x404   : > { %v5562_v22 = vld [vmem:[#allocation3 + $0xb0] sm:$0xff]  ;;  %v9697_v2 = vpop.f32.mrf.mxu1  ;;  %v9747_v14 = vpop.f32.mrf.mxu0  ;;  %9996 = vmatmul.mubr.msk.f32.gmra.mxu1 %vm258_vm1, %v12591_v45 }
 0x405   : > { %5627 = vst.msk [vmem:[#allocation3 + $0xb8] sm:$0xff] %vm258_vm1, %v5595_v62  ;;  %v5594_v41 = vadd.f32 %v5562_v22, %v5491_v7  ;;  %5172 = vst.msk [vmem:[#allocation3 + $0xd0] sm:$0xff] %vm258_vm1, %v5140_v37  ;;  %v5143_v19 = vadd.f32 %v9697_v2, %v5111_v54  ;;  %9998 = vmatprep.mubr.msk.f32.mxu1 %vm258_vm1, %v6334_v60  ;;  %v6335_v45 = vld [vmem:[#allocation2 + $0x1a2] sm:$0xff] }
 0x406   : > { %v5565_v36 = vld [vmem:[#allocation3 + $0xc8] sm:$0xff]  ;;  %v5063_v28 = vpop.f32.mrf.mxu1  ;;  %v5521_v27 = vpop.f32.mrf.mxu0  ;;  %v5879_v22 = vld [vmem:[#allocation3 + $0x38] sm:$0xff] }
 0x407   : > { %5626 = vst.msk [vmem:[#allocation3 + $0xb0] sm:$0xff] %vm258_vm1, %v5594_v41  ;;  %v5597_v51 = vadd.f32 %v9741_v34, %v5565_v36  ;;  %5175 = vst.msk [vmem:[#allocation3 + $0xe8] sm:$0xff] %vm258_vm1, %v5143_v19  ;;  %v5142_v15 = vadd.f32 %v5110_v48, %v5063_v28  ;;  %v5878_v19 = vld [vmem:[#allocation3 + $0x30] sm:$0xff] }
 0x408   : > { %v5564_v0 = vld [vmem:[#allocation3 + $0xc0] sm:$0xff]  ;;  %v9700_v44 = vpop.f32.mrf.mxu1  ;;  %v9750_v13 = vpop.f32.mrf.mxu0  ;;  %9999 = vmatmul.mubr.msk.f32.gmra.mxu1 %vm258_vm1, %v6335_v45 }
 0x409   : > { %5629 = vst.msk [vmem:[#allocation3 + $0xc8] sm:$0xff] %vm258_vm1, %v5597_v51  ;;  %v5596_v10 = vadd.f32 %v5564_v0, %v5501_v46  ;;  %5174 = vst.msk [vmem:[#allocation3 + $0xe0] sm:$0xff] %vm258_vm1, %v5142_v15  ;;  %v5145_v23 = vadd.f32 %v9700_v44, %v5113_v50  ;;  %v5881_v15 = vld [vmem:[#allocation3 + $0x48] sm:$0xff] }
 0x40a   : > { %v5567_v8 = vld [vmem:[#allocation3 + $0xd8] sm:$0xff]  ;;  %v5073_v42 = vpop.f32.mrf.mxu1  ;;  %v5531_v53 = vpop.f32.mrf.mxu0 }
 0x40b   : > { %5628 = vst.msk [vmem:[#allocation3 + $0xc0] sm:$0xff] %vm258_vm1, %v5596_v10  ;;  %v5599_v1 = vadd.f32 %v9744_v26, %v5567_v8  ;;  %5177 = vst.msk [vmem:[#allocation3 + $0xf8] sm:$0xff] %vm258_vm1, %v5145_v23  ;;  %v5144_v57 = vadd.f32 %v5112_v55, %v5073_v42  ;;  %v5880_v10 = vld [vmem:[#allocation3 + $0x40] sm:$0xff] }
 0x40c   : > { %v5566_v47 = vld [vmem:[#allocation3 + $0xd0] sm:$0xff]  ;;  %v9755_v40 = vpop.f32.mrf.mxu1  ;;  %v9805_v11 = vpop.f32.mrf.mxu0 }
 0x40d   : > { %5631 = vst.msk [vmem:[#allocation3 + $0xd8] sm:$0xff] %vm258_vm1, %v5599_v1  ;;  %v5598_v56 = vadd.f32 %v5566_v47, %v5511_v43  ;;  %5176 = vst.msk [vmem:[#allocation3 + $0xf0] sm:$0xff] %vm258_vm1, %v5144_v57  ;;  %v5905_v32 = vadd.f32 %v9755_v40, %v5873_v17  ;;  %v5883_v1 = vld [vmem:[#allocation3 + $0x58] sm:$0xff] }
 0x40e   : > { %v5569_v38 = vld [vmem:[#allocation3 + $0xe8] sm:$0xff]  ;;  %v5713_v9 = vpop.f32.mrf.mxu1  ;;  %v6045_v39 = vpop.f32.mrf.mxu0 }
 0x40f   : > { %5630 = vst.msk [vmem:[#allocation3 + $0xd0] sm:$0xff] %vm258_vm1, %v5598_v56  ;;  %v5601_v52 = vadd.f32 %v9747_v14, %v5569_v38  ;;  %5937 = vst.msk [vmem:[#allocation3 + $0x8] sm:$0xff] %vm258_vm1, %v5905_v32  ;;  %v5904_v7 = vadd.f32 %v5872_v18, %v5713_v9  ;;  %v5882_v56 = vld [vmem:[#allocation3 + $0x50] sm:$0xff] }
 0x410   : > { %v5568_v3 = vld [vmem:[#allocation3 + $0xe0] sm:$0xff]  ;;  %v9758_v30 = vpop.f32.mrf.mxu1  ;;  %v9808_v61 = vpop.f32.mrf.mxu0 }
 0x411   : > { %5633 = vst.msk [vmem:[#allocation3 + $0xe8] sm:$0xff] %vm258_vm1, %v5601_v52  ;;  %v5600_v16 = vadd.f32 %v5568_v3, %v5521_v27  ;;  %5936 = vst.msk [vmem:[#allocation3] sm:$0xff] %vm258_vm1, %v5904_v7  ;;  %v5907_v34 = vadd.f32 %v9758_v30, %v5875_v12  ;;  %v5885_v52 = vld [vmem:[#allocation3 + $0x68] sm:$0xff] }
 0x412   : > { %v5571_v49 = vld [vmem:[#allocation3 + $0xf8] sm:$0xff]  ;;  %v5723_v31 = vpop.f32.mrf.mxu1  ;;  %v6055_v4 = vpop.f32.mrf.mxu0 }
 0x413   : > { %5632 = vst.msk [vmem:[#allocation3 + $0xe0] sm:$0xff] %vm258_vm1, %v5600_v16  ;;  %v5603_v6 = vadd.f32 %v9750_v13, %v5571_v49  ;;  %5939 = vst.msk [vmem:[#allocation3 + $0x18] sm:$0xff] %vm258_vm1, %v5907_v34  ;;  %v5906_v46 = vadd.f32 %v5874_v5, %v5723_v31  ;;  %v5884_v16 = vld [vmem:[#allocation3 + $0x60] sm:$0xff] }
 0x414   : > { %v5570_v20 = vld [vmem:[#allocation3 + $0xf0] sm:$0xff]  ;;  %v9761_v33 = vpop.f32.mrf.mxu1  ;;  %v9811_v63 = vpop.f32.mrf.mxu0 }
 0x415   : > { %5635 = vst.msk [vmem:[#allocation3 + $0xf8] sm:$0xff] %vm258_vm1, %v5603_v6  ;;  %v5602_v35 = vadd.f32 %v5570_v20, %v5531_v53  ;;  %5938 = vst.msk [vmem:[#allocation3 + $0x10] sm:$0xff] %vm258_vm1, %v5906_v46  ;;  %v5909_v26 = vadd.f32 %v9761_v33, %v5877_v21  ;;  %v5887_v6 = vld [vmem:[#allocation3 + $0x78] sm:$0xff] }
 0x416   : > { %v6205_v59 = vld [vmem:[#allocation3 + $0x8] sm:$0xff]  ;;  %v5733_v24 = vpop.f32.mrf.mxu1  ;;  %v6065_v29 = vpop.f32.mrf.mxu0 }
 0x417   : > { %5634 = vst.msk [vmem:[#allocation3 + $0xf0] sm:$0xff] %vm258_vm1, %v5602_v35  ;;  %v6237_v58 = vadd.f32 %v9805_v11, %v6205_v59  ;;  %5941 = vst.msk [vmem:[#allocation3 + $0x28] sm:$0xff] %vm258_vm1, %v5909_v26  ;;  %v5908_v43 = vadd.f32 %v5876_v25, %v5733_v24  ;;  %v5886_v35 = vld [vmem:[#allocation3 + $0x70] sm:$0xff] }
 0x418   : > { %v6204_v62 = vld [vmem:[#allocation3] sm:$0xff]  ;;  %v9764_v37 = vpop.f32.mrf.mxu1  ;;  %v9814_v2 = vpop.f32.mrf.mxu0 }
 0x419   : > { %6269 = vst.msk [vmem:[#allocation3 + $0x8] sm:$0xff] %vm258_vm1, %v6237_v58  ;;  %v6236_v54 = vadd.f32 %v6204_v62, %v6045_v39  ;;  %5940 = vst.msk [vmem:[#allocation3 + $0x20] sm:$0xff] %vm258_vm1, %v5908_v43  ;;  %v5911_v14 = vadd.f32 %v9764_v37, %v5879_v22  ;;  %v5889_v58 = vld [vmem:[#allocation3 + $0x88] sm:$0xff] }
 0x41a   : > { %v6207_v60 = vld [vmem:[#allocation3 + $0x18] sm:$0xff]  ;;  %v5743_v41 = vpop.f32.mrf.mxu1  ;;  %v6075_v36 = vpop.f32.mrf.mxu0 }
 0x41b   : > { %6268 = vst.msk [vmem:[#allocation3] sm:$0xff] %vm258_vm1, %v6236_v54  ;;  %v6239_v28 = vadd.f32 %v9808_v61, %v6207_v60  ;;  %5943 = vst.msk [vmem:[#allocation3 + $0x38] sm:$0xff] %vm258_vm1, %v5911_v14  ;;  %v5910_v48 = vadd.f32 %v5878_v19, %v5743_v41  ;;  %v5888_v54 = vld [vmem:[#allocation3 + $0x80] sm:$0xff] }
 0x41c   : > { %v6206_v27 = vld [vmem:[#allocation3 + $0x10] sm:$0xff]  ;;  %v9767_v51 = vpop.f32.mrf.mxu1  ;;  %v9817_v45 = vpop.f32.mrf.mxu0 }
 0x41d   : > { %6271 = vst.msk [vmem:[#allocation3 + $0x18] sm:$0xff] %vm258_vm1, %v6239_v28  ;;  %v6238_v0 = vadd.f32 %v6206_v27, %v6055_v4  ;;  %5942 = vst.msk [vmem:[#allocation3 + $0x30] sm:$0xff] %vm258_vm1, %v5910_v48  ;;  %v5913_v44 = vadd.f32 %v9767_v51, %v5881_v15  ;;  %v5891_v28 = vld [vmem:[#allocation3 + $0x98] sm:$0xff] }
 0x41e   : > { %v6209_v50 = vld [vmem:[#allocation3 + $0x28] sm:$0xff]  ;;  %v5753_v13 = vpop.f32.mrf.mxu1  ;;  %v6085_v23 = vpop.f32.mrf.mxu0 }
 0x41f   : > { %6270 = vst.msk [vmem:[#allocation3 + $0x10] sm:$0xff] %vm258_vm1, %v6238_v0  ;;  %v6241_v8 = vadd.f32 %v9811_v63, %v6209_v50  ;;  %5945 = vst.msk [vmem:[#allocation3 + $0x48] sm:$0xff] %vm258_vm1, %v5913_v44  ;;  %v5912_v42 = vadd.f32 %v5880_v10, %v5753_v13  ;;  %v5890_v0 = vld [vmem:[#allocation3 + $0x90] sm:$0xff] }
 0x420   : > { %v6208_v55 = vld [vmem:[#allocation3 + $0x20] sm:$0xff]  ;;  %v9770_v53 = vpop.f32.mrf.mxu1  ;;  %v9820_v57 = vpop.f32.mrf.mxu0 }
 0x421   : > { %6273 = vst.msk [vmem:[#allocation3 + $0x28] sm:$0xff] %vm258_vm1, %v6241_v8  ;;  %v6240_v47 = vadd.f32 %v6208_v55, %v6065_v29  ;;  %5944 = vst.msk [vmem:[#allocation3 + $0x40] sm:$0xff] %vm258_vm1, %v5912_v42  ;;  %v5915_v40 = vadd.f32 %v9770_v53, %v5883_v1  ;;  %v5893_v8 = vld [vmem:[#allocation3 + $0xa8] sm:$0xff] }
 0x422   : > { %v6211_v17 = vld [vmem:[#allocation3 + $0x38] sm:$0xff]  ;;  %v5763_v11 = vpop.f32.mrf.mxu1  ;;  %v6095_v32 = vpop.f32.mrf.mxu0 }
 0x423   : > { %6272 = vst.msk [vmem:[#allocation3 + $0x20] sm:$0xff] %vm258_vm1, %v6240_v47  ;;  %v6243_v38 = vadd.f32 %v9814_v2, %v6211_v17  ;;  %5947 = vst.msk [vmem:[#allocation3 + $0x58] sm:$0xff] %vm258_vm1, %v5915_v40  ;;  %v5914_v9 = vadd.f32 %v5882_v56, %v5763_v11  ;;  %v5892_v47 = vld [vmem:[#allocation3 + $0xa0] sm:$0xff] }
 0x424   : > { %v6210_v18 = vld [vmem:[#allocation3 + $0x30] sm:$0xff]  ;;  %v9773_v39 = vpop.f32.mrf.mxu1  ;;  %v9823_v7 = vpop.f32.mrf.mxu0 }
 0x425   : > { %6275 = vst.msk [vmem:[#allocation3 + $0x38] sm:$0xff] %vm258_vm1, %v6243_v38  ;;  %v6242_v3 = vadd.f32 %v6210_v18, %v6075_v36  ;;  %5946 = vst.msk [vmem:[#allocation3 + $0x50] sm:$0xff] %vm258_vm1, %v5914_v9  ;;  %v5917_v30 = vadd.f32 %v9773_v39, %v5885_v52  ;;  %v5895_v38 = vld [vmem:[#allocation3 + $0xb8] sm:$0xff] }
 0x426   : > { %v6213_v12 = vld [vmem:[#allocation3 + $0x48] sm:$0xff]  ;;  %v5773_v61 = vpop.f32.mrf.mxu1  ;;  %v6105_v34 = vpop.f32.mrf.mxu0 }
 0x427   : > { %6274 = vst.msk [vmem:[#allocation3 + $0x30] sm:$0xff] %vm258_vm1, %v6242_v3  ;;  %v6245_v49 = vadd.f32 %v9817_v45, %v6213_v12  ;;  %5949 = vst.msk [vmem:[#allocation3 + $0x68] sm:$0xff] %vm258_vm1, %v5917_v30  ;;  %v5916_v31 = vadd.f32 %v5884_v16, %v5773_v61  ;;  %v5894_v3 = vld [vmem:[#allocation3 + $0xb0] sm:$0xff] }
 0x428   : > { %v6212_v5 = vld [vmem:[#allocation3 + $0x40] sm:$0xff]  ;;  %v9776_v4 = vpop.f32.mrf.mxu1  ;;  %v9826_v46 = vpop.f32.mrf.mxu0 }
 0x429   : > { %6277 = vst.msk [vmem:[#allocation3 + $0x48] sm:$0xff] %vm258_vm1, %v6245_v49  ;;  %v6244_v20 = vadd.f32 %v6212_v5, %v6085_v23  ;;  %5948 = vst.msk [vmem:[#allocation3 + $0x60] sm:$0xff] %vm258_vm1, %v5916_v31  ;;  %v5919_v33 = vadd.f32 %v9776_v4, %v5887_v6  ;;  %v5897_v49 = vld [vmem:[#allocation3 + $0xc8] sm:$0xff] }
 0x42a   : > { %v6215_v21 = vld [vmem:[#allocation3 + $0x58] sm:$0xff]  ;;  %v5783_v63 = vpop.f32.mrf.mxu1  ;;  %v6115_v26 = vpop.f32.mrf.mxu0 }
 0x42b   : > { %6276 = vst.msk [vmem:[#allocation3 + $0x40] sm:$0xff] %vm258_vm1, %v6244_v20  ;;  %v6247_v59 = vadd.f32 %v9820_v57, %v6215_v21  ;;  %5951 = vst.msk [vmem:[#allocation3 + $0x78] sm:$0xff] %vm258_vm1, %v5919_v33  ;;  %v5918_v24 = vadd.f32 %v5886_v35, %v5783_v63  ;;  %v5896_v20 = vld [vmem:[#allocation3 + $0xc0] sm:$0xff] }
 0x42c   : > { %v6214_v25 = vld [vmem:[#allocation3 + $0x50] sm:$0xff]  ;;  %v9779_v29 = vpop.f32.mrf.mxu1  ;;  %v9829_v43 = vpop.f32.mrf.mxu0 }
 0x42d   : > { %6279 = vst.msk [vmem:[#allocation3 + $0x58] sm:$0xff] %vm258_vm1, %v6247_v59  ;;  %v6246_v62 = vadd.f32 %v6214_v25, %v6095_v32  ;;  %5950 = vst.msk [vmem:[#allocation3 + $0x70] sm:$0xff] %vm258_vm1, %v5918_v24  ;;  %v5921_v37 = vadd.f32 %v9779_v29, %v5889_v58  ;;  %v5899_v59 = vld [vmem:[#allocation3 + $0xd8] sm:$0xff] }
 0x42e   : > { %v6217_v22 = vld [vmem:[#allocation3 + $0x68] sm:$0xff]  ;;  %v5793_v2 = vpop.f32.mrf.mxu1  ;;  %v6125_v14 = vpop.f32.mrf.mxu0 }
 0x42f   : > { %6278 = vst.msk [vmem:[#allocation3 + $0x50] sm:$0xff] %vm258_vm1, %v6246_v62  ;;  %v6249_v60 = vadd.f32 %v9823_v7, %v6217_v22  ;;  %5953 = vst.msk [vmem:[#allocation3 + $0x88] sm:$0xff] %vm258_vm1, %v5921_v37  ;;  %v5920_v41 = vadd.f32 %v5888_v54, %v5793_v2  ;;  %v5898_v62 = vld [vmem:[#allocation3 + $0xd0] sm:$0xff] }
 0x430   : > { %v6216_v19 = vld [vmem:[#allocation3 + $0x60] sm:$0xff]  ;;  %v9782_v36 = vpop.f32.mrf.mxu1  ;;  %v9832_v48 = vpop.f32.mrf.mxu0 }
 0x431   : > { %6281 = vst.msk [vmem:[#allocation3 + $0x68] sm:$0xff] %vm258_vm1, %v6249_v60  ;;  %v6248_v27 = vadd.f32 %v6216_v19, %v6105_v34  ;;  %5952 = vst.msk [vmem:[#allocation3 + $0x80] sm:$0xff] %vm258_vm1, %v5920_v41  ;;  %v5923_v51 = vadd.f32 %v9782_v36, %v5891_v28  ;;  %v5901_v60 = vld [vmem:[#allocation3 + $0xe8] sm:$0xff] }
 0x432   : > { %v6219_v15 = vld [vmem:[#allocation3 + $0x78] sm:$0xff]  ;;  %v5803_v45 = vpop.f32.mrf.mxu1  ;;  %v6135_v44 = vpop.f32.mrf.mxu0 }
 0x433   : > { %6280 = vst.msk [vmem:[#allocation3 + $0x60] sm:$0xff] %vm258_vm1, %v6248_v27  ;;  %v6251_v50 = vadd.f32 %v9826_v46, %v6219_v15  ;;  %5955 = vst.msk [vmem:[#allocation3 + $0x98] sm:$0xff] %vm258_vm1, %v5923_v51  ;;  %v5922_v13 = vadd.f32 %v5890_v0, %v5803_v45  ;;  %v5900_v27 = vld [vmem:[#allocation3 + $0xe0] sm:$0xff] }
 0x434   : > { %v6218_v10 = vld [vmem:[#allocation3 + $0x70] sm:$0xff]  ;;  %v9785_v23 = vpop.f32.mrf.mxu1  ;;  %v9835_v42 = vpop.f32.mrf.mxu0 }
 0x435   : > { %6283 = vst.msk [vmem:[#allocation3 + $0x78] sm:$0xff] %vm258_vm1, %v6251_v50  ;;  %v6250_v55 = vadd.f32 %v6218_v10, %v6115_v26  ;;  %5954 = vst.msk [vmem:[#allocation3 + $0x90] sm:$0xff] %vm258_vm1, %v5922_v13  ;;  %v5925_v53 = vadd.f32 %v9785_v23, %v5893_v8  ;;  %v5903_v50 = vld [vmem:[#allocation3 + $0xf8] sm:$0xff] }
 0x436   : > { %v6221_v1 = vld [vmem:[#allocation3 + $0x88] sm:$0xff]  ;;  %v5813_v57 = vpop.f32.mrf.mxu1  ;;  %v6145_v40 = vpop.f32.mrf.mxu0 }
 0x437   : > { %6282 = vst.msk [vmem:[#allocation3 + $0x70] sm:$0xff] %vm258_vm1, %v6250_v55  ;;  %v6253_v17 = vadd.f32 %v9829_v43, %v6221_v1  ;;  %5957 = vst.msk [vmem:[#allocation3 + $0xa8] sm:$0xff] %vm258_vm1, %v5925_v53  ;;  %v5924_v11 = vadd.f32 %v5892_v47, %v5813_v57  ;;  %v5902_v55 = vld [vmem:[#allocation3 + $0xf0] sm:$0xff] }
 0x438   : > { %v6220_v56 = vld [vmem:[#allocation3 + $0x80] sm:$0xff]  ;;  %v9788_v32 = vpop.f32.mrf.mxu1  ;;  %v9838_v9 = vpop.f32.mrf.mxu0 }
 0x439   : > { %6285 = vst.msk [vmem:[#allocation3 + $0x88] sm:$0xff] %vm258_vm1, %v6253_v17  ;;  %v6252_v18 = vadd.f32 %v6220_v56, %v6125_v14  ;;  %5956 = vst.msk [vmem:[#allocation3 + $0xa0] sm:$0xff] %vm258_vm1, %v5924_v11  ;;  %v5927_v39 = vadd.f32 %v9788_v32, %v5895_v38  ;;  %v6663_v17 = vld [vmem:[#allocation3 + $0x8] sm:$0xff] }
 0x43a   : > { %v6223_v52 = vld [vmem:[#allocation3 + $0x98] sm:$0xff]  ;;  %v5823_v7 = vpop.f32.mrf.mxu1  ;;  %v6155_v30 = vpop.f32.mrf.mxu0 }
 0x43b   : > { %6284 = vst.msk [vmem:[#allocation3 + $0x80] sm:$0xff] %vm258_vm1, %v6252_v18  ;;  %v6255_v12 = vadd.f32 %v9832_v48, %v6223_v52  ;;  %5959 = vst.msk [vmem:[#allocation3 + $0xb8] sm:$0xff] %vm258_vm1, %v5927_v39  ;;  %v5926_v61 = vadd.f32 %v5894_v3, %v5823_v7  ;;  %v6662_v18 = vld [vmem:[#allocation3] sm:$0xff] }
 0x43c   : > { %v6222_v16 = vld [vmem:[#allocation3 + $0x90] sm:$0xff]  ;;  %v9791_v34 = vpop.f32.mrf.mxu1  ;;  %v9841_v31 = vpop.f32.mrf.mxu0 }
 0x43d   : > { %6287 = vst.msk [vmem:[#allocation3 + $0x98] sm:$0xff] %vm258_vm1, %v6255_v12  ;;  %v6254_v5 = vadd.f32 %v6222_v16, %v6135_v44  ;;  %5958 = vst.msk [vmem:[#allocation3 + $0xb0] sm:$0xff] %vm258_vm1, %v5926_v61  ;;  %v5929_v4 = vadd.f32 %v9791_v34, %v5897_v49  ;;  %v6665_v12 = vld [vmem:[#allocation3 + $0x18] sm:$0xff] }
 0x43e   : > { %v6225_v6 = vld [vmem:[#allocation3 + $0xa8] sm:$0xff]  ;;  %v5833_v46 = vpop.f32.mrf.mxu1  ;;  %v6165_v33 = vpop.f32.mrf.mxu0 }
 0x43f   : > { %6286 = vst.msk [vmem:[#allocation3 + $0x90] sm:$0xff] %vm258_vm1, %v6254_v5  ;;  %v6257_v21 = vadd.f32 %v9835_v42, %v6225_v6  ;;  %5961 = vst.msk [vmem:[#allocation3 + $0xc8] sm:$0xff] %vm258_vm1, %v5929_v4  ;;  %v5928_v63 = vadd.f32 %v5896_v20, %v5833_v46  ;;  %v6664_v5 = vld [vmem:[#allocation3 + $0x10] sm:$0xff] }
 0x440   : > { %v6224_v35 = vld [vmem:[#allocation3 + $0xa0] sm:$0xff]  ;;  %v9794_v26 = vpop.f32.mrf.mxu1  ;;  %v9844_v24 = vpop.f32.mrf.mxu0 }
 0x441   : > { %6289 = vst.msk [vmem:[#allocation3 + $0xa8] sm:$0xff] %vm258_vm1, %v6257_v21  ;;  %v6256_v25 = vadd.f32 %v6224_v35, %v6145_v40  ;;  %5960 = vst.msk [vmem:[#allocation3 + $0xc0] sm:$0xff] %vm258_vm1, %v5928_v63  ;;  %v5931_v29 = vadd.f32 %v9794_v26, %v5899_v59  ;;  %v6667_v21 = vld [vmem:[#allocation3 + $0x28] sm:$0xff] }
 0x442   : > { %v6227_v58 = vld [vmem:[#allocation3 + $0xb8] sm:$0xff]  ;;  %v5843_v43 = vpop.f32.mrf.mxu1  ;;  %v6175_v37 = vpop.f32.mrf.mxu0 }
 0x443   : > { %6288 = vst.msk [vmem:[#allocation3 + $0xa0] sm:$0xff] %vm258_vm1, %v6256_v25  ;;  %v6259_v22 = vadd.f32 %v9838_v9, %v6227_v58  ;;  %5963 = vst.msk [vmem:[#allocation3 + $0xd8] sm:$0xff] %vm258_vm1, %v5931_v29  ;;  %v5930_v2 = vadd.f32 %v5898_v62, %v5843_v43  ;;  %v6666_v25 = vld [vmem:[#allocation3 + $0x20] sm:$0xff] }
 0x444   : > { %v6226_v54 = vld [vmem:[#allocation3 + $0xb0] sm:$0xff]  ;;  %v9797_v14 = vpop.f32.mrf.mxu1  ;;  %v9847_v41 = vpop.f32.mrf.mxu0 }
 0x445   : > { %6291 = vst.msk [vmem:[#allocation3 + $0xb8] sm:$0xff] %vm258_vm1, %v6259_v22  ;;  %v6258_v19 = vadd.f32 %v6226_v54, %v6155_v30  ;;  %5962 = vst.msk [vmem:[#allocation3 + $0xd0] sm:$0xff] %vm258_vm1, %v5930_v2  ;;  %v5933_v36 = vadd.f32 %v9797_v14, %v5901_v60  ;;  %v6669_v22 = vld [vmem:[#allocation3 + $0x38] sm:$0xff] }
 0x446   : > { %v6229_v28 = vld [vmem:[#allocation3 + $0xc8] sm:$0xff]  ;;  %v5853_v48 = vpop.f32.mrf.mxu1  ;;  %v6185_v51 = vpop.f32.mrf.mxu0 }
 0x447   : > { %6290 = vst.msk [vmem:[#allocation3 + $0xb0] sm:$0xff] %vm258_vm1, %v6258_v19  ;;  %v6261_v15 = vadd.f32 %v9841_v31, %v6229_v28  ;;  %5965 = vst.msk [vmem:[#allocation3 + $0xe8] sm:$0xff] %vm258_vm1, %v5933_v36  ;;  %v5932_v45 = vadd.f32 %v5900_v27, %v5853_v48  ;;  %v6668_v19 = vld [vmem:[#allocation3 + $0x30] sm:$0xff] }
 0x448   : > { %v6228_v0 = vld [vmem:[#allocation3 + $0xc0] sm:$0xff]  ;;  %v9800_v44 = vpop.f32.mrf.mxu1  ;;  %v9850_v13 = vpop.f32.mrf.mxu0 }
 0x449   : > { %6293 = vst.msk [vmem:[#allocation3 + $0xc8] sm:$0xff] %vm258_vm1, %v6261_v15  ;;  %v6260_v10 = vadd.f32 %v6228_v0, %v6165_v33  ;;  %5964 = vst.msk [vmem:[#allocation3 + $0xe0] sm:$0xff] %vm258_vm1, %v5932_v45  ;;  %v5935_v23 = vadd.f32 %v9800_v44, %v5903_v50  ;;  %v6671_v15 = vld [vmem:[#allocation3 + $0x48] sm:$0xff] }
 0x44a   : > { %v6231_v8 = vld [vmem:[#allocation3 + $0xd8] sm:$0xff]  ;;  %v5863_v42 = vpop.f32.mrf.mxu1  ;;  %v6195_v53 = vpop.f32.mrf.mxu0 }
 0x44b   : > { %6292 = vst.msk [vmem:[#allocation3 + $0xc0] sm:$0xff] %vm258_vm1, %v6260_v10  ;;  %v6263_v1 = vadd.f32 %v9844_v24, %v6231_v8  ;;  %5967 = vst.msk [vmem:[#allocation3 + $0xf8] sm:$0xff] %vm258_vm1, %v5935_v23  ;;  %v5934_v57 = vadd.f32 %v5902_v55, %v5863_v42  ;;  %v6670_v10 = vld [vmem:[#allocation3 + $0x40] sm:$0xff] }
 0x44c   : > { %v6230_v47 = vld [vmem:[#allocation3 + $0xd0] sm:$0xff]  ;;  %v9855_v40 = vpop.f32.mrf.mxu1  ;;  %v9905_v11 = vpop.f32.mrf.mxu0 }
 0x44d   : > { %6295 = vst.msk [vmem:[#allocation3 + $0xd8] sm:$0xff] %vm258_vm1, %v6263_v1  ;;  %v6262_v56 = vadd.f32 %v6230_v47, %v6175_v37  ;;  %5966 = vst.msk [vmem:[#allocation3 + $0xf0] sm:$0xff] %vm258_vm1, %v5934_v57  ;;  %v6695_v32 = vadd.f32 %v9855_v40, %v6663_v17  ;;  %v6673_v1 = vld [vmem:[#allocation3 + $0x58] sm:$0xff] }
 0x44e   : > { %v6233_v38 = vld [vmem:[#allocation3 + $0xe8] sm:$0xff]  ;;  %v6503_v9 = vpop.f32.mrf.mxu1  ;;  %v6835_v39 = vpop.f32.mrf.mxu0 }
 0x44f   : > { %6294 = vst.msk [vmem:[#allocation3 + $0xd0] sm:$0xff] %vm258_vm1, %v6262_v56  ;;  %v6265_v52 = vadd.f32 %v9847_v41, %v6233_v38  ;;  %6727 = vst.msk [vmem:[#allocation3 + $0x8] sm:$0xff] %vm258_vm1, %v6695_v32  ;;  %v6694_v7 = vadd.f32 %v6662_v18, %v6503_v9  ;;  %v6672_v56 = vld [vmem:[#allocation3 + $0x50] sm:$0xff] }
 0x450   : > { %v6232_v3 = vld [vmem:[#allocation3 + $0xe0] sm:$0xff]  ;;  %v9858_v30 = vpop.f32.mrf.mxu1  ;;  %v9908_v61 = vpop.f32.mrf.mxu0 }
 0x451   : > { %6297 = vst.msk [vmem:[#allocation3 + $0xe8] sm:$0xff] %vm258_vm1, %v6265_v52  ;;  %v6264_v16 = vadd.f32 %v6232_v3, %v6185_v51  ;;  %6726 = vst.msk [vmem:[#allocation3] sm:$0xff] %vm258_vm1, %v6694_v7  ;;  %v6697_v34 = vadd.f32 %v9858_v30, %v6665_v12  ;;  %v6675_v52 = vld [vmem:[#allocation3 + $0x68] sm:$0xff] }
 0x452   : > { %v6235_v49 = vld [vmem:[#allocation3 + $0xf8] sm:$0xff]  ;;  %v6513_v31 = vpop.f32.mrf.mxu1  ;;  %v6845_v4 = vpop.f32.mrf.mxu0 }
 0x453   : > { %6296 = vst.msk [vmem:[#allocation3 + $0xe0] sm:$0xff] %vm258_vm1, %v6264_v16  ;;  %v6267_v6 = vadd.f32 %v9850_v13, %v6235_v49  ;;  %6729 = vst.msk [vmem:[#allocation3 + $0x18] sm:$0xff] %vm258_vm1, %v6697_v34  ;;  %v6696_v46 = vadd.f32 %v6664_v5, %v6513_v31  ;;  %v6674_v16 = vld [vmem:[#allocation3 + $0x60] sm:$0xff] }
 0x454   : > { %v6234_v20 = vld [vmem:[#allocation3 + $0xf0] sm:$0xff]  ;;  %v9861_v33 = vpop.f32.mrf.mxu1  ;;  %v9911_v63 = vpop.f32.mrf.mxu0 }
 0x455   : > { %6299 = vst.msk [vmem:[#allocation3 + $0xf8] sm:$0xff] %vm258_vm1, %v6267_v6  ;;  %v6266_v35 = vadd.f32 %v6234_v20, %v6195_v53  ;;  %6728 = vst.msk [vmem:[#allocation3 + $0x10] sm:$0xff] %vm258_vm1, %v6696_v46  ;;  %v6699_v26 = vadd.f32 %v9861_v33, %v6667_v21  ;;  %v6677_v6 = vld [vmem:[#allocation3 + $0x78] sm:$0xff] }
 0x456   : > { %v6995_v59 = vld [vmem:[#allocation3 + $0x8] sm:$0xff]  ;;  %v6523_v24 = vpop.f32.mrf.mxu1  ;;  %v6855_v29 = vpop.f32.mrf.mxu0 }
 0x457   : > { %6298 = vst.msk [vmem:[#allocation3 + $0xf0] sm:$0xff] %vm258_vm1, %v6266_v35  ;;  %v7027_v58 = vadd.f32 %v9905_v11, %v6995_v59  ;;  %6731 = vst.msk [vmem:[#allocation3 + $0x28] sm:$0xff] %vm258_vm1, %v6699_v26  ;;  %v6698_v43 = vadd.f32 %v6666_v25, %v6523_v24  ;;  %v6676_v35 = vld [vmem:[#allocation3 + $0x70] sm:$0xff] }
 0x458   : > { %v6994_v62 = vld [vmem:[#allocation3] sm:$0xff]  ;;  %v9864_v37 = vpop.f32.mrf.mxu1  ;;  %v9914_v2 = vpop.f32.mrf.mxu0 }
 0x459   : > { %7059 = vst.msk [vmem:[#allocation3 + $0x8] sm:$0xff] %vm258_vm1, %v7027_v58  ;;  %v7026_v54 = vadd.f32 %v6994_v62, %v6835_v39  ;;  %6730 = vst.msk [vmem:[#allocation3 + $0x20] sm:$0xff] %vm258_vm1, %v6698_v43  ;;  %v6701_v14 = vadd.f32 %v9864_v37, %v6669_v22  ;;  %v6679_v58 = vld [vmem:[#allocation3 + $0x88] sm:$0xff] }
 0x45a   : > { %v6997_v60 = vld [vmem:[#allocation3 + $0x18] sm:$0xff]  ;;  %v6533_v41 = vpop.f32.mrf.mxu1  ;;  %v6865_v36 = vpop.f32.mrf.mxu0 }
 0x45b   : > { %7058 = vst.msk [vmem:[#allocation3] sm:$0xff] %vm258_vm1, %v7026_v54  ;;  %v7029_v28 = vadd.f32 %v9908_v61, %v6997_v60  ;;  %6733 = vst.msk [vmem:[#allocation3 + $0x38] sm:$0xff] %vm258_vm1, %v6701_v14  ;;  %v6700_v48 = vadd.f32 %v6668_v19, %v6533_v41  ;;  %v6678_v54 = vld [vmem:[#allocation3 + $0x80] sm:$0xff] }
 0x45c   : > { %v6996_v27 = vld [vmem:[#allocation3 + $0x10] sm:$0xff]  ;;  %v9867_v51 = vpop.f32.mrf.mxu1  ;;  %v9917_v45 = vpop.f32.mrf.mxu0 }
 0x45d   : > { %7061 = vst.msk [vmem:[#allocation3 + $0x18] sm:$0xff] %vm258_vm1, %v7029_v28  ;;  %v7028_v0 = vadd.f32 %v6996_v27, %v6845_v4  ;;  %6732 = vst.msk [vmem:[#allocation3 + $0x30] sm:$0xff] %vm258_vm1, %v6700_v48  ;;  %v6703_v44 = vadd.f32 %v9867_v51, %v6671_v15  ;;  %v6681_v28 = vld [vmem:[#allocation3 + $0x98] sm:$0xff] }
 0x45e   : > { %v6999_v50 = vld [vmem:[#allocation3 + $0x28] sm:$0xff]  ;;  %v6543_v13 = vpop.f32.mrf.mxu1  ;;  %v6875_v23 = vpop.f32.mrf.mxu0 }
 0x45f   : > { %7060 = vst.msk [vmem:[#allocation3 + $0x10] sm:$0xff] %vm258_vm1, %v7028_v0  ;;  %v7031_v8 = vadd.f32 %v9911_v63, %v6999_v50  ;;  %6735 = vst.msk [vmem:[#allocation3 + $0x48] sm:$0xff] %vm258_vm1, %v6703_v44  ;;  %v6702_v42 = vadd.f32 %v6670_v10, %v6543_v13  ;;  %v6680_v0 = vld [vmem:[#allocation3 + $0x90] sm:$0xff] }
 0x460   : > { %v6998_v55 = vld [vmem:[#allocation3 + $0x20] sm:$0xff]  ;;  %v9870_v53 = vpop.f32.mrf.mxu1  ;;  %v9920_v57 = vpop.f32.mrf.mxu0 }
 0x461   : > { %7063 = vst.msk [vmem:[#allocation3 + $0x28] sm:$0xff] %vm258_vm1, %v7031_v8  ;;  %v7030_v47 = vadd.f32 %v6998_v55, %v6855_v29  ;;  %6734 = vst.msk [vmem:[#allocation3 + $0x40] sm:$0xff] %vm258_vm1, %v6702_v42  ;;  %v6705_v40 = vadd.f32 %v9870_v53, %v6673_v1  ;;  %v6683_v8 = vld [vmem:[#allocation3 + $0xa8] sm:$0xff] }
 0x462   : > { %v7001_v17 = vld [vmem:[#allocation3 + $0x38] sm:$0xff]  ;;  %v6553_v11 = vpop.f32.mrf.mxu1  ;;  %v6885_v32 = vpop.f32.mrf.mxu0 }
 0x463   : > { %7062 = vst.msk [vmem:[#allocation3 + $0x20] sm:$0xff] %vm258_vm1, %v7030_v47  ;;  %v7033_v38 = vadd.f32 %v9914_v2, %v7001_v17  ;;  %6737 = vst.msk [vmem:[#allocation3 + $0x58] sm:$0xff] %vm258_vm1, %v6705_v40  ;;  %v6704_v9 = vadd.f32 %v6672_v56, %v6553_v11  ;;  %v6682_v47 = vld [vmem:[#allocation3 + $0xa0] sm:$0xff] }
 0x464   : > { %v7000_v18 = vld [vmem:[#allocation3 + $0x30] sm:$0xff]  ;;  %v9873_v39 = vpop.f32.mrf.mxu1  ;;  %v9923_v7 = vpop.f32.mrf.mxu0 }
 0x465   : > { %7065 = vst.msk [vmem:[#allocation3 + $0x38] sm:$0xff] %vm258_vm1, %v7033_v38  ;;  %v7032_v3 = vadd.f32 %v7000_v18, %v6865_v36  ;;  %6736 = vst.msk [vmem:[#allocation3 + $0x50] sm:$0xff] %vm258_vm1, %v6704_v9  ;;  %v6707_v30 = vadd.f32 %v9873_v39, %v6675_v52  ;;  %v6685_v38 = vld [vmem:[#allocation3 + $0xb8] sm:$0xff] }
 0x466   : > { %v7003_v12 = vld [vmem:[#allocation3 + $0x48] sm:$0xff]  ;;  %v6563_v61 = vpop.f32.mrf.mxu1  ;;  %v6895_v34 = vpop.f32.mrf.mxu0 }
 0x467   : > { %7064 = vst.msk [vmem:[#allocation3 + $0x30] sm:$0xff] %vm258_vm1, %v7032_v3  ;;  %v7035_v49 = vadd.f32 %v9917_v45, %v7003_v12  ;;  %6739 = vst.msk [vmem:[#allocation3 + $0x68] sm:$0xff] %vm258_vm1, %v6707_v30  ;;  %v6706_v31 = vadd.f32 %v6674_v16, %v6563_v61  ;;  %v6684_v3 = vld [vmem:[#allocation3 + $0xb0] sm:$0xff] }
 0x468   : > { %v7002_v5 = vld [vmem:[#allocation3 + $0x40] sm:$0xff]  ;;  %v9876_v4 = vpop.f32.mrf.mxu1  ;;  %v9926_v46 = vpop.f32.mrf.mxu0 }
 0x469   : > { %7067 = vst.msk [vmem:[#allocation3 + $0x48] sm:$0xff] %vm258_vm1, %v7035_v49  ;;  %v7034_v20 = vadd.f32 %v7002_v5, %v6875_v23  ;;  %6738 = vst.msk [vmem:[#allocation3 + $0x60] sm:$0xff] %vm258_vm1, %v6706_v31  ;;  %v6709_v33 = vadd.f32 %v9876_v4, %v6677_v6  ;;  %v6687_v49 = vld [vmem:[#allocation3 + $0xc8] sm:$0xff] }
 0x46a   : > { %v7005_v21 = vld [vmem:[#allocation3 + $0x58] sm:$0xff]  ;;  %v6573_v63 = vpop.f32.mrf.mxu1  ;;  %v6905_v26 = vpop.f32.mrf.mxu0 }
 0x46b   : > { %7066 = vst.msk [vmem:[#allocation3 + $0x40] sm:$0xff] %vm258_vm1, %v7034_v20  ;;  %v7037_v59 = vadd.f32 %v9920_v57, %v7005_v21  ;;  %6741 = vst.msk [vmem:[#allocation3 + $0x78] sm:$0xff] %vm258_vm1, %v6709_v33  ;;  %v6708_v24 = vadd.f32 %v6676_v35, %v6573_v63  ;;  %v6686_v20 = vld [vmem:[#allocation3 + $0xc0] sm:$0xff] }
 0x46c   : > { %v7004_v25 = vld [vmem:[#allocation3 + $0x50] sm:$0xff]  ;;  %v9879_v29 = vpop.f32.mrf.mxu1  ;;  %v9929_v43 = vpop.f32.mrf.mxu0 }
 0x46d   : > { %7069 = vst.msk [vmem:[#allocation3 + $0x58] sm:$0xff] %vm258_vm1, %v7037_v59  ;;  %v7036_v62 = vadd.f32 %v7004_v25, %v6885_v32  ;;  %6740 = vst.msk [vmem:[#allocation3 + $0x70] sm:$0xff] %vm258_vm1, %v6708_v24  ;;  %v6711_v37 = vadd.f32 %v9879_v29, %v6679_v58  ;;  %v6689_v59 = vld [vmem:[#allocation3 + $0xd8] sm:$0xff] }
 0x46e   : > { %v7007_v22 = vld [vmem:[#allocation3 + $0x68] sm:$0xff]  ;;  %v6583_v2 = vpop.f32.mrf.mxu1  ;;  %v6915_v14 = vpop.f32.mrf.mxu0 }
 0x46f   : > { %7068 = vst.msk [vmem:[#allocation3 + $0x50] sm:$0xff] %vm258_vm1, %v7036_v62  ;;  %v7039_v60 = vadd.f32 %v9923_v7, %v7007_v22  ;;  %6743 = vst.msk [vmem:[#allocation3 + $0x88] sm:$0xff] %vm258_vm1, %v6711_v37  ;;  %v6710_v41 = vadd.f32 %v6678_v54, %v6583_v2  ;;  %v6688_v62 = vld [vmem:[#allocation3 + $0xd0] sm:$0xff] }
 0x470   : > { %v7006_v19 = vld [vmem:[#allocation3 + $0x60] sm:$0xff]  ;;  %v9882_v36 = vpop.f32.mrf.mxu1  ;;  %v9932_v48 = vpop.f32.mrf.mxu0 }
 0x471   : > { %7071 = vst.msk [vmem:[#allocation3 + $0x68] sm:$0xff] %vm258_vm1, %v7039_v60  ;;  %v7038_v27 = vadd.f32 %v7006_v19, %v6895_v34  ;;  %6742 = vst.msk [vmem:[#allocation3 + $0x80] sm:$0xff] %vm258_vm1, %v6710_v41  ;;  %v6713_v51 = vadd.f32 %v9882_v36, %v6681_v28  ;;  %v6691_v60 = vld [vmem:[#allocation3 + $0xe8] sm:$0xff] }
 0x472   : > { %v7009_v15 = vld [vmem:[#allocation3 + $0x78] sm:$0xff]  ;;  %v6593_v45 = vpop.f32.mrf.mxu1  ;;  %v6925_v44 = vpop.f32.mrf.mxu0 }
 0x473   : > { %7070 = vst.msk [vmem:[#allocation3 + $0x60] sm:$0xff] %vm258_vm1, %v7038_v27  ;;  %v7041_v50 = vadd.f32 %v9926_v46, %v7009_v15  ;;  %6745 = vst.msk [vmem:[#allocation3 + $0x98] sm:$0xff] %vm258_vm1, %v6713_v51  ;;  %v6712_v13 = vadd.f32 %v6680_v0, %v6593_v45 }
 0x474   : > { %v7008_v10 = vld [vmem:[#allocation3 + $0x70] sm:$0xff]  ;;  %v9885_v23 = vpop.f32.mrf.mxu1  ;;  %v9935_v42 = vpop.f32.mrf.mxu0 }
 0x475   : > { %7073 = vst.msk [vmem:[#allocation3 + $0x78] sm:$0xff] %vm258_vm1, %v7041_v50  ;;  %v7040_v55 = vadd.f32 %v7008_v10, %v6905_v26  ;;  %6744 = vst.msk [vmem:[#allocation3 + $0x90] sm:$0xff] %vm258_vm1, %v6712_v13  ;;  %v6715_v53 = vadd.f32 %v9885_v23, %v6683_v8  ;;  %v6692_v8 = vld [vmem:[#allocation3 + $0xf0] sm:$0xff] }
 0x476   : > { %v7011_v1 = vld [vmem:[#allocation3 + $0x88] sm:$0xff]  ;;  %v6603_v57 = vpop.f32.mrf.mxu1  ;;  %v6935_v40 = vpop.f32.mrf.mxu0 }
 0x477   : > { %7072 = vst.msk [vmem:[#allocation3 + $0x70] sm:$0xff] %vm258_vm1, %v7040_v55  ;;  %v7043_v17 = vadd.f32 %v9929_v43, %v7011_v1  ;;  %6747 = vst.msk [vmem:[#allocation3 + $0xa8] sm:$0xff] %vm258_vm1, %v6715_v53  ;;  %v6714_v11 = vadd.f32 %v6682_v47, %v6603_v57  ;;  %v7327_v47 = vld [vmem:[#allocation3 + $0x8] sm:$0xff] }
 0x478   : > { %v7010_v56 = vld [vmem:[#allocation3 + $0x80] sm:$0xff]  ;;  %v9888_v32 = vpop.f32.mrf.mxu1  ;;  %v9938_v9 = vpop.f32.mrf.mxu0 }
 0x479   : > { %7075 = vst.msk [vmem:[#allocation3 + $0x88] sm:$0xff] %vm258_vm1, %v7043_v17  ;;  %v7042_v18 = vadd.f32 %v7010_v56, %v6915_v14  ;;  %6746 = vst.msk [vmem:[#allocation3 + $0xa0] sm:$0xff] %vm258_vm1, %v6714_v11  ;;  %v6717_v39 = vadd.f32 %v9888_v32, %v6685_v38  ;;  %v7326_v32 = vld [vmem:[#allocation3] sm:$0xff] }
 0x47a   : > { %v7013_v52 = vld [vmem:[#allocation3 + $0x98] sm:$0xff]  ;;  %v6613_v7 = vpop.f32.mrf.mxu1  ;;  %v6945_v30 = vpop.f32.mrf.mxu0 }
 0x47b   : > { %7074 = vst.msk [vmem:[#allocation3 + $0x80] sm:$0xff] %vm258_vm1, %v7042_v18  ;;  %v7045_v12 = vadd.f32 %v9932_v48, %v7013_v52  ;;  %6749 = vst.msk [vmem:[#allocation3 + $0xb8] sm:$0xff] %vm258_vm1, %v6717_v39  ;;  %v6716_v61 = vadd.f32 %v6684_v3, %v6613_v7  ;;  %v6690_v48 = vld [vmem:[#allocation3 + $0xe0] sm:$0xff]  ;;  %v7329_v7 = vld [vmem:[#allocation3 + $0x18] sm:$0xff] }
 0x47c   : > { %v7012_v16 = vld [vmem:[#allocation3 + $0x90] sm:$0xff]  ;;  %v9891_v34 = vpop.f32.mrf.mxu1  ;;  %v9941_v31 = vpop.f32.mrf.mxu0 }
 0x47d   : > { %7077 = vst.msk [vmem:[#allocation3 + $0x98] sm:$0xff] %vm258_vm1, %v7045_v12  ;;  %v7044_v5 = vadd.f32 %v7012_v16, %v6925_v44  ;;  %6748 = vst.msk [vmem:[#allocation3 + $0xb0] sm:$0xff] %vm258_vm1, %v6716_v61  ;;  %v6719_v4 = vadd.f32 %v9891_v34, %v6687_v49  ;;  %v6693_v44 = vld [vmem:[#allocation3 + $0xf8] sm:$0xff]  ;;  %v7328_v16 = vld [vmem:[#allocation3 + $0x10] sm:$0xff] }
 0x47e   : > { %v7015_v6 = vld [vmem:[#allocation3 + $0xa8] sm:$0xff]  ;;  %v6623_v46 = vpop.f32.mrf.mxu1  ;;  %v6955_v33 = vpop.f32.mrf.mxu0 }
 0x47f   : > { %7076 = vst.msk [vmem:[#allocation3 + $0x90] sm:$0xff] %vm258_vm1, %v7044_v5  ;;  %v7047_v21 = vadd.f32 %v9935_v42, %v7015_v6  ;;  %6751 = vst.msk [vmem:[#allocation3 + $0xc8] sm:$0xff] %vm258_vm1, %v6719_v4  ;;  %v6718_v63 = vadd.f32 %v6686_v20, %v6623_v46  ;;  %v7331_v6 = vld [vmem:[#allocation3 + $0x28] sm:$0xff] }
 0x480   : > { %v7014_v35 = vld [vmem:[#allocation3 + $0xa0] sm:$0xff]  ;;  %v9894_v26 = vpop.f32.mrf.mxu1  ;;  %v9944_v24 = vpop.f32.mrf.mxu0 }
 0x481   : > { %7079 = vst.msk [vmem:[#allocation3 + $0xa8] sm:$0xff] %vm258_vm1, %v7047_v21  ;;  %v7046_v25 = vadd.f32 %v7014_v35, %v6935_v40  ;;  %6750 = vst.msk [vmem:[#allocation3 + $0xc0] sm:$0xff] %vm258_vm1, %v6718_v63  ;;  %v6721_v29 = vadd.f32 %v9894_v26, %v6689_v59  ;;  %v12866_v21 = vld [vmem:[%s13485_s4] ss:$0 sm:$0xff]  ;;  %v7330_v35 = vld [vmem:[#allocation3 + $0x20] sm:$0xff] }
 0x482   : > { %v7017_v58 = vld [vmem:[#allocation3 + $0xb8] sm:$0xff]  ;;  %v6633_v43 = vpop.f32.mrf.mxu1  ;;  %v6965_v54 = vpop.f32.mrf.mxu0 }
 0x483   : > { %7078 = vst.msk [vmem:[#allocation3 + $0xa0] sm:$0xff] %vm258_vm1, %v7046_v25  ;;  %v7049_v37 = vadd.f32 %v9938_v9, %v7017_v58  ;;  %6753 = vst.msk [vmem:[#allocation3 + $0xd8] sm:$0xff] %vm258_vm1, %v6721_v29  ;;  %v6720_v22 = vadd.f32 %v6688_v62, %v6633_v43  ;;  %v7333_v25 = vld [vmem:[#allocation3 + $0x38] sm:$0xff] }
 0x484   : > { %v7016_v2 = vld [vmem:[#allocation3 + $0xb0] sm:$0xff]  ;;  %v9897_v14 = vpop.f32.mrf.mxu1  ;;  %v9947_v45 = vpop.f32.mrf.mxu0 }
 0x485   : > { %7081 = vst.msk [vmem:[#allocation3 + $0xb8] sm:$0xff] %vm258_vm1, %v7049_v37  ;;  %v7048_v41 = vadd.f32 %v7016_v2, %v6945_v30  ;;  %6752 = vst.msk [vmem:[#allocation3 + $0xd0] sm:$0xff] %vm258_vm1, %v6720_v22  ;;  %v6723_v19 = vadd.f32 %v9897_v14, %v6691_v60  ;;  %v7332_v22 = vld [vmem:[#allocation3 + $0x30] sm:$0xff] }
 0x486   : > { %v7019_v36 = vld [vmem:[#allocation3 + $0xc8] sm:$0xff]  ;;  %v6643_v28 = vpop.f32.mrf.mxu1  ;;  %v6975_v1 = vpop.f32.mrf.mxu0 }
 0x487   : > { %7080 = vst.msk [vmem:[#allocation3 + $0xb0] sm:$0xff] %vm258_vm1, %v7048_v41  ;;  %v7051_v27 = vadd.f32 %v9941_v31, %v7019_v36  ;;  %6755 = vst.msk [vmem:[#allocation3 + $0xe8] sm:$0xff] %vm258_vm1, %v6723_v19  ;;  %v6722_v51 = vadd.f32 %v6690_v48, %v6643_v28  ;;  %v7335_v41 = vld [vmem:[#allocation3 + $0x48] sm:$0xff] }
 0x488   : > { %v7018_v15 = vld [vmem:[#allocation3 + $0xc0] sm:$0xff]  ;;  %v9900_v0 = vpop.f32.mrf.mxu1  ;;  %v9950_v39 = vpop.f32.mrf.mxu0 }
 0x489   : > { %7083 = vst.msk [vmem:[#allocation3 + $0xc8] sm:$0xff] %vm258_vm1, %v7051_v27  ;;  %v7050_v50 = vadd.f32 %v7018_v15, %v6955_v33  ;;  %6754 = vst.msk [vmem:[#allocation3 + $0xe0] sm:$0xff] %vm258_vm1, %v6722_v51  ;;  %v6725_v13 = vadd.f32 %v9900_v0, %v6693_v44 }
 0x48a   : > { %v7021_v10 = vld [vmem:[#allocation3 + $0xd8] sm:$0xff]  ;;  %v6653_v23 = vpop.f32.mrf.mxu1  ;;  %v6985_v31 = vpop.f32.mrf.mxu0 }
 0x48b   : > { %7082 = vst.msk [vmem:[#allocation3 + $0xc0] sm:$0xff] %vm258_vm1, %v7050_v50  ;;  %v7053_v42 = vadd.f32 %v9944_v24, %v7021_v10  ;;  %6757 = vst.msk [vmem:[#allocation3 + $0xf8] sm:$0xff] %vm258_vm1, %v6725_v13  ;;  %v6724_v55 = vadd.f32 %v6692_v8, %v6653_v23  ;;  %v7337_v23 = vld [vmem:[#allocation3 + $0x58] sm:$0xff] }
 0x48c   : > { %v7020_v53 = vld [vmem:[#allocation3 + $0xd0] sm:$0xff]  ;;  %v9955_v57 = vpop.f32.mrf.mxu1 }
 0x48d   : > { %7085 = vst.msk [vmem:[#allocation3 + $0xd8] sm:$0xff] %vm258_vm1, %v7053_v42  ;;  %v7052_v40 = vadd.f32 %v7020_v53, %v6965_v54  ;;  %6756 = vst.msk [vmem:[#allocation3 + $0xf0] sm:$0xff] %vm258_vm1, %v6724_v55  ;;  %v7359_v17 = vadd.f32 %v9955_v57, %v7327_v47 }
 0x48e   : > { %v7023_v11 = vld [vmem:[#allocation3 + $0xe8] sm:$0xff]  ;;  %v7167_v56 = vpop.f32.mrf.mxu1 }
 0x48f   : > { %7084 = vst.msk [vmem:[#allocation3 + $0xd0] sm:$0xff] %vm258_vm1, %v7052_v40  ;;  %v7055_v38 = vadd.f32 %v9947_v45, %v7023_v11  ;;  %7391 = vst.msk [vmem:[#allocation3 + $0x8] sm:$0xff] %vm258_vm1, %v7359_v17  ;;  %v7358_v9 = vadd.f32 %v7326_v32, %v7167_v56  ;;  %v7334_v45 = vld [vmem:[#allocation3 + $0x40] sm:$0xff]  ;;  %v7336_v40 = vld [vmem:[#allocation3 + $0x50] sm:$0xff] }
 0x490   : > { %v7022_v18 = vld [vmem:[#allocation3 + $0xe0] sm:$0xff]  ;;  %v9958_v52 = vpop.f32.mrf.mxu1 }
 0x491   : > { %7087 = vst.msk [vmem:[#allocation3 + $0xe8] sm:$0xff] %vm258_vm1, %v7055_v38  ;;  %v7054_v3 = vadd.f32 %v7022_v18, %v6975_v1  ;;  %7390 = vst.msk [vmem:[#allocation3] sm:$0xff] %vm258_vm1, %v7358_v9  ;;  %v7361_v30 = vadd.f32 %v9958_v52, %v7329_v7  ;;  %v7339_v9 = vld [vmem:[#allocation3 + $0x68] sm:$0xff] }
 0x492   : > { %v7025_v12 = vld [vmem:[#allocation3 + $0xf8] sm:$0xff]  ;;  %v7177_v61 = vpop.f32.mrf.mxu1 }
 0x493   : > { %7086 = vst.msk [vmem:[#allocation3 + $0xe0] sm:$0xff] %vm258_vm1, %v7054_v3  ;;  %v7057_v34 = vadd.f32 %v9950_v39, %v7025_v12  ;;  %7393 = vst.msk [vmem:[#allocation3 + $0x18] sm:$0xff] %vm258_vm1, %v7361_v30  ;;  %v7360_v49 = vadd.f32 %v7328_v16, %v7177_v61  ;;  %v7338_v61 = vld [vmem:[#allocation3 + $0x60] sm:$0xff] }
 0x494   : > { %v7024_v5 = vld [vmem:[#allocation3 + $0xf0] sm:$0xff]  ;;  %v9961_v4 = vpop.f32.mrf.mxu1 }
 0x495   : > { %7089 = vst.msk [vmem:[#allocation3 + $0xf8] sm:$0xff] %vm258_vm1, %v7057_v34  ;;  %v7056_v46 = vadd.f32 %v7024_v5, %v6985_v31  ;;  %7392 = vst.msk [vmem:[#allocation3 + $0x10] sm:$0xff] %vm258_vm1, %v7360_v49  ;;  %v7363_v20 = vadd.f32 %v9961_v4, %v7331_v6  ;;  %v7341_v4 = vld [vmem:[#allocation3 + $0x78] sm:$0xff] }
 0x496   : > { %v7423_v33 = vld [vmem:[#allocation3 + $0x8] sm:$0xff]  ;;  %v7187_v63 = vpop.f32.mrf.mxu1 }
 0x497   : > { %7088 = vst.msk [vmem:[#allocation3 + $0xf0] sm:$0xff] %vm258_vm1, %v7056_v46  ;;  %7395 = vst.msk [vmem:[#allocation3 + $0x28] sm:$0xff] %vm258_vm1, %v7363_v20  ;;  %v7362_v26 = vadd.f32 %v7330_v35, %v7187_v63  ;;  %v12871_v29 = vadd.f32 %v12866_v21, %v7423_v33 }
 0x498   : > { %v7422_v59 = vld [vmem:[#allocation3] sm:$0xff]  ;;  %v9964_v24 = vpop.f32.mrf.mxu1 }
 0x499   : > { %v12874_v58 = vadd.f32 %v12866_v21, %v7422_v59  ;;  %7394 = vst.msk [vmem:[#allocation3 + $0x20] sm:$0xff] %vm258_vm1, %v7362_v26  ;;  %v7365_v43 = vadd.f32 %v9964_v24, %v7333_v25  ;;  %v7494_v19 = vsel %vm258_vm1, %v12871_v29, 0.0  ;;  %v7340_v59 = vld [vmem:[#allocation3 + $0x70] sm:$0xff] }
 0x49a   : > { %v7425_v62 = vld [vmem:[#allocation3 + $0x18] sm:$0xff]  ;;  %v7197_v37 = vpop.f32.mrf.mxu1 }
 0x49b   : > { %v7493_v2 = vsel %vm258_vm1, %v12874_v58, 0.0  ;;  %7397 = vst.msk [vmem:[#allocation3 + $0x38] sm:$0xff] %vm258_vm1, %v7365_v43  ;;  %v7364_v54 = vadd.f32 %v7332_v22, %v7197_v37  ;;  %v12883_v36 = vadd.f32 %v12866_v21, %v7425_v62  ;;  %v7343_v22 = vld [vmem:[#allocation3 + $0x88] sm:$0xff] }
 0x49c   : > { %v7424_v14 = vld [vmem:[#allocation3 + $0x10] sm:$0xff]  ;;  %v9967_v60 = vpop.f32.mrf.mxu1  ;;  %v7495_v27 = vadd.f32 %v7494_v19, %v7493_v2 }
 0x49d   : > { %v12886_v28 = vadd.f32 %v12866_v21, %v7424_v14  ;;  %7396 = vst.msk [vmem:[#allocation3 + $0x30] sm:$0xff] %vm258_vm1, %v7364_v54  ;;  %v7367_v48 = vadd.f32 %v9967_v60, %v7335_v41  ;;  %v7498_v8 = vsel %vm258_vm1, %v12883_v36, 0.0 }
 0x49e   : > { %v7427_v51 = vld [vmem:[#allocation3 + $0x28] sm:$0xff]  ;;  %v7207_v15 = vpop.f32.mrf.mxu1 }
 0x49f   : > { %v7496_v0 = vsel %vm258_vm1, %v12886_v28, 0.0  ;;  %7399 = vst.msk [vmem:[#allocation3 + $0x48] sm:$0xff] %vm258_vm1, %v7367_v48  ;;  %v7366_v44 = vadd.f32 %v7334_v45, %v7207_v15  ;;  %v12895_v42 = vadd.f32 %v12866_v21, %v7427_v51 }
 0x4a0   : > { %v7497_v50 = vadd.f32 %v7496_v0, %v7495_v27  ;;  %v7426_v13 = vld [vmem:[#allocation3 + $0x20] sm:$0xff]  ;;  %v9970_v10 = vpop.f32.mrf.mxu1 }
 0x4a1   : > { %v12898_v55 = vadd.f32 %v12866_v21, %v7426_v13  ;;  %7398 = vst.msk [vmem:[#allocation3 + $0x40] sm:$0xff] %vm258_vm1, %v7366_v44  ;;  %v7369_v53 = vadd.f32 %v9970_v10, %v7337_v23  ;;  %v7502_v18 = vsel %vm258_vm1, %v12895_v42, 0.0  ;;  %v7342_v27 = vld [vmem:[#allocation3 + $0x80] sm:$0xff] }
 0x4a2   : > { %v7499_v1 = vadd.f32 %v7498_v8, %v7497_v50  ;;  %v7429_v57 = vld [vmem:[#allocation3 + $0x38] sm:$0xff]  ;;  %v7217_v47 = vpop.f32.mrf.mxu1 }
 0x4a3   : > { %v7500_v17 = vsel %vm258_vm1, %v12898_v55, 0.0  ;;  %7401 = vst.msk [vmem:[#allocation3 + $0x58] sm:$0xff] %vm258_vm1, %v7369_v53  ;;  %v7368_v11 = vadd.f32 %v7336_v40, %v7217_v47  ;;  %v12907_v39 = vadd.f32 %v12866_v21, %v7429_v57  ;;  %v7345_v50 = vld [vmem:[#allocation3 + $0x98] sm:$0xff]  ;;  %v7344_v47 = vld [vmem:[#allocation3 + $0x90] sm:$0xff] }
 0x4a4   : > { %v7501_v56 = vadd.f32 %v7500_v17, %v7499_v1  ;;  %v7428_v32 = vld [vmem:[#allocation3 + $0x30] sm:$0xff]  ;;  %v9973_v38 = vpop.f32.mrf.mxu1 }
 0x4a5   : > { %v12910_v52 = vadd.f32 %v12866_v21, %v7428_v32  ;;  %7400 = vst.msk [vmem:[#allocation3 + $0x50] sm:$0xff] %vm258_vm1, %v7368_v11  ;;  %v7371_v7 = vadd.f32 %v9973_v38, %v7339_v9  ;;  %v7506_v6 = vsel %vm258_vm1, %v12907_v39, 0.0  ;;  %v7347_v38 = vld [vmem:[#allocation3 + $0xa8] sm:$0xff] }
 0x4a6   : > { %v7503_v3 = vadd.f32 %v7502_v18, %v7501_v56  ;;  %v7431_v30 = vld [vmem:[#allocation3 + $0x48] sm:$0xff]  ;;  %v7227_v12 = vpop.f32.mrf.mxu1 }
 0x4a7   : > { %v7504_v16 = vsel %vm258_vm1, %v12910_v52, 0.0  ;;  %7403 = vst.msk [vmem:[#allocation3 + $0x68] sm:$0xff] %vm258_vm1, %v7371_v7  ;;  %v7370_v34 = vadd.f32 %v7338_v61, %v7227_v12  ;;  %v12919_v46 = vadd.f32 %v12866_v21, %v7431_v30 }
 0x4a8   : > { %v7505_v49 = vadd.f32 %v7504_v16, %v7503_v3  ;;  %v7430_v31 = vld [vmem:[#allocation3 + $0x40] sm:$0xff]  ;;  %v9976_v5 = vpop.f32.mrf.mxu1 }
 0x4a9   : > { %v12922_v20 = vadd.f32 %v12866_v21, %v7430_v31  ;;  %7402 = vst.msk [vmem:[#allocation3 + $0x60] sm:$0xff] %vm258_vm1, %v7370_v34  ;;  %v7373_v33 = vadd.f32 %v9976_v5, %v7341_v4  ;;  %v7510_v2 = vsel %vm258_vm1, %v12919_v46, 0.0  ;;  %v7346_v16 = vld [vmem:[#allocation3 + $0xa0] sm:$0xff] }
 0x4aa   : > { %v7507_v63 = vadd.f32 %v7506_v6, %v7505_v49  ;;  %v7433_v35 = vld [vmem:[#allocation3 + $0x58] sm:$0xff]  ;;  %v7237_v26 = vpop.f32.mrf.mxu1 }
 0x4ab   : > { %v7508_v24 = vsel %vm258_vm1, %v12922_v20, 0.0  ;;  %7405 = vst.msk [vmem:[#allocation3 + $0x78] sm:$0xff] %vm258_vm1, %v7373_v33  ;;  %v7372_v25 = vadd.f32 %v7340_v59, %v7237_v26  ;;  %v12931_v54 = vadd.f32 %v12866_v21, %v7433_v35  ;;  %v7349_v6 = vld [vmem:[#allocation3 + $0xb8] sm:$0xff] }
 0x4ac   : > { %v7509_v43 = vadd.f32 %v7508_v24, %v7507_v63  ;;  %v7432_v62 = vld [vmem:[#allocation3 + $0x50] sm:$0xff]  ;;  %v9979_v37 = vpop.f32.mrf.mxu1 }
 0x4ad   : > { %v12934_v14 = vadd.f32 %v12866_v21, %v7432_v62  ;;  %7404 = vst.msk [vmem:[#allocation3 + $0x70] sm:$0xff] %vm258_vm1, %v7372_v25  ;;  %v7375_v60 = vadd.f32 %v9979_v37, %v7343_v22  ;;  %v7514_v13 = vsel %vm258_vm1, %v12931_v54, 0.0 }
 0x4ae   : > { %v7511_v41 = vadd.f32 %v7510_v2, %v7509_v43  ;;  %v7435_v19 = vld [vmem:[#allocation3 + $0x68] sm:$0xff]  ;;  %v7247_v48 = vpop.f32.mrf.mxu1  ;;  %v7348_v43 = vld [vmem:[#allocation3 + $0xb0] sm:$0xff] }
 0x4af   : > { %v7512_v51 = vsel %vm258_vm1, %v12934_v14, 0.0  ;;  %7407 = vst.msk [vmem:[#allocation3 + $0x88] sm:$0xff] %vm258_vm1, %v7375_v60  ;;  %v7374_v15 = vadd.f32 %v7342_v27, %v7247_v48  ;;  %v12943_v10 = vadd.f32 %v12866_v21, %v7435_v19 }
 0x4b0   : > { %v7513_v45 = vadd.f32 %v7512_v51, %v7511_v41  ;;  %v7434_v0 = vld [vmem:[#allocation3 + $0x60] sm:$0xff]  ;;  %v9982_v44 = vpop.f32.mrf.mxu1  ;;  %v7351_v41 = vld [vmem:[#allocation3 + $0xc8] sm:$0xff] }
 0x4b1   : > { %v12946_v23 = vadd.f32 %v12866_v21, %v7434_v0  ;;  %7406 = vst.msk [vmem:[#allocation3 + $0x80] sm:$0xff] %vm258_vm1, %v7374_v15  ;;  %v7377_v8 = vadd.f32 %v9982_v44, %v7345_v50  ;;  %v7518_v9 = vsel %vm258_vm1, %v12943_v10, 0.0  ;;  %v7350_v44 = vld [vmem:[#allocation3 + $0xc0] sm:$0xff] }
 0x4b2   : > { %v7515_v53 = vadd.f32 %v7514_v13, %v7513_v45  ;;  %v7437_v1 = vld [vmem:[#allocation3 + $0x78] sm:$0xff]  ;;  %v7257_v57 = vpop.f32.mrf.mxu1 }
 0x4b3   : > { %v7516_v40 = vsel %vm258_vm1, %v12946_v23, 0.0  ;;  %7409 = vst.msk [vmem:[#allocation3 + $0x98] sm:$0xff] %vm258_vm1, %v7377_v8  ;;  %v7376_v17 = vadd.f32 %v7344_v47, %v7257_v57  ;;  %v12955_v18 = vadd.f32 %v12866_v21, %v7437_v1  ;;  %v7353_v57 = vld [vmem:[#allocation3 + $0xd8] sm:$0xff] }
 0x4b4   : > { %v7517_v11 = vadd.f32 %v7516_v40, %v7515_v53  ;;  %v7436_v56 = vld [vmem:[#allocation3 + $0x70] sm:$0xff]  ;;  %v9985_v32 = vpop.f32.mrf.mxu1 }
 0x4b5   : > { %v12958_v7 = vadd.f32 %v12866_v21, %v7436_v56  ;;  %7408 = vst.msk [vmem:[#allocation3 + $0x90] sm:$0xff] %vm258_vm1, %v7376_v17  ;;  %v7379_v3 = vadd.f32 %v9985_v32, %v7347_v38  ;;  %v7522_v33 = vsel %vm258_vm1, %v12955_v18, 0.0 }
 0x4b6   : > { %v7519_v30 = vadd.f32 %v7518_v9, %v7517_v11  ;;  %v7439_v12 = vld [vmem:[#allocation3 + $0x88] sm:$0xff]  ;;  %v7267_v61 = vpop.f32.mrf.mxu1  ;;  %v7352_v9 = vld [vmem:[#allocation3 + $0xd0] sm:$0xff] }
 0x4b7   : > { %v7520_v34 = vsel %vm258_vm1, %v12958_v7, 0.0  ;;  %7411 = vst.msk [vmem:[#allocation3 + $0xa8] sm:$0xff] %vm258_vm1, %v7379_v3  ;;  %v7378_v49 = vadd.f32 %v7346_v16, %v7267_v61  ;;  %v12967_v63 = vadd.f32 %v12866_v21, %v7439_v12 }
 0x4b8   : > { %v7521_v31 = vadd.f32 %v7520_v34, %v7519_v30  ;;  %v7438_v5 = vld [vmem:[#allocation3 + $0x80] sm:$0xff]  ;;  %v9988_v4 = vpop.f32.mrf.mxu1  ;;  %v7355_v34 = vld [vmem:[#allocation3 + $0xe8] sm:$0xff] }
 0x4b9   : > { %v12970_v35 = vadd.f32 %v12866_v21, %v7438_v5  ;;  %7410 = vst.msk [vmem:[#allocation3 + $0xa0] sm:$0xff] %vm258_vm1, %v7378_v49  ;;  %v7381_v26 = vadd.f32 %v9988_v4, %v7349_v6  ;;  %v7526_v19 = vsel %vm258_vm1, %v12967_v63, 0.0 }
 0x4ba   : > { %v7523_v59 = vadd.f32 %v7522_v33, %v7521_v31  ;;  %v7441_v24 = vld [vmem:[#allocation3 + $0x98] sm:$0xff]  ;;  %v7277_v25 = vpop.f32.mrf.mxu1 }
 0x4bb   : > { %v7524_v62 = vsel %vm258_vm1, %v12970_v35, 0.0  ;;  %7413 = vst.msk [vmem:[#allocation3 + $0xb8] sm:$0xff] %vm258_vm1, %v7381_v26  ;;  %v7380_v37 = vadd.f32 %v7348_v43, %v7277_v25  ;;  %v12979_v48 = vadd.f32 %v12866_v21, %v7441_v24 }
 0x4bc   : > { %v7525_v22 = vadd.f32 %v7524_v62, %v7523_v59  ;;  %v7440_v2 = vld [vmem:[#allocation3 + $0x90] sm:$0xff]  ;;  %v9991_v60 = vpop.f32.mrf.mxu1  ;;  %v7354_v59 = vld [vmem:[#allocation3 + $0xe0] sm:$0xff] }
 0x4bd   : > { %v12982_v27 = vadd.f32 %v12866_v21, %v7440_v2  ;;  %7412 = vst.msk [vmem:[#allocation3 + $0xb0] sm:$0xff] %vm258_vm1, %v7380_v37  ;;  %v7383_v51 = vadd.f32 %v9991_v60, %v7351_v41  ;;  %v7530_v47 = vsel %vm258_vm1, %v12979_v48, 0.0 }
 0x4be   : > { %v7527_v15 = vadd.f32 %v7526_v19, %v7525_v22  ;;  %v7443_v45 = vld [vmem:[#allocation3 + $0xa8] sm:$0xff]  ;;  %v7287_v0 = vpop.f32.mrf.mxu1  ;;  %v7357_v22 = vld [vmem:[#allocation3 + $0xf8] sm:$0xff] }
 0x4bf   : > { %v7528_v50 = vsel %vm258_vm1, %v12982_v27, 0.0  ;;  %7415 = vst.msk [vmem:[#allocation3 + $0xc8] sm:$0xff] %vm258_vm1, %v7383_v51  ;;  %v7382_v13 = vadd.f32 %v7350_v44, %v7287_v0  ;;  %v12991_v40 = vadd.f32 %v12866_v21, %v7443_v45  ;;  %v7356_v0 = vld [vmem:[#allocation3 + $0xf0] sm:$0xff] }
 0x4c0   : > { %v7529_v8 = vadd.f32 %v7528_v50, %v7527_v15  ;;  %v7442_v53 = vld [vmem:[#allocation3 + $0xa0] sm:$0xff]  ;;  %v9994_v1 = vpop.f32.mrf.mxu1 }
 0x4c1   : > { %v12994_v17 = vadd.f32 %v12866_v21, %v7442_v53  ;;  %7414 = vst.msk [vmem:[#allocation3 + $0xc0] sm:$0xff] %vm258_vm1, %v7382_v13  ;;  %v7385_v11 = vadd.f32 %v9994_v1, %v7353_v57  ;;  %v7534_v49 = vsel %vm258_vm1, %v12991_v40, 0.0 }
 0x4c2   : > { %v7531_v56 = vadd.f32 %v7530_v47, %v7529_v8  ;;  %v7445_v32 = vld [vmem:[#allocation3 + $0xb8] sm:$0xff]  ;;  %v7297_v38 = vpop.f32.mrf.mxu1 }
 0x4c3   : > { %v7532_v3 = vsel %vm258_vm1, %v12994_v17, 0.0  ;;  %7417 = vst.msk [vmem:[#allocation3 + $0xd8] sm:$0xff] %vm258_vm1, %v7385_v11  ;;  %v7384_v30 = vadd.f32 %v7352_v9, %v7297_v38  ;;  %v13003_v31 = vadd.f32 %v12866_v21, %v7445_v32 }
 0x4c4   : > { %v7533_v12 = vadd.f32 %v7532_v3, %v7531_v56  ;;  %v7444_v61 = vld [vmem:[#allocation3 + $0xb0] sm:$0xff]  ;;  %v9997_v16 = vpop.f32.mrf.mxu1 }
 0x4c5   : > { %v13006_v5 = vadd.f32 %v12866_v21, %v7444_v61  ;;  %7416 = vst.msk [vmem:[#allocation3 + $0xd0] sm:$0xff] %vm258_vm1, %v7384_v30  ;;  %v7387_v4 = vadd.f32 %v9997_v16, %v7355_v34  ;;  %v7538_v2 = vsel %vm258_vm1, %v13003_v31, 0.0 }
 0x4c6   : > { %v7535_v6 = vadd.f32 %v7534_v49, %v7533_v12  ;;  %v7447_v33 = vld [vmem:[#allocation3 + $0xc8] sm:$0xff]  ;;  %v7307_v26 = vpop.f32.mrf.mxu1 }
 0x4c7   : > { %v7536_v24 = vsel %vm258_vm1, %v13006_v5, 0.0  ;;  %7419 = vst.msk [vmem:[#allocation3 + $0xe8] sm:$0xff] %vm258_vm1, %v7387_v4  ;;  %v7386_v25 = vadd.f32 %v7354_v59, %v7307_v26  ;;  %v13015_v60 = vadd.f32 %v12866_v21, %v7447_v33 }
 0x4c8   : > { %v7537_v43 = vadd.f32 %v7536_v24, %v7535_v6  ;;  %v7446_v62 = vld [vmem:[#allocation3 + $0xc0] sm:$0xff]  ;;  %v10000_v37 = vpop.f32.mrf.mxu1 }
 0x4c9   : > { %v13018_v41 = vadd.f32 %v12866_v21, %v7446_v62  ;;  %7418 = vst.msk [vmem:[#allocation3 + $0xe0] sm:$0xff] %vm258_vm1, %v7386_v25  ;;  %v7389_v19 = vadd.f32 %v10000_v37, %v7357_v22  ;;  %v7542_v53 = vsel %vm258_vm1, %v13015_v60, 0.0 }
 0x4ca   : > { %v7539_v51 = vadd.f32 %v7538_v2, %v7537_v43  ;;  %v7449_v15 = vld [vmem:[#allocation3 + $0xd8] sm:$0xff]  ;;  %v7317_v45 = vpop.f32.mrf.mxu1 }
 0x4cb   : > { %v7540_v44 = vsel %vm258_vm1, %v13018_v41, 0.0  ;;  %7421 = vst.msk [vmem:[#allocation3 + $0xf8] sm:$0xff] %vm258_vm1, %v7389_v19  ;;  %v7388_v50 = vadd.f32 %v7356_v0, %v7317_v45  ;;  %v13027_v1 = vadd.f32 %v12866_v21, %v7449_v15 }
 0x4cc   : > { %v7541_v13 = vadd.f32 %v7540_v44, %v7539_v51  ;;  %v7448_v8 = vld [vmem:[#allocation3 + $0xd0] sm:$0xff] }
 0x4cd   : > { %v13030_v57 = vadd.f32 %v12866_v21, %v7448_v8  ;;  %7420 = vst.msk [vmem:[#allocation3 + $0xf0] sm:$0xff] %vm258_vm1, %v7388_v50  ;;  %v7546_v9 = vsel %vm258_vm1, %v13027_v1, 0.0 }
 0x4ce   : > { %v7543_v47 = vadd.f32 %v7542_v53, %v7541_v13  ;;  %v7451_v11 = vld [vmem:[#allocation3 + $0xe8] sm:$0xff] }
 0x4cf   : > { %v7544_v56 = vsel %vm258_vm1, %v13030_v57, 0.0  ;;  %v13038_v3 = vadd.f32 %v12866_v21, %v7451_v11 }
 0x4d0   : > { %v7545_v32 = vadd.f32 %v7544_v56, %v7543_v47  ;;  %v7450_v38 = vld [vmem:[#allocation3 + $0xe0] sm:$0xff] }
 0x4d1   : > { %v13041_v30 = vadd.f32 %v12866_v21, %v7450_v38  ;;  %v7550_v4 = vsel %vm258_vm1, %v13038_v3, 0.0 }
 0x4d2   : > { %v7547_v12 = vadd.f32 %v7546_v9, %v7545_v32  ;;  %v7453_v61 = vld [vmem:[#allocation3 + $0xf8] sm:$0xff] }
 0x4d3   : > { %v7548_v16 = vsel %vm258_vm1, %v13041_v30, 0.0  ;;  %v13048_v6 = vadd.f32 %v12866_v21, %v7453_v61 }
 0x4d4   : > { %v7549_v34 = vadd.f32 %v7548_v16, %v7547_v12  ;;  %v7452_v49 = vld [vmem:[#allocation3 + $0xf0] sm:$0xff] }
 0x4d5   : > { %v13051_v33 = vadd.f32 %v12866_v21, %v7452_v49  ;;  %v7554_v25 = vsel %vm258_vm1, %v13048_v6, 0.0 }
 0x4d6   : > { %v7551_v26 = vadd.f32 %v7550_v4, %v7549_v34 }
 0x4d7   : > { %v7552_v59 = vsel %vm258_vm1, %v13051_v33, 0.0 }
 0x4d8   : > { %v7553_v24 = vadd.f32 %v7552_v59, %v7551_v26 }
 0x4da   : > { %v7555_v43 = vadd.f32 %v7554_v25, %v7553_v24 }
 0x4dc   : > { %v7556_v62 = vrot.slane %v7555_v43, 4 }
 0x4de   : > { %v7557_v37 = vadd.f32 %v7556_v62, %v7555_v43 }
 0x4e0   : > { %v7558_v22 = vrot.slane %v7557_v37, 2 }
 0x4e2   : > { %v7559_v2 = vadd.f32 %v7558_v22, %v7557_v37 }
 0x4e4   : > { %v7560_v19 = vrot.slane %v7559_v2, 1 }
 0x4e6   : > { %v7561_v51 = vadd.f32 %v7560_v19, %v7559_v2 }
 0x4e8   : > { %v13057_v15 = vmul.f32 0.00390625, %v7561_v51 }
 0x4ea   : > { %v13061_v21 = vsub.f32 %v12874_v58, %v13057_v15  ;;  %v13065_v45 = vsub.f32 %v12871_v29, %v13057_v15  ;;  %v13069_v0 = vsub.f32 %v12886_v28, %v13057_v15  ;;  %v13073_v44 = vsub.f32 %v12883_v36, %v13057_v15 }
 0x4eb   : > { %v13081_v58 = vsub.f32 %v12898_v55, %v13057_v15  ;;  %v13087_v28 = vsub.f32 %v12895_v42, %v13057_v15  ;;  %v13095_v11 = vsub.f32 %v12910_v52, %v13057_v15  ;;  %v13102_v42 = vsub.f32 %v12907_v39, %v13057_v15 }
 0x4ec   : > { %v7595_v50 = vmul.f32 %v13061_v21, %v13061_v21  ;;  %v7596_v13 = vmul.f32 %v13065_v45, %v13065_v45  ;;  %v7597_v29 = vmul.f32 %v13069_v0, %v13069_v0  ;;  %v7598_v36 = vmul.f32 %v13073_v44, %v13073_v44 }
 0x4ed   : > { %v7599_v55 = vmul.f32 %v13081_v58, %v13081_v58  ;;  %v7600_v38 = vmul.f32 %v13087_v28, %v13087_v28  ;;  %v13109_v52 = vsub.f32 %v12922_v20, %v13057_v15  ;;  %v7601_v61 = vmul.f32 %v13095_v11, %v13095_v11 }
 0x4ee   : > { %v7627_v8 = vsel %vm258_vm1, %v7595_v50, 0.0  ;;  %v7628_v53 = vsel %vm258_vm1, %v7596_v13, 0.0  ;;  %v7630_v56 = vsel %vm258_vm1, %v7597_v29, 0.0  ;;  %v7632_v9 = vsel %vm258_vm1, %v7598_v36, 0.0 }
 0x4ef   : > { %v7629_v47 = vadd.f32 %v7628_v53, %v7627_v8  ;;  %v7634_v16 = vsel %vm258_vm1, %v7599_v55, 0.0  ;;  %v13116_v39 = vsub.f32 %v12919_v46, %v13057_v15  ;;  %v7602_v49 = vmul.f32 %v13102_v42, %v13102_v42 }
 0x4f0   : > { %v7636_v4 = vsel %vm258_vm1, %v7600_v38, 0.0  ;;  %v13123_v20 = vsub.f32 %v12934_v14, %v13057_v15  ;;  %v7603_v59 = vmul.f32 %v13109_v52, %v13109_v52  ;;  %v7638_v24 = vsel %vm258_vm1, %v7601_v61, 0.0 }
 0x4f1   : > { %v7631_v32 = vadd.f32 %v7630_v56, %v7629_v47  ;;  %v13130_v46 = vsub.f32 %v12931_v54, %v13057_v15  ;;  %v7604_v43 = vmul.f32 %v13116_v39, %v13116_v39  ;;  %v7640_v62 = vsel %vm258_vm1, %v7602_v49, 0.0 }
 0x4f2   : > { %v13137_v14 = vsub.f32 %v12946_v23, %v13057_v15  ;;  %v7605_v22 = vmul.f32 %v13123_v20, %v13123_v20  ;;  %v7642_v2 = vsel %vm258_vm1, %v7603_v59, 0.0  ;;  %v13144_v54 = vsub.f32 %v12943_v10, %v13057_v15 }
 0x4f3   : > { %v7633_v12 = vadd.f32 %v7632_v9, %v7631_v32  ;;  %v7606_v51 = vmul.f32 %v13130_v46, %v13130_v46  ;;  %v7644_v50 = vsel %vm258_vm1, %v7604_v43, 0.0  ;;  %v13151_v23 = vsub.f32 %v12958_v7, %v13057_v15 }
 0x4f4   : > { %v7607_v29 = vmul.f32 %v13137_v14, %v13137_v14  ;;  %v7646_v36 = vsel %vm258_vm1, %v7605_v22, 0.0  ;;  %v13158_v10 = vsub.f32 %v12955_v18, %v13057_v15  ;;  %v7608_v53 = vmul.f32 %v13144_v54, %v13144_v54 }
 0x4f5   : > { %v7635_v34 = vadd.f32 %v7634_v16, %v7633_v12  ;;  %v7648_v47 = vsel %vm258_vm1, %v7606_v51, 0.0  ;;  %v13165_v7 = vsub.f32 %v12970_v35, %v13057_v15  ;;  %v7609_v56 = vmul.f32 %v13151_v23, %v13151_v23 }
 0x4f6   : > { %v7650_v32 = vsel %vm258_vm1, %v7607_v29, 0.0  ;;  %v13172_v18 = vsub.f32 %v12967_v63, %v13057_v15  ;;  %v7610_v9 = vmul.f32 %v13158_v10, %v13158_v10  ;;  %v7652_v12 = vsel %vm258_vm1, %v7608_v53, 0.0 }
 0x4f7   : > { %v7637_v26 = vadd.f32 %v7636_v4, %v7635_v34  ;;  %v13179_v35 = vsub.f32 %v12982_v27, %v13057_v15  ;;  %v7611_v16 = vmul.f32 %v13165_v7, %v13165_v7  ;;  %v7654_v34 = vsel %vm258_vm1, %v7609_v56, 0.0 }
 0x4f8   : > { %v13186_v63 = vsub.f32 %v12979_v48, %v13057_v15  ;;  %v7612_v4 = vmul.f32 %v13172_v18, %v13172_v18  ;;  %v13193_v27 = vsub.f32 %v12994_v17, %v13057_v15  ;;  %v13200_v48 = vsub.f32 %v12991_v40, %v13057_v15 }
 0x4f9   : > { %v7639_v25 = vadd.f32 %v7638_v24, %v7637_v26  ;;  %v7656_v26 = vsel %vm258_vm1, %v7610_v9, 0.0  ;;  %v7613_v24 = vmul.f32 %v13179_v35, %v13179_v35  ;;  %v13207_v17 = vsub.f32 %v13006_v5, %v13057_v15 }
 0x4fa   : > { %v13214_v40 = vsub.f32 %v13003_v31, %v13057_v15  ;;  %v13221_v5 = vsub.f32 %v13018_v41, %v13057_v15  ;;  %v13228_v31 = vsub.f32 %v13015_v60, %v13057_v15  ;;  %v13235_v41 = vsub.f32 %v13030_v57, %v13057_v15 }
 0x4fb   : > { %v7641_v37 = vadd.f32 %v7640_v62, %v7639_v25  ;;  %v7658_v25 = vsel %vm258_vm1, %v7611_v16, 0.0  ;;  %v7614_v62 = vmul.f32 %v13186_v63, %v13186_v63  ;;  %v13242_v60 = vsub.f32 %v13027_v1, %v13057_v15 }
 0x4fc   : > { %v13249_v57 = vsub.f32 %v13041_v30, %v13057_v15  ;;  %v13256_v1 = vsub.f32 %v13038_v3, %v13057_v15  ;;  %v13263_v30 = vsub.f32 %v13051_v33, %v13057_v15  ;;  %v13270_v3 = vsub.f32 %v13048_v6, %v13057_v15 }
 0x4fd   : > { %v7643_v19 = vadd.f32 %v7642_v2, %v7641_v37  ;;  %v7660_v37 = vsel %vm258_vm1, %v7612_v4, 0.0  ;;  %v7615_v2 = vmul.f32 %v13193_v27, %v13193_v27 }
 0x4fe   : > { %v7625_v33 = vmul.f32 %v13263_v30, %v13263_v30 }
 0x4ff   : > { %v7645_v13 = vadd.f32 %v7644_v50, %v7643_v19  ;;  %v7662_v19 = vsel %vm258_vm1, %v7613_v24, 0.0  ;;  %v7616_v50 = vmul.f32 %v13200_v48, %v13200_v48 }
 0x500   : > { %v7686_v6 = vsel %vm258_vm1, %v7625_v33, 0.0  ;;  %v7740_v33 = vld [vmem:[%s10091_s6 + $0x48] sm:$0xff] }
 0x501   : > { %v7647_v8 = vadd.f32 %v7646_v36, %v7645_v13  ;;  %v7664_v13 = vsel %vm258_vm1, %v7614_v62, 0.0  ;;  %v7617_v36 = vmul.f32 %v13207_v17, %v13207_v17 }
 0x503   : > { %v7649_v55 = vadd.f32 %v7648_v47, %v7647_v8  ;;  %v7666_v8 = vsel %vm258_vm1, %v7615_v2, 0.0  ;;  %v7618_v47 = vmul.f32 %v13214_v40, %v13214_v40 }
 0x505   : > { %v7651_v38 = vadd.f32 %v7650_v32, %v7649_v55  ;;  %v7668_v55 = vsel %vm258_vm1, %v7616_v50, 0.0  ;;  %v7619_v32 = vmul.f32 %v13221_v5, %v13221_v5  ;;  %v7626_v50 = vmul.f32 %v13270_v3, %v13270_v3 }
 0x507   : > { %v7653_v61 = vadd.f32 %v7652_v12, %v7651_v38  ;;  %v7670_v38 = vsel %vm258_vm1, %v7617_v36, 0.0  ;;  %v7620_v12 = vmul.f32 %v13228_v31, %v13228_v31  ;;  %v7688_v36 = vsel %vm258_vm1, %v7626_v50, 0.0  ;;  %v7743_v50 = vld [vmem:[%s10091_s6 + $0x60] sm:$0xff] }
 0x509   : > { %v7655_v49 = vadd.f32 %v7654_v34, %v7653_v61  ;;  %v7672_v61 = vsel %vm258_vm1, %v7618_v47, 0.0  ;;  %v7621_v34 = vmul.f32 %v13235_v41, %v13235_v41 }
 0x50b   : > { %v7657_v59 = vadd.f32 %v7656_v26, %v7655_v49  ;;  %v7674_v49 = vsel %vm258_vm1, %v7619_v32, 0.0  ;;  %v7622_v26 = vmul.f32 %v13242_v60, %v13242_v60 }
 0x50d   : > { %v7659_v43 = vadd.f32 %v7658_v25, %v7657_v59  ;;  %v7676_v59 = vsel %vm258_vm1, %v7620_v12, 0.0  ;;  %v7623_v25 = vmul.f32 %v13249_v57, %v13249_v57 }
 0x50f   : > { %v7661_v22 = vadd.f32 %v7660_v37, %v7659_v43  ;;  %v7678_v43 = vsel %vm258_vm1, %v7621_v34, 0.0  ;;  %v7624_v37 = vmul.f32 %v13256_v1, %v13256_v1 }
 0x511   : > { %v7663_v51 = vadd.f32 %v7662_v19, %v7661_v22  ;;  %v7680_v22 = vsel %vm258_vm1, %v7622_v26, 0.0  ;;  %v7682_v19 = vsel %vm258_vm1, %v7623_v25, 0.0 }
 0x513   : > { %v7665_v29 = vadd.f32 %v7664_v13, %v7663_v51  ;;  %v7684_v13 = vsel %vm258_vm1, %v7624_v37, 0.0  ;;  %v7737_v37 = vld [vmem:[%s10091_s6 + $0x30] sm:$0xff] }
 0x515   : > { %v7667_v53 = vadd.f32 %v7666_v8, %v7665_v29 }
 0x517   : > { %v7669_v56 = vadd.f32 %v7668_v55, %v7667_v53 }
 0x519   : > { %v7671_v9 = vadd.f32 %v7670_v38, %v7669_v56 }
 0x51b   : > { %v7673_v16 = vadd.f32 %v7672_v61, %v7671_v9 }
 0x51d   : > { %v7675_v4 = vadd.f32 %v7674_v49, %v7673_v16 }
 0x51f   : > { %v7677_v24 = vadd.f32 %v7676_v59, %v7675_v4 }
 0x521   : > { %v7679_v62 = vadd.f32 %v7678_v43, %v7677_v24 }
 0x523   : > { %v7681_v2 = vadd.f32 %v7680_v22, %v7679_v62  ;;  %v7736_v62 = vld [vmem:[%s10091_s6 + $0x28] sm:$0xff]  ;;  %v7738_v22 = vld [vmem:[%s10091_s6 + $0x38] sm:$0xff] }
 0x525   : > { %v7683_v51 = vadd.f32 %v7682_v19, %v7681_v2  ;;  %v7739_v2 = vld [vmem:[%s10091_s6 + $0x40] sm:$0xff]  ;;  %v7741_v19 = vld [vmem:[%s10091_s6 + $0x50] sm:$0xff] }
 0x527   : > { %v7685_v29 = vadd.f32 %v7684_v13, %v7683_v51  ;;  %v7744_v13 = vld [vmem:[%s10091_s6 + $0x68] sm:$0xff] }
 0x529   : > { %v7687_v15 = vadd.f32 %v7686_v6, %v7685_v29  ;;  %v7745_v29 = vld [vmem:[%s10091_s6 + $0x70] sm:$0xff]  ;;  %v7746_v6 = vld [vmem:[%s10091_s6 + $0x78] sm:$0xff] }
 0x52b   : > { %v7689_v8 = vadd.f32 %v7688_v36, %v7687_v15  ;;  %v7747_v15 = vld [vmem:[%s10091_s6 + $0x80] sm:$0xff]  ;;  %v7748_v36 = vld [vmem:[%s10091_s6 + $0x88] sm:$0xff] }
 0x52d   : > { %v7690_v53 = vrot.slane %v7689_v8, 4 }
 0x52f   : > { %v7691_v47 = vadd.f32 %v7690_v53, %v7689_v8  ;;  %v7749_v8 = vld [vmem:[%s10091_s6 + $0x90] sm:$0xff] }
 0x531   : > { %v7692_v55 = vrot.slane %v7691_v47, 2 }
 0x533   : > { %v7693_v56 = vadd.f32 %v7692_v55, %v7691_v47 }
 0x535   : > { %v7694_v32 = vrot.slane %v7693_v56, 1 }
 0x537   : > { %v7695_v38 = vadd.f32 %v7694_v32, %v7693_v56  ;;  %v7752_v56 = vld [vmem:[%s10091_s6 + $0xa8] sm:$0xff] }
 0x539   : > { %v7696_v9 = vmul.f32 0.00390625, %v7695_v38 }
 0x53b   : > { %v7697_v12 = vadd.f32 1e-05, %v7696_v9 }
 0x53d   : > { %10011 = vrsqrt.f32 %v7697_v12 }
 0x54a   : > { %v10012_v61 = vpop.eup %10011 }
 0x54b   : > { %v7699_v16 = vmul.f32 %v10012_v61, %v13061_v21  ;;  %v7700_v34 = vmul.f32 %v10012_v61, %v13065_v45  ;;  %v7701_v49 = vmul.f32 %v10012_v61, %v13069_v0  ;;  %v7702_v4 = vmul.f32 %v10012_v61, %v13073_v44 }
 0x54c   : > { %v7703_v26 = vmul.f32 %v10012_v61, %v13081_v58  ;;  %v7704_v59 = vmul.f32 %v10012_v61, %v13087_v28  ;;  %v7705_v24 = vmul.f32 %v10012_v61, %v13095_v11  ;;  %v7706_v25 = vmul.f32 %v10012_v61, %v13102_v42 }
 0x54d   : > { %v7707_v21 = vmul.f32 %v10012_v61, %v13109_v52  ;;  %v7708_v45 = vmul.f32 %v10012_v61, %v13116_v39  ;;  %v7709_v0 = vmul.f32 %v10012_v61, %v13123_v20  ;;  %v7710_v44 = vmul.f32 %v10012_v61, %v13130_v46  ;;  %v7731_v52 = vld [vmem:[%s10091_s6] sm:$0xff]  ;;  %v7732_v39 = vld [vmem:[%s10091_s6 + $0x8] sm:$0xff]  ;;  %v7733_v20 = vld [vmem:[%s10091_s6 + $0x10] sm:$0xff] }
 0x54e   : > { %v13296_v58 = vmul.f32 %v10012_v61, %v13137_v14  ;;  %v13299_v28 = vmul.f32 %v10012_v61, %v13144_v54  ;;  %v13302_v11 = vmul.f32 %v10012_v61, %v13151_v23  ;;  %v13305_v42 = vmul.f32 %v10012_v61, %v13158_v10  ;;  %v7734_v46 = vld [vmem:[%s10091_s6 + $0x18] sm:$0xff]  ;;  %v7735_v10 = vld [vmem:[%s10091_s6 + $0x20] sm:$0xff] }
 0x54f   : > { %v13312_v43 = vmul.f32 %v10012_v61, %v13165_v7  ;;  %v13315_v14 = vmul.f32 %v10012_v61, %v13172_v18  ;;  %v13318_v54 = vmul.f32 %v10012_v61, %v13179_v35  ;;  %v13321_v23 = vmul.f32 %v10012_v61, %v13186_v63 }
 0x550   : > { %v13328_v7 = vmul.f32 %v10012_v61, %v13193_v27  ;;  %v13331_v18 = vmul.f32 %v10012_v61, %v13200_v48  ;;  %v13334_v35 = vmul.f32 %v10012_v61, %v13207_v17  ;;  %v13337_v63 = vmul.f32 %v10012_v61, %v13214_v40  ;;  %v7742_v40 = vld [vmem:[%s10091_s6 + $0x58] sm:$0xff] }
 0x551   : > { %v13343_v51 = vmul.f32 %v10012_v61, %v13221_v5  ;;  %v13346_v27 = vmul.f32 %v10012_v61, %v13228_v31  ;;  %v13349_v48 = vmul.f32 %v10012_v61, %v13235_v41  ;;  %v13352_v17 = vmul.f32 %v10012_v61, %v13242_v60 }
 0x552   : > { %v13365_v5 = vmul.f32 %v10012_v61, %v13249_v57  ;;  %v13368_v31 = vmul.f32 %v10012_v61, %v13256_v1  ;;  %v13371_v41 = vmul.f32 %v10012_v61, %v13263_v30  ;;  %v13374_v60 = vmul.f32 %v10012_v61, %v13270_v3  ;;  %v7750_v57 = vld [vmem:[%s10091_s6 + $0x98] sm:$0xff]  ;;  %v7751_v30 = vld [vmem:[%s10091_s6 + $0xa0] sm:$0xff]  ;;  %v7753_v3 = vld [vmem:[%s10091_s6 + $0xb0] sm:$0xff] }
 0x553   : > { %v7763_v53 = vadd.f32 %v7731_v52, %v7699_v16  ;;  %v7764_v47 = vadd.f32 %v7732_v39, %v7700_v34  ;;  %v7765_v55 = vadd.f32 %v7733_v20, %v7701_v49  ;;  %v7766_v1 = vadd.f32 %v7734_v46, %v7702_v4  ;;  %v7754_v61 = vld [vmem:[%s10091_s6 + $0xb8] sm:$0xff]  ;;  %v7756_v16 = vld [vmem:[%s10091_s6 + $0xc8] sm:$0xff] }
 0x554   : > { %13487 = vst [vmem:[#allocation4_spill] sm:$0xff] %v13374_v60  ;;  %v7767_v32 = vadd.f32 %v7735_v10, %v7703_v26  ;;  %v7768_v38 = vadd.f32 %v7736_v62, %v7704_v59  ;;  %v7769_v9 = vadd.f32 %v7737_v37, %v7705_v24  ;;  %v7770_v12 = vadd.f32 %v7738_v22, %v7706_v25  ;;  %v7755_v60 = vld [vmem:[%s10091_s6 + $0xc0] sm:$0xff]  ;;  %v7757_v26 = vld [vmem:[%s10091_s6 + $0xd0] sm:$0xff]  ;;  %v7758_v59 = vld [vmem:[%s10091_s6 + $0xd8] sm:$0xff] }
 0x555   : > { %v7771_v34 = vadd.f32 %v7739_v2, %v7707_v21  ;;  %v7772_v49 = vadd.f32 %v7740_v33, %v7708_v45  ;;  %v7773_v4 = vadd.f32 %v7741_v19, %v7709_v0  ;;  %v7774_v52 = vadd.f32 %v7742_v40, %v7710_v44  ;;  %7795 = vst.msk [vmem:[%s13362_s22] sm:$0xff] %vm258_vm1, %v7763_v53  ;;  %v7759_v24 = vld [vmem:[%s10091_s6 + $0xe0] sm:$0xff]  ;;  %v7760_v44 = vld [vmem:[%s10091_s6 + $0xe8] sm:$0xff] }
 0x556   : > { %7796 = vst.msk [vmem:[%s13362_s22 + $0x8] sm:$0xff] %vm258_vm1, %v7764_v47  ;;  %7797 = vst.msk [vmem:[%s13362_s22 + $0x10] sm:$0xff] %vm258_vm1, %v7765_v55  ;;  %v7775_v25 = vadd.f32 %v7743_v50, %v13296_v58  ;;  %v7776_v21 = vadd.f32 %v7744_v13, %v13299_v28  ;;  %v7777_v45 = vadd.f32 %v7745_v29, %v13302_v11  ;;  %v7761_v58 = vld [vmem:[%s10091_s6 + $0xf0] sm:$0xff]  ;;  %v7762_v28 = vld [vmem:[%s10091_s6 + $0xf8] sm:$0xff] }
 0x557   : > { %7798 = vst.msk [vmem:[%s13362_s22 + $0x18] sm:$0xff] %vm258_vm1, %v7766_v1  ;;  %v7778_v0 = vadd.f32 %v7746_v6, %v13305_v42  ;;  %7799 = vst.msk [vmem:[%s13362_s22 + $0x20] sm:$0xff] %vm258_vm1, %v7767_v32  ;;  %v7779_v11 = vadd.f32 %v7747_v15, %v13312_v43  ;;  %v7780_v39 = vadd.f32 %v7748_v36, %v13315_v14 }
 0x558   : > { %7800 = vst.msk [vmem:[%s13362_s22 + $0x28] sm:$0xff] %vm258_vm1, %v7768_v38  ;;  %7801 = vst.msk [vmem:[%s13362_s22 + $0x30] sm:$0xff] %vm258_vm1, %v7769_v9  ;;  %v7781_v42 = vadd.f32 %v7749_v8, %v13318_v54  ;;  %v7782_v20 = vadd.f32 %v7750_v57, %v13321_v23  ;;  %v7783_v46 = vadd.f32 %v7751_v30, %v13328_v7 }
 0x559   : > { %7802 = vst.msk [vmem:[%s13362_s22 + $0x38] sm:$0xff] %vm258_vm1, %v7770_v12  ;;  %7803 = vst.msk [vmem:[%s13362_s22 + $0x40] sm:$0xff] %vm258_vm1, %v7771_v34  ;;  %v7784_v43 = vadd.f32 %v7752_v56, %v13331_v18  ;;  %v7785_v14 = vadd.f32 %v7753_v3, %v13334_v35  ;;  %v7786_v54 = vadd.f32 %v7754_v61, %v13337_v63 }
 0x55a   : > { %7804 = vst.msk [vmem:[%s13362_s22 + $0x48] sm:$0xff] %vm258_vm1, %v7772_v49  ;;  %7805 = vst.msk [vmem:[%s13362_s22 + $0x50] sm:$0xff] %vm258_vm1, %v7773_v4  ;;  %v7787_v23 = vadd.f32 %v7755_v60, %v13343_v51  ;;  %v7788_v10 = vadd.f32 %v7756_v16, %v13346_v27  ;;  %v7789_v62 = vadd.f32 %v7757_v26, %v13349_v48 }
 0x55b   : > { %7806 = vst.msk [vmem:[%s13362_s22 + $0x58] sm:$0xff] %vm258_vm1, %v7774_v52  ;;  %7807 = vst.msk [vmem:[%s13362_s22 + $0x60] sm:$0xff] %vm258_vm1, %v7775_v25  ;;  %v7790_v37 = vadd.f32 %v7758_v59, %v13352_v17  ;;  %v7791_v22 = vadd.f32 %v7759_v24, %v13365_v5  ;;  %v7792_v7 = vadd.f32 %v7760_v44, %v13368_v31  ;;  %v13488_v35 = vld [vmem:[#allocation4_spill] sm:$0xff] }
 0x55c   : > { %7808 = vst.msk [vmem:[%s13362_s22 + $0x68] sm:$0xff] %vm258_vm1, %v7776_v21  ;;  %7809 = vst.msk [vmem:[%s13362_s22 + $0x70] sm:$0xff] %vm258_vm1, %v7777_v45  ;;  %v7793_v18 = vadd.f32 %v7761_v58, %v13371_v41  ;;  %v7794_v63 = vadd.f32 %v7762_v28, %v13488_v35 }
 0x55d   : > { %7810 = vst.msk [vmem:[%s13362_s22 + $0x78] sm:$0xff] %vm258_vm1, %v7778_v0  ;;  %7811 = vst.msk [vmem:[%s13362_s22 + $0x80] sm:$0xff] %vm258_vm1, %v7779_v11 }
 0x55e   : > { %7812 = vst.msk [vmem:[%s13362_s22 + $0x88] sm:$0xff] %vm258_vm1, %v7780_v39  ;;  %7813 = vst.msk [vmem:[%s13362_s22 + $0x90] sm:$0xff] %vm258_vm1, %v7781_v42 }
 0x55f   : > { %7814 = vst.msk [vmem:[%s13362_s22 + $0x98] sm:$0xff] %vm258_vm1, %v7782_v20  ;;  %7815 = vst.msk [vmem:[%s13362_s22 + $0xa0] sm:$0xff] %vm258_vm1, %v7783_v46 }
 0x560   : > { %7816 = vst.msk [vmem:[%s13362_s22 + $0xa8] sm:$0xff] %vm258_vm1, %v7784_v43  ;;  %7817 = vst.msk [vmem:[%s13362_s22 + $0xb0] sm:$0xff] %vm258_vm1, %v7785_v14 }
 0x561   : > { %7818 = vst.msk [vmem:[%s13362_s22 + $0xb8] sm:$0xff] %vm258_vm1, %v7786_v54  ;;  %7819 = vst.msk [vmem:[%s13362_s22 + $0xc0] sm:$0xff] %vm258_vm1, %v7787_v23 }
 0x562   : > { %7820 = vst.msk [vmem:[%s13362_s22 + $0xc8] sm:$0xff] %vm258_vm1, %v7788_v10  ;;  %7821 = vst.msk [vmem:[%s13362_s22 + $0xd0] sm:$0xff] %vm258_vm1, %v7789_v62 }
 0x563   : > { %7822 = vst.msk [vmem:[%s13362_s22 + $0xd8] sm:$0xff] %vm258_vm1, %v7790_v37  ;;  %7823 = vst.msk [vmem:[%s13362_s22 + $0xe0] sm:$0xff] %vm258_vm1, %v7791_v22 }
 0x564   : > { %7824 = vst.msk [vmem:[%s13362_s22 + $0xe8] sm:$0xff] %vm258_vm1, %v7792_v7  ;;  %7825 = vst.msk [vmem:[%s13362_s22 + $0xf0] sm:$0xff] %vm258_vm1, %v7793_v18 }
 0x565   : > { %7826 = vst.msk [vmem:[%s13362_s22 + $0xf8] sm:$0xff] %vm258_vm1, %v7794_v63 }
 0x566 PF: > { %s15_s18 = sadd.s32 1, %s10019_s18  }
 0x567   : > { %p12_p4 = scmp.ge.s32.totalorder %s15_s18, 4  }
 0x569   :  { %14 = sbr.rel (!%p12_p4) target bundleno = 1 (0x1), region = 88 }

</bundles_post_ra>
